<compile_context>
chip_gen: v7x
topology: tpu7x:2x2x1
jax: 0.10.0
libtpu: 0.0.40
codegen_flags: <defaults>
</compile_context>

<pallas_src>
import functools

import jax
import jax.numpy as jnp
from jax import lax
from jax.experimental import pallas as pl
from jax.experimental.pallas import tpu as pltpu

# ------------------------------ hyperparameters --------------------------------
N_EMBD     = 384                 # from the spec
N_HEAD     = 6                   # v2.py: n_head = 6
HEAD_SIZE  = N_EMBD // N_HEAD    # 64
BLOCK_SIZE = 256                 # max context (only an upper bound on T here)
B, T       = 4, 64               # small example batch / sequence (T <= BLOCK_SIZE)


# ---------------------------------- kernel -------------------------------------
def mha_kernel(x_ref, wqkv_ref, wo_ref, bo_ref, o_ref, *, n_head, head_size):
    """Fused multi-head self-attention for one chunk of `block_b` batch elements.

    x_ref:    (block_b, T, C)  activations (f32)
    wqkv_ref: (C, 3*C)         [Q*scale | K | V] packed projection weights (bf16)
    wo_ref:   (C, C)           output projection weight (bf16)
    bo_ref:   (1, C)           output projection bias (f32)
    o_ref:    (block_b, T, C)  lane-dense f32 output
    """
    bb, t, c = x_ref.shape

    # Flatten the batch chunk so the fused QKV projection sees M = bb*t rows
    # (one wide MXU matmul), then keep q/k/v as bf16 matmul operands.
    x = x_ref[...].reshape(bb * t, c).astype(jnp.bfloat16)
    qkv = jnp.dot(x, wqkv_ref[...], preferred_element_type=jnp.float32)   # (bb*t, 3C)
    qkv = qkv.astype(jnp.bfloat16)

    # Causal mask built once per invocation, shared by every (batch, head) pair.
    row = lax.broadcasted_iota(jnp.int32, (t, t), 0)
    col = lax.broadcasted_iota(jnp.int32, (t, t), 1)
    causal = col <= row

    bias = bo_ref[...]                                                    # (1, C) f32

    # TODO(synk): if T is raised toward BLOCK_SIZE=256, switch the head loop to
    # lax.fori_loop with dynamic slices to bound live ranges (per perf review).
    for b in range(bb):                                                   # static unroll
        rows = slice(b * t, (b + 1) * t)
        acc = jnp.zeros((t, c), jnp.float32)                              # projection acc
        for h in range(n_head):                                           # static unroll
            lo = h * head_size
            hi = lo + head_size
            q = qkv[rows, lo:hi]                                          # (t, hs) bf16, pre-scaled
            k = qkv[rows, c + lo:c + hi]
            v = qkv[rows, 2 * c + lo:2 * c + hi]

            # q @ k^T without materialising k.T (contract last dims of both).
            wei = lax.dot_general(q, k, (((1,), (1,)), ((), ())),
                                  preferred_element_type=jnp.float32)     # (t, t) f32
            wei = jnp.where(causal, wei, -jnp.inf)                        # tril==0 -> -inf
            wei = wei - jnp.max(wei, axis=-1, keepdims=True)
            p = jnp.exp(wei)
            p = p * pl.reciprocal(jnp.sum(p, axis=-1, keepdims=True), approx=True)
            # TODO(synk): attention dropout (p=0.2) is identity here (eval mode).

            pv = jnp.dot(p.astype(jnp.bfloat16), v,
                         preferred_element_type=jnp.float32)              # (t, hs) f32
            # Fold this head directly into the output projection (no concat):
            acc = acc + jnp.dot(pv.astype(jnp.bfloat16), wo_ref[lo:hi, :],
                                preferred_element_type=jnp.float32)

        # Proj dropout: identity (eval mode). Lane-dense (t, 384) store.
        o_ref[b] = (acc + bias).astype(o_ref.dtype)


# ------------------------------- pallas wrapper ---------------------------------
def multi_head_attention(x, w_qkv, w_o, b_o, *, n_head=N_HEAD, block_b=None):
    """x: (B, T, C) f32; w_qkv: (C, 3C) bf16 (Q pre-scaled); w_o: (C, C) bf16;
    b_o: (C,) f32 -> (B, T, C) f32."""
    b, t, c = x.shape
    head_size = c // n_head
    if block_b is None:
        # Largest divisor of b with block_b*t <= 128 rows: fills the MXU M-dim
        # on the projections while keeping >= 2 grid steps for megacore here.
        block_b = 1
        for cand in range(b, 0, -1):
            if b % cand == 0 and cand * t <= 128:
                block_b = cand
                break
    kern = functools.partial(mha_kernel, n_head=n_head, head_size=head_size)
    return pl.pallas_call(
        kern,
        out_shape=jax.ShapeDtypeStruct((b, t, c), jnp.float32),
        grid=(b // block_b,),
        in_specs=[
            pl.BlockSpec((block_b, t, c), lambda i: (i, 0, 0)),  # x (batch chunk)
            pl.BlockSpec((c, 3 * c), lambda i: (0, 0)),          # fused QKV weight (resident)
            pl.BlockSpec((c, c), lambda i: (0, 0)),              # proj weight (resident)
            pl.BlockSpec((1, c), lambda i: (0, 0)),              # proj bias
        ],
        out_specs=pl.BlockSpec((block_b, t, c), lambda i: (i, 0, 0)),
        compiler_params=pltpu.CompilerParams(
            dimension_semantics=("parallel",)),                  # both TCs busy
    )(x, w_qkv, w_o, b_o.reshape(1, c))


def pack_qkv(wq, wk, wv, scale):
    """(H, C, hs) q/k/v weights -> single (C, 3C) [Q*scale | K | V], head-major cols.

    Folds the v2.py score scale (C**-0.5 with C = n_embd) into the Q columns so
    the kernel needs no per-score multiply."""
    def flat(w):                                                 # (H, C, hs) -> (C, H*hs)
        return jnp.transpose(w, (1, 0, 2)).reshape(w.shape[1], -1)
    return jnp.concatenate([flat(wq) * scale, flat(wk), flat(wv)], axis=1)


# ----------------------------- pure-JAX reference -------------------------------
def ref_mha(x, wq, wk, wv, w_o, b_o):
    b, t, c = x.shape
    mask = jnp.tril(jnp.ones((t, t), dtype=bool))
    outs = []
    for h in range(wq.shape[0]):
        q = x @ wq[h]
        k = x @ wk[h]
        v = x @ wv[h]
        wei = q @ jnp.swapaxes(k, -1, -2) * (c ** -0.5)
        wei = jnp.where(mask, wei, -jnp.inf)
        wei = jax.nn.softmax(wei, axis=-1)
        outs.append(wei @ v)
    out = jnp.concatenate(outs, axis=-1)
    return out @ w_o + b_o


# ------------------------------------ main ---------------------------------------
if __name__ == "__main__":
    key = jax.random.PRNGKey(0)
    kx, kq, kk, kv, ko, kb = jax.random.split(key, 6)

    x   = 0.1  * jax.random.normal(kx, (B, T, N_EMBD), jnp.float32)
    wq  = 0.02 * jax.random.normal(kq, (N_HEAD, N_EMBD, HEAD_SIZE), jnp.float32)
    wk  = 0.02 * jax.random.normal(kk, (N_HEAD, N_EMBD, HEAD_SIZE), jnp.float32)
    wv  = 0.02 * jax.random.normal(kv, (N_HEAD, N_EMBD, HEAD_SIZE), jnp.float32)
    w_o = 0.02 * jax.random.normal(ko, (N_EMBD, N_EMBD), jnp.float32)
    b_o = 0.02 * jax.random.normal(kb, (N_EMBD,), jnp.float32)

    # One-time weight preprocessing: pack + fold scale (f32), then store in bf16.
    scale = float(N_EMBD) ** -0.5                    # v2.py quirk: C**-0.5, C = n_embd
    w_qkv = pack_qkv(wq, wk, wv, scale).astype(jnp.bfloat16)
    w_o_bf = w_o.astype(jnp.bfloat16)

    out = jax.block_until_ready(multi_head_attention(x, w_qkv, w_o_bf, b_o))
    assert out.shape == (B, T, N_EMBD) and out.dtype == jnp.float32

    ref = jax.block_until_ready(ref_mha(x, wq, wk, wv, w_o, b_o))
    # bf16 matmul operands + approx reciprocal: tolerance relaxed vs. the f32
    # reference (per review); still far tighter than the output std (~2e-2).
    max_err = float(jnp.max(jnp.abs(out - ref)))
    assert jnp.allclose(out, ref, atol=3e-3, rtol=3e-2), \
        f"mismatch vs pure-JAX reference: max abs err {max_err}"

    print("KERNEL_OK")
</pallas_src>

<mosaic_0001>
module attributes {stable_mosaic.version = 11 : i64} {
  func.func @mha_kernel(%arg0: i32, %arg1: memref<2x64x384xf32, #tpu.memory_space<vmem>>, %arg2: memref<384x1152xbf16, #tpu.memory_space<vmem>>, %arg3: memref<384x384xbf16, #tpu.memory_space<vmem>>, %arg4: memref<1x384xf32, #tpu.memory_space<vmem>>, %arg5: memref<2x64x384xf32, #tpu.memory_space<vmem>>) attributes {dimension_semantics = [#tpu.dimension_semantics<parallel>], iteration_bounds = array<i64: 2>, scalar_prefetch = 0 : i64, scratch_operands = 0 : i64, tpu.core_type = #tpu.core_type<tc>, window_params = [{transform_indices = @transform_0, window_bounds = array<i64: 2, 64, 384>}, {pipeline_mode = #tpu.pipeline_mode<synchronous>, transform_indices = @transform_1, window_bounds = array<i64: 384, 1152>}, {pipeline_mode = #tpu.pipeline_mode<synchronous>, transform_indices = @transform_2, window_bounds = array<i64: 384, 384>}, {pipeline_mode = #tpu.pipeline_mode<synchronous>, transform_indices = @transform_3, window_bounds = array<i64: 1, 384>}, {transform_indices = @transform_4, window_bounds = array<i64: 2, 64, 384>}]} {
    %c0 = arith.constant 0 : index
    %c0_0 = arith.constant 0 : index
    %c0_1 = arith.constant 0 : index
    %0 = vector.load %arg1[%c0, %c0_0, %c0_1] : memref<2x64x384xf32, #tpu.memory_space<vmem>>, vector<2x64x384xf32>
    %1 = vector.shape_cast %0 : vector<2x64x384xf32> to vector<128x384xf32>
    %2 = arith.truncf %1 : vector<128x384xf32> to vector<128x384xbf16>
    %c0_2 = arith.constant 0 : index
    %c0_3 = arith.constant 0 : index
    %3 = vector.load %arg2[%c0_2, %c0_3] : memref<384x1152xbf16, #tpu.memory_space<vmem>>, vector<384x1152xbf16>
    %cst = arith.constant dense<0.000000e+00> : vector<128x1152xf32>
    %4 = tpu.matmul %2, %3, %cst {dimension_numbers = #tpu.dot_dimension_numbers<[1], [0], [0], [1], [0, 0, 1, 1], [], []>} : vector<128x384xbf16>, vector<384x1152xbf16>, vector<128x1152xf32> -> vector<128x1152xf32>
    %5 = arith.truncf %4 : vector<128x1152xf32> to vector<128x1152xbf16>
    %6 = tpu.iota {dimensions = array<i32: 0>} : vector<64x64xi32>
    %7 = tpu.iota {dimensions = array<i32: 1>} : vector<64x64xi32>
    %8 = arith.cmpi sle, %7, %6 : vector<64x64xi32>
    %c0_4 = arith.constant 0 : index
    %c0_5 = arith.constant 0 : index
    %9 = vector.load %arg4[%c0_4, %c0_5] : memref<1x384xf32, #tpu.memory_space<vmem>>, vector<1x384xf32>
    %cst_6 = arith.constant 0.000000e+00 : f32
    %10 = vector.broadcast %cst_6 : f32 to vector<64x384xf32>
    %11 = vector.extract_strided_slice %5 {offsets = [0, 0], sizes = [64, 64], strides = [1, 1]} : vector<128x1152xbf16> to vector<64x64xbf16>
    %12 = vector.extract_strided_slice %5 {offsets = [0, 384], sizes = [64, 64], strides = [1, 1]} : vector<128x1152xbf16> to vector<64x64xbf16>
    %13 = vector.extract_strided_slice %5 {offsets = [0, 768], sizes = [64, 64], strides = [1, 1]} : vector<128x1152xbf16> to vector<64x64xbf16>
    %cst_7 = arith.constant dense<0.000000e+00> : vector<64x64xf32>
    %14 = tpu.matmul %11, %12, %cst_7 {dimension_numbers = #tpu.dot_dimension_numbers<[1], [1], [0], [0], [0, 0, 1, 0], [], []>} : vector<64x64xbf16>, vector<64x64xbf16>, vector<64x64xf32> -> vector<64x64xf32>
    %cst_8 = arith.constant 0xFF800000 : f32
    %15 = vector.broadcast %cst_8 : f32 to vector<64x64xf32>
    %16 = arith.select %8, %14, %15 : vector<64x64xi1>, vector<64x64xf32>
    %cst_9 = arith.constant dense<0xFF800000> : vector<64xf32>
    %17 = vector.multi_reduction <maximumf>, %16, %cst_9 [1] : vector<64x64xf32> to vector<64xf32>
    %18 = vector.shape_cast %17 : vector<64xf32> to vector<64x1xf32>
    %19 = vector.broadcast %18 : vector<64x1xf32> to vector<64x64xf32>
    %20 = arith.subf %16, %19 : vector<64x64xf32>
    %21 = math.exp %20 : vector<64x64xf32>
    %cst_10 = arith.constant dense<0.000000e+00> : vector<64xf32>
    %22 = vector.multi_reduction <add>, %21, %cst_10 [1] : vector<64x64xf32> to vector<64xf32>
    %23 = vector.shape_cast %22 : vector<64xf32> to vector<64x1xf32>
    %24 = tpu.reciprocal %23 {approx = true} : vector<64x1xf32> -> vector<64x1xf32>
    %25 = vector.broadcast %24 : vector<64x1xf32> to vector<64x64xf32>
    %26 = arith.mulf %21, %25 : vector<64x64xf32>
    %27 = arith.truncf %26 : vector<64x64xf32> to vector<64x64xbf16>
    %cst_11 = arith.constant dense<0.000000e+00> : vector<64x64xf32>
    %28 = tpu.matmul %27, %13, %cst_11 {dimension_numbers = #tpu.dot_dimension_numbers<[1], [0], [0], [1], [0, 0, 1, 1], [], []>} : vector<64x64xbf16>, vector<64x64xbf16>, vector<64x64xf32> -> vector<64x64xf32>
    %29 = arith.truncf %28 : vector<64x64xf32> to vector<64x64xbf16>
    %c0_12 = arith.constant 0 : index
    %c0_13 = arith.constant 0 : index
    %30 = vector.load %arg3[%c0_12, %c0_13] : memref<384x384xbf16, #tpu.memory_space<vmem>>, vector<64x384xbf16>
    %cst_14 = arith.constant dense<0.000000e+00> : vector<64x384xf32>
    %31 = tpu.matmul %29, %30, %cst_14 {dimension_numbers = #tpu.dot_dimension_numbers<[1], [0], [0], [1], [0, 0, 1, 1], [], []>} : vector<64x64xbf16>, vector<64x384xbf16>, vector<64x384xf32> -> vector<64x384xf32>
    %32 = arith.addf %10, %31 : vector<64x384xf32>
    %33 = vector.extract_strided_slice %5 {offsets = [0, 64], sizes = [64, 64], strides = [1, 1]} : vector<128x1152xbf16> to vector<64x64xbf16>
    %34 = vector.extract_strided_slice %5 {offsets = [0, 448], sizes = [64, 64], strides = [1, 1]} : vector<128x1152xbf16> to vector<64x64xbf16>
    %35 = vector.extract_strided_slice %5 {offsets = [0, 832], sizes = [64, 64], strides = [1, 1]} : vector<128x1152xbf16> to vector<64x64xbf16>
    %cst_15 = arith.constant dense<0.000000e+00> : vector<64x64xf32>
    %36 = tpu.matmul %33, %34, %cst_15 {dimension_numbers = #tpu.dot_dimension_numbers<[1], [1], [0], [0], [0, 0, 1, 0], [], []>} : vector<64x64xbf16>, vector<64x64xbf16>, vector<64x64xf32> -> vector<64x64xf32>
    %cst_16 = arith.constant 0xFF800000 : f32
    %37 = vector.broadcast %cst_16 : f32 to vector<64x64xf32>
    %38 = arith.select %8, %36, %37 : vector<64x64xi1>, vector<64x64xf32>
    %cst_17 = arith.constant dense<0xFF800000> : vector<64xf32>
    %39 = vector.multi_reduction <maximumf>, %38, %cst_17 [1] : vector<64x64xf32> to vector<64xf32>
    %40 = vector.shape_cast %39 : vector<64xf32> to vector<64x1xf32>
    %41 = vector.broadcast %40 : vector<64x1xf32> to vector<64x64xf32>
    %42 = arith.subf %38, %41 : vector<64x64xf32>
    %43 = math.exp %42 : vector<64x64xf32>
    %cst_18 = arith.constant dense<0.000000e+00> : vector<64xf32>
    %44 = vector.multi_reduction <add>, %43, %cst_18 [1] : vector<64x64xf32> to vector<64xf32>
    %45 = vector.shape_cast %44 : vector<64xf32> to vector<64x1xf32>
    %46 = tpu.reciprocal %45 {approx = true} : vector<64x1xf32> -> vector<64x1xf32>
    %47 = vector.broadcast %46 : vector<64x1xf32> to vector<64x64xf32>
    %48 = arith.mulf %43, %47 : vector<64x64xf32>
    %49 = arith.truncf %48 : vector<64x64xf32> to vector<64x64xbf16>
    %cst_19 = arith.constant dense<0.000000e+00> : vector<64x64xf32>
    %50 = tpu.matmul %49, %35, %cst_19 {dimension_numbers = #tpu.dot_dimension_numbers<[1], [0], [0], [1], [0, 0, 1, 1], [], []>} : vector<64x64xbf16>, vector<64x64xbf16>, vector<64x64xf32> -> vector<64x64xf32>
    %51 = arith.truncf %50 : vector<64x64xf32> to vector<64x64xbf16>
    %c64 = arith.constant 64 : index
    %c0_20 = arith.constant 0 : index
    %52 = vector.load %arg3[%c64, %c0_20] : memref<384x384xbf16, #tpu.memory_space<vmem>>, vector<64x384xbf16>
    %cst_21 = arith.constant dense<0.000000e+00> : vector<64x384xf32>
    %53 = tpu.matmul %51, %52, %cst_21 {dimension_numbers = #tpu.dot_dimension_numbers<[1], [0], [0], [1], [0, 0, 1, 1], [], []>} : vector<64x64xbf16>, vector<64x384xbf16>, vector<64x384xf32> -> vector<64x384xf32>
    %54 = arith.addf %32, %53 : vector<64x384xf32>
    %55 = vector.extract_strided_slice %5 {offsets = [0, 128], sizes = [64, 64], strides = [1, 1]} : vector<128x1152xbf16> to vector<64x64xbf16>
    %56 = vector.extract_strided_slice %5 {offsets = [0, 512], sizes = [64, 64], strides = [1, 1]} : vector<128x1152xbf16> to vector<64x64xbf16>
    %57 = vector.extract_strided_slice %5 {offsets = [0, 896], sizes = [64, 64], strides = [1, 1]} : vector<128x1152xbf16> to vector<64x64xbf16>
    %cst_22 = arith.constant dense<0.000000e+00> : vector<64x64xf32>
    %58 = tpu.matmul %55, %56, %cst_22 {dimension_numbers = #tpu.dot_dimension_numbers<[1], [1], [0], [0], [0, 0, 1, 0], [], []>} : vector<64x64xbf16>, vector<64x64xbf16>, vector<64x64xf32> -> vector<64x64xf32>
    %cst_23 = arith.constant 0xFF800000 : f32
    %59 = vector.broadcast %cst_23 : f32 to vector<64x64xf32>
    %60 = arith.select %8, %58, %59 : vector<64x64xi1>, vector<64x64xf32>
    %cst_24 = arith.constant dense<0xFF800000> : vector<64xf32>
    %61 = vector.multi_reduction <maximumf>, %60, %cst_24 [1] : vector<64x64xf32> to vector<64xf32>
    %62 = vector.shape_cast %61 : vector<64xf32> to vector<64x1xf32>
    %63 = vector.broadcast %62 : vector<64x1xf32> to vector<64x64xf32>
    %64 = arith.subf %60, %63 : vector<64x64xf32>
    %65 = math.exp %64 : vector<64x64xf32>
    %cst_25 = arith.constant dense<0.000000e+00> : vector<64xf32>
    %66 = vector.multi_reduction <add>, %65, %cst_25 [1] : vector<64x64xf32> to vector<64xf32>
    %67 = vector.shape_cast %66 : vector<64xf32> to vector<64x1xf32>
    %68 = tpu.reciprocal %67 {approx = true} : vector<64x1xf32> -> vector<64x1xf32>
    %69 = vector.broadcast %68 : vector<64x1xf32> to vector<64x64xf32>
    %70 = arith.mulf %65, %69 : vector<64x64xf32>
    %71 = arith.truncf %70 : vector<64x64xf32> to vector<64x64xbf16>
    %cst_26 = arith.constant dense<0.000000e+00> : vector<64x64xf32>
    %72 = tpu.matmul %71, %57, %cst_26 {dimension_numbers = #tpu.dot_dimension_numbers<[1], [0], [0], [1], [0, 0, 1, 1], [], []>} : vector<64x64xbf16>, vector<64x64xbf16>, vector<64x64xf32> -> vector<64x64xf32>
    %73 = arith.truncf %72 : vector<64x64xf32> to vector<64x64xbf16>
    %c128 = arith.constant 128 : index
    %c0_27 = arith.constant 0 : index
    %74 = vector.load %arg3[%c128, %c0_27] : memref<384x384xbf16, #tpu.memory_space<vmem>>, vector<64x384xbf16>
    %cst_28 = arith.constant dense<0.000000e+00> : vector<64x384xf32>
    %75 = tpu.matmul %73, %74, %cst_28 {dimension_numbers = #tpu.dot_dimension_numbers<[1], [0], [0], [1], [0, 0, 1, 1], [], []>} : vector<64x64xbf16>, vector<64x384xbf16>, vector<64x384xf32> -> vector<64x384xf32>
    %76 = arith.addf %54, %75 : vector<64x384xf32>
    %77 = vector.extract_strided_slice %5 {offsets = [0, 192], sizes = [64, 64], strides = [1, 1]} : vector<128x1152xbf16> to vector<64x64xbf16>
    %78 = vector.extract_strided_slice %5 {offsets = [0, 576], sizes = [64, 64], strides = [1, 1]} : vector<128x1152xbf16> to vector<64x64xbf16>
    %79 = vector.extract_strided_slice %5 {offsets = [0, 960], sizes = [64, 64], strides = [1, 1]} : vector<128x1152xbf16> to vector<64x64xbf16>
    %cst_29 = arith.constant dense<0.000000e+00> : vector<64x64xf32>
    %80 = tpu.matmul %77, %78, %cst_29 {dimension_numbers = #tpu.dot_dimension_numbers<[1], [1], [0], [0], [0, 0, 1, 0], [], []>} : vector<64x64xbf16>, vector<64x64xbf16>, vector<64x64xf32> -> vector<64x64xf32>
    %cst_30 = arith.constant 0xFF800000 : f32
    %81 = vector.broadcast %cst_30 : f32 to vector<64x64xf32>
    %82 = arith.select %8, %80, %81 : vector<64x64xi1>, vector<64x64xf32>
    %cst_31 = arith.constant dense<0xFF800000> : vector<64xf32>
    %83 = vector.multi_reduction <maximumf>, %82, %cst_31 [1] : vector<64x64xf32> to vector<64xf32>
    %84 = vector.shape_cast %83 : vector<64xf32> to vector<64x1xf32>
    %85 = vector.broadcast %84 : vector<64x1xf32> to vector<64x64xf32>
    %86 = arith.subf %82, %85 : vector<64x64xf32>
    %87 = math.exp %86 : vector<64x64xf32>
    %cst_32 = arith.constant dense<0.000000e+00> : vector<64xf32>
    %88 = vector.multi_reduction <add>, %87, %cst_32 [1] : vector<64x64xf32> to vector<64xf32>
    %89 = vector.shape_cast %88 : vector<64xf32> to vector<64x1xf32>
    %90 = tpu.reciprocal %89 {approx = true} : vector<64x1xf32> -> vector<64x1xf32>
    %91 = vector.broadcast %90 : vector<64x1xf32> to vector<64x64xf32>
    %92 = arith.mulf %87, %91 : vector<64x64xf32>
    %93 = arith.truncf %92 : vector<64x64xf32> to vector<64x64xbf16>
    %cst_33 = arith.constant dense<0.000000e+00> : vector<64x64xf32>
    %94 = tpu.matmul %93, %79, %cst_33 {dimension_numbers = #tpu.dot_dimension_numbers<[1], [0], [0], [1], [0, 0, 1, 1], [], []>} : vector<64x64xbf16>, vector<64x64xbf16>, vector<64x64xf32> -> vector<64x64xf32>
    %95 = arith.truncf %94 : vector<64x64xf32> to vector<64x64xbf16>
    %c192 = arith.constant 192 : index
    %c0_34 = arith.constant 0 : index
    %96 = vector.load %arg3[%c192, %c0_34] : memref<384x384xbf16, #tpu.memory_space<vmem>>, vector<64x384xbf16>
    %cst_35 = arith.constant dense<0.000000e+00> : vector<64x384xf32>
    %97 = tpu.matmul %95, %96, %cst_35 {dimension_numbers = #tpu.dot_dimension_numbers<[1], [0], [0], [1], [0, 0, 1, 1], [], []>} : vector<64x64xbf16>, vector<64x384xbf16>, vector<64x384xf32> -> vector<64x384xf32>
    %98 = arith.addf %76, %97 : vector<64x384xf32>
    %99 = vector.extract_strided_slice %5 {offsets = [0, 256], sizes = [64, 64], strides = [1, 1]} : vector<128x1152xbf16> to vector<64x64xbf16>
    %100 = vector.extract_strided_slice %5 {offsets = [0, 640], sizes = [64, 64], strides = [1, 1]} : vector<128x1152xbf16> to vector<64x64xbf16>
    %101 = vector.extract_strided_slice %5 {offsets = [0, 1024], sizes = [64, 64], strides = [1, 1]} : vector<128x1152xbf16> to vector<64x64xbf16>
    %cst_36 = arith.constant dense<0.000000e+00> : vector<64x64xf32>
    %102 = tpu.matmul %99, %100, %cst_36 {dimension_numbers = #tpu.dot_dimension_numbers<[1], [1], [0], [0], [0, 0, 1, 0], [], []>} : vector<64x64xbf16>, vector<64x64xbf16>, vector<64x64xf32> -> vector<64x64xf32>
    %cst_37 = arith.constant 0xFF800000 : f32
    %103 = vector.broadcast %cst_37 : f32 to vector<64x64xf32>
    %104 = arith.select %8, %102, %103 : vector<64x64xi1>, vector<64x64xf32>
    %cst_38 = arith.constant dense<0xFF800000> : vector<64xf32>
    %105 = vector.multi_reduction <maximumf>, %104, %cst_38 [1] : vector<64x64xf32> to vector<64xf32>
    %106 = vector.shape_cast %105 : vector<64xf32> to vector<64x1xf32>
    %107 = vector.broadcast %106 : vector<64x1xf32> to vector<64x64xf32>
    %108 = arith.subf %104, %107 : vector<64x64xf32>
    %109 = math.exp %108 : vector<64x64xf32>
    %cst_39 = arith.constant dense<0.000000e+00> : vector<64xf32>
    %110 = vector.multi_reduction <add>, %109, %cst_39 [1] : vector<64x64xf32> to vector<64xf32>
    %111 = vector.shape_cast %110 : vector<64xf32> to vector<64x1xf32>
    %112 = tpu.reciprocal %111 {approx = true} : vector<64x1xf32> -> vector<64x1xf32>
    %113 = vector.broadcast %112 : vector<64x1xf32> to vector<64x64xf32>
    %114 = arith.mulf %109, %113 : vector<64x64xf32>
    %115 = arith.truncf %114 : vector<64x64xf32> to vector<64x64xbf16>
    %cst_40 = arith.constant dense<0.000000e+00> : vector<64x64xf32>
    %116 = tpu.matmul %115, %101, %cst_40 {dimension_numbers = #tpu.dot_dimension_numbers<[1], [0], [0], [1], [0, 0, 1, 1], [], []>} : vector<64x64xbf16>, vector<64x64xbf16>, vector<64x64xf32> -> vector<64x64xf32>
    %117 = arith.truncf %116 : vector<64x64xf32> to vector<64x64xbf16>
    %c256 = arith.constant 256 : index
    %c0_41 = arith.constant 0 : index
    %118 = vector.load %arg3[%c256, %c0_41] : memref<384x384xbf16, #tpu.memory_space<vmem>>, vector<64x384xbf16>
    %cst_42 = arith.constant dense<0.000000e+00> : vector<64x384xf32>
    %119 = tpu.matmul %117, %118, %cst_42 {dimension_numbers = #tpu.dot_dimension_numbers<[1], [0], [0], [1], [0, 0, 1, 1], [], []>} : vector<64x64xbf16>, vector<64x384xbf16>, vector<64x384xf32> -> vector<64x384xf32>
    %120 = arith.addf %98, %119 : vector<64x384xf32>
    %121 = vector.extract_strided_slice %5 {offsets = [0, 320], sizes = [64, 64], strides = [1, 1]} : vector<128x1152xbf16> to vector<64x64xbf16>
    %122 = vector.extract_strided_slice %5 {offsets = [0, 704], sizes = [64, 64], strides = [1, 1]} : vector<128x1152xbf16> to vector<64x64xbf16>
    %123 = vector.extract_strided_slice %5 {offsets = [0, 1088], sizes = [64, 64], strides = [1, 1]} : vector<128x1152xbf16> to vector<64x64xbf16>
    %cst_43 = arith.constant dense<0.000000e+00> : vector<64x64xf32>
    %124 = tpu.matmul %121, %122, %cst_43 {dimension_numbers = #tpu.dot_dimension_numbers<[1], [1], [0], [0], [0, 0, 1, 0], [], []>} : vector<64x64xbf16>, vector<64x64xbf16>, vector<64x64xf32> -> vector<64x64xf32>
    %cst_44 = arith.constant 0xFF800000 : f32
    %125 = vector.broadcast %cst_44 : f32 to vector<64x64xf32>
    %126 = arith.select %8, %124, %125 : vector<64x64xi1>, vector<64x64xf32>
    %cst_45 = arith.constant dense<0xFF800000> : vector<64xf32>
    %127 = vector.multi_reduction <maximumf>, %126, %cst_45 [1] : vector<64x64xf32> to vector<64xf32>
    %128 = vector.shape_cast %127 : vector<64xf32> to vector<64x1xf32>
    %129 = vector.broadcast %128 : vector<64x1xf32> to vector<64x64xf32>
    %130 = arith.subf %126, %129 : vector<64x64xf32>
    %131 = math.exp %130 : vector<64x64xf32>
    %cst_46 = arith.constant dense<0.000000e+00> : vector<64xf32>
    %132 = vector.multi_reduction <add>, %131, %cst_46 [1] : vector<64x64xf32> to vector<64xf32>
    %133 = vector.shape_cast %132 : vector<64xf32> to vector<64x1xf32>
    %134 = tpu.reciprocal %133 {approx = true} : vector<64x1xf32> -> vector<64x1xf32>
    %135 = vector.broadcast %134 : vector<64x1xf32> to vector<64x64xf32>
    %136 = arith.mulf %131, %135 : vector<64x64xf32>
    %137 = arith.truncf %136 : vector<64x64xf32> to vector<64x64xbf16>
    %cst_47 = arith.constant dense<0.000000e+00> : vector<64x64xf32>
    %138 = tpu.matmul %137, %123, %cst_47 {dimension_numbers = #tpu.dot_dimension_numbers<[1], [0], [0], [1], [0, 0, 1, 1], [], []>} : vector<64x64xbf16>, vector<64x64xbf16>, vector<64x64xf32> -> vector<64x64xf32>
    %139 = arith.truncf %138 : vector<64x64xf32> to vector<64x64xbf16>
    %c320 = arith.constant 320 : index
    %c0_48 = arith.constant 0 : index
    %140 = vector.load %arg3[%c320, %c0_48] : memref<384x384xbf16, #tpu.memory_space<vmem>>, vector<64x384xbf16>
    %cst_49 = arith.constant dense<0.000000e+00> : vector<64x384xf32>
    %141 = tpu.matmul %139, %140, %cst_49 {dimension_numbers = #tpu.dot_dimension_numbers<[1], [0], [0], [1], [0, 0, 1, 1], [], []>} : vector<64x64xbf16>, vector<64x384xbf16>, vector<64x384xf32> -> vector<64x384xf32>
    %142 = arith.addf %120, %141 : vector<64x384xf32>
    %143 = vector.broadcast %9 : vector<1x384xf32> to vector<64x384xf32>
    %144 = arith.addf %142, %143 : vector<64x384xf32>
    %c0_50 = arith.constant 0 : index
    %c0_51 = arith.constant 0 : index
    %c0_52 = arith.constant 0 : index
    %145 = vector.load %arg5[%c0_50, %c0_51, %c0_52] : memref<2x64x384xf32, #tpu.memory_space<vmem>>, vector<1x64x384xf32>
    %146 = vector.shape_cast %145 : vector<1x64x384xf32> to vector<64x384xf32>
    %147 = vector.shape_cast %144 : vector<64x384xf32> to vector<1x64x384xf32>
    tpu.vector_store %arg5[%c0_50, %c0_51, %c0_52], %147 {strides = array<i32>} : memref<2x64x384xf32, #tpu.memory_space<vmem>>, vector<1x64x384xf32>,
    %cst_53 = arith.constant 0.000000e+00 : f32
    %148 = vector.broadcast %cst_53 : f32 to vector<64x384xf32>
    %149 = vector.extract_strided_slice %5 {offsets = [64, 0], sizes = [64, 64], strides = [1, 1]} : vector<128x1152xbf16> to vector<64x64xbf16>
    %150 = vector.extract_strided_slice %5 {offsets = [64, 384], sizes = [64, 64], strides = [1, 1]} : vector<128x1152xbf16> to vector<64x64xbf16>
    %151 = vector.extract_strided_slice %5 {offsets = [64, 768], sizes = [64, 64], strides = [1, 1]} : vector<128x1152xbf16> to vector<64x64xbf16>
    %cst_54 = arith.constant dense<0.000000e+00> : vector<64x64xf32>
    %152 = tpu.matmul %149, %150, %cst_54 {dimension_numbers = #tpu.dot_dimension_numbers<[1], [1], [0], [0], [0, 0, 1, 0], [], []>} : vector<64x64xbf16>, vector<64x64xbf16>, vector<64x64xf32> -> vector<64x64xf32>
    %cst_55 = arith.constant 0xFF800000 : f32
    %153 = vector.broadcast %cst_55 : f32 to vector<64x64xf32>
    %154 = arith.select %8, %152, %153 : vector<64x64xi1>, vector<64x64xf32>
    %cst_56 = arith.constant dense<0xFF800000> : vector<64xf32>
    %155 = vector.multi_reduction <maximumf>, %154, %cst_56 [1] : vector<64x64xf32> to vector<64xf32>
    %156 = vector.shape_cast %155 : vector<64xf32> to vector<64x1xf32>
    %157 = vector.broadcast %156 : vector<64x1xf32> to vector<64x64xf32>
    %158 = arith.subf %154, %157 : vector<64x64xf32>
    %159 = math.exp %158 : vector<64x64xf32>
    %cst_57 = arith.constant dense<0.000000e+00> : vector<64xf32>
    %160 = vector.multi_reduction <add>, %159, %cst_57 [1] : vector<64x64xf32> to vector<64xf32>
    %161 = vector.shape_cast %160 : vector<64xf32> to vector<64x1xf32>
    %162 = tpu.reciprocal %161 {approx = true} : vector<64x1xf32> -> vector<64x1xf32>
    %163 = vector.broadcast %162 : vector<64x1xf32> to vector<64x64xf32>
    %164 = arith.mulf %159, %163 : vector<64x64xf32>
    %165 = arith.truncf %164 : vector<64x64xf32> to vector<64x64xbf16>
    %cst_58 = arith.constant dense<0.000000e+00> : vector<64x64xf32>
    %166 = tpu.matmul %165, %151, %cst_58 {dimension_numbers = #tpu.dot_dimension_numbers<[1], [0], [0], [1], [0, 0, 1, 1], [], []>} : vector<64x64xbf16>, vector<64x64xbf16>, vector<64x64xf32> -> vector<64x64xf32>
    %167 = arith.truncf %166 : vector<64x64xf32> to vector<64x64xbf16>
    %c0_59 = arith.constant 0 : index
    %c0_60 = arith.constant 0 : index
    %168 = vector.load %arg3[%c0_59, %c0_60] : memref<384x384xbf16, #tpu.memory_space<vmem>>, vector<64x384xbf16>
    %cst_61 = arith.constant dense<0.000000e+00> : vector<64x384xf32>
    %169 = tpu.matmul %167, %168, %cst_61 {dimension_numbers = #tpu.dot_dimension_numbers<[1], [0], [0], [1], [0, 0, 1, 1], [], []>} : vector<64x64xbf16>, vector<64x384xbf16>, vector<64x384xf32> -> vector<64x384xf32>
    %170 = arith.addf %148, %169 : vector<64x384xf32>
    %171 = vector.extract_strided_slice %5 {offsets = [64, 64], sizes = [64, 64], strides = [1, 1]} : vector<128x1152xbf16> to vector<64x64xbf16>
    %172 = vector.extract_strided_slice %5 {offsets = [64, 448], sizes = [64, 64], strides = [1, 1]} : vector<128x1152xbf16> to vector<64x64xbf16>
    %173 = vector.extract_strided_slice %5 {offsets = [64, 832], sizes = [64, 64], strides = [1, 1]} : vector<128x1152xbf16> to vector<64x64xbf16>
    %cst_62 = arith.constant dense<0.000000e+00> : vector<64x64xf32>
    %174 = tpu.matmul %171, %172, %cst_62 {dimension_numbers = #tpu.dot_dimension_numbers<[1], [1], [0], [0], [0, 0, 1, 0], [], []>} : vector<64x64xbf16>, vector<64x64xbf16>, vector<64x64xf32> -> vector<64x64xf32>
    %cst_63 = arith.constant 0xFF800000 : f32
    %175 = vector.broadcast %cst_63 : f32 to vector<64x64xf32>
    %176 = arith.select %8, %174, %175 : vector<64x64xi1>, vector<64x64xf32>
    %cst_64 = arith.constant dense<0xFF800000> : vector<64xf32>
    %177 = vector.multi_reduction <maximumf>, %176, %cst_64 [1] : vector<64x64xf32> to vector<64xf32>
    %178 = vector.shape_cast %177 : vector<64xf32> to vector<64x1xf32>
    %179 = vector.broadcast %178 : vector<64x1xf32> to vector<64x64xf32>
    %180 = arith.subf %176, %179 : vector<64x64xf32>
    %181 = math.exp %180 : vector<64x64xf32>
    %cst_65 = arith.constant dense<0.000000e+00> : vector<64xf32>
    %182 = vector.multi_reduction <add>, %181, %cst_65 [1] : vector<64x64xf32> to vector<64xf32>
    %183 = vector.shape_cast %182 : vector<64xf32> to vector<64x1xf32>
    %184 = tpu.reciprocal %183 {approx = true} : vector<64x1xf32> -> vector<64x1xf32>
    %185 = vector.broadcast %184 : vector<64x1xf32> to vector<64x64xf32>
    %186 = arith.mulf %181, %185 : vector<64x64xf32>
    %187 = arith.truncf %186 : vector<64x64xf32> to vector<64x64xbf16>
    %cst_66 = arith.constant dense<0.000000e+00> : vector<64x64xf32>
    %188 = tpu.matmul %187, %173, %cst_66 {dimension_numbers = #tpu.dot_dimension_numbers<[1], [0], [0], [1], [0, 0, 1, 1], [], []>} : vector<64x64xbf16>, vector<64x64xbf16>, vector<64x64xf32> -> vector<64x64xf32>
    %189 = arith.truncf %188 : vector<64x64xf32> to vector<64x64xbf16>
    %c64_67 = arith.constant 64 : index
    %c0_68 = arith.constant 0 : index
    %190 = vector.load %arg3[%c64_67, %c0_68] : memref<384x384xbf16, #tpu.memory_space<vmem>>, vector<64x384xbf16>
    %cst_69 = arith.constant dense<0.000000e+00> : vector<64x384xf32>
    %191 = tpu.matmul %189, %190, %cst_69 {dimension_numbers = #tpu.dot_dimension_numbers<[1], [0], [0], [1], [0, 0, 1, 1], [], []>} : vector<64x64xbf16>, vector<64x384xbf16>, vector<64x384xf32> -> vector<64x384xf32>
    %192 = arith.addf %170, %191 : vector<64x384xf32>
    %193 = vector.extract_strided_slice %5 {offsets = [64, 128], sizes = [64, 64], strides = [1, 1]} : vector<128x1152xbf16> to vector<64x64xbf16>
    %194 = vector.extract_strided_slice %5 {offsets = [64, 512], sizes = [64, 64], strides = [1, 1]} : vector<128x1152xbf16> to vector<64x64xbf16>
    %195 = vector.extract_strided_slice %5 {offsets = [64, 896], sizes = [64, 64], strides = [1, 1]} : vector<128x1152xbf16> to vector<64x64xbf16>
    %cst_70 = arith.constant dense<0.000000e+00> : vector<64x64xf32>
    %196 = tpu.matmul %193, %194, %cst_70 {dimension_numbers = #tpu.dot_dimension_numbers<[1], [1], [0], [0], [0, 0, 1, 0], [], []>} : vector<64x64xbf16>, vector<64x64xbf16>, vector<64x64xf32> -> vector<64x64xf32>
    %cst_71 = arith.constant 0xFF800000 : f32
    %197 = vector.broadcast %cst_71 : f32 to vector<64x64xf32>
    %198 = arith.select %8, %196, %197 : vector<64x64xi1>, vector<64x64xf32>
    %cst_72 = arith.constant dense<0xFF800000> : vector<64xf32>
    %199 = vector.multi_reduction <maximumf>, %198, %cst_72 [1] : vector<64x64xf32> to vector<64xf32>
    %200 = vector.shape_cast %199 : vector<64xf32> to vector<64x1xf32>
    %201 = vector.broadcast %200 : vector<64x1xf32> to vector<64x64xf32>
    %202 = arith.subf %198, %201 : vector<64x64xf32>
    %203 = math.exp %202 : vector<64x64xf32>
    %cst_73 = arith.constant dense<0.000000e+00> : vector<64xf32>
    %204 = vector.multi_reduction <add>, %203, %cst_73 [1] : vector<64x64xf32> to vector<64xf32>
    %205 = vector.shape_cast %204 : vector<64xf32> to vector<64x1xf32>
    %206 = tpu.reciprocal %205 {approx = true} : vector<64x1xf32> -> vector<64x1xf32>
    %207 = vector.broadcast %206 : vector<64x1xf32> to vector<64x64xf32>
    %208 = arith.mulf %203, %207 : vector<64x64xf32>
    %209 = arith.truncf %208 : vector<64x64xf32> to vector<64x64xbf16>
    %cst_74 = arith.constant dense<0.000000e+00> : vector<64x64xf32>
    %210 = tpu.matmul %209, %195, %cst_74 {dimension_numbers = #tpu.dot_dimension_numbers<[1], [0], [0], [1], [0, 0, 1, 1], [], []>} : vector<64x64xbf16>, vector<64x64xbf16>, vector<64x64xf32> -> vector<64x64xf32>
    %211 = arith.truncf %210 : vector<64x64xf32> to vector<64x64xbf16>
    %c128_75 = arith.constant 128 : index
    %c0_76 = arith.constant 0 : index
    %212 = vector.load %arg3[%c128_75, %c0_76] : memref<384x384xbf16, #tpu.memory_space<vmem>>, vector<64x384xbf16>
    %cst_77 = arith.constant dense<0.000000e+00> : vector<64x384xf32>
    %213 = tpu.matmul %211, %212, %cst_77 {dimension_numbers = #tpu.dot_dimension_numbers<[1], [0], [0], [1], [0, 0, 1, 1], [], []>} : vector<64x64xbf16>, vector<64x384xbf16>, vector<64x384xf32> -> vector<64x384xf32>
    %214 = arith.addf %192, %213 : vector<64x384xf32>
    %215 = vector.extract_strided_slice %5 {offsets = [64, 192], sizes = [64, 64], strides = [1, 1]} : vector<128x1152xbf16> to vector<64x64xbf16>
    %216 = vector.extract_strided_slice %5 {offsets = [64, 576], sizes = [64, 64], strides = [1, 1]} : vector<128x1152xbf16> to vector<64x64xbf16>
    %217 = vector.extract_strided_slice %5 {offsets = [64, 960], sizes = [64, 64], strides = [1, 1]} : vector<128x1152xbf16> to vector<64x64xbf16>
    %cst_78 = arith.constant dense<0.000000e+00> : vector<64x64xf32>
    %218 = tpu.matmul %215, %216, %cst_78 {dimension_numbers = #tpu.dot_dimension_numbers<[1], [1], [0], [0], [0, 0, 1, 0], [], []>} : vector<64x64xbf16>, vector<64x64xbf16>, vector<64x64xf32> -> vector<64x64xf32>
    %cst_79 = arith.constant 0xFF800000 : f32
    %219 = vector.broadcast %cst_79 : f32 to vector<64x64xf32>
    %220 = arith.select %8, %218, %219 : vector<64x64xi1>, vector<64x64xf32>
    %cst_80 = arith.constant dense<0xFF800000> : vector<64xf32>
    %221 = vector.multi_reduction <maximumf>, %220, %cst_80 [1] : vector<64x64xf32> to vector<64xf32>
    %222 = vector.shape_cast %221 : vector<64xf32> to vector<64x1xf32>
    %223 = vector.broadcast %222 : vector<64x1xf32> to vector<64x64xf32>
    %224 = arith.subf %220, %223 : vector<64x64xf32>
    %225 = math.exp %224 : vector<64x64xf32>
    %cst_81 = arith.constant dense<0.000000e+00> : vector<64xf32>
    %226 = vector.multi_reduction <add>, %225, %cst_81 [1] : vector<64x64xf32> to vector<64xf32>
    %227 = vector.shape_cast %226 : vector<64xf32> to vector<64x1xf32>
    %228 = tpu.reciprocal %227 {approx = true} : vector<64x1xf32> -> vector<64x1xf32>
    %229 = vector.broadcast %228 : vector<64x1xf32> to vector<64x64xf32>
    %230 = arith.mulf %225, %229 : vector<64x64xf32>
    %231 = arith.truncf %230 : vector<64x64xf32> to vector<64x64xbf16>
    %cst_82 = arith.constant dense<0.000000e+00> : vector<64x64xf32>
    %232 = tpu.matmul %231, %217, %cst_82 {dimension_numbers = #tpu.dot_dimension_numbers<[1], [0], [0], [1], [0, 0, 1, 1], [], []>} : vector<64x64xbf16>, vector<64x64xbf16>, vector<64x64xf32> -> vector<64x64xf32>
    %233 = arith.truncf %232 : vector<64x64xf32> to vector<64x64xbf16>
    %c192_83 = arith.constant 192 : index
    %c0_84 = arith.constant 0 : index
    %234 = vector.load %arg3[%c192_83, %c0_84] : memref<384x384xbf16, #tpu.memory_space<vmem>>, vector<64x384xbf16>
    %cst_85 = arith.constant dense<0.000000e+00> : vector<64x384xf32>
    %235 = tpu.matmul %233, %234, %cst_85 {dimension_numbers = #tpu.dot_dimension_numbers<[1], [0], [0], [1], [0, 0, 1, 1], [], []>} : vector<64x64xbf16>, vector<64x384xbf16>, vector<64x384xf32> -> vector<64x384xf32>
    %236 = arith.addf %214, %235 : vector<64x384xf32>
    %237 = vector.extract_strided_slice %5 {offsets = [64, 256], sizes = [64, 64], strides = [1, 1]} : vector<128x1152xbf16> to vector<64x64xbf16>
    %238 = vector.extract_strided_slice %5 {offsets = [64, 640], sizes = [64, 64], strides = [1, 1]} : vector<128x1152xbf16> to vector<64x64xbf16>
    %239 = vector.extract_strided_slice %5 {offsets = [64, 1024], sizes = [64, 64], strides = [1, 1]} : vector<128x1152xbf16> to vector<64x64xbf16>
    %cst_86 = arith.constant dense<0.000000e+00> : vector<64x64xf32>
    %240 = tpu.matmul %237, %238, %cst_86 {dimension_numbers = #tpu.dot_dimension_numbers<[1], [1], [0], [0], [0, 0, 1, 0], [], []>} : vector<64x64xbf16>, vector<64x64xbf16>, vector<64x64xf32> -> vector<64x64xf32>
    %cst_87 = arith.constant 0xFF800000 : f32
    %241 = vector.broadcast %cst_87 : f32 to vector<64x64xf32>
    %242 = arith.select %8, %240, %241 : vector<64x64xi1>, vector<64x64xf32>
    %cst_88 = arith.constant dense<0xFF800000> : vector<64xf32>
    %243 = vector.multi_reduction <maximumf>, %242, %cst_88 [1] : vector<64x64xf32> to vector<64xf32>
    %244 = vector.shape_cast %243 : vector<64xf32> to vector<64x1xf32>
    %245 = vector.broadcast %244 : vector<64x1xf32> to vector<64x64xf32>
    %246 = arith.subf %242, %245 : vector<64x64xf32>
    %247 = math.exp %246 : vector<64x64xf32>
    %cst_89 = arith.constant dense<0.000000e+00> : vector<64xf32>
    %248 = vector.multi_reduction <add>, %247, %cst_89 [1] : vector<64x64xf32> to vector<64xf32>
    %249 = vector.shape_cast %248 : vector<64xf32> to vector<64x1xf32>
    %250 = tpu.reciprocal %249 {approx = true} : vector<64x1xf32> -> vector<64x1xf32>
    %251 = vector.broadcast %250 : vector<64x1xf32> to vector<64x64xf32>
    %252 = arith.mulf %247, %251 : vector<64x64xf32>
    %253 = arith.truncf %252 : vector<64x64xf32> to vector<64x64xbf16>
    %cst_90 = arith.constant dense<0.000000e+00> : vector<64x64xf32>
    %254 = tpu.matmul %253, %239, %cst_90 {dimension_numbers = #tpu.dot_dimension_numbers<[1], [0], [0], [1], [0, 0, 1, 1], [], []>} : vector<64x64xbf16>, vector<64x64xbf16>, vector<64x64xf32> -> vector<64x64xf32>
    %255 = arith.truncf %254 : vector<64x64xf32> to vector<64x64xbf16>
    %c256_91 = arith.constant 256 : index
    %c0_92 = arith.constant 0 : index
    %256 = vector.load %arg3[%c256_91, %c0_92] : memref<384x384xbf16, #tpu.memory_space<vmem>>, vector<64x384xbf16>
    %cst_93 = arith.constant dense<0.000000e+00> : vector<64x384xf32>
    %257 = tpu.matmul %255, %256, %cst_93 {dimension_numbers = #tpu.dot_dimension_numbers<[1], [0], [0], [1], [0, 0, 1, 1], [], []>} : vector<64x64xbf16>, vector<64x384xbf16>, vector<64x384xf32> -> vector<64x384xf32>
    %258 = arith.addf %236, %257 : vector<64x384xf32>
    %259 = vector.extract_strided_slice %5 {offsets = [64, 320], sizes = [64, 64], strides = [1, 1]} : vector<128x1152xbf16> to vector<64x64xbf16>
    %260 = vector.extract_strided_slice %5 {offsets = [64, 704], sizes = [64, 64], strides = [1, 1]} : vector<128x1152xbf16> to vector<64x64xbf16>
    %261 = vector.extract_strided_slice %5 {offsets = [64, 1088], sizes = [64, 64], strides = [1, 1]} : vector<128x1152xbf16> to vector<64x64xbf16>
    %cst_94 = arith.constant dense<0.000000e+00> : vector<64x64xf32>
    %262 = tpu.matmul %259, %260, %cst_94 {dimension_numbers = #tpu.dot_dimension_numbers<[1], [1], [0], [0], [0, 0, 1, 0], [], []>} : vector<64x64xbf16>, vector<64x64xbf16>, vector<64x64xf32> -> vector<64x64xf32>
    %cst_95 = arith.constant 0xFF800000 : f32
    %263 = vector.broadcast %cst_95 : f32 to vector<64x64xf32>
    %264 = arith.select %8, %262, %263 : vector<64x64xi1>, vector<64x64xf32>
    %cst_96 = arith.constant dense<0xFF800000> : vector<64xf32>
    %265 = vector.multi_reduction <maximumf>, %264, %cst_96 [1] : vector<64x64xf32> to vector<64xf32>
    %266 = vector.shape_cast %265 : vector<64xf32> to vector<64x1xf32>
    %267 = vector.broadcast %266 : vector<64x1xf32> to vector<64x64xf32>
    %268 = arith.subf %264, %267 : vector<64x64xf32>
    %269 = math.exp %268 : vector<64x64xf32>
    %cst_97 = arith.constant dense<0.000000e+00> : vector<64xf32>
    %270 = vector.multi_reduction <add>, %269, %cst_97 [1] : vector<64x64xf32> to vector<64xf32>
    %271 = vector.shape_cast %270 : vector<64xf32> to vector<64x1xf32>
    %272 = tpu.reciprocal %271 {approx = true} : vector<64x1xf32> -> vector<64x1xf32>
    %273 = vector.broadcast %272 : vector<64x1xf32> to vector<64x64xf32>
    %274 = arith.mulf %269, %273 : vector<64x64xf32>
    %275 = arith.truncf %274 : vector<64x64xf32> to vector<64x64xbf16>
    %cst_98 = arith.constant dense<0.000000e+00> : vector<64x64xf32>
    %276 = tpu.matmul %275, %261, %cst_98 {dimension_numbers = #tpu.dot_dimension_numbers<[1], [0], [0], [1], [0, 0, 1, 1], [], []>} : vector<64x64xbf16>, vector<64x64xbf16>, vector<64x64xf32> -> vector<64x64xf32>
    %277 = arith.truncf %276 : vector<64x64xf32> to vector<64x64xbf16>
    %c320_99 = arith.constant 320 : index
    %c0_100 = arith.constant 0 : index
    %278 = vector.load %arg3[%c320_99, %c0_100] : memref<384x384xbf16, #tpu.memory_space<vmem>>, vector<64x384xbf16>
    %cst_101 = arith.constant dense<0.000000e+00> : vector<64x384xf32>
    %279 = tpu.matmul %277, %278, %cst_101 {dimension_numbers = #tpu.dot_dimension_numbers<[1], [0], [0], [1], [0, 0, 1, 1], [], []>} : vector<64x64xbf16>, vector<64x384xbf16>, vector<64x384xf32> -> vector<64x384xf32>
    %280 = arith.addf %258, %279 : vector<64x384xf32>
    %281 = vector.broadcast %9 : vector<1x384xf32> to vector<64x384xf32>
    %282 = arith.addf %280, %281 : vector<64x384xf32>
    %c1 = arith.constant 1 : index
    %c0_102 = arith.constant 0 : index
    %c0_103 = arith.constant 0 : index
    %283 = vector.load %arg5[%c1, %c0_102, %c0_103] : memref<2x64x384xf32, #tpu.memory_space<vmem>>, vector<1x64x384xf32>
    %284 = vector.shape_cast %283 : vector<1x64x384xf32> to vector<64x384xf32>
    %285 = vector.shape_cast %282 : vector<64x384xf32> to vector<1x64x384xf32>
    tpu.vector_store %arg5[%c1, %c0_102, %c0_103], %285 {strides = array<i32>} : memref<2x64x384xf32, #tpu.memory_space<vmem>>, vector<1x64x384xf32>,
    return
  }
  func.func @transform_0(%arg0: i32) -> (i32, i32, i32) {
    %c0_i32 = arith.constant 0 : i32
    %c0_i32_0 = arith.constant 0 : i32
    %c0_i32_1 = arith.constant 0 : i32
    return %arg0, %c0_i32, %c0_i32_0 : i32, i32, i32
  }
  func.func @transform_1(%arg0: i32) -> (i32, i32) {
    %c0_i32 = arith.constant 0 : i32
    %c0_i32_0 = arith.constant 0 : i32
    %c0_i32_1 = arith.constant 0 : i32
    return %c0_i32, %c0_i32_0 : i32, i32
  }
  func.func @transform_2(%arg0: i32) -> (i32, i32) {
    %c0_i32 = arith.constant 0 : i32
    %c0_i32_0 = arith.constant 0 : i32
    %c0_i32_1 = arith.constant 0 : i32
    return %c0_i32, %c0_i32_0 : i32, i32
  }
  func.func @transform_3(%arg0: i32) -> (i32, i32) {
    %c0_i32 = arith.constant 0 : i32
    %c0_i32_0 = arith.constant 0 : i32
    %c0_i32_1 = arith.constant 0 : i32
    return %c0_i32, %c0_i32_0 : i32, i32
  }
  func.func @transform_4(%arg0: i32) -> (i32, i32, i32) {
    %c0_i32 = arith.constant 0 : i32
    %c0_i32_0 = arith.constant 0 : i32
    %c0_i32_1 = arith.constant 0 : i32
    return %arg0, %c0_i32, %c0_i32_0 : i32, i32, i32
  }
}

</mosaic_0001>

<bundles_post_ra>
// kernel: tpu_custom_call.1
= control target key start
LH: loop header
LB: loop body
LE: loop exit
PB: predicated region body
PF: predicated region fallthrough
CT: control target
= control target key end

     0   :  { %9 = vsyncpa [#allocation3], 0  ;;  %s14941_s0 = inlined_call_operand.hbm [shape: f32[4,64,384], index: 0, kind: input, shape index: {}]   ;;  %s14942_s1 = inlined_call_operand.hbm [shape: bf16[384,1152], index: 1, kind: input, shape index: {}]   ;;  %s14943_s2 = inlined_call_operand.hbm [shape: bf16[384,384], index: 2, kind: input, shape index: {}]   ;;  %s14944_s3 = inlined_call_operand.vmem [shape: f32[1,384], index: 3, kind: input, shape index: {}]   ;;  %s14945_s4 = inlined_call_operand.hbm [shape: f32[4,64,384], index: 4, kind: output, shape index: {}]  }
   0x1   :  { %11 = vsyncpa [#allocation3 + $0x1], 0 }
   0x2   :  { %12 = vsyncpa [#allocation6], 0 }
   0x3   :  { %13 = vsyncpa [#allocation4], 0 }
   0x4   :  { %15 = vsyncpa [#allocation4 + $0x1], 0  ;;  %s12666_s15 = smov 0   ;;  %s12668_s16 = smov 0  }
   0x5   :  { %s12670_s17 = smov 0   ;;  %s12672_s18 = smov 0  }
   0x6 LB: > { %s12687_s19 = sadd.s32 4294967295, %s12625_s18   ;;  %s9508_s20 = sadd.s32 4294967294, %s12625_s18   ;;  %s12625_s18 = sphi %s12672_s18, %s15108_s18   ;;  %s12621_s17 = sphi %s12670_s17, %s15107_s17   ;;  %s12617_s16 = sphi %s12668_s16, %s15106_s16   ;;  %s12613_s15 = sphi %s12666_s15, %s15105_s15  }
   0x7   : > { %p41_p0 = scmp.ne.s32.totalorder %s12617_s16, %s12613_s15  ;;  %p14946_p1 = scmp.eq.s32.totalorder %s12687_s19, 0 }
   0x8   : > { %p134_p3 = scmp.eq.s32.totalorder %s9508_s20, 1  ;;  %p9509_p5 = scmp.ge.s32.totalorder %s12625_s18, 1 }
   0x9   : > { %p12696_p4 = por %p14946_p1, %p41_p0  ;;  %p141_p7 = scmp.lt.s32.totalorder %s12625_s18, 3 }
   0xa   : > { %p12701_p6 = por %p134_p3, %p41_p0  ;;  %s12627_s24 = smov [#allocation5]  }
   0xb   : > { %s14993_s21 = scalar_select %p12696_p4, 1, 0 }
   0xc   : > { %s14994_s22 = scalar_select %p12701_p6, 1, 0 }
   0xd   : > { %p12706_p8 = pnand %p9509_p5, %p141_p7  ;;  %s153_s25 = sshll.u32 %s12627_s24, 4  ;;  %s12710_s25 = int_to_ptr.vmem [resolvable:$true] %s153_s25 }
   0xe   : > { %s12628_s27 = smov [#allocation7]   ;;  %s12469_s5 = scalar_lea.hbm %s14942_s1, 27648 }
   0xf   : > { %p11516_p9 = pneg %p12706_p8  ;;  %s166_s28 = sshll.u32 %s12628_s27, 4  ;;  %s12721_s28 = int_to_ptr.vmem [resolvable:$true] %s166_s28 }
  0x10   : > { %p12470_p12 = scmp.ne.s32.totalorder %s14942_s1, %s12469_s5  ;;  %p12476_p5 = scmp.lt.u32.totalorder %s12469_s5, %s14942_s1 }
  0x11   : > { %p12717_p11 = pnand %p11516_p9, %p14946_p1 }
  0x13   : > { %p12471_p13 = pneg %p12717_p11 }
  0x15   : > { %p12472_p0 = pnand %p12471_p13, %p12470_p12 }
  0x17   : > { %p12473_p3 = pneg %p12472_p0 }
  0x19   : > { %p12478_p7 = pnand %p12476_p5, %p12473_p3 }
  0x1b   : > { %12481 = shalt.err (!%p12478_p7)
}
  0x1c   : > { %s12482_s10 = scalar_lea.vmem %s12710_s25, 27648  ;;  %p12490_p2 = scmp.lt.s32.totalorder %s12710_s25, %s12710_s25 }
  0x1d   : > { %p12483_p9 = scmp.ne.s32.totalorder %s12710_s25, %s12482_s10  ;;  %p12491_p12 = scmp.lt.s32.totalorder %s12482_s10, %s12482_s10 }
  0x1f   : > { %p12485_p10 = pnand %p12483_p9, %p12471_p13  ;;  %p12492_p0 = por %p12491_p12, %p12490_p2 }
  0x21   : > { %p12486_p1 = pneg %p12485_p10 }
  0x23   : > { %p12493_p6 = pnand %p12492_p0, %p12486_p1 }
  0x25   : > { %12496 = shalt.err (!%p12493_p6)
}
  0x26   : > { %s12629_s11 = smov 576   ;;  %s12630_s12 = smov 36  }
  0x27   : > { %11519 = dma.hbm_to_vmem [thread:$0]  (!%p12717_p11), %s14942_s1, 27648, %s12710_s25, [#allocation6], %s12629_s11, %s12629_s11, %s12630_s12  }
  0x28   : > { %s12497_s27 = scalar_lea.hbm %s14943_s2, 9216 }
  0x29   : > { %p12498_p2 = scmp.ne.s32.totalorder %s14943_s2, %s12497_s27  ;;  %p12504_p10 = scmp.lt.u32.totalorder %s12497_s27, %s14943_s2 }
  0x2b   : > { %p12500_p1 = pnand %p12498_p2, %p12471_p13 }
  0x2d   : > { %p12501_p6 = pneg %p12500_p1 }
  0x2f   : > { %p12506_p3 = pnand %p12504_p10, %p12501_p6 }
  0x31   : > { %12509 = shalt.err (!%p12506_p3)
}
  0x32   : > { %s12510_s25 = scalar_lea.vmem %s12721_s28, 9216  ;;  %p12518_p12 = scmp.lt.s32.totalorder %s12721_s28, %s12721_s28 }
  0x33   : > { %p12511_p5 = scmp.ne.s32.totalorder %s12721_s28, %s12510_s25  ;;  %p12519_p0 = scmp.lt.s32.totalorder %s12510_s25, %s12510_s25 }
  0x35   : > { %p12513_p7 = pnand %p12511_p5, %p12471_p13  ;;  %p12520_p2 = por %p12519_p0, %p12518_p12 }
  0x37   : > { %p12514_p9 = pneg %p12513_p7 }
  0x39   : > { %p12521_p1 = pnand %p12520_p2, %p12514_p9 }
  0x3b   : > { %12524 = shalt.err (!%p12521_p1)
}
  0x3c   : > { %s12631_s7 = smov 192   ;;  %s12632_s8 = smov 12  }
  0x3d   : > { %11522 = dma.hbm_to_vmem [thread:$0]  (!%p12717_p11), %s14943_s2, 9216, %s12721_s28, [#allocation6], %s12631_s7, %s12631_s7, %s12632_s8  }
  0x3e   : > { %s12776_s11 = sadd.s32 1, %s12625_s18   ;;  %s28_s13 = sadd.s32 1, %s12621_s17 }
  0x3f   : > { %s25_s12 = ssub.s32 %s12625_s18, %s12776_s11  ;;  %p35_p6 = scmp.ne.s32.totalorder %s12621_s17, %s12617_s16 }
  0x40   : > { %p26_p13 = scmp.eq.s32.totalorder %s25_s12, 0  ;;  %p36_p10 = scmp.eq.s32.totalorder %s12625_s18, 0 }
  0x41   : > { %p14997_p5 = scmp.eq.s32.totalorder %s12687_s19, 1  ;;  %p11533_p9 = scmp.lt.s32.totalorder %s12625_s18, 2 }
  0x42   : > { %s12785_s14 = scalar_select %p26_p13, %s12621_s17, %s28_s13  }
  0x43   : > { %p37_p3 = por %p36_p10, %p35_p6  ;;  %p12789_p7 = por %p14997_p5, %p35_p6 }
  0x44   : > { %s183_s26 = sand.u32 1, %s12621_s17   ;;  %s11501_s28 = smul.u32 6144, %s12625_s18 }
  0x45   : > { %s14998_s20 = scalar_select %p12789_p7, 1, 0 }
  0x46   : > { %s11500_s24 = smul.u32 384, %s183_s26  ;;  %p12796_p11 = pnand %p11533_p9, %p37_p3 }
  0x47   : > { %s12803_s5 = scalar_lea.hbm %s14941_s0, %s11501_s28  ;;  %s12807_s7 = scalar_lea.sflag [#allocation3], %s183_s26 }
  0x48   : > { %s187_s6 = scalar_lea.vmem [#allocation2], %s11500_s24  ;;  %s12525_s8 = scalar_lea.hbm %s12803_s5, 6144 }
  0x49   : > { %s195_s25 = sshll.u32 %s187_s6, 4  ;;  %p12526_p12 = scmp.ne.s32.totalorder %s12803_s5, %s12525_s8  ;;  %s12805_s25 = int_to_ptr.vmem [resolvable:$true] %s195_s25 }
  0x4a   : > { %p12527_p0 = pneg %p12796_p11  ;;  %s12530_s12 = scalar_lea.hbm %s14941_s0, 12288 }
  0x4b   : > { %p12531_p13 = scmp.lt.u32.totalorder %s12803_s5, %s14941_s0  ;;  %p12532_p6 = scmp.lt.u32.totalorder %s12530_s12, %s12525_s8 }
  0x4c   : > { %p12528_p2 = pnand %p12527_p0, %p12526_p12  ;;  %p12534_p3 = scmp.lt.u32.totalorder %s12525_s8, %s12803_s5 }
  0x4d   : > { %p12533_p10 = por %p12532_p6, %p12531_p13 }
  0x4e   : > { %p12529_p1 = pneg %p12528_p2 }
  0x4f   : > { %p12535_p5 = por %p12534_p3, %p12533_p10 }
  0x51   : > { %p12536_p9 = pnand %p12535_p5, %p12529_p1 }
  0x53   : > { %12539 = shalt.err (!%p12536_p9)
}
  0x54   : > { %s12540_s26 = scalar_lea.vmem %s12805_s25, 6144  ;;  %s12633_s24 = smov [#allocation2]  }
  0x55   : > { %p12541_p12 = scmp.ne.s32.totalorder %s12805_s25, %s12540_s26  ;;  %s12545_s29 = sshll.u32 %s12633_s24, 4  ;;  %s12546_s29 = int_to_ptr.vmem [resolvable:$false] %s12545_s29 }
  0x56   : > { %s12547_s30 = scalar_lea.vmem %s12546_s29, 12288  ;;  %p12548_p4 = scmp.lt.s32.totalorder %s12805_s25, %s12546_s29 }
  0x57   : > { %p12543_p2 = pnand %p12541_p12, %p12527_p0  ;;  %p12549_p13 = scmp.lt.s32.totalorder %s12547_s30, %s12540_s26 }
  0x59   : > { %p12544_p7 = pneg %p12543_p2  ;;  %p12550_p6 = por %p12549_p13, %p12548_p4 }
  0x5b   : > { %p12551_p10 = pnand %p12550_p6, %p12544_p7 }
  0x5d   : > { %12554 = shalt.err (!%p12551_p10)
}
  0x5e   : > { %s12634_s6 = smov 384   ;;  %s12635_s8 = smov 24  }
  0x5f   : > { %11526 = dma.hbm_to_vmem [thread:$0]  (!%p12796_p11), %s12803_s5, 6144, %s12805_s25, %s12807_s7, %s12634_s6, %s12634_s6, %s12635_s8  }
  0x60   : > { %207 = sbr.rel (%p12706_p8) target bundleno = 8992 (0x2320), region = 36 }
  0x67   : > { %s12838_s9 = sand.u32 1, %s12617_s16   ;;  %p15000_p4 = scmp.ne.s32.totalorder %s14993_s21, 0 }
  0x68   : > { %s11502_s10 = smul.u32 384, %s12838_s9  ;;  %s210_s12 = scalar_lea.sflag [#allocation3], %s12838_s9 }
  0x6a   : > { %s12844_s13 = scalar_lea.vmem [#allocation2], %s11502_s10 }
  0x6b   : > { %12600 = dma.done.wait (%p15000_p4), %s210_s12, 6144  }
  0x6c   : > { %12602 = vsyncadd (%p15000_p4), %s210_s12, 4294961152  ;;  %p15001_p7 = scmp.eq.s32.totalorder %s12687_s19, 0 }
  0x6e   : > { %12604 = dma.done.wait (%p15001_p7), [#allocation6], 36864   ;;  %p15002_p8 = pmov %p15001_p7 }
  0x6f   : > { %v11581_v0 = vld [vmem:[#allocation5 + $0x4] ss:$36 sps:$4 sm:$0xff]   ;;  %v11583_v1 = vld [vmem:[#allocation5 + $0xc] ss:$36 sps:$4 sm:$0xff]   ;;  %v11589_v5 = vld [vmem:[#allocation5 + $0x54] ss:$36 sps:$4 sm:$0xff]  }
  0x70   : > { %12606 = vsyncadd (%p15002_p8), [#allocation6], 4294930432  ;;  %1665 = vmatprep.subr.bf16.mxu0 %v11581_v0  ;;  %v11585_v2 = vld [vmem:[#allocation5] ss:$36 sps:$4 sm:$0xff]   ;;  %v11586_v3 = vld [vmem:[#allocation5 + $0x8] ss:$36 sps:$4 sm:$0xff]   ;;  %1891 = vmatprep.subr.bf16.mxu1 %v11583_v1 }
  0x71   : > { %v11587_v4 = vld [vmem:[#allocation5 + $0x4c] ss:$36 sps:$4 sm:$0xff]   ;;  %1666 = vmatpush1.bf16.msra.mxu0 %v11585_v2  ;;  %1892 = vmatpush1.bf16.msra.mxu1 %v11586_v3  ;;  %v11593_v8 = vld [vmem:[#allocation5 + $0x94] ss:$36 sps:$4 sm:$0xff]   ;;  %v11595_v9 = vld [vmem:[#allocation5 + $0x9c] ss:$36 sps:$4 sm:$0xff]  }
  0x72   : > { %v11591_v6 = vld [vmem:[#allocation5 + $0x48] ss:$36 sps:$4 sm:$0xff]   ;;  %1667 = vmatprep.subr.bf16.mxu0 %v11587_v4  ;;  %v11592_v7 = vld [vmem:[#allocation5 + $0x50] ss:$36 sps:$4 sm:$0xff]   ;;  %1893 = vmatprep.subr.bf16.mxu1 %v11589_v5  ;;  %v11598_v11 = vld [vmem:[#allocation5 + $0x98] ss:$36 sps:$4 sm:$0xff]  }
  0x73   : > { %v11597_v10 = vld [vmem:[#allocation5 + $0x90] ss:$36 sps:$4 sm:$0xff]   ;;  %v11599_v12 = vld [vmem:[#allocation5 + $0xdc] ss:$36 sps:$4 sm:$0xff]   ;;  %v11601_v13 = vld [vmem:[#allocation5 + $0xe4] ss:$36 sps:$4 sm:$0xff]  }
  0x74   : > { %v11603_v14 = vld [vmem:[#allocation5 + $0xd8] ss:$36 sps:$4 sm:$0xff]   ;;  %v11604_v15 = vld [vmem:[#allocation5 + $0xe0] ss:$36 sps:$4 sm:$0xff]   ;;  %v11607_v17 = vld [vmem:[#allocation5 + $0x12c] ss:$36 sps:$4 sm:$0xff]  }
  0x75   : > { %1668 = vmatpush1.bf16.msra.mxu0 %v11591_v6  ;;  %1894 = vmatpush1.bf16.msra.mxu1 %v11592_v7  ;;  %v11605_v16 = vld [vmem:[#allocation5 + $0x124] ss:$36 sps:$4 sm:$0xff]   ;;  %v11611_v20 = vld [vmem:[#allocation5 + $0x16c] ss:$36 sps:$4 sm:$0xff]   ;;  %v11613_v21 = vld [vmem:[#allocation5 + $0x174] ss:$36 sps:$4 sm:$0xff]  }
  0x76   : > { %1669 = vmatprep.subr.bf16.mxu0 %v11593_v8  ;;  %1895 = vmatprep.subr.bf16.mxu1 %v11595_v9  ;;  %v11609_v18 = vld [vmem:[#allocation5 + $0x120] ss:$36 sps:$4 sm:$0xff]   ;;  %v11610_v19 = vld [vmem:[#allocation5 + $0x128] ss:$36 sps:$4 sm:$0xff]   ;;  %v11616_v23 = vld [vmem:[#allocation5 + $0x170] ss:$36 sps:$4 sm:$0xff]  }
  0x77   : > { %v11615_v22 = vld [vmem:[#allocation5 + $0x168] ss:$36 sps:$4 sm:$0xff]   ;;  %v11617_v24 = vld [vmem:[#allocation5 + $0x1b4] ss:$36 sps:$4 sm:$0xff]   ;;  %v11619_v25 = vld [vmem:[#allocation5 + $0x1bc] ss:$36 sps:$4 sm:$0xff]  }
  0x78   : > { %v11621_v26 = vld [vmem:[#allocation5 + $0x1b0] ss:$36 sps:$4 sm:$0xff]   ;;  %v11622_v27 = vld [vmem:[#allocation5 + $0x1b8] ss:$36 sps:$4 sm:$0xff]   ;;  %v11625_v29 = vld [vmem:[#allocation5 + $0x204] ss:$36 sps:$4 sm:$0xff]  }
  0x79   : > { %1670 = vmatpush1.bf16.msra.mxu0 %v11597_v10  ;;  %1896 = vmatpush1.bf16.msra.mxu1 %v11598_v11  ;;  %v11623_v28 = vld [vmem:[#allocation5 + $0x1fc] ss:$36 sps:$4 sm:$0xff]   ;;  %v11629_v32 = vld [vmem:[#allocation5 + $0x244] ss:$36 sps:$4 sm:$0xff]   ;;  %v11631_v33 = vld [vmem:[#allocation5 + $0x24c] ss:$36 sps:$4 sm:$0xff]  }
  0x7a   : > { %1671 = vmatprep.subr.bf16.mxu0 %v11599_v12  ;;  %1897 = vmatprep.subr.bf16.mxu1 %v11601_v13  ;;  %v11627_v30 = vld [vmem:[#allocation5 + $0x1f8] ss:$36 sps:$4 sm:$0xff]   ;;  %v11628_v31 = vld [vmem:[#allocation5 + $0x200] ss:$36 sps:$4 sm:$0xff]   ;;  %v11634_v35 = vld [vmem:[#allocation5 + $0x248] ss:$36 sps:$4 sm:$0xff]  }
  0x7b   : > { %v11633_v34 = vld [vmem:[#allocation5 + $0x240] ss:$36 sps:$4 sm:$0xff]   ;;  %v11635_v36 = vld [vmem:[#allocation5 + $0x28c] ss:$36 sps:$4 sm:$0xff]   ;;  %v11637_v37 = vld [vmem:[#allocation5 + $0x294] ss:$36 sps:$4 sm:$0xff]  }
  0x7c   : > { %v11639_v38 = vld [vmem:[#allocation5 + $0x288] ss:$36 sps:$4 sm:$0xff]   ;;  %v11640_v39 = vld [vmem:[#allocation5 + $0x290] ss:$36 sps:$4 sm:$0xff]   ;;  %v11643_v41 = vld [vmem:[#allocation5 + $0x2dc] ss:$36 sps:$4 sm:$0xff]  }
  0x7d   : > { %1672 = vmatpush1.bf16.msra.mxu0 %v11603_v14  ;;  %1898 = vmatpush1.bf16.msra.mxu1 %v11604_v15  ;;  %v11641_v40 = vld [vmem:[#allocation5 + $0x2d4] ss:$36 sps:$4 sm:$0xff]   ;;  %v11647_v44 = vld [vmem:[#allocation5 + $0x31c] ss:$36 sps:$4 sm:$0xff]   ;;  %v11649_v45 = vld [vmem:[#allocation5 + $0x324] ss:$36 sps:$4 sm:$0xff]  }
  0x7e   : > { %1673 = vmatprep.subr.bf16.mxu0 %v11605_v16  ;;  %1899 = vmatprep.subr.bf16.mxu1 %v11607_v17  ;;  %v11645_v42 = vld [vmem:[#allocation5 + $0x2d0] ss:$36 sps:$4 sm:$0xff]   ;;  %v11646_v43 = vld [vmem:[#allocation5 + $0x2d8] ss:$36 sps:$4 sm:$0xff]   ;;  %v250_v46 = vld [vmem:[%s12844_s13 + $0x8] sm:$0xff]  ;;  %vm2855_vm0 = vcmask 523264  }
  0x7f   : > { %v253_v47 = vld [vmem:[%s12844_s13 + $0x20] sm:$0xff]  ;;  %v11651_v48 = vld [vmem:[#allocation5 + $0x318] ss:$36 sps:$4 sm:$0xff]   ;;  %v11655_v52 = vld [vmem:[#allocation5 + $0x36c] ss:$36 sps:$4 sm:$0xff]   ;;  %s12637_s21 = smov 64  }
  0x80   : > { %v11652_v49 = vld [vmem:[#allocation5 + $0x320] ss:$36 sps:$4 sm:$0xff]   ;;  %v12856_v50 = vpack.c.bf16 %v253_v47, %v250_v46  ;;  %v11658_v54 = vld [vmem:[#allocation5 + $0x368] ss:$36 sps:$4 sm:$0xff]   ;;  %v11661_v56 = vld [vmem:[#allocation5 + $0x3b4] ss:$36 sps:$4 sm:$0xff]  }
  0x81   : > { %1674 = vmatpush1.bf16.msra.mxu0 %v11609_v18  ;;  %1900 = vmatpush1.bf16.msra.mxu1 %v11610_v19  ;;  %v11653_v51 = vld [vmem:[#allocation5 + $0x364] ss:$36 sps:$4 sm:$0xff]   ;;  %v11659_v55 = vld [vmem:[#allocation5 + $0x3ac] ss:$36 sps:$4 sm:$0xff]   ;;  %v11665_v59 = vld [vmem:[#allocation5 + $0x3f4] ss:$36 sps:$4 sm:$0xff]  }
  0x82   : > { %1675 = vmatprep.subr.bf16.mxu0 %v11611_v20  ;;  %1901 = vmatprep.subr.bf16.mxu1 %v11613_v21  ;;  %v11657_v53 = vld [vmem:[#allocation5 + $0x360] ss:$36 sps:$4 sm:$0xff]   ;;  %v11663_v57 = vld [vmem:[#allocation5 + $0x3a8] ss:$36 sps:$4 sm:$0xff]   ;;  %v11664_v58 = vld [vmem:[#allocation5 + $0x3b0] ss:$36 sps:$4 sm:$0xff]  }
  0x83   : > { %1697 = vmatprep.mubr.bf16.mxu0 %v12856_v50  ;;  %1923 = vmatprep.mubr.bf16.mxu1 %v12856_v50  ;;  %v11667_v60 = vld [vmem:[#allocation5 + $0x3fc] ss:$36 sps:$4 sm:$0xff]   ;;  %v11669_v61 = vld [vmem:[#allocation5 + $0x3f0] ss:$36 sps:$4 sm:$0xff]   ;;  %v11673_v0 = vld [vmem:[#allocation5 + $0x444] ss:$36 sps:$4 sm:$0xff]  }
  0x84   : > { %v11670_v62 = vld [vmem:[#allocation5 + $0x3f8] ss:$36 sps:$4 sm:$0xff]   ;;  %v11676_v2 = vld [vmem:[#allocation5 + $0x440] ss:$36 sps:$4 sm:$0xff]   ;;  %v259_v6 = vld [vmem:[%s12844_s13 + $0x50] sm:$0xff]  ;;  %s14119_s5 = scalar_lea.vmem [#allocation8], %s11502_s10 }
  0x85   : > { %1676 = vmatpush1.bf16.msra.mxu0 %v11615_v22  ;;  %1902 = vmatpush1.bf16.msra.mxu1 %v11616_v23  ;;  %v11671_v63 = vld [vmem:[#allocation5 + $0x43c] ss:$36 sps:$4 sm:$0xff]   ;;  %v11679_v7 = vld [vmem:[#allocation5 + $0x484] ss:$36 sps:$4 sm:$0xff]   ;;  %v11682_v8 = vld [vmem:[#allocation5 + $0x48c] ss:$36 sps:$4 sm:$0xff]  }
  0x86   : > { %1677 = vmatprep.subr.bf16.mxu0 %v11617_v24  ;;  %1903 = vmatprep.subr.bf16.mxu1 %v11619_v25  ;;  %v11675_v1 = vld [vmem:[#allocation5 + $0x438] ss:$36 sps:$4 sm:$0xff]   ;;  %v249_v3 = vld [vmem:[%s12844_s13] sm:$0xff]  ;;  %v11680_v12 = vld [vmem:[#allocation5 + $0x488] ss:$36 sps:$4 sm:$0xff]   ;;  %s11503_s25 = smul.u32 6144, %s12687_s19 }
  0x87   : > { %v252_v4 = vld [vmem:[%s12844_s13 + $0x18] sm:$0xff]  ;;  %v11677_v11 = vld [vmem:[#allocation5 + $0x480] ss:$36 sps:$4 sm:$0xff]   ;;  %v11685_v13 = vld [vmem:[#allocation5 + $0x4cc] ss:$36 sps:$4 sm:$0xff]   ;;  %s9416_s7 = sshll.u32 %s14119_s5, 4  ;;  %s14893_s7 = int_to_ptr.vmem [resolvable:$true] %s9416_s7 }
  0x88   : > { %v256_v5 = vld [vmem:[%s12844_s13 + $0x38] sm:$0xff]  ;;  %v12864_v9 = vpack.c.bf16 %v252_v4, %v249_v3  ;;  %v255_v15 = vld [vmem:[%s12844_s13 + $0x30] sm:$0xff]  ;;  %v258_v16 = vld [vmem:[%s12844_s13 + $0x48] sm:$0xff]  ;;  %s14891_s24 = scalar_lea.hbm %s14945_s4, %s11503_s25  ;;  %s9402_s19 = scalar_lea.sflag [#allocation4], %s12838_s9 }
  0x89   : > { %1678 = vmatpush1.bf16.msra.mxu0 %v11621_v26  ;;  %1904 = vmatpush1.bf16.msra.mxu1 %v11622_v27  ;;  %v12866_v10 = vpack.c.bf16 %v259_v6, %v256_v5  ;;  %v11688_v14 = vld [vmem:[#allocation5 + $0x4d4] ss:$36 sps:$4 sm:$0xff]   ;;  %v262_v17 = vld [vmem:[%s12844_s13 + $0x68] sm:$0xff]  ;;  %v265_v18 = vld [vmem:[%s12844_s13 + $0x80] sm:$0xff]  ;;  %v12876_v23 = vpack.c.bf16 %v258_v16, %v255_v15  ;;  %s12555_s29 = scalar_lea.vmem %s14893_s7, 6144  ;;  %p15102_p0 = scmp.ne.s32.totalorder %s14998_s20, 0 }
  0x8a   : > { %1679 = vmatprep.subr.bf16.mxu0 %v11623_v28  ;;  %1905 = vmatprep.subr.bf16.mxu1 %v11625_v29  ;;  %v11683_v19 = vld [vmem:[#allocation5 + $0x4c8] ss:$36 sps:$4 sm:$0xff]   ;;  %v11686_v20 = vld [vmem:[#allocation5 + $0x4d0] ss:$36 sps:$4 sm:$0xff]   ;;  %v11694_v22 = vld [vmem:[#allocation5 + $0x51c] ss:$36 sps:$4 sm:$0xff]   ;;  %v12878_v24 = vpack.c.bf16 %v265_v18, %v262_v17  ;;  %p12556_p11 = scmp.ne.s32.totalorder %s14893_s7, %s12555_s29 }
  0x8b   : > { %v11691_v21 = vld [vmem:[#allocation5 + $0x514] ss:$36 sps:$4 sm:$0xff]   ;;  %v261_v27 = vld [vmem:[%s12844_s13 + $0x60] sm:$0xff]  ;;  %v11707_v47 = vld [vmem:[#allocation5 + $0x5e8] ss:$36 sps:$4 sm:$0xff]   ;;  %s12638_s30 = smov [#allocation8]  }
  0x8c   : > { %v11689_v25 = vld [vmem:[#allocation5 + $0x510] ss:$36 sps:$4 sm:$0xff]   ;;  %v11692_v26 = vld [vmem:[#allocation5 + $0x518] ss:$36 sps:$4 sm:$0xff]   ;;  %v11700_v29 = vld [vmem:[#allocation5 + $0x564] ss:$36 sps:$4 sm:$0xff]   ;;  %p12557_p1 = pnand %p12556_p11, %p15102_p0 }
  0x8d   : > { %1680 = vmatpush1.bf16.msra.mxu0 %v11627_v30  ;;  %1906 = vmatpush1.bf16.msra.mxu1 %v11628_v31  ;;  %v11697_v28 = vld [vmem:[#allocation5 + $0x55c] ss:$36 sps:$4 sm:$0xff]   ;;  %v279_v3 = vld [vmem:[%s12844_s13 + $0xf0] sm:$0xff]  ;;  %v282_v4 = vld [vmem:[%s12844_s13 + $0x108] sm:$0xff]  ;;  %s12559_s6 = sshll.u32 %s12638_s30, 4  ;;  %s12560_s6 = int_to_ptr.vmem [resolvable:$false] %s12559_s6 }
  0x8e   : > { %1681 = vmatprep.subr.bf16.mxu0 %v11629_v32  ;;  %1907 = vmatprep.subr.bf16.mxu1 %v11631_v33  ;;  %v264_v30 = vld [vmem:[%s12844_s13 + $0x78] sm:$0xff]  ;;  %v271_v32 = vld [vmem:[%s12844_s13 + $0xb0] sm:$0xff]  ;;  %v277_v46 = vld [vmem:[%s12844_s13 + $0xe0] sm:$0xff]  ;;  %p12558_p3 = pneg %p12557_p1  ;;  %s12561_s8 = scalar_lea.vmem %s12560_s6, 12288 }
  0x8f   : > { %v268_v31 = vld [vmem:[%s12844_s13 + $0x98] sm:$0xff]  ;;  %v286_v5 = vld [vmem:[%s12844_s13 + $0x128] sm:$0xff]  ;;  %v289_v6 = vld [vmem:[%s12844_s13 + $0x140] sm:$0xff]  ;;  %p12562_p5 = scmp.lt.s32.totalorder %s14893_s7, %s12560_s6  ;;  %p12563_p9 = scmp.lt.s32.totalorder %s12561_s8, %s12555_s29 }
  0x90   : > { %v11695_v33 = vld [vmem:[#allocation5 + $0x558] ss:$36 sps:$4 sm:$0xff]   ;;  %v295_v15 = vld [vmem:[%s12844_s13 + $0x170] sm:$0xff] }
  0x91   : > { %1682 = vmatpush1.bf16.msra.mxu0 %v11633_v34  ;;  %1908 = vmatpush1.bf16.msra.mxu1 %v11634_v35  ;;  %v11698_v34 = vld [vmem:[#allocation5 + $0x560] ss:$36 sps:$4 sm:$0xff]   ;;  %v291_v18 = vld [vmem:[%s12844_s13 + $0x150] sm:$0xff]  ;;  %p12564_p12 = por %p12563_p9, %p12562_p5 }
  0x92   : > { %1683 = vmatprep.subr.bf16.mxu0 %v11635_v36  ;;  %1909 = vmatprep.subr.bf16.mxu1 %v11637_v37  ;;  %v11703_v35 = vld [vmem:[#allocation5 + $0x5a4] ss:$36 sps:$4 sm:$0xff]   ;;  %v11706_v36 = vld [vmem:[#allocation5 + $0x5ac] ss:$36 sps:$4 sm:$0xff]   ;;  %v12888_v37 = vpack.c.bf16 %v264_v30, %v261_v27  ;;  %v11725_v27 = vld [vmem:[#allocation5 + $0x18] ss:$36 sps:$4 sm:$0xff]  }
  0x93   : > { %v257_v30 = vld [vmem:[%s12844_s13 + $0x40] sm:$0xff]  ;;  %p12565_p2 = pnand %p12564_p12, %p12558_p3 }
  0x95   : > { %1684 = vmatpush1.bf16.msra.mxu0 %v11639_v38  ;;  %1910 = vmatpush1.bf16.msra.mxu1 %v11640_v39  ;;  %v12890_v38 = vpack.c.bf16 %v271_v32, %v268_v31  ;;  %v11701_v39 = vld [vmem:[#allocation5 + $0x5a0] ss:$36 sps:$4 sm:$0xff]   ;;  %v11773_v31 = vld [vmem:[#allocation5 + $0x10] ss:$36 sps:$4 sm:$0xff]   ;;  %v260_v32 = vld [vmem:[%s12844_s13 + $0x58] sm:$0xff] }
  0x96   : > { %1685 = vmatprep.subr.bf16.mxu0 %v11641_v40  ;;  %1911 = vmatprep.subr.bf16.mxu1 %v11643_v41  ;;  %v11704_v40 = vld [vmem:[#allocation5 + $0x5a8] ss:$36 sps:$4 sm:$0xff]  }
  0x97   : > { %v11709_v41 = vld [vmem:[#allocation5 + $0x5ec] ss:$36 sps:$4 sm:$0xff]  }
  0x99   : > { %1686 = vmatpush1.bf16.msra.mxu0 %v11645_v42  ;;  %1912 = vmatpush1.bf16.msra.mxu1 %v11646_v43  ;;  %v267_v42 = vld [vmem:[%s12844_s13 + $0x90] sm:$0xff] }
  0x9a   : > { %1687 = vmatprep.subr.bf16.mxu0 %v11647_v44  ;;  %1913 = vmatprep.subr.bf16.mxu1 %v11649_v45  ;;  %v11712_v43 = vld [vmem:[#allocation5 + $0x5f4] ss:$36 sps:$4 sm:$0xff]   ;;  %v270_v44 = vld [vmem:[%s12844_s13 + $0xa8] sm:$0xff] }
  0x9b   : > { %v274_v45 = vld [vmem:[%s12844_s13 + $0xc8] sm:$0xff] }
  0x9d   : > { %1688 = vmatpush1.bf16.msra.mxu0 %v11651_v48  ;;  %1914 = vmatpush1.bf16.msra.mxu1 %v11652_v49  ;;  %v11710_v48 = vld [vmem:[#allocation5 + $0x5f0] ss:$36 sps:$4 sm:$0xff]  }
  0x9e   : > { %1689 = vmatprep.subr.bf16.mxu0 %v11653_v51  ;;  %1915 = vmatprep.subr.bf16.mxu1 %v11655_v52  ;;  %v11715_v49 = vld [vmem:[#allocation5 + $0x634] ss:$36 sps:$4 sm:$0xff]   ;;  %v11718_v51 = vld [vmem:[#allocation5 + $0x63c] ss:$36 sps:$4 sm:$0xff]   ;;  %v12900_v52 = vpack.c.bf16 %v270_v44, %v267_v42  ;;  %v266_v44 = vld [vmem:[%s12844_s13 + $0x88] sm:$0xff] }
  0x9f   : > { %v11734_v42 = vld [vmem:[#allocation5 + $0xf0] ss:$36 sps:$4 sm:$0xff]  }
  0xa1   : > { %1690 = vmatpush1.bf16.msra.mxu0 %v11657_v53  ;;  %1916 = vmatpush1.bf16.msra.mxu1 %v11658_v54  ;;  %v12902_v53 = vpack.c.bf16 %v277_v46, %v274_v45  ;;  %v11713_v54 = vld [vmem:[#allocation5 + $0x630] ss:$36 sps:$4 sm:$0xff]   ;;  %v11781_v45 = vld [vmem:[#allocation5 + $0xa4] ss:$36 sps:$4 sm:$0xff]   ;;  %v11739_v46 = vld [vmem:[#allocation5 + $0x13c] ss:$36 sps:$4 sm:$0xff]  }
  0xa2   : > { %1691 = vmatprep.subr.bf16.mxu0 %v11659_v55  ;;  %1917 = vmatprep.subr.bf16.mxu1 %v11661_v56  ;;  %v11716_v55 = vld [vmem:[#allocation5 + $0x638] ss:$36 sps:$4 sm:$0xff]  }
  0xa3   : > { %v11721_v56 = vld [vmem:[#allocation5 + $0x67c] ss:$36 sps:$4 sm:$0xff]  }
  0xa5   : > { %1692 = vmatpush1.bf16.msra.mxu0 %v11663_v57  ;;  %1918 = vmatpush1.bf16.msra.mxu1 %v11664_v58  ;;  %v273_v57 = vld [vmem:[%s12844_s13 + $0xc0] sm:$0xff] }
  0xa6   : > { %1693 = vmatprep.subr.bf16.mxu0 %v11665_v59  ;;  %1919 = vmatprep.subr.bf16.mxu1 %v11667_v60  ;;  %v11724_v58 = vld [vmem:[#allocation5 + $0x684] ss:$36 sps:$4 sm:$0xff]   ;;  %v276_v59 = vld [vmem:[%s12844_s13 + $0xd8] sm:$0xff] }
  0xa7   : > { %v280_v60 = vld [vmem:[%s12844_s13 + $0xf8] sm:$0xff] }
  0xa9   : > { %1694 = vmatpush1.bf16.msra.mxu0 %v11669_v61  ;;  %1920 = vmatpush1.bf16.msra.mxu1 %v11670_v62  ;;  %v283_v61 = vld [vmem:[%s12844_s13 + $0x110] sm:$0xff]  ;;  %v11719_v62 = vld [vmem:[#allocation5 + $0x678] ss:$36 sps:$4 sm:$0xff]  }
  0xaa   : > { %1695 = vmatprep.subr.bf16.mxu0 %v11671_v63  ;;  %1921 = vmatprep.subr.bf16.mxu1 %v11673_v0  ;;  %v11722_v63 = vld [vmem:[#allocation5 + $0x680] ss:$36 sps:$4 sm:$0xff]  }
  0xab   : > { %v11727_v0 = vld [vmem:[#allocation5 + $0x1c] ss:$36 sps:$4 sm:$0xff]  }
  0xad   : > { %1696 = vmatpush1.bf16.msra.mxu0 %v11675_v1  ;;  %1922 = vmatpush1.bf16.msra.mxu1 %v11676_v2  ;;  %v12912_v1 = vpack.c.bf16 %v276_v59, %v273_v57  ;;  %v12914_v2 = vpack.c.bf16 %v283_v61, %v280_v60  ;;  %v11782_v57 = vld [vmem:[#allocation5 + $0xe8] ss:$36 sps:$4 sm:$0xff]   ;;  %v11787_v59 = vld [vmem:[#allocation5 + $0x134] ss:$36 sps:$4 sm:$0xff]  }
  0xae   : > { %1778 = vmatprep.subr.bf16.mxu0 %v11679_v7  ;;  %2004 = vmatprep.subr.bf16.mxu1 %v11682_v8  ;;  %v11775_v7 = vld [vmem:[#allocation5 + $0x14] ss:$36 sps:$4 sm:$0xff]   ;;  %v12924_v8 = vpack.c.bf16 %v282_v4, %v279_v3  ;;  %v11743_v60 = vld [vmem:[#allocation5 + $0x1c8] ss:$36 sps:$4 sm:$0xff]  }
  0xaf   : > { %v11785_v61 = vld [vmem:[#allocation5 + $0x130] ss:$36 sps:$4 sm:$0xff]  }
  0xb0   : > { %1698 = vmatmul.mubr.bf16.vlgmr.msra.gmra.mrb[0].mxu0 %v12864_v9  ;;  %1924 = vmatmul.mubr.bf16.vlgmr.msra.gmra.mrb[0].mxu1 %v12864_v9  ;;  %v11746_v3 = vld [vmem:[#allocation5 + $0x210] ss:$36 sps:$4 sm:$0xff]  }
  0xb1   : > { %1707 = vmatprep.mubr.bf16.mxu0 %v12866_v10  ;;  %1933 = vmatprep.mubr.bf16.mxu1 %v12866_v10  ;;  %v275_v4 = vld [vmem:[%s12844_s13 + $0xd0] sm:$0xff] }
  0xb2   : > { %1779 = vmatpush1.bf16.msra.mxu0 %v11677_v11  ;;  %2005 = vmatpush1.bf16.msra.mxu1 %v11680_v12  ;;  %v12926_v11 = vpack.c.bf16 %v289_v6, %v286_v5  ;;  %v285_v12 = vld [vmem:[%s12844_s13 + $0x120] sm:$0xff]  ;;  %v278_v5 = vld [vmem:[%s12844_s13 + $0xe8] sm:$0xff] }
  0xb3   : > { %1780 = vmatprep.subr.bf16.mxu0 %v11685_v13  ;;  %2006 = vmatprep.subr.bf16.mxu1 %v11688_v14  ;;  %v288_v13 = vld [vmem:[%s12844_s13 + $0x138] sm:$0xff] }
  0xb4   : > { %v292_v14 = vld [vmem:[%s12844_s13 + $0x158] sm:$0xff]  ;;  %v12936_v16 = vpack.c.bf16 %v288_v13, %v285_v12  ;;  %v11793_v12 = vld [vmem:[#allocation5 + $0x1c4] ss:$36 sps:$4 sm:$0xff]   ;;  %v12986_v13 = vpack.c.bf16 %v278_v5, %v275_v4  ;;  %v11824_v4 = vld [vmem:[#allocation5 + $0x370] ss:$36 sps:$4 sm:$0xff]  }
  0xb5   : > { %v12938_v17 = vpack.c.bf16 %v295_v15, %v292_v14  ;;  %v11790_v6 = vld [vmem:[#allocation5 + $0x17c] ss:$36 sps:$4 sm:$0xff]   ;;  %v11754_v15 = vld [vmem:[#allocation5 + $0x2a4] ss:$36 sps:$4 sm:$0xff]  }
  0xb6   : > { %1781 = vmatpush1.bf16.msra.mxu0 %v11683_v19  ;;  %2007 = vmatpush1.bf16.msra.mxu1 %v11686_v20  ;;  %v294_v19 = vld [vmem:[%s12844_s13 + $0x168] sm:$0xff]  ;;  %v11749_v14 = vld [vmem:[#allocation5 + $0x258] ss:$36 sps:$4 sm:$0xff]  }
  0xb7   : > { %1782 = vmatprep.subr.bf16.mxu0 %v11691_v21  ;;  %2008 = vmatprep.subr.bf16.mxu1 %v11694_v22  ;;  %v12946_v20 = vpack.c.bf16 %v294_v19, %v291_v18  ;;  %v251_v21 = vld [vmem:[%s12844_s13 + $0x10] sm:$0xff]  ;;  %v14949_v22 = vmov 0   ;;  %v11752_v18 = vld [vmem:[#allocation5 + $0x2a0] ss:$36 sps:$4 sm:$0xff]  }
  0xb8   : > { %1708 = vmatmul.mubr.bf16.gmra.mrb[4].mxu0 %v12876_v23  ;;  %1934 = vmatmul.mubr.bf16.gmra.mrb[4].mxu1 %v12876_v23  ;;  %v281_v19 = vld [vmem:[%s12844_s13 + $0x100] sm:$0xff] }
  0xb9   : > { %1717 = vmatprep.mubr.bf16.mxu0 %v12878_v24  ;;  %1943 = vmatprep.mubr.bf16.mxu1 %v12878_v24  ;;  %v11832_v5 = vld [vmem:[#allocation5 + $0x3bc] ss:$36 sps:$4 sm:$0xff]  }
  0xba   : > { %1783 = vmatpush1.bf16.msra.mxu0 %v11689_v25  ;;  %2009 = vmatpush1.bf16.msra.mxu1 %v11692_v26  ;;  %v254_v25 = vld [vmem:[%s12844_s13 + $0x28] sm:$0xff] }
  0xbb   : > { %1784 = vmatprep.subr.bf16.mxu0 %v11697_v28  ;;  %2010 = vmatprep.subr.bf16.mxu1 %v11700_v29  ;;  %v12954_v26 = vpack.c.bf16 %v254_v25, %v251_v21  ;;  %v11730_v28 = vld [vmem:[#allocation5 + $0x64] ss:$36 sps:$4 sm:$0xff]   ;;  %v284_v21 = vld [vmem:[%s12844_s13 + $0x118] sm:$0xff] }
  0xbc   : > { %v11728_v29 = vld [vmem:[#allocation5 + $0x60] ss:$36 sps:$4 sm:$0xff]  }
  0xbd   : > { %v11791_v25 = vld [vmem:[#allocation5 + $0x1c0] ss:$36 sps:$4 sm:$0xff]  }
  0xbe   : > { %1785 = vmatpush1.bf16.msra.mxu0 %v11695_v33  ;;  %2011 = vmatpush1.bf16.msra.mxu1 %v11698_v34  ;;  %v11778_v33 = vld [vmem:[#allocation5 + $0x5c] ss:$36 sps:$4 sm:$0xff]   ;;  %v11733_v34 = vld [vmem:[#allocation5 + $0xac] ss:$36 sps:$4 sm:$0xff]  }
  0xbf   : > { %1786 = vmatprep.subr.bf16.mxu0 %v11703_v35  ;;  %2012 = vmatprep.subr.bf16.mxu1 %v11706_v36  ;;  %v11776_v35 = vld [vmem:[#allocation5 + $0x58] ss:$36 sps:$4 sm:$0xff]   ;;  %v11731_v36 = vld [vmem:[#allocation5 + $0xa8] ss:$36 sps:$4 sm:$0xff]  }
  0xc0   : > { %1718 = vmatmul.mubr.bf16.gmra.mrb[8].mxu0 %v12888_v37  ;;  %1944 = vmatmul.mubr.bf16.gmra.mrb[8].mxu1 %v12888_v37 }
  0xc1   : > { %1727 = vmatprep.mubr.bf16.mxu0 %v12890_v38  ;;  %1953 = vmatprep.mubr.bf16.mxu1 %v12890_v38 }
  0xc2   : > { %1787 = vmatpush1.bf16.msra.mxu0 %v11701_v39  ;;  %2013 = vmatpush1.bf16.msra.mxu1 %v11704_v40  ;;  %v12962_v39 = vpack.c.bf16 %v260_v32, %v257_v30  ;;  %v11736_v40 = vld [vmem:[#allocation5 + $0xf4] ss:$36 sps:$4 sm:$0xff]   ;;  %v11794_v30 = vld [vmem:[#allocation5 + $0x208] ss:$36 sps:$4 sm:$0xff]  }
  0xc3   : > { %1788 = vmatprep.subr.bf16.mxu0 %v11709_v41  ;;  %2014 = vmatprep.subr.bf16.mxu1 %v11712_v43  ;;  %v11779_v41 = vld [vmem:[#allocation5 + $0xa0] ss:$36 sps:$4 sm:$0xff]   ;;  %v263_v43 = vld [vmem:[%s12844_s13 + $0x70] sm:$0xff] }
  0xc4   : > { %v11760_v32 = vld [vmem:[#allocation5 + $0x334] ss:$36 sps:$4 sm:$0xff]  }
  0xc6   : > { %1789 = vmatpush1.bf16.msra.mxu0 %v11707_v47  ;;  %2015 = vmatpush1.bf16.msra.mxu1 %v11710_v48  ;;  %v11784_v47 = vld [vmem:[#allocation5 + $0xec] ss:$36 sps:$4 sm:$0xff]   ;;  %v11737_v48 = vld [vmem:[#allocation5 + $0x138] ss:$36 sps:$4 sm:$0xff]  }
  0xc7   : > { %1790 = vmatprep.subr.bf16.mxu0 %v11715_v49  ;;  %2016 = vmatprep.subr.bf16.mxu1 %v11718_v51  ;;  %v12970_v49 = vpack.c.bf16 %v266_v44, %v263_v43  ;;  %v11742_v51 = vld [vmem:[#allocation5 + $0x184] ss:$36 sps:$4 sm:$0xff]   ;;  %v11761_v43 = vld [vmem:[#allocation5 + $0x378] ss:$36 sps:$4 sm:$0xff]  }
  0xc8   : > { %1728 = vmatmul.mubr.bf16.gmra.mrb[12].mxu0 %v12900_v52  ;;  %1954 = vmatmul.mubr.bf16.gmra.mrb[12].mxu1 %v12900_v52 }
  0xc9   : > { %1737 = vmatprep.mubr.bf16.mxu0 %v12902_v53  ;;  %1963 = vmatprep.mubr.bf16.mxu1 %v12902_v53 }
  0xca   : > { %1791 = vmatpush1.bf16.msra.mxu0 %v11713_v54  ;;  %2017 = vmatpush1.bf16.msra.mxu1 %v11716_v55  ;;  %v11740_v54 = vld [vmem:[#allocation5 + $0x180] ss:$36 sps:$4 sm:$0xff]  }
  0xcb   : > { %1792 = vmatprep.subr.bf16.mxu0 %v11721_v56  ;;  %2018 = vmatprep.subr.bf16.mxu1 %v11724_v58  ;;  %v269_v55 = vld [vmem:[%s12844_s13 + $0xa0] sm:$0xff]  ;;  %v272_v56 = vld [vmem:[%s12844_s13 + $0xb8] sm:$0xff]  ;;  %v11745_v58 = vld [vmem:[#allocation5 + $0x1cc] ss:$36 sps:$4 sm:$0xff]  }
  0xce   : > { %1793 = vmatpush1.bf16.msra.mxu0 %v11719_v62  ;;  %2019 = vmatpush1.bf16.msra.mxu1 %v11722_v63  ;;  %v12978_v62 = vpack.c.bf16 %v272_v56, %v269_v55  ;;  %v11748_v63 = vld [vmem:[#allocation5 + $0x214] ss:$36 sps:$4 sm:$0xff]   ;;  %v11814_v55 = vld [vmem:[#allocation5 + $0x2e4] ss:$36 sps:$4 sm:$0xff]  }
  0xcf   : > { %2343 = vmatprep.subr.bf16.mxu1 %v11727_v0  ;;  %2117 = vmatprep.subr.bf16.mxu0 %v11775_v7  ;;  %v11788_v0 = vld [vmem:[#allocation5 + $0x178] ss:$36 sps:$4 sm:$0xff]   ;;  %v11812_v56 = vld [vmem:[#allocation5 + $0x2e0] ss:$36 sps:$4 sm:$0xff]  }
  0xd0   : > { %1738 = vmatmul.mubr.bf16.gmra.mrb[16].mxu0 %v12912_v1  ;;  %1964 = vmatmul.mubr.bf16.gmra.mrb[16].mxu1 %v12912_v1  ;;  %v11751_v7 = vld [vmem:[#allocation5 + $0x25c] ss:$36 sps:$4 sm:$0xff]  }
  0xd1   : > { %1747 = vmatprep.mubr.bf16.mxu0 %v12914_v2  ;;  %1973 = vmatprep.mubr.bf16.mxu1 %v12914_v2 }
  0xd8   : > { %1748 = vmatmul.mubr.bf16.gmra.mrb[20].mxu0 %v12924_v8  ;;  %1974 = vmatmul.mubr.bf16.gmra.mrb[20].mxu1 %v12924_v8 }
  0xd9   : > { %1757 = vmatprep.mubr.bf16.mxu0 %v12926_v11  ;;  %1983 = vmatprep.mubr.bf16.mxu1 %v12926_v11 }
  0xe0   : > { %1758 = vmatmul.mubr.bf16.gmra.mrb[24].mxu0 %v12936_v16  ;;  %1984 = vmatmul.mubr.bf16.gmra.mrb[24].mxu1 %v12936_v16 }
  0xe1   : > { %1767 = vmatprep.mubr.bf16.mxu0 %v12938_v17  ;;  %1993 = vmatprep.mubr.bf16.mxu1 %v12938_v17 }
  0xe8   : > { %1768 = vmatmul.mubr.bf16.gmra.mrb[28].mxu0 %v12946_v20  ;;  %1994 = vmatmul.mubr.bf16.gmra.mrb[28].mxu1 %v12946_v20 }
  0xe9   : > { %1810 = vmatprep.mubr.bf16.mxu0 %v14949_v22  ;;  %2036 = vmatprep.mubr.bf16.mxu1 %v14949_v22 }
  0xf0   : > { %1811 = vmatmul.mubr.bf16.vlgmr.msra.gmra.mrb[0].mxu0 %v12954_v26  ;;  %2037 = vmatmul.mubr.bf16.vlgmr.msra.gmra.mrb[0].mxu1 %v12954_v26 }
  0xf1   : > { %2344 = vmatpush1.bf16.msra.mxu1 %v11725_v27  ;;  %1820 = vmatprep.mubr.bf16.mxu0 %v14949_v22  ;;  %v11757_v27 = vld [vmem:[#allocation5 + $0x2ec] ss:$36 sps:$4 sm:$0xff]  }
  0xf2   : > { %2345 = vmatprep.subr.bf16.mxu1 %v11730_v28  ;;  %2046 = vmatprep.mubr.bf16.mxu1 %v14949_v22  ;;  %v11796_v28 = vld [vmem:[#allocation5 + $0x20c] ss:$36 sps:$4 sm:$0xff]  }
  0xf3   : > { %2118 = vmatpush1.bf16.msra.mxu0 %v11773_v31  ;;  %v12994_v31 = vpack.c.bf16 %v284_v21, %v281_v19  ;;  %v11836_v19 = vld [vmem:[#allocation5 + $0x400] ss:$36 sps:$4 sm:$0xff]   ;;  %v11844_v21 = vld [vmem:[#allocation5 + $0x44c] ss:$36 sps:$4 sm:$0xff]  }
  0xf4   : > { %2119 = vmatprep.subr.bf16.mxu0 %v11778_v33  ;;  %v11800_v33 = vld [vmem:[#allocation5 + $0x250] ss:$36 sps:$4 sm:$0xff]  }
  0xf5   : > { %2346 = vmatpush1.bf16.msra.mxu1 %v11728_v29  ;;  %v11755_v29 = vld [vmem:[#allocation5 + $0x2e8] ss:$36 sps:$4 sm:$0xff]  }
  0xf6   : > { %2347 = vmatprep.subr.bf16.mxu1 %v11733_v34  ;;  %v11802_v34 = vld [vmem:[#allocation5 + $0x254] ss:$36 sps:$4 sm:$0xff]  }
  0xf7   : > { %2120 = vmatpush1.bf16.msra.mxu0 %v11776_v35  ;;  %v11758_v35 = vld [vmem:[#allocation5 + $0x330] ss:$36 sps:$4 sm:$0xff]  }
  0xf8   : > { %1821 = vmatmul.mubr.bf16.gmra.mrb[4].mxu0 %v12962_v39  ;;  %2047 = vmatmul.mubr.bf16.gmra.mrb[4].mxu1 %v12962_v39 }
  0xf9   : > { %2348 = vmatpush1.bf16.msra.mxu1 %v11731_v36  ;;  %1830 = vmatprep.mubr.bf16.mxu0 %v14949_v22  ;;  %v287_v36 = vld [vmem:[%s12844_s13 + $0x130] sm:$0xff] }
  0xfa   : > { %2349 = vmatprep.subr.bf16.mxu1 %v11736_v40  ;;  %2056 = vmatprep.mubr.bf16.mxu1 %v14949_v22  ;;  %v290_v40 = vld [vmem:[%s12844_s13 + $0x148] sm:$0xff] }
  0xfb   : > { %2121 = vmatprep.subr.bf16.mxu0 %v11781_v45  ;;  %v13002_v44 = vpack.c.bf16 %v290_v40, %v287_v36  ;;  %v11766_v45 = vld [vmem:[#allocation5 + $0x3c4] ss:$36 sps:$4 sm:$0xff]   ;;  %v11850_v40 = vld [vmem:[#allocation5 + $0x4d8] ss:$36 sps:$4 sm:$0xff]  }
  0xfc   : > { %2122 = vmatpush1.bf16.msra.mxu0 %v11779_v41  ;;  %v11763_v41 = vld [vmem:[#allocation5 + $0x37c] ss:$36 sps:$4 sm:$0xff]   ;;  %v11829_v36 = vld [vmem:[#allocation5 + $0x604] ss:$36 sps:$4 sm:$0xff]  }
  0xfd   : > { %2350 = vmatpush1.bf16.msra.mxu1 %v11734_v42  ;;  %2123 = vmatprep.subr.bf16.mxu0 %v11784_v47  ;;  %v11808_v42 = vld [vmem:[#allocation5 + $0x29c] ss:$36 sps:$4 sm:$0xff]  }
  0xfe   : > { %2351 = vmatprep.subr.bf16.mxu1 %v11739_v46  ;;  %v11806_v46 = vld [vmem:[#allocation5 + $0x298] ss:$36 sps:$4 sm:$0xff]   ;;  %v11764_v47 = vld [vmem:[#allocation5 + $0x3c0] ss:$36 sps:$4 sm:$0xff]  }
 0x100   : > { %1831 = vmatmul.mubr.bf16.gmra.mrb[8].mxu0 %v12970_v49  ;;  %2057 = vmatmul.mubr.bf16.gmra.mrb[8].mxu1 %v12970_v49 }
 0x101   : > { %2352 = vmatpush1.bf16.msra.mxu1 %v11737_v48  ;;  %1840 = vmatprep.mubr.bf16.mxu0 %v14949_v22  ;;  %v293_v48 = vld [vmem:[%s12844_s13 + $0x160] sm:$0xff] }
 0x102   : > { %2353 = vmatprep.subr.bf16.mxu1 %v11742_v51  ;;  %2066 = vmatprep.mubr.bf16.mxu1 %v14949_v22  ;;  %v296_v51 = vld [vmem:[%s12844_s13 + $0x178] sm:$0xff] }
 0x103   : > { %2124 = vmatpush1.bf16.msra.mxu0 %v11782_v57  ;;  %v11767_v57 = vld [vmem:[#allocation5 + $0x408] ss:$36 sps:$4 sm:$0xff]  }
 0x104   : > { %2125 = vmatprep.subr.bf16.mxu0 %v11787_v59  ;;  %v11772_v59 = vld [vmem:[#allocation5 + $0x454] ss:$36 sps:$4 sm:$0xff]  }
 0x105   : > { %2354 = vmatpush1.bf16.msra.mxu1 %v11740_v54  ;;  %v11769_v54 = vld [vmem:[#allocation5 + $0x40c] ss:$36 sps:$4 sm:$0xff]  }
 0x106   : > { %2355 = vmatprep.subr.bf16.mxu1 %v11745_v58  ;;  %v13010_v58 = vpack.c.bf16 %v296_v51, %v293_v48  ;;  %v11841_v48 = vld [vmem:[#allocation5 + $0x694] ss:$36 sps:$4 sm:$0xff]   ;;  %v11858_v51 = vld [vmem:[#allocation5 + $0x568] ss:$36 sps:$4 sm:$0xff]  }
 0x107   : > { %2126 = vmatpush1.bf16.msra.mxu0 %v11785_v61  ;;  %v11820_v61 = vld [vmem:[#allocation5 + $0x32c] ss:$36 sps:$4 sm:$0xff]  }
 0x108   : > { %1841 = vmatmul.mubr.bf16.gmra.mrb[12].mxu0 %v12978_v62  ;;  %2067 = vmatmul.mubr.bf16.gmra.mrb[12].mxu1 %v12978_v62 }
 0x109   : > { %2356 = vmatpush1.bf16.msra.mxu1 %v11743_v60  ;;  %1850 = vmatprep.mubr.bf16.mxu0 %v14949_v22  ;;  %v11818_v60 = vld [vmem:[#allocation5 + $0x328] ss:$36 sps:$4 sm:$0xff]  }
 0x10a   : > { %2357 = vmatprep.subr.bf16.mxu1 %v11748_v63  ;;  %2076 = vmatprep.mubr.bf16.mxu1 %v14949_v22  ;;  %v11770_v63 = vld [vmem:[#allocation5 + $0x450] ss:$36 sps:$4 sm:$0xff]  }
 0x10b   : > { %2127 = vmatprep.subr.bf16.mxu0 %v11790_v6  ;;  %v11797_v6 = vld [vmem:[#allocation5 + $0x498] ss:$36 sps:$4 sm:$0xff]  }
 0x10c   : > { %2128 = vmatpush1.bf16.msra.mxu0 %v11788_v0  ;;  %v11799_v0 = vld [vmem:[#allocation5 + $0x49c] ss:$36 sps:$4 sm:$0xff]  }
 0x10d   : > { %2358 = vmatpush1.bf16.msra.mxu1 %v11746_v3  ;;  %2129 = vmatprep.subr.bf16.mxu0 %v11793_v12  ;;  %v11826_v3 = vld [vmem:[#allocation5 + $0x374] ss:$36 sps:$4 sm:$0xff]  }
 0x10e   : > { %2359 = vmatprep.subr.bf16.mxu1 %v11751_v7  ;;  %v11805_v7 = vld [vmem:[#allocation5 + $0x4e4] ss:$36 sps:$4 sm:$0xff]   ;;  %v11830_v12 = vld [vmem:[#allocation5 + $0x3b8] ss:$36 sps:$4 sm:$0xff]  }
 0x110   : > { %1851 = vmatmul.mubr.bf16.gmra.mrb[16].mxu0 %v12986_v13  ;;  %2077 = vmatmul.mubr.bf16.gmra.mrb[16].mxu1 %v12986_v13 }
 0x111   : > { %2360 = vmatpush1.bf16.msra.mxu1 %v11749_v14  ;;  %1860 = vmatprep.mubr.bf16.mxu0 %v14949_v22  ;;  %v11838_v14 = vld [vmem:[#allocation5 + $0x404] ss:$36 sps:$4 sm:$0xff]  }
 0x112   : > { %2361 = vmatprep.subr.bf16.mxu1 %v11754_v15  ;;  %2086 = vmatprep.mubr.bf16.mxu1 %v14949_v22  ;;  %v11803_v15 = vld [vmem:[#allocation5 + $0x4e0] ss:$36 sps:$4 sm:$0xff]  }
 0x113   : > { %2130 = vmatpush1.bf16.msra.mxu0 %v11791_v25  ;;  %v11809_v25 = vld [vmem:[#allocation5 + $0x528] ss:$36 sps:$4 sm:$0xff]  }
 0x114   : > { %2131 = vmatprep.subr.bf16.mxu0 %v11796_v28  ;;  %v11842_v28 = vld [vmem:[#allocation5 + $0x448] ss:$36 sps:$4 sm:$0xff]  }
 0x115   : > { %2362 = vmatpush1.bf16.msra.mxu1 %v11752_v18  ;;  %v11811_v18 = vld [vmem:[#allocation5 + $0x52c] ss:$36 sps:$4 sm:$0xff]  }
 0x116   : > { %2363 = vmatprep.subr.bf16.mxu1 %v11757_v27  ;;  %v11817_v27 = vld [vmem:[#allocation5 + $0x574] ss:$36 sps:$4 sm:$0xff]  }
 0x117   : > { %2132 = vmatpush1.bf16.msra.mxu0 %v11794_v30  ;;  %v11815_v30 = vld [vmem:[#allocation5 + $0x570] ss:$36 sps:$4 sm:$0xff]  }
 0x118   : > { %1861 = vmatmul.mubr.bf16.gmra.mrb[20].mxu0 %v12994_v31  ;;  %2087 = vmatmul.mubr.bf16.gmra.mrb[20].mxu1 %v12994_v31 }
 0x119   : > { %2364 = vmatpush1.bf16.msra.mxu1 %v11755_v29  ;;  %1870 = vmatprep.mubr.bf16.mxu0 %v14949_v22  ;;  %v11848_v29 = vld [vmem:[#allocation5 + $0x494] ss:$36 sps:$4 sm:$0xff]  }
 0x11a   : > { %2365 = vmatprep.subr.bf16.mxu1 %v11760_v32  ;;  %2096 = vmatprep.mubr.bf16.mxu1 %v14949_v22  ;;  %v11823_v32 = vld [vmem:[#allocation5 + $0x5bc] ss:$36 sps:$4 sm:$0xff]  }
 0x11b   : > { %2133 = vmatprep.subr.bf16.mxu0 %v11802_v34  ;;  %v11852_v34 = vld [vmem:[#allocation5 + $0x4dc] ss:$36 sps:$4 sm:$0xff]  }
 0x11c   : > { %2134 = vmatpush1.bf16.msra.mxu0 %v11800_v33  ;;  %v11846_v33 = vld [vmem:[#allocation5 + $0x490] ss:$36 sps:$4 sm:$0xff]  }
 0x11d   : > { %2366 = vmatpush1.bf16.msra.mxu1 %v11758_v35  ;;  %2135 = vmatprep.subr.bf16.mxu0 %v11808_v42  ;;  %v11821_v35 = vld [vmem:[#allocation5 + $0x5b8] ss:$36 sps:$4 sm:$0xff]   ;;  %v11827_v42 = vld [vmem:[#allocation5 + $0x600] ss:$36 sps:$4 sm:$0xff]  }
 0x11e   : > { %2367 = vmatprep.subr.bf16.mxu1 %v11763_v41  ;;  %v11856_v41 = vld [vmem:[#allocation5 + $0x524] ss:$36 sps:$4 sm:$0xff]  }
 0x120   : > { %1871 = vmatmul.mubr.bf16.gmra.mrb[24].mxu0 %v13002_v44  ;;  %2097 = vmatmul.mubr.bf16.gmra.mrb[24].mxu1 %v13002_v44 }
 0x121   : > { %2368 = vmatpush1.bf16.msra.mxu1 %v11761_v43  ;;  %1880 = vmatprep.mubr.bf16.mxu0 %v14949_v22  ;;  %v11835_v43 = vld [vmem:[#allocation5 + $0x64c] ss:$36 sps:$4 sm:$0xff]  }
 0x122   : > { %2369 = vmatprep.subr.bf16.mxu1 %v11766_v45  ;;  %2106 = vmatprep.mubr.bf16.mxu1 %v14949_v22  ;;  %v11854_v45 = vld [vmem:[#allocation5 + $0x520] ss:$36 sps:$4 sm:$0xff]  }
 0x123   : > { %2136 = vmatpush1.bf16.msra.mxu0 %v11806_v46  ;;  %v11860_v46 = vld [vmem:[#allocation5 + $0x56c] ss:$36 sps:$4 sm:$0xff]  }
 0x124   : > { %2137 = vmatprep.subr.bf16.mxu0 %v11814_v55  ;;  %v11839_v55 = vld [vmem:[#allocation5 + $0x690] ss:$36 sps:$4 sm:$0xff]  }
 0x125   : > { %2370 = vmatpush1.bf16.msra.mxu1 %v11764_v47  ;;  %v11833_v47 = vld [vmem:[#allocation5 + $0x648] ss:$36 sps:$4 sm:$0xff]  }
 0x126   : > { %2371 = vmatprep.subr.bf16.mxu1 %v11769_v54  ;;  %v11864_v54 = vld [vmem:[#allocation5 + $0x5b4] ss:$36 sps:$4 sm:$0xff]  }
 0x127   : > { %2138 = vmatpush1.bf16.msra.mxu0 %v11812_v56  ;;  %v11845_v56 = vld [vmem:[#allocation5 + $0x4a0] ss:$36 sps:$4 sm:$0xff]  }
 0x128   : > { %1881 = vmatmul.mubr.bf16.gmra.mrb[28].mxu0 %v13010_v58  ;;  %2107 = vmatmul.mubr.bf16.gmra.mrb[28].mxu1 %v13010_v58 }
 0x129   : > { %2372 = vmatpush1.bf16.msra.mxu1 %v11767_v57  ;;  %2375 = vmatprep.mubr.bf16.mxu1 %v12856_v50  ;;  %v11862_v57 = vld [vmem:[#allocation5 + $0x5b0] ss:$36 sps:$4 sm:$0xff]  }
 0x12a   : > { %2373 = vmatprep.subr.bf16.mxu1 %v11772_v59  ;;  %2139 = vmatprep.subr.bf16.mxu0 %v11820_v61  ;;  %v11868_v59 = vld [vmem:[#allocation5 + $0x5fc] ss:$36 sps:$4 sm:$0xff]   ;;  %v11872_v61 = vld [vmem:[#allocation5 + $0x644] ss:$36 sps:$4 sm:$0xff]  }
 0x12b   : > { %2140 = vmatpush1.bf16.msra.mxu0 %v11818_v60  ;;  %2149 = vmatprep.mubr.bf16.mxu0 %v12856_v50  ;;  %v11866_v60 = vld [vmem:[#allocation5 + $0x5f8] ss:$36 sps:$4 sm:$0xff]  }
 0x12c   : > { %2141 = vmatprep.subr.bf16.mxu0 %v11826_v3  ;;  %v11874_v3 = vld [vmem:[#allocation5 + $0x688] ss:$36 sps:$4 sm:$0xff]  }
 0x12d   : > { %2374 = vmatpush1.bf16.msra.mxu1 %v11770_v63  ;;  %v11870_v63 = vld [vmem:[#allocation5 + $0x640] ss:$36 sps:$4 sm:$0xff]  }
 0x12e   : > { %2456 = vmatprep.subr.bf16.mxu1 %v11799_v0  ;;  %v11876_v0 = vld [vmem:[#allocation5 + $0x68c] ss:$36 sps:$4 sm:$0xff]  }
 0x12f   : > { %2142 = vmatpush1.bf16.msra.mxu0 %v11824_v4  ;;  %v11877_v4 = vld [vmem:[#allocation5 + $0x260] ss:$36 sps:$4 sm:$0xff]  }
 0x130   : > { %2376 = vmatmul.mubr.bf16.vlgmr.msra.gmra.mrb[32].mxu1 %v12864_v9  ;;  %2143 = vmatprep.subr.bf16.mxu0 %v11832_v5  ;;  %v11849_v5 = vld [vmem:[#allocation5 + $0x4e8] ss:$36 sps:$4 sm:$0xff]  }
 0x131   : > { %2385 = vmatprep.mubr.bf16.mxu1 %v12866_v10  ;;  %2457 = vmatpush1.bf16.msra.mxu1 %v11797_v6  ;;  %v11853_v6 = vld [vmem:[#allocation5 + $0x530] ss:$36 sps:$4 sm:$0xff]  }
 0x132   : > { %2458 = vmatprep.subr.bf16.mxu1 %v11805_v7  ;;  %v11857_v7 = vld [vmem:[#allocation5 + $0x578] ss:$36 sps:$4 sm:$0xff]  }
 0x133   : > { %2144 = vmatpush1.bf16.msra.mxu0 %v11830_v12  ;;  %v11861_v12 = vld [vmem:[#allocation5 + $0x5c0] ss:$36 sps:$4 sm:$0xff]  }
 0x134   : > { %2145 = vmatprep.subr.bf16.mxu0 %v11838_v14  ;;  %v11878_v14 = vld [vmem:[#allocation5 + $0x20] ss:$36 sps:$4 sm:$0xff]  }
 0x135   : > { %2459 = vmatpush1.bf16.msra.mxu1 %v11803_v15  ;;  %v11879_v15 = vld [vmem:[#allocation5 + $0x2a8] ss:$36 sps:$4 sm:$0xff]  }
 0x136   : > { %2460 = vmatprep.subr.bf16.mxu1 %v11811_v18  ;;  %v11865_v18 = vld [vmem:[#allocation5 + $0x608] ss:$36 sps:$4 sm:$0xff]  }
 0x137   : > { %2146 = vmatpush1.bf16.msra.mxu0 %v11836_v19  ;;  %v11880_v19 = vld [vmem:[#allocation5 + $0x68] ss:$36 sps:$4 sm:$0xff]  }
 0x138   : > { %2386 = vmatmul.mubr.bf16.gmra.mrb[36].mxu1 %v12876_v23  ;;  %2147 = vmatprep.subr.bf16.mxu0 %v11844_v21  ;;  %v11881_v21 = vld [vmem:[#allocation5 + $0x2f0] ss:$36 sps:$4 sm:$0xff]  }
 0x139   : > { %2395 = vmatprep.mubr.bf16.mxu1 %v12878_v24  ;;  %2461 = vmatpush1.bf16.msra.mxu1 %v11809_v25  ;;  %v11869_v25 = vld [vmem:[#allocation5 + $0x650] ss:$36 sps:$4 sm:$0xff]  }
 0x13a   : > { %2462 = vmatprep.subr.bf16.mxu1 %v11817_v27  ;;  %v11882_v27 = vld [vmem:[#allocation5 + $0xb0] ss:$36 sps:$4 sm:$0xff]  }
 0x13b   : > { %2148 = vmatpush1.bf16.msra.mxu0 %v11842_v28  ;;  %v11883_v28 = vld [vmem:[#allocation5 + $0x338] ss:$36 sps:$4 sm:$0xff]  }
 0x13c   : > { %2230 = vmatprep.subr.bf16.mxu0 %v11848_v29  ;;  %v11873_v29 = vld [vmem:[#allocation5 + $0x698] ss:$36 sps:$4 sm:$0xff]  }
 0x13d   : > { %2463 = vmatpush1.bf16.msra.mxu1 %v11815_v30  ;;  %v11884_v30 = vld [vmem:[#allocation5 + $0xf8] ss:$36 sps:$4 sm:$0xff]  }
 0x13e   : > { %2464 = vmatprep.subr.bf16.mxu1 %v11823_v32  ;;  %2150 = vmatmul.mubr.bf16.vlgmr.msra.gmra.mrb[32].mxu0 %v12864_v9  ;;  %v11885_v32 = vld [vmem:[#allocation5 + $0x380] ss:$36 sps:$4 sm:$0xff]  }
 0x13f   : > { %2159 = vmatprep.mubr.bf16.mxu0 %v12866_v10  ;;  %2231 = vmatpush1.bf16.msra.mxu0 %v11846_v33  ;;  %v11886_v33 = vld [vmem:[#allocation5 + $0x140] ss:$36 sps:$4 sm:$0xff]  }
 0x140   : > { %2396 = vmatmul.mubr.bf16.gmra.mrb[40].mxu1 %v12888_v37  ;;  %2232 = vmatprep.subr.bf16.mxu0 %v11852_v34  ;;  %v11887_v34 = vld [vmem:[#allocation5 + $0x3c8] ss:$36 sps:$4 sm:$0xff]  }
 0x141   : > { %2405 = vmatprep.mubr.bf16.mxu1 %v12890_v38  ;;  %2465 = vmatpush1.bf16.msra.mxu1 %v11821_v35  ;;  %v11888_v35 = vld [vmem:[#allocation5 + $0x188] ss:$36 sps:$4 sm:$0xff]  }
 0x142   : > { %2466 = vmatprep.subr.bf16.mxu1 %v11829_v36  ;;  %v11889_v36 = vld [vmem:[#allocation5 + $0x410] ss:$36 sps:$4 sm:$0xff]  }
 0x143   : > { %2233 = vmatpush1.bf16.msra.mxu0 %v11850_v40  ;;  %v11890_v40 = vld [vmem:[#allocation5 + $0x1d0] ss:$36 sps:$4 sm:$0xff]  }
 0x144   : > { %2234 = vmatprep.subr.bf16.mxu0 %v11856_v41  ;;  %v11891_v41 = vld [vmem:[#allocation5 + $0x458] ss:$36 sps:$4 sm:$0xff]  }
 0x145   : > { %2467 = vmatpush1.bf16.msra.mxu1 %v11827_v42  ;;  %v11892_v42 = vld [vmem:[#allocation5 + $0x218] ss:$36 sps:$4 sm:$0xff]  }
 0x146   : > { %2468 = vmatprep.subr.bf16.mxu1 %v11835_v43  ;;  %2160 = vmatmul.mubr.bf16.gmra.mrb[36].mxu0 %v12876_v23 }
 0x147   : > { %2169 = vmatprep.mubr.bf16.mxu0 %v12878_v24  ;;  %2235 = vmatpush1.bf16.msra.mxu0 %v11854_v45 }
 0x148   : > { %2406 = vmatmul.mubr.bf16.gmra.mrb[44].mxu1 %v12900_v52  ;;  %2236 = vmatprep.subr.bf16.mxu0 %v11860_v46 }
 0x149   : > { %2415 = vmatprep.mubr.bf16.mxu1 %v12902_v53  ;;  %2469 = vmatpush1.bf16.msra.mxu1 %v11833_v47 }
 0x14a   : > { %2470 = vmatprep.subr.bf16.mxu1 %v11841_v48 }
 0x14b   : > { %2237 = vmatpush1.bf16.msra.mxu0 %v11858_v51 }
 0x14c   : > { %2238 = vmatprep.subr.bf16.mxu0 %v11864_v54 }
 0x14d   : > { %2471 = vmatpush1.bf16.msra.mxu1 %v11839_v55 }
 0x14e   : > { %2170 = vmatmul.mubr.bf16.gmra.mrb[40].mxu0 %v12888_v37  ;;  %10468 = vmatprep.subr.bf16.mxu1 %v11845_v56 }
 0x14f   : > { %2179 = vmatprep.mubr.bf16.mxu0 %v12890_v38  ;;  %2239 = vmatpush1.bf16.msra.mxu0 %v11862_v57 }
 0x150   : > { %2416 = vmatmul.mubr.bf16.gmra.mrb[48].mxu1 %v12912_v1  ;;  %2240 = vmatprep.subr.bf16.mxu0 %v11868_v59 }
 0x151   : > { %2425 = vmatprep.mubr.bf16.mxu1 %v12914_v2 }
 0x153   : > { %2241 = vmatpush1.bf16.msra.mxu0 %v11866_v60 }
 0x154   : > { %2242 = vmatprep.subr.bf16.mxu0 %v11872_v61 }
 0x156   : > { %2180 = vmatmul.mubr.bf16.gmra.mrb[44].mxu0 %v12900_v52 }
 0x157   : > { %2189 = vmatprep.mubr.bf16.mxu0 %v12902_v53  ;;  %2243 = vmatpush1.bf16.msra.mxu0 %v11870_v63 }
 0x158   : > { %2426 = vmatmul.mubr.bf16.gmra.mrb[52].mxu1 %v12924_v8  ;;  %2244 = vmatprep.subr.bf16.mxu0 %v11876_v0 }
 0x159   : > { %2435 = vmatprep.mubr.bf16.mxu1 %v12926_v11 }
 0x15b   : > { %2245 = vmatpush1.bf16.msra.mxu0 %v11874_v3 }
 0x15c   : > { %10100 = vmatprep.subr.bf16.mxu0 %v11877_v4 }
 0x15e   : > { %2190 = vmatmul.mubr.bf16.gmra.mrb[48].mxu0 %v12912_v1 }
 0x15f   : > { %2199 = vmatprep.mubr.bf16.mxu0 %v12914_v2 }
 0x160   : > { %2436 = vmatmul.mubr.bf16.gmra.mrb[56].mxu1 %v12936_v16 }
 0x161   : > { %2445 = vmatprep.mubr.bf16.mxu1 %v12938_v17 }
 0x166   : > { %2200 = vmatmul.mubr.bf16.gmra.mrb[52].mxu0 %v12924_v8 }
 0x167   : > { %2209 = vmatprep.mubr.bf16.mxu0 %v12926_v11 }
 0x168   : > { %2446 = vmatmul.mubr.bf16.gmra.mrb[60].mxu1 %v12946_v20 }
 0x169   : > { %2488 = vmatprep.mubr.bf16.mxu1 %v14949_v22 }
 0x16e   : > { %2210 = vmatmul.mubr.bf16.gmra.mrb[56].mxu0 %v12936_v16 }
 0x16f   : > { %2219 = vmatprep.mubr.bf16.mxu0 %v12938_v17 }
 0x170   : > { %2489 = vmatmul.mubr.bf16.vlgmr.msra.gmra.mrb[32].mxu1 %v12954_v26 }
 0x171   : > { %2498 = vmatprep.mubr.bf16.mxu1 %v14949_v22  ;;  %10469 = vmatpush3.bf16.msra.mxu1 %v11845_v56 }
 0x172   : > { %10470 = vmatprep.subr.bf16.mxu1 %v11849_v5 }
 0x175   : > { %10471 = vmatpush3.bf16.msra.mxu1 %v11849_v5 }
 0x176   : > { %10472 = vmatprep.subr.bf16.mxu1 %v11853_v6  ;;  %2220 = vmatmul.mubr.bf16.gmra.mrb[60].mxu0 %v12946_v20 }
 0x177   : > { %2262 = vmatprep.mubr.bf16.mxu0 %v14949_v22 }
 0x178   : > { %2499 = vmatmul.mubr.bf16.gmra.mrb[36].mxu1 %v12962_v39 }
 0x179   : > { %2508 = vmatprep.mubr.bf16.mxu1 %v14949_v22  ;;  %10473 = vmatpush3.bf16.msra.mxu1 %v11853_v6 }
 0x17a   : > { %10474 = vmatprep.subr.bf16.mxu1 %v11857_v7 }
 0x17d   : > { %10475 = vmatpush3.bf16.msra.mxu1 %v11857_v7 }
 0x17e   : > { %10476 = vmatprep.subr.bf16.mxu1 %v11861_v12  ;;  %2263 = vmatmul.mubr.bf16.vlgmr.msra.gmra.mrb[32].mxu0 %v12954_v26 }
 0x17f   : > { %2272 = vmatprep.mubr.bf16.mxu0 %v14949_v22  ;;  %10101 = vmatpush3.bf16.msra.mxu0 %v11878_v14 }
 0x180   : > { %2509 = vmatmul.mubr.bf16.gmra.mrb[40].mxu1 %v12970_v49  ;;  %10102 = vmatprep.subr.bf16.mxu0 %v11879_v15 }
 0x181   : > { %2518 = vmatprep.mubr.bf16.mxu1 %v14949_v22  ;;  %10477 = vmatpush3.bf16.msra.mxu1 %v11861_v12 }
 0x182   : > { %10478 = vmatprep.subr.bf16.mxu1 %v11865_v18 }
 0x183   : > { %10103 = vmatpush3.bf16.msra.mxu0 %v11880_v19 }
 0x184   : > { %10104 = vmatprep.subr.bf16.mxu0 %v11881_v21 }
 0x185   : > { %10479 = vmatpush3.bf16.msra.mxu1 %v11865_v18 }
 0x186   : > { %10480 = vmatprep.subr.bf16.mxu1 %v11869_v25  ;;  %2273 = vmatmul.mubr.bf16.gmra.mrb[36].mxu0 %v12962_v39 }
 0x187   : > { %2282 = vmatprep.mubr.bf16.mxu0 %v14949_v22  ;;  %10105 = vmatpush3.bf16.msra.mxu0 %v11882_v27 }
 0x188   : > { %2519 = vmatmul.mubr.bf16.gmra.mrb[44].mxu1 %v12978_v62  ;;  %10106 = vmatprep.subr.bf16.mxu0 %v11883_v28 }
 0x189   : > { %2528 = vmatprep.mubr.bf16.mxu1 %v14949_v22  ;;  %10481 = vmatpush3.bf16.msra.mxu1 %v11869_v25 }
 0x18a   : > { %10482 = vmatprep.subr.bf16.mxu1 %v11873_v29 }
 0x18b   : > { %10107 = vmatpush3.bf16.msra.mxu0 %v11884_v30 }
 0x18c   : > { %10108 = vmatprep.subr.bf16.mxu0 %v11885_v32 }
 0x18d   : > { %10483 = vmatpush3.bf16.msra.mxu1 %v11873_v29 }
 0x18e   : > { %2283 = vmatmul.mubr.bf16.gmra.mrb[40].mxu0 %v12970_v49 }
 0x18f   : > { %2292 = vmatprep.mubr.bf16.mxu0 %v14949_v22  ;;  %10109 = vmatpush3.bf16.msra.mxu0 %v11886_v33 }
 0x190   : > { %2529 = vmatmul.mubr.bf16.gmra.mrb[48].mxu1 %v12986_v13  ;;  %10110 = vmatprep.subr.bf16.mxu0 %v11887_v34 }
 0x191   : > { %2538 = vmatprep.mubr.bf16.mxu1 %v14949_v22 }
 0x193   : > { %10111 = vmatpush3.bf16.msra.mxu0 %v11888_v35 }
 0x194   : > { %10112 = vmatprep.subr.bf16.mxu0 %v11889_v36 }
 0x196   : > { %2293 = vmatmul.mubr.bf16.gmra.mrb[44].mxu0 %v12978_v62 }
 0x197   : > { %2302 = vmatprep.mubr.bf16.mxu0 %v14949_v22  ;;  %10113 = vmatpush3.bf16.msra.mxu0 %v11890_v40 }
 0x198   : > { %2539 = vmatmul.mubr.bf16.gmra.mrb[52].mxu1 %v12994_v31  ;;  %10114 = vmatprep.subr.bf16.mxu0 %v11891_v41 }
 0x199   : > { %2548 = vmatprep.mubr.bf16.mxu1 %v14949_v22 }
 0x19b   : > { %10115 = vmatpush3.bf16.msra.mxu0 %v11892_v42 }
 0x19e   : > { %2303 = vmatmul.mubr.bf16.gmra.mrb[48].mxu0 %v12986_v13 }
 0x19f   : > { %2312 = vmatprep.mubr.bf16.mxu0 %v14949_v22 }
 0x1a0   : > { %2549 = vmatmul.mubr.bf16.gmra.mrb[56].mxu1 %v13002_v44 }
 0x1a1   : > { %2558 = vmatprep.mubr.bf16.mxu1 %v14949_v22 }
 0x1a6   : > { %2313 = vmatmul.mubr.bf16.gmra.mrb[52].mxu0 %v12994_v31 }
 0x1a7   : > { %2322 = vmatprep.mubr.bf16.mxu0 %v14949_v22 }
 0x1a8   : > { %2559 = vmatmul.mubr.bf16.gmra.mrb[60].mxu1 %v13010_v58 }
 0x1a9   : > { %10484 = vmatprep.mubr.bf16.mxu1 %v12954_v26 }
 0x1ae   : > { %2323 = vmatmul.mubr.bf16.gmra.mrb[56].mxu0 %v13002_v44 }
 0x1af   : > { %2332 = vmatprep.mubr.bf16.mxu0 %v14949_v22 }
 0x1b0   : > { %10485 = vmatmul.mubr.bf16.vlgmr.msra.gmra.mrb[64].mxu1 %v12962_v39 }
 0x1b1   : > { %10488 = vmatprep.mubr.bf16.mxu1 %v12970_v49 }
 0x1b6   : > { %2333 = vmatmul.mubr.bf16.gmra.mrb[60].mxu0 %v13010_v58 }
 0x1b7   : > { %2601 = vmatprep.mubr.bf16.mxu0 %v12856_v50 }
 0x1b8   : > { %10489 = vmatmul.mubr.bf16.gmra.mrb[68].mxu1 %v12978_v62 }
 0x1b9   : > { %10492 = vmatprep.mubr.bf16.mxu1 %v12986_v13 }
 0x1be   : > { %2602 = vmatmul.mubr.bf16.vlgmr.msra.gmra.mrb[64].mxu0 %v12864_v9 }
 0x1bf   : > { %2609 = vmatprep.mubr.bf16.mxu0 %v12866_v10 }
 0x1c0   : > { %10493 = vmatmul.mubr.bf16.gmra.mrb[72].mxu1 %v12994_v31 }
 0x1c1   : > { %10496 = vmatprep.mubr.bf16.mxu1 %v13002_v44 }
 0x1c3   : > { %v1812_v26 = vpop.f32.mrb[0].mxu0  ;;  %v2038_v39 = vpop.f32.mrb[0].mxu1 }
 0x1c4   : > { %v1814_v43 = vpop.f32.mrb[1].mxu0  ;;  %v2040_v49 = vpop.f32.mrb[1].mxu1 }
 0x1c5   : > { %v1816_v45 = vpop.f32.mrb[2].mxu0  ;;  %v2042_v46 = vpop.f32.mrb[2].mxu1 }
 0x1c6   : > { %v2763_v47 = vpack.c.bf16 %v1816_v45, %v1812_v26  ;;  %v13088_v50 = vpack.c.bf16 %v2042_v46, %v2038_v39  ;;  %v1818_v62 = vpop.f32.mrb[3].mxu0  ;;  %v2044_v48 = vpop.f32.mrb[3].mxu1  ;;  %2610 = vmatmul.mubr.bf16.gmra.mrb[68].mxu0 %v12876_v23 }
 0x1c7   : > { %v13091_v9 = vpack.c.bf16 %v1818_v62, %v1814_v43  ;;  %v2766_v10 = vpack.c.bf16 %v2044_v48, %v2040_v49  ;;  %2617 = vmatprep.mubr.bf16.mxu0 %v12878_v24 }
 0x1c8   : > { %15003 = vst [vmem:[#allocation12_spill] sm:$0xff] %v13088_v50  ;;  %10497 = vmatmul.mubr.bf16.gmra.mrb[76].mxu1 %v13010_v58 }
 0x1c9   : > { %3158 = vrot.lane.b32.xlu0 %v2766_v10, %s12637_s21  ;;  %11452 = vmatprep.subr.msk.bf16.mxu1 %vm2855_vm0, %v2766_v10  ;;  %v2869_v13 = vsel %vm2855_vm0, %v2766_v10, 0 }
 0x1ca   : > { %10508 = vmatprep.mubr.msk.bf16.mxu1 %vm2855_vm0, %v2763_v47  ;;  %10501 = vmatpush3.bf16.xpose.msra.mxu1 %v2869_v13 }
 0x1cb   : > { %v1822_v31 = vpop.f32.mrb[4].mxu0  ;;  %v2048_v44 = vpop.f32.mrb[4].mxu1 }
 0x1cc   : > { %v1824_v23 = vpop.f32.mrb[5].mxu0  ;;  %v2050_v51 = vpop.f32.mrb[5].mxu1 }
 0x1cd   : > { %v1826_v54 = vpop.f32.mrb[6].mxu0  ;;  %v2052_v55 = vpop.f32.mrb[6].mxu1 }
 0x1ce   : > { %v13099_v56 = vpack.c.bf16 %v1826_v54, %v1822_v31  ;;  %v13101_v24 = vpack.c.bf16 %v2052_v55, %v2048_v44  ;;  %v1828_v58 = vpop.f32.mrb[7].mxu0  ;;  %v2054_v57 = vpop.f32.mrb[7].mxu1  ;;  %2618 = vmatmul.mubr.bf16.gmra.mrb[72].mxu0 %v12888_v37 }
 0x1cf   : > { %v13104_v59 = vpack.c.bf16 %v1828_v58, %v1824_v23  ;;  %v2775_v60 = vpack.c.bf16 %v2054_v57, %v2050_v51  ;;  %2625 = vmatprep.mubr.bf16.mxu0 %v12890_v38 }
 0x1d0   : > { %15004 = vst [vmem:[#allocation13_spill] sm:$0xff] %v13101_v24 }
 0x1d1   : > { %3160 = vrot.lane.b32.xlu0 %v2775_v60, %s12637_s21  ;;  %11453 = vmatprep.subr.msk.bf16.mxu1 %vm2855_vm0, %v2775_v60  ;;  %v2872_v61 = vsel %vm2855_vm0, %v2775_v60, 0 }
 0x1d2   : > { %10503 = vmatpush3.bf16.xpose.msra.mxu1 %v2872_v61 }
 0x1d3   : > { %v1832_v63 = vpop.f32.mrb[8].mxu0  ;;  %v2058_v0 = vpop.f32.mrb[8].mxu1 }
 0x1d4   : > { %v1834_v3 = vpop.f32.mrb[9].mxu0  ;;  %v2060_v4 = vpop.f32.mrb[9].mxu1 }
 0x1d5   : > { %v2062_v5 = vpop.f32.mrb[10].mxu1  ;;  %3146 = vrot.lane.b32.xlu0 %v2763_v47, %s12637_s21  ;;  %v1836_v37 = vpop.f32.mrb[10].mxu0 }
 0x1d6   : > { %v13111_v6 = vpack.c.bf16 %v2062_v5, %v2058_v0  ;;  %v2781_v7 = vpack.c.bf16 %v1836_v37, %v1832_v63  ;;  %v1838_v12 = vpop.f32.mrb[11].mxu0  ;;  %v2064_v38 = vpop.f32.mrb[11].mxu1  ;;  %2626 = vmatmul.mubr.bf16.gmra.mrb[76].mxu0 %v12900_v52 }
 0x1d7   : > { %v13114_v14 = vpack.c.bf16 %v1838_v12, %v1834_v3  ;;  %v2784_v15 = vpack.c.bf16 %v2064_v38, %v2060_v4  ;;  %2633 = vmatprep.mubr.bf16.mxu0 %v12902_v53 }
 0x1d8   : > { %15005 = vst [vmem:[#allocation14_spill] sm:$0xff] %v13111_v6 }
 0x1d9   : > { %3162 = vrot.lane.b32.xlu1 %v2784_v15, %s12637_s21  ;;  %11454 = vmatprep.subr.msk.bf16.mxu1 %vm2855_vm0, %v2784_v15  ;;  %v2875_v18 = vsel %vm2855_vm0, %v2784_v15, 0 }
 0x1da   : > { %3150 = vrot.lane.b32.xlu0 %v2781_v7, %s12637_s21  ;;  %10505 = vmatpush3.bf16.xpose.msra.mxu1 %v2875_v18 }
 0x1db   : > { %v1842_v19 = vpop.f32.mrb[12].mxu0  ;;  %v2068_v21 = vpop.f32.mrb[12].mxu1 }
 0x1dc   : > { %v1844_v25 = vpop.f32.mrb[13].mxu0  ;;  %v2070_v27 = vpop.f32.mrb[13].mxu1 }
 0x1dd   : > { %v1846_v28 = vpop.f32.mrb[14].mxu0  ;;  %v2072_v52 = vpop.f32.mrb[14].mxu1 }
 0x1de   : > { %v2790_v29 = vpack.c.bf16 %v1846_v28, %v1842_v19  ;;  %v13121_v30 = vpack.c.bf16 %v2072_v52, %v2068_v21  ;;  %v1848_v32 = vpop.f32.mrb[15].mxu0  ;;  %v2074_v53 = vpop.f32.mrb[15].mxu1  ;;  %2634 = vmatmul.mubr.bf16.gmra.mrb[80].mxu0 %v12912_v1 }
 0x1df   : > { %v13124_v33 = vpack.c.bf16 %v1848_v32, %v1844_v25  ;;  %v2793_v34 = vpack.c.bf16 %v2074_v53, %v2070_v27  ;;  %2641 = vmatprep.mubr.bf16.mxu0 %v12914_v2 }
 0x1e0   : > { %15006 = vst [vmem:[#allocation15_spill] sm:$0xff] %v13121_v30 }
 0x1e1   : > { %3164 = vrot.lane.b32.xlu1 %v2793_v34, %s12637_s21  ;;  %11455 = vmatprep.subr.msk.bf16.mxu1 %vm2855_vm0, %v2793_v34  ;;  %v2878_v35 = vsel %vm2855_vm0, %v2793_v34, 0 }
 0x1e2   : > { %10507 = vmatpush3.bf16.xpose.msra.mxu1 %v2878_v35 }
 0x1e3   : > { %v1852_v36 = vpop.f32.mrb[16].mxu0  ;;  %v2078_v40 = vpop.f32.mrb[16].mxu1 }
 0x1e4   : > { %v1854_v41 = vpop.f32.mrb[17].mxu0  ;;  %v2080_v42 = vpop.f32.mrb[17].mxu1 }
 0x1e5   : > { %v2082_v26 = vpop.f32.mrb[18].mxu1  ;;  %3148 = vrot.lane.b32.xlu1 %v13099_v56, %s12637_s21  ;;  %v1856_v1 = vpop.f32.mrb[18].mxu0 }
 0x1e6   : > { %v13132_v39 = vpack.c.bf16 %v2082_v26, %v2078_v40  ;;  %v13134_v43 = vpack.c.bf16 %v1856_v1, %v1852_v36  ;;  %v1858_v2 = vpop.f32.mrb[19].mxu0  ;;  %v2084_v49 = vpop.f32.mrb[19].mxu1  ;;  %2642 = vmatmul.mubr.bf16.gmra.mrb[84].mxu0 %v12924_v8 }
 0x1e7   : > { %v13137_v45 = vpack.c.bf16 %v1858_v2, %v1854_v41  ;;  %v13139_v46 = vpack.c.bf16 %v2084_v49, %v2080_v42  ;;  %2649 = vmatprep.mubr.bf16.mxu0 %v12926_v11 }
 0x1e8   : > { %15007 = vst [vmem:[#allocation16_spill] sm:$0xff] %v13132_v39  ;;  %15008 = vst [vmem:[#allocation17_spill] sm:$0xff] %v13134_v43 }
 0x1e9   : > { %15009 = vst [vmem:[#allocation18_spill] sm:$0xff] %v13137_v45  ;;  %15010 = vst [vmem:[#allocation19_spill] sm:$0xff] %v13139_v46  ;;  %10509 = vmatmul.mubr.msk.bf16.vlgmr.msra.gmra.mrb[80].mxu1 %vm2855_vm0, %v13099_v56  ;;  %3152 = vrot.lane.b32.xlu1 %v2790_v29, %s12637_s21 }
 0x1ea   : > { %10512 = vmatprep.mubr.msk.bf16.mxu1 %vm2855_vm0, %v2781_v7 }
 0x1eb   : > { %v1862_v47 = vpop.f32.mrb[20].mxu0  ;;  %v2088_v62 = vpop.f32.mrb[20].mxu1 }
 0x1ec   : > { %v1864_v48 = vpop.f32.mrb[21].mxu0  ;;  %v2090_v10 = vpop.f32.mrb[21].mxu1 }
 0x1ed   : > { %v1866_v13 = vpop.f32.mrb[22].mxu0  ;;  %v2092_v31 = vpop.f32.mrb[22].mxu1 }
 0x1ee   : > { %v13146_v8 = vpack.c.bf16 %v1866_v13, %v1862_v47  ;;  %v13148_v44 = vpack.c.bf16 %v2092_v31, %v2088_v62  ;;  %v1868_v23 = vpop.f32.mrb[23].mxu0  ;;  %v2094_v51 = vpop.f32.mrb[23].mxu1  ;;  %2650 = vmatmul.mubr.bf16.gmra.mrb[88].mxu0 %v12936_v16 }
 0x1ef   : > { %v13151_v11 = vpack.c.bf16 %v1868_v23, %v1864_v48  ;;  %v13153_v54 = vpack.c.bf16 %v2094_v51, %v2090_v10  ;;  %2657 = vmatprep.mubr.bf16.mxu0 %v12938_v17 }
 0x1f0   : > { %15011 = vst [vmem:[#allocation20_spill] sm:$0xff] %v13146_v8  ;;  %15012 = vst [vmem:[#allocation21_spill] sm:$0xff] %v13148_v44 }
 0x1f1   : > { %15013 = vst [vmem:[#allocation22_spill] sm:$0xff] %v13151_v11  ;;  %15014 = vst [vmem:[#allocation23_spill] sm:$0xff] %v13153_v54  ;;  %10513 = vmatmul.mubr.msk.bf16.gmra.mrb[84].mxu1 %vm2855_vm0, %v2790_v29 }
 0x1f3   : > { %v1872_v55 = vpop.f32.mrb[24].mxu0  ;;  %v2098_v56 = vpop.f32.mrb[24].mxu1 }
 0x1f4   : > { %v1874_v58 = vpop.f32.mrb[25].mxu0  ;;  %v2100_v57 = vpop.f32.mrb[25].mxu1 }
 0x1f5   : > { %v1876_v60 = vpop.f32.mrb[26].mxu0  ;;  %v2102_v61 = vpop.f32.mrb[26].mxu1 }
 0x1f6   : > { %v13157_v63 = vpack.c.bf16 %v1876_v60, %v1872_v55  ;;  %v13159_v0 = vpack.c.bf16 %v2102_v61, %v2098_v56  ;;  %v1878_v3 = vpop.f32.mrb[27].mxu0  ;;  %v2104_v16 = vpop.f32.mrb[27].mxu1  ;;  %2658 = vmatmul.mubr.bf16.gmra.mrb[92].mxu0 %v12946_v20 }
 0x1f7   : > { %v13162_v4 = vpack.c.bf16 %v1878_v3, %v1874_v58  ;;  %v13164_v5 = vpack.c.bf16 %v2104_v16, %v2100_v57 }
 0x1f8   : > { %15015 = vst [vmem:[#allocation24_spill] sm:$0xff] %v13157_v63  ;;  %15016 = vst [vmem:[#allocation25_spill] sm:$0xff] %v13159_v0 }
 0x1f9   : > { %15017 = vst [vmem:[#allocation26_spill] sm:$0xff] %v13162_v4  ;;  %15018 = vst [vmem:[#allocation27_spill] sm:$0xff] %v13164_v5 }
 0x1fb   : > { %v1882_v17 = vpop.f32.mrb[28].mxu0  ;;  %v2108_v37 = vpop.f32.mrb[28].mxu1 }
 0x1fc   : > { %v1884_v7 = vpop.f32.mrb[29].mxu0  ;;  %v2110_v12 = vpop.f32.mrb[29].mxu1 }
 0x1fd   : > { %v1886_v38 = vpop.f32.mrb[30].mxu0  ;;  %v2112_v15 = vpop.f32.mrb[30].mxu1 }
 0x1fe   : > { %v13166_v18 = vpack.c.bf16 %v1886_v38, %v1882_v17  ;;  %v13168_v19 = vpack.c.bf16 %v2112_v15, %v2108_v37  ;;  %v1888_v21 = vpop.f32.mrb[31].mxu0  ;;  %v2114_v25 = vpop.f32.mrb[31].mxu1 }
 0x1ff   : > { %v13170_v27 = vpack.c.bf16 %v1888_v21, %v1884_v7  ;;  %v13172_v28 = vpack.c.bf16 %v2114_v25, %v2110_v12 }
 0x200   : > { %15019 = vst [vmem:[#allocation28_spill] sm:$0xff] %v13166_v18  ;;  %15020 = vst [vmem:[#allocation29_spill] sm:$0xff] %v13168_v19 }
 0x201   : > { %15021 = vst [vmem:[#allocation30_spill] sm:$0xff] %v13170_v27  ;;  %15022 = vst [vmem:[#allocation31_spill] sm:$0xff] %v13172_v28 }
 0x23b   : > { %v3159_v20 = vpop.permute.xlu0 %3158 }
 0x23c   : > { %11456 = vmatprep.subr.msk.bf16.mxu0 %vm2855_vm0, %v3159_v20  ;;  %v3179_v52 = vsel %vm2855_vm0, %v3159_v20, 0 }
 0x23d   : > { %10533 = vmatpush3.bf16.xpose.msra.mxu0 %v3179_v52 }
 0x243   : > { %v3161_v29 = vpop.permute.xlu0 %3160  ;;  %v2490_v32 = vpop.f32.mrb[32].mxu1 }
 0x244   : > { %11457 = vmatprep.subr.msk.bf16.mxu0 %vm2855_vm0, %v3161_v29  ;;  %v3182_v53 = vsel %vm2855_vm0, %v3161_v29, 0  ;;  %v2492_v34 = vpop.f32.mrb[33].mxu1 }
 0x245   : > { %10535 = vmatpush3.bf16.xpose.msra.mxu0 %v3182_v53  ;;  %v2494_v35 = vpop.f32.mrb[34].mxu1 }
 0x246   : > { %v13178_v36 = vpack.c.bf16 %v2494_v35, %v2490_v32  ;;  %v2496_v40 = vpop.f32.mrb[35].mxu1 }
 0x247   : > { %v3147_v41 = vpop.permute.xlu0 %3146  ;;  %v13180_v42 = vpack.c.bf16 %v2496_v40, %v2492_v34 }
 0x248   : > { %10540 = vmatprep.mubr.msk.bf16.mxu0 %vm2855_vm0, %v3147_v41  ;;  %10516 = vmatprep.subr.bf16.mxu1 %v13178_v36 }
 0x249   : > { %10517 = vmatpush3.bf16.msra.mxu1 %v13178_v36 }
 0x24b   : > { %v3163_v26 = vpop.permute.xlu1 %3162  ;;  %v2500_v1 = vpop.f32.mrb[36].mxu1 }
 0x24c   : > { %11458 = vmatprep.subr.msk.bf16.mxu0 %vm2855_vm0, %v3163_v26  ;;  %v3185_v2 = vsel %vm2855_vm0, %v3163_v26, 0  ;;  %v2502_v49 = vpop.f32.mrb[37].mxu1  ;;  %v3151_v12 = vpop.permute.xlu0 %3150 }
 0x24d   : > { %10537 = vmatpush3.bf16.xpose.msra.mxu0 %v3185_v2  ;;  %v2504_v47 = vpop.f32.mrb[38].mxu1 }
 0x24e   : > { %v13187_v62 = vpack.c.bf16 %v2504_v47, %v2500_v1  ;;  %v2506_v48 = vpop.f32.mrb[39].mxu1 }
 0x24f   : > { %v13189_v10 = vpack.c.bf16 %v2506_v48, %v2502_v49 }
 0x250   : > { %10518 = vmatprep.subr.bf16.mxu1 %v13187_v62 }
 0x251   : > { %v2264_v13 = vpop.f32.mrb[32].mxu0  ;;  %10519 = vmatpush3.bf16.msra.mxu1 %v13187_v62 }
 0x252   : > { %v2266_v31 = vpop.f32.mrb[33].mxu0 }
 0x253   : > { %v3165_v23 = vpop.permute.xlu1 %3164  ;;  %v2268_v51 = vpop.f32.mrb[34].mxu0 }
 0x254   : > { %11459 = vmatprep.subr.msk.bf16.mxu0 %vm2855_vm0, %v3165_v23  ;;  %v3188_v55 = vsel %vm2855_vm0, %v3165_v23, 0  ;;  %v13195_v56 = vpack.c.bf16 %v2268_v51, %v2264_v13  ;;  %v2270_v58 = vpop.f32.mrb[35].mxu0  ;;  %v2510_v57 = vpop.f32.mrb[40].mxu1 }
 0x255   : > { %10539 = vmatpush3.bf16.xpose.msra.mxu0 %v3188_v55  ;;  %v13197_v60 = vpack.c.bf16 %v2270_v58, %v2266_v31  ;;  %v2512_v61 = vpop.f32.mrb[41].mxu1 }
 0x256   : > { %v2514_v3 = vpop.f32.mrb[42].mxu1 }
 0x257   : > { %v13199_v16 = vpack.c.bf16 %v2514_v3, %v2510_v57  ;;  %v2516_v17 = vpop.f32.mrb[43].mxu1  ;;  %v3149_v15 = vpop.permute.xlu1 %3148 }
 0x258   : > { %v13201_v37 = vpack.c.bf16 %v2516_v17, %v2512_v61 }
 0x259   : > { %v2274_v7 = vpop.f32.mrb[36].mxu0  ;;  %10520 = vmatprep.subr.bf16.mxu1 %v13199_v16 }
 0x25a   : > { %v2276_v38 = vpop.f32.mrb[37].mxu0  ;;  %10521 = vmatpush3.bf16.msra.mxu1 %v13199_v16 }
 0x25b   : > { %v2278_v21 = vpop.f32.mrb[38].mxu0  ;;  %v2520_v52 = vpop.f32.mrb[44].mxu1 }
 0x25c   : > { %10541 = vmatmul.mubr.msk.bf16.vlgmr.msra.gmra.mrb[96].mxu0 %vm2855_vm0, %v3149_v15  ;;  %v13206_v25 = vpack.c.bf16 %v2278_v21, %v2274_v7  ;;  %v2280_v20 = vpop.f32.mrb[39].mxu0  ;;  %v2522_v32 = vpop.f32.mrb[45].mxu1 }
 0x25d   : > { %10544 = vmatprep.mubr.msk.bf16.mxu0 %vm2855_vm0, %v3151_v12  ;;  %v13209_v29 = vpack.c.bf16 %v2280_v20, %v2276_v38  ;;  %v2524_v53 = vpop.f32.mrb[46].mxu1  ;;  %v3153_v26 = vpop.permute.xlu1 %3152 }
 0x25e   : > { %v13211_v34 = vpack.c.bf16 %v2524_v53, %v2520_v52  ;;  %v2526_v35 = vpop.f32.mrb[47].mxu1 }
 0x25f   : > { %v13213_v40 = vpack.c.bf16 %v2526_v35, %v2522_v32 }
 0x260   : > { %10522 = vmatprep.subr.bf16.mxu1 %v13211_v34 }
 0x261   : > { %v2284_v41 = vpop.f32.mrb[40].mxu0  ;;  %10523 = vmatpush3.bf16.msra.mxu1 %v13211_v34 }
 0x262   : > { %v2286_v1 = vpop.f32.mrb[41].mxu0 }
 0x263   : > { %v2288_v2 = vpop.f32.mrb[42].mxu0  ;;  %v2530_v49 = vpop.f32.mrb[48].mxu1 }
 0x264   : > { %10545 = vmatmul.mubr.msk.bf16.gmra.mrb[100].mxu0 %vm2855_vm0, %v3153_v26  ;;  %v13218_v47 = vpack.c.bf16 %v2288_v2, %v2284_v41  ;;  %v2290_v48 = vpop.f32.mrb[43].mxu0  ;;  %v2532_v13 = vpop.f32.mrb[49].mxu1 }
 0x265   : > { %v13220_v31 = vpack.c.bf16 %v2290_v48, %v2286_v1  ;;  %v2534_v23 = vpop.f32.mrb[50].mxu1  ;;  %3576 = vmatprep.mubr.bf16.mxu0 %v14949_v22 }
 0x266   : > { %v13223_v51 = vpack.c.bf16 %v2534_v23, %v2530_v49  ;;  %v2536_v55 = vpop.f32.mrb[51].mxu1 }
 0x267   : > { %v13225_v58 = vpack.c.bf16 %v2536_v55, %v2532_v13 }
 0x268   : > { %15023 = vst [vmem:[#allocation32_spill] sm:$0xff] %v13223_v51 }
 0x269   : > { %15024 = vst [vmem:[#allocation33_spill] sm:$0xff] %v13225_v58  ;;  %v2294_v57 = vpop.f32.mrb[44].mxu0 }
 0x26a   : > { %v2296_v61 = vpop.f32.mrb[45].mxu0 }
 0x26b   : > { %v2298_v3 = vpop.f32.mrb[46].mxu0  ;;  %v2540_v17 = vpop.f32.mrb[52].mxu1 }
 0x26c   : > { %v13227_v7 = vpack.c.bf16 %v2298_v3, %v2294_v57  ;;  %v2300_v12 = vpop.f32.mrb[47].mxu0  ;;  %v2542_v38 = vpop.f32.mrb[53].mxu1 }
 0x26d   : > { %v13229_v15 = vpack.c.bf16 %v2300_v12, %v2296_v61  ;;  %v2544_v21 = vpop.f32.mrb[54].mxu1 }
 0x26e   : > { %v13231_v20 = vpack.c.bf16 %v2544_v21, %v2540_v17  ;;  %v2546_v52 = vpop.f32.mrb[55].mxu1 }
 0x26f   : > { %v13233_v32 = vpack.c.bf16 %v2546_v52, %v2542_v38 }
 0x270   : > { %15025 = vst [vmem:[#allocation34_spill] sm:$0xff] %v13231_v20 }
 0x271   : > { %15026 = vst [vmem:[#allocation35_spill] sm:$0xff] %v13233_v32  ;;  %v2304_v53 = vpop.f32.mrb[48].mxu0 }
 0x272   : > { %v2306_v35 = vpop.f32.mrb[49].mxu0 }
 0x273   : > { %v2550_v41 = vpop.f32.mrb[56].mxu1  ;;  %v2308_v26 = vpop.f32.mrb[50].mxu0 }
 0x274   : > { %v2552_v1 = vpop.f32.mrb[57].mxu1  ;;  %v13235_v2 = vpack.c.bf16 %v2308_v26, %v2304_v53  ;;  %v2310_v49 = vpop.f32.mrb[51].mxu0 }
 0x275   : > { %v2554_v48 = vpop.f32.mrb[58].mxu1  ;;  %v13237_v13 = vpack.c.bf16 %v2310_v49, %v2306_v35 }
 0x276   : > { %15027 = vst [vmem:[#allocation36_spill] sm:$0xff] %v13235_v2  ;;  %v13239_v23 = vpack.c.bf16 %v2554_v48, %v2550_v41  ;;  %v2556_v55 = vpop.f32.mrb[59].mxu1 }
 0x277   : > { %15028 = vst [vmem:[#allocation37_spill] sm:$0xff] %v13237_v13  ;;  %v13241_v57 = vpack.c.bf16 %v2556_v55, %v2552_v1 }
 0x278   : > { %15029 = vst [vmem:[#allocation38_spill] sm:$0xff] %v13239_v23 }
 0x279   : > { %15030 = vst [vmem:[#allocation39_spill] sm:$0xff] %v13241_v57  ;;  %v2314_v61 = vpop.f32.mrb[52].mxu0 }
 0x27a   : > { %v2316_v3 = vpop.f32.mrb[53].mxu0 }
 0x27b   : > { %v2560_v17 = vpop.f32.mrb[60].mxu1  ;;  %v2318_v12 = vpop.f32.mrb[54].mxu0 }
 0x27c   : > { %v2562_v38 = vpop.f32.mrb[61].mxu1  ;;  %v13243_v21 = vpack.c.bf16 %v2318_v12, %v2314_v61  ;;  %v2320_v52 = vpop.f32.mrb[55].mxu0 }
 0x27d   : > { %v2564_v22 = vpop.f32.mrb[62].mxu1  ;;  %v13245_v53 = vpack.c.bf16 %v2320_v52, %v2316_v3 }
 0x27e   : > { %15031 = vst [vmem:[#allocation40_spill] sm:$0xff] %v13243_v21  ;;  %v13247_v26 = vpack.c.bf16 %v2564_v22, %v2560_v17  ;;  %v2566_v35 = vpop.f32.mrb[63].mxu1 }
 0x27f   : > { %15032 = vst [vmem:[#allocation41_spill] sm:$0xff] %v13245_v53  ;;  %v13249_v49 = vpack.c.bf16 %v2566_v35, %v2562_v38 }
 0x280   : > { %15033 = vst [vmem:[#allocation42_spill] sm:$0xff] %v13247_v26 }
 0x281   : > { %15034 = vst [vmem:[#allocation43_spill] sm:$0xff] %v13249_v49  ;;  %v2324_v41 = vpop.f32.mrb[56].mxu0 }
 0x282   : > { %v2326_v48 = vpop.f32.mrb[57].mxu0 }
 0x283   : > { %v10486_v1 = vpop.f32.mrb[64].mxu1  ;;  %v2328_v55 = vpop.f32.mrb[58].mxu0 }
 0x284   : > { %v2700_v19 = vpop.f32.mrb[65].mxu1  ;;  %v13251_v0 = vpack.c.bf16 %v2328_v55, %v2324_v41  ;;  %v2330_v44 = vpop.f32.mrb[59].mxu0 }
 0x285   : > { %v10487_v39 = vpop.f32.mrb[66].mxu1  ;;  %v13253_v61 = vpack.c.bf16 %v2330_v44, %v2326_v48 }
 0x286   : > { %15035 = vst [vmem:[#allocation44_spill] sm:$0xff] %v13251_v0  ;;  %v2703_v12 = vpop.f32.mrb[67].mxu1 }
 0x287   : > { %15036 = vst [vmem:[#allocation45_spill] sm:$0xff] %v13253_v61 }
 0x289   : > { %v2334_v13 = vpop.f32.mrb[60].mxu0 }
 0x28a   : > { %v2336_v3 = vpop.f32.mrb[61].mxu0 }
 0x28b   : > { %v10490_v52 = vpop.f32.mrb[68].mxu1  ;;  %v2338_v22 = vpop.f32.mrb[62].mxu0 }
 0x28c   : > { %v2716_v17 = vpop.f32.mrb[69].mxu1  ;;  %v13255_v53 = vpack.c.bf16 %v2338_v22, %v2334_v13  ;;  %v2340_v38 = vpop.f32.mrb[63].mxu0 }
 0x28d   : > { %v10491_v35 = vpop.f32.mrb[70].mxu1  ;;  %v13257_v27 = vpack.c.bf16 %v2340_v38, %v2336_v3 }
 0x28e   : > { %15037 = vst [vmem:[#allocation46_spill] sm:$0xff] %v13255_v53  ;;  %v2719_v4 = vpop.f32.mrb[71].mxu1 }
 0x28f   : > { %15038 = vst [vmem:[#allocation47_spill] sm:$0xff] %v13257_v27 }
 0x291   : > { %v10116_v11 = vpop.f32.mrb[64].mxu0 }
 0x292   : > { %v10117_v41 = vpop.f32.mrb[65].mxu0 }
 0x293   : > { %v13259_v55 = vpop.f32.mrb[72].mxu1  ;;  %v10118_v49 = vadd.f32 %v10117_v41, %v10116_v11  ;;  %v10119_v44 = vpop.f32.mrb[66].mxu0 }
 0x294   : > { %v2732_v48 = vpop.f32.mrb[73].mxu1  ;;  %v10120_v61 = vpop.f32.mrb[67].mxu0 }
 0x295   : > { %v13261_v57 = vpop.f32.mrb[74].mxu1  ;;  %v2701_v32 = vadd.f32 %v10118_v49, %v2700_v19  ;;  %v10121_v0 = vadd.f32 %v10120_v61, %v10119_v44 }
 0x296   : > { %v2735_v45 = vpop.f32.mrb[75].mxu1 }
 0x297   : > { %v2704_v13 = vadd.f32 %v10121_v0, %v2703_v12 }
 0x299   : > { %v10122_v22 = vpop.f32.mrb[68].mxu0  ;;  %v13263_v53 = vpack.c.bf16 %v2704_v13, %v2701_v32 }
 0x29a   : > { %v10123_v3 = vpop.f32.mrb[69].mxu0 }
 0x29b   : > { %v13265_v38 = vpop.f32.mrb[76].mxu1  ;;  %v10124_v27 = vadd.f32 %v10123_v3, %v10122_v22  ;;  %v10125_v21 = vpop.f32.mrb[70].mxu0 }
 0x29c   : > { %v13267_v2 = vpop.f32.mrb[77].mxu1  ;;  %v10126_v11 = vpop.f32.mrb[71].mxu0 }
 0x29d   : > { %v13269_v41 = vpop.f32.mrb[78].mxu1  ;;  %v2709_v58 = vadd.f32 %v10486_v1, %v10124_v27  ;;  %v10127_v26 = vadd.f32 %v10126_v11, %v10125_v21 }
 0x29e   : > { %v13271_v23 = vpop.f32.mrb[79].mxu1 }
 0x29f   : > { %v2712_v19 = vadd.f32 %v10487_v39, %v10127_v26  ;;  %v2835_v39 = vlaneseq }
 0x2a1   : > { %v10128_v49 = vpop.f32.mrb[72].mxu0  ;;  %v13273_v0 = vpack.c.bf16 %v2712_v19, %v2709_v58 }
 0x2a2   : > { %v10129_v32 = vpop.f32.mrb[73].mxu0 }
 0x2a3   : > { %v10130_v61 = vadd.f32 %v10129_v32, %v10128_v49  ;;  %v10131_v12 = vpop.f32.mrb[74].mxu0  ;;  %v13279_v49 = vshrl.u32 %v2835_v39, 7 }
 0x2a4   : > { %v10132_v44 = vpop.f32.mrb[75].mxu0 }
 0x2a5   : > { %v2717_v13 = vadd.f32 %v10130_v61, %v2716_v17  ;;  %v10133_v22 = vadd.f32 %v10132_v44, %v10131_v12  ;;  %15039 = vst [vmem:[#allocation48_spill] sm:$0xff] %v13279_v49 }
 0x2a7   : > { %v2720_v3 = vadd.f32 %v10133_v22, %v2719_v4 }
 0x2a9   : > { %v10134_v20 = vpop.f32.mrb[76].mxu0  ;;  %v13275_v51 = vpack.c.bf16 %v2720_v3, %v2717_v13  ;;  %v2838_v13 = vadd.s32 16, %v13279_v49 }
 0x2aa   : > { %v10135_v63 = vpop.f32.mrb[77].mxu0 }
 0x2ab   : > { %v10136_v43 = vadd.f32 %v10135_v63, %v10134_v20  ;;  %v10137_v27 = vpop.f32.mrb[78].mxu0  ;;  %v2845_v63 = vand.u32 127, %v2835_v39 }
 0x2ac   : > { %v10138_v21 = vpop.f32.mrb[79].mxu0 }
 0x2ad   : > { %v2725_v1 = vadd.f32 %v10490_v52, %v10136_v43  ;;  %v10139_v11 = vadd.f32 %v10138_v21, %v10137_v27  ;;  %v2837_v43 = vadd.s32 8, %v13279_v49  ;;  %vm13285_vm1 = vcmp.le.s32.totalorder %v2845_v63, %v2838_v13 }
 0x2ae   : > { %vm13290_vm2 = vcmp.le.s32.totalorder %v2845_v63, %v13279_v49 }
 0x2af   : > { %v2728_v26 = vadd.f32 %v10491_v35, %v10139_v11  ;;  %vm13299_vm3 = vcmp.le.s32.totalorder %v2845_v63, %v2837_v43 }
 0x2b1   : > { %v10140_v58 = vpop.f32.mrb[80].mxu0  ;;  %v13277_v19 = vpack.c.bf16 %v2728_v26, %v2725_v1 }
 0x2b2   : > { %v10141_v32 = vpop.f32.mrb[81].mxu0 }
 0x2b3   : > { %v10142_v17 = vadd.f32 %v10141_v32, %v10140_v58  ;;  %v10143_v61 = vpop.f32.mrb[82].mxu0 }
 0x2b4   : > { %v10144_v4 = vpop.f32.mrb[83].mxu0 }
 0x2b5   : > { %v2733_v12 = vadd.f32 %v10142_v17, %v2732_v48  ;;  %v10145_v44 = vadd.f32 %v10144_v4, %v10143_v61 }
 0x2b7   : > { %v2736_v20 = vadd.f32 %v10145_v44, %v2735_v45  ;;  %v2839_v45 = vadd.s32 24, %v13279_v49 }
 0x2b9   : > { %v10146_v52 = vpop.f32.mrb[84].mxu0  ;;  %v13283_v22 = vpack.c.bf16 %v2736_v20, %v2733_v12  ;;  %v2842_v12 = vadd.s32 48, %v13279_v49  ;;  %vm13312_vm4 = vcmp.le.s32.totalorder %v2845_v63, %v2839_v45 }
 0x2ba   : > { %v10147_v3 = vpop.f32.mrb[85].mxu0 }
 0x2bb   : > { %15040 = vst [vmem:[#allocation49_spill] sm:$0xff] %v13283_v22  ;;  %v10148_v27 = vadd.f32 %v10147_v3, %v10146_v52  ;;  %v10149_v21 = vpop.f32.mrb[86].mxu0  ;;  %v2840_v52 = vadd.s32 32, %v13279_v49  ;;  %vm13328_vm5 = vcmp.le.s32.totalorder %v2845_v63, %v2842_v12 }
 0x2bc   : > { %v10510_v1 = vpop.f32.mrb[80].mxu1  ;;  %v10150_v11 = vpop.f32.mrb[87].mxu0 }
 0x2bd   : > { %v13297_v39 = vsel %vm13285_vm1, %v10510_v1, -inf  ;;  %v2914_v26 = vpop.f32.mrb[81].mxu1  ;;  %v2741_v32 = vadd.f32 %v13259_v55, %v10148_v27  ;;  %v10151_v17 = vadd.f32 %v10150_v11, %v10149_v21  ;;  %v2841_v27 = vadd.s32 40, %v13279_v49 }
 0x2be   : > { %v10511_v61 = vpop.f32.mrb[82].mxu1  ;;  %v2959_v4 = vsel %vm2855_vm0, %v13297_v39, -inf  ;;  %v13309_v44 = vsel %vm13290_vm2, %v2914_v26, -inf  ;;  %vm13336_vm6 = vcmp.le.s32.totalorder %v2845_v63, %v2840_v52 }
 0x2bf   : > { %v2917_v13 = vpop.f32.mrb[83].mxu1  ;;  %2960 = vmax.xlane.f32.xlu0 %v2959_v4  ;;  %v2744_v20 = vadd.f32 %v13261_v57, %v10151_v17  ;;  %v2953_v57 = vsel %vm2855_vm0, %v13309_v44, -inf  ;;  %v13334_v26 = vsel %vm13312_vm4, %v10511_v61, -inf  ;;  %vm13345_vm7 = vcmp.le.s32.totalorder %v2845_v63, %v2841_v27 }
 0x2c0   : > { %v13318_v55 = vsel %vm13299_vm3, %v2917_v13, -inf  ;;  %v2962_v52 = vsel %vm2855_vm0, %v13334_v26, -inf }
 0x2c1   : > { %v2956_v3 = vsel %vm2855_vm0, %v13318_v55, -inf  ;;  %v10152_v21 = vpop.f32.mrb[88].mxu0  ;;  %v13324_v1 = vpack.c.bf16 %v2744_v20, %v2741_v32  ;;  %v2843_v20 = vadd.s32 56, %v13279_v49 }
 0x2c2   : > { %2957 = vmax.xlane.f32.xlu1 %v2956_v3  ;;  %v10153_v11 = vpop.f32.mrb[89].mxu0 }
 0x2c3   : > { %15049 = vst [vmem:[#allocation50_spill] sm:$0xff] %v13324_v1  ;;  %2954 = vmax.xlane.f32.xlu0 %v2953_v57  ;;  %v10154_v17 = vadd.f32 %v10153_v11, %v10152_v21  ;;  %v10155_v4 = vpop.f32.mrb[90].mxu0  ;;  %vm13359_vm8 = vcmp.le.s32.totalorder %v2845_v63, %v2843_v20 }
 0x2c4   : > { %v10514_v13 = vpop.f32.mrb[84].mxu1  ;;  %v10156_v3 = vpop.f32.mrb[91].mxu0 }
 0x2c5   : > { %v13343_v12 = vsel %vm13328_vm5, %v10514_v13, -inf  ;;  %v2930_v1 = vpop.f32.mrb[85].mxu1  ;;  %v2749_v61 = vadd.f32 %v10154_v17, %v13267_v2  ;;  %v10157_v21 = vadd.f32 %v10156_v3, %v10155_v4 }
 0x2c6   : > { %v10515_v57 = vpop.f32.mrb[86].mxu1  ;;  %v2971_v11 = vsel %vm2855_vm0, %v13343_v12, -inf  ;;  %v13356_v49 = vsel %vm13336_vm6, %v2930_v1, -inf }
 0x2c7   : > { %2963 = vmax.xlane.f32.xlu0 %v2962_v52  ;;  %2972 = vmax.xlane.f32.xlu1 %v2971_v11  ;;  %v2933_v27 = vpop.f32.mrb[87].mxu1  ;;  %v2752_v13 = vadd.f32 %v10157_v21, %v13271_v23  ;;  %v2965_v1 = vsel %vm2855_vm0, %v13356_v49, -inf  ;;  %v2952_v23 = vsel %vm13359_vm8, %v10515_v57, -inf }
 0x2c8   : > { %v13365_v2 = vsel %vm13345_vm7, %v2933_v27, -inf  ;;  %v2974_v8 = vsel %vm2855_vm0, %v2952_v23, -inf }
 0x2c9   : > { %v2968_v17 = vsel %vm2855_vm0, %v13365_v2, -inf  ;;  %v10158_v4 = vpop.f32.mrb[92].mxu0  ;;  %v13369_v3 = vpack.c.bf16 %v2752_v13, %v2749_v61 }
 0x2ca   : > { %v10159_v52 = vpop.f32.mrb[93].mxu0 }
 0x2cb   : > { %15058 = vst [vmem:[#allocation51_spill] sm:$0xff] %v13369_v3  ;;  %2966 = vmax.xlane.f32.xlu1 %v2965_v1  ;;  %2969 = vmax.xlane.f32.xlu0 %v2968_v17  ;;  %v10160_v63 = vadd.f32 %v10159_v52, %v10158_v4  ;;  %v10161_v20 = vpop.f32.mrb[94].mxu0 }
 0x2cc   : > { %v10162_v21 = vpop.f32.mrb[95].mxu0 }
 0x2cd   : > { %v2757_v11 = vadd.f32 %v13265_v38, %v10160_v63  ;;  %v10163_v27 = vadd.f32 %v10162_v21, %v10161_v20 }
 0x2cf   : > { %2975 = vmax.xlane.f32.xlu0 %v2974_v8  ;;  %v2760_v61 = vadd.f32 %v13269_v41, %v10163_v27 }
 0x2d1   : > { %v13378_v13 = vpack.c.bf16 %v2760_v61, %v2757_v11 }
 0x2d3   : > { %15059 = vst [vmem:[#allocation52_spill] sm:$0xff] %v13378_v13 }
 0x32f   : > { %v10542_v3 = vpop.f32.mrb[96].mxu0 }
 0x330   : > { %v13382_v28 = vsel %vm13285_vm1, %v10542_v3, -inf  ;;  %v3224_v57 = vpop.f32.mrb[97].mxu0 }
 0x331   : > { %v10543_v17 = vpop.f32.mrb[98].mxu0  ;;  %v3269_v4 = vsel %vm2855_vm0, %v13382_v28, -inf  ;;  %v13388_v38 = vsel %vm13290_vm2, %v3224_v57, -inf }
 0x332   : > { %3270 = vmax.xlane.f32.xlu1 %v3269_v4  ;;  %v3227_v8 = vpop.f32.mrb[99].mxu0  ;;  %v13398_v3 = vsel %vm13312_vm4, %v10543_v17, -inf  ;;  %v3263_v52 = vsel %vm2855_vm0, %v13388_v38, -inf }
 0x333   : > { %v13392_v41 = vsel %vm13299_vm3, %v3227_v8, -inf  ;;  %v3272_v11 = vsel %vm2855_vm0, %v13398_v3, -inf }
 0x334   : > { %v3266_v1 = vsel %vm2855_vm0, %v13392_v41, -inf }
 0x335   : > { %3267 = vmax.xlane.f32.xlu0 %v3266_v1 }
 0x336   : > { %3264 = vmax.xlane.f32.xlu1 %v3263_v52 }
 0x337   : > { %v10546_v63 = vpop.f32.mrb[100].mxu0 }
 0x338   : > { %v13404_v20 = vsel %vm13328_vm5, %v10546_v63, -inf  ;;  %v3240_v21 = vpop.f32.mrb[101].mxu0 }
 0x339   : > { %3273 = vmax.xlane.f32.xlu0 %v3272_v11  ;;  %v10547_v27 = vpop.f32.mrb[102].mxu0  ;;  %v3281_v61 = vsel %vm2855_vm0, %v13404_v20, -inf  ;;  %v13412_v57 = vsel %vm13336_vm6, %v3240_v21, -inf }
 0x33a   : > { %3282 = vmax.xlane.f32.xlu1 %v3281_v61  ;;  %v3243_v17 = vpop.f32.mrb[103].mxu0  ;;  %v13422_v1 = vsel %vm13359_vm8, %v10547_v27, -inf  ;;  %v3275_v52 = vsel %vm2855_vm0, %v13412_v57, -inf }
 0x33b   : > { %v13416_v4 = vsel %vm13345_vm7, %v3243_v17, -inf  ;;  %v3284_v63 = vsel %vm2855_vm0, %v13422_v1, -inf }
 0x33c   : > { %v3278_v8 = vsel %vm2855_vm0, %v13416_v4, -inf }
 0x33d   : > { %3279 = vmax.xlane.f32.xlu0 %v3278_v8 }
 0x33e   : > { %3276 = vmax.xlane.f32.xlu1 %v3275_v52 }
 0x341   : > { %3285 = vmax.xlane.f32.xlu0 %v3284_v63 }
 0x34c   : > { %v2961_v21 = vpop.xlane.xlu0 %2960 }
 0x34d   : > { %v2979_v63 = vsub.f32 %v13297_v39, %v2961_v21 }
 0x34f   : > { %3359 = vrot.lane.b32.xlu1 %v13178_v36, %s12637_s21  ;;  %v2958_v11 = vpop.xlane.xlu1 %2957  ;;  %v2989_v50 = vmul.f32 1.442695, %v2979_v63 }
 0x350   : > { %v2955_v61 = vpop.xlane.xlu0 %2954  ;;  %v2978_v17 = vsub.f32 %v13318_v55, %v2958_v11 }
 0x351   : > { %v2977_v55 = vsub.f32 %v13309_v44, %v2955_v61 }
 0x352   : > { %v2987_v8 = vmul.f32 1.442695, %v2978_v17 }
 0x354   : > { %v2964_v13 = vpop.xlane.xlu0 %2963  ;;  %v2973_v24 = vpop.xlane.xlu1 %2972 }
 0x355   : > { %v2980_v27 = vsub.f32 %v13334_v26, %v2964_v13  ;;  %v2983_v39 = vsub.f32 %v13343_v12, %v2973_v24 }
 0x357   : > { %v2991_v5 = vmul.f32 1.442695, %v2980_v27  ;;  %v2997_v44 = vmul.f32 1.442695, %v2983_v39 }
 0x358   : > { %v2970_v54 = vpop.xlane.xlu0 %2969 }
 0x359   : > { %12085 = vpow2.f32 %v2991_v5  ;;  %v2982_v52 = vsub.f32 %v13365_v2, %v2970_v54  ;;  %v2985_v54 = vmul.f32 1.442695, %v2977_v55 }
 0x35a   : > { %12087 = vpow2.f32 %v2987_v8 }
 0x35b   : > { %v2995_v6 = vmul.f32 1.442695, %v2982_v52 }
 0x35c   : > { %v2976_v46 = vpop.xlane.xlu0 %2975 }
 0x35d   : > { %v2984_v30 = vsub.f32 %v2952_v23, %v2976_v46  ;;  %v2967_v46 = vpop.xlane.xlu1 %2966 }
 0x35e   : > { %v2981_v2 = vsub.f32 %v13356_v49, %v2967_v46 }
 0x35f   : > { %v2999_v36 = vmul.f32 1.442695, %v2984_v30 }
 0x361   : > { %12089 = vpow2.f32 %v2999_v36 }
 0x362   : > { %12091 = vpow2.f32 %v2995_v6 }
 0x363   : > { %v13435_v11 = vpop.eup %12085  ;;  %12093 = vpow2.f32 %v2989_v50  ;;  %v2993_v50 = vmul.f32 1.442695, %v2981_v2 }
 0x364   : > { %v3010_v5 = vsel %vm2855_vm0, %v13435_v11, 0.0  ;;  %v13439_v26 = vpop.eup %12087  ;;  %12095 = vpow2.f32 %v2985_v54 }
 0x365   : > { %3011 = vadd.xlane.f32.xlu0 %v3010_v5  ;;  %v3004_v30 = vsel %vm2855_vm0, %v13439_v26, 0.0  ;;  %12097 = vpow2.f32 %v2997_v44 }
 0x366   : > { %12099 = vpow2.f32 %v2993_v50 }
 0x369   : > { %3005 = vadd.xlane.f32.xlu0 %v3004_v30 }
 0x36b   : > { %v13445_v6 = vpop.eup %12089 }
 0x36c   : > { %v3022_v23 = vsel %vm2855_vm0, %v13445_v6, 0.0  ;;  %v13449_v13 = vpop.eup %12091 }
 0x36d   : > { %3023 = vadd.xlane.f32.xlu0 %v3022_v23  ;;  %v13451_v24 = vpop.eup %12093  ;;  %v3016_v12 = vsel %vm2855_vm0, %v13449_v13, 0.0 }
 0x36e   : > { %v3007_v49 = vsel %vm2855_vm0, %v13451_v24, 0.0  ;;  %v13457_v21 = vpop.eup %12095 }
 0x36f   : > { %v3001_v61 = vsel %vm2855_vm0, %v13457_v21, 0.0  ;;  %v13461_v17 = vpop.eup %12097 }
 0x370   : > { %v3019_v27 = vsel %vm2855_vm0, %v13461_v17, 0.0  ;;  %v13465_v8 = vpop.eup %12099 }
 0x371   : > { %3017 = vadd.xlane.f32.xlu0 %v3016_v12  ;;  %v3013_v52 = vsel %vm2855_vm0, %v13465_v8, 0.0 }
 0x373   : > { %3008 = vadd.xlane.f32.xlu1 %v3007_v49 }
 0x377   : > { %3002 = vadd.xlane.f32.xlu1 %v3001_v61 }
 0x37b   : > { %3020 = vadd.xlane.f32.xlu1 %v3019_v27 }
 0x37f   : > { %3014 = vadd.xlane.f32.xlu1 %v3013_v52 }
 0x3bf   : > { %v3271_v63 = vpop.xlane.xlu1 %3270 }
 0x3c0   : > { %v3289_v36 = vsub.f32 %v13382_v28, %v3271_v63 }
 0x3c2   : > { %v3299_v55 = vmul.f32 1.442695, %v3289_v36  ;;  %v3268_v5 = vpop.xlane.xlu0 %3267 }
 0x3c3   : > { %v3265_v54 = vpop.xlane.xlu1 %3264  ;;  %v3288_v46 = vsub.f32 %v13392_v41, %v3268_v5 }
 0x3c4   : > { %12101 = vpow2.f32 %v3299_v55  ;;  %v3287_v39 = vsub.f32 %v13388_v38, %v3265_v54 }
 0x3c5   : > { %v3297_v12 = vmul.f32 1.442695, %v3288_v46 }
 0x3c6   : > { %v3295_v30 = vmul.f32 1.442695, %v3287_v39  ;;  %v3274_v44 = vpop.xlane.xlu0 %3273 }
 0x3c7   : > { %v3290_v2 = vsub.f32 %v13398_v3, %v3274_v44  ;;  %v3283_v23 = vpop.xlane.xlu1 %3282 }
 0x3c8   : > { %12103 = vpow2.f32 %v3295_v30  ;;  %v3293_v50 = vsub.f32 %v13404_v20, %v3283_v23 }
 0x3c9   : > { %v3301_v49 = vmul.f32 1.442695, %v3290_v2 }
 0x3ca   : > { %v3307_v61 = vmul.f32 1.442695, %v3293_v50  ;;  %v3280_v28 = vpop.xlane.xlu0 %3279 }
 0x3cb   : > { %12105 = vpow2.f32 %v3301_v49  ;;  %v3277_v27 = vpop.xlane.xlu1 %3276  ;;  %v3292_v38 = vsub.f32 %v13416_v4, %v3280_v28 }
 0x3cc   : > { %12107 = vpow2.f32 %v3307_v61  ;;  %v3291_v52 = vsub.f32 %v13412_v57, %v3277_v27 }
 0x3cd   : > { %12109 = vpow2.f32 %v3297_v12  ;;  %v3305_v5 = vmul.f32 1.442695, %v3292_v38 }
 0x3ce   : > { %v13476_v41 = vpop.eup %12101  ;;  %v3303_v63 = vmul.f32 1.442695, %v3291_v52  ;;  %v3286_v3 = vpop.xlane.xlu0 %3285 }
 0x3cf   : > { %v3294_v36 = vsub.f32 %v13422_v1, %v3286_v3  ;;  %v13479_v55 = vpop.permute.xlu1 %3359  ;;  %v3317_v20 = vsel %vm2855_vm0, %v13476_v41, 0.0 }
 0x3d0   : > { %12111 = vpow2.f32 %v3303_v63  ;;  %3318 = vadd.xlane.f32.xlu1 %v3317_v20  ;;  %10548 = vmatprep.subr.bf16.mxu1 %v13479_v55 }
 0x3d1   : > { %v3309_v57 = vmul.f32 1.442695, %v3294_v36 }
 0x3d2   : > { %v13484_v54 = vpop.eup %12103 }
 0x3d3   : > { %12113 = vpow2.f32 %v3309_v57  ;;  %v3311_v4 = vsel %vm2855_vm0, %v13484_v54, 0.0 }
 0x3d4   : > { %3312 = vadd.xlane.f32.xlu1 %v3311_v4  ;;  %12115 = vpow2.f32 %v3305_v5 }
 0x3d5   : > { %v13488_v39 = vpop.eup %12105 }
 0x3d6   : > { %v13490_v1 = vpop.eup %12107  ;;  %v3320_v46 = vsel %vm2855_vm0, %v13488_v39, 0.0 }
 0x3d7   : > { %v13494_v30 = vpop.eup %12109  ;;  %3321 = vadd.xlane.f32.xlu0 %v3320_v46  ;;  %v3329_v44 = vsel %vm2855_vm0, %v13490_v1, 0.0 }
 0x3d8   : > { %3330 = vadd.xlane.f32.xlu1 %v3329_v44  ;;  %v3314_v23 = vsel %vm2855_vm0, %v13494_v30, 0.0 }
 0x3da   : > { %v13498_v2 = vpop.eup %12111 }
 0x3db   : > { %3315 = vadd.xlane.f32.xlu0 %v3314_v23  ;;  %v3323_v50 = vsel %vm2855_vm0, %v13498_v2, 0.0 }
 0x3dc   : > { %3324 = vadd.xlane.f32.xlu1 %v3323_v50 }
 0x3dd   : > { %v13504_v12 = vpop.eup %12113 }
 0x3de   : > { %v3332_v49 = vsel %vm2855_vm0, %v13504_v12, 0.0  ;;  %v13508_v61 = vpop.eup %12115 }
 0x3df   : > { %3333 = vadd.xlane.f32.xlu0 %v3332_v49  ;;  %v3326_v28 = vsel %vm2855_vm0, %v13508_v61, 0.0 }
 0x3e3   : > { %3327 = vadd.xlane.f32.xlu0 %v3326_v28 }
 0x3ed   : > { %3363 = vrot.lane.b32.xlu1 %v13199_v16, %s12637_s21 }
 0x3f1   : > { %3365 = vrot.lane.b32.xlu1 %v13211_v34, %s12637_s21 }
 0x3f2   : > { %v3012_v27 = vpop.xlane.xlu0 %3011 }
 0x3f6   : > { %v3006_v52 = vpop.xlane.xlu0 %3005 }
 0x3f9   : > { %3361 = vrot.lane.b32.xlu0 %v13187_v62, %s12637_s21 }
 0x3fa   : > { %v3024_v63 = vpop.xlane.xlu0 %3023 }
 0x3fe   : > { %v3018_v36 = vpop.xlane.xlu0 %3017 }
 0x400   : > { %v3009_v38 = vpop.xlane.xlu1 %3008 }
 0x401   : > { %12117 = vrcp.f32 %v3009_v38 }
 0x402   : > { %12119 = vrcp.f32 %v3006_v52 }
 0x403   : > { %12121 = vrcp.f32 %v3012_v27 }
 0x404   : > { %v3003_v3 = vpop.xlane.xlu1 %3002 }
 0x405   : > { %12123 = vrcp.f32 %v3003_v3 }
 0x408   : > { %v3021_v20 = vpop.xlane.xlu1 %3020 }
 0x409   : > { %12125 = vrcp.f32 %v3021_v20 }
 0x40a   : > { %12127 = vrcp.f32 %v3018_v36 }
 0x40b   : > { %v12118_v16 = vpop.eup %12117  ;;  %12129 = vrcp.f32 %v3024_v63 }
 0x40c   : > { %v3015_v5 = vpop.xlane.xlu1 %3014  ;;  %v12120_v34 = vpop.eup %12119  ;;  %v3035_v62 = vmul.f32 %v12118_v16, %v13451_v24 }
 0x40d   : > { %12131 = vrcp.f32 %v3015_v5  ;;  %v12122_v57 = vpop.eup %12121  ;;  %v3034_v44 = vmul.f32 %v12120_v34, %v13439_v26 }
 0x40e   : > { %v3036_v23 = vmul.f32 %v12122_v57, %v13435_v11 }
 0x40f   : > { %v12124_v4 = vpop.eup %12123 }
 0x410   : > { %v3033_v46 = vmul.f32 %v12124_v4, %v13457_v21  ;;  %v3042_v49 = vpack.c.bf16 %v3036_v23, %v3035_v62  ;;  %v11895_v23 = vld [vmem:[#allocation7 + $0x64] ss:$12 sps:$4 sm:$0xff]  }
 0x411   : > { %3544 = vmatprep.subr.bf16.mxu0 %v11895_v23 }
 0x412   : > { %v3041_v50 = vpack.c.bf16 %v3034_v44, %v3033_v46  ;;  %v11893_v44 = vld [vmem:[#allocation7 + $0x60] ss:$12 sps:$4 sm:$0xff]  }
 0x413   : > { %v12126_v28 = vpop.eup %12125  ;;  %3545 = vmatpush1.bf16.msra.mxu0 %v11893_v44 }
 0x414   : > { %10524 = vmatprep.mubr.msk.bf16.mxu1 %vm2855_vm0, %v3041_v50  ;;  %v12128_v27 = vpop.eup %12127  ;;  %v3039_v24 = vmul.f32 %v12126_v28, %v13461_v17  ;;  %v11898_v50 = vld [vmem:[#allocation7 + $0x7c] ss:$12 sps:$4 sm:$0xff]   ;;  %v11896_v28 = vld [vmem:[#allocation7 + $0x78] ss:$12 sps:$4 sm:$0xff]  }
 0x415   : > { %10525 = vmatmul.mubr.msk.bf16.vlgmr.msra.gmra.mrb[88].mxu1 %vm2855_vm0, %v3042_v49  ;;  %v12130_v52 = vpop.eup %12129  ;;  %v3038_v26 = vmul.f32 %v12128_v27, %v13449_v13  ;;  %3546 = vmatprep.subr.bf16.mxu0 %v11898_v50 }
 0x416   : > { %10549 = vmatpush3.bf16.msra.mxu1 %v13479_v55  ;;  %v3040_v11 = vmul.f32 %v12130_v52, %v13445_v6  ;;  %v11901_v52 = vld [vmem:[#allocation7 + $0x94] ss:$12 sps:$4 sm:$0xff]  }
 0x417   : > { %v12132_v38 = vpop.eup %12131  ;;  %3547 = vmatpush1.bf16.msra.mxu0 %v11896_v28 }
 0x418   : > { %v3037_v21 = vmul.f32 %v12132_v38, %v13465_v8  ;;  %v3044_v3 = vpack.c.bf16 %v3040_v11, %v3039_v24  ;;  %3548 = vmatprep.subr.bf16.mxu0 %v11901_v52 }
 0x41a   : > { %v3043_v63 = vpack.c.bf16 %v3038_v26, %v3037_v21  ;;  %v11899_v26 = vld [vmem:[#allocation7 + $0x90] ss:$12 sps:$4 sm:$0xff]  }
 0x41b   : > { %3549 = vmatpush1.bf16.msra.mxu0 %v11899_v26 }
 0x41c   : > { %10528 = vmatprep.mubr.msk.bf16.mxu1 %vm2855_vm0, %v3043_v63 }
 0x41d   : > { %10529 = vmatmul.mubr.msk.bf16.gmra.mrb[92].mxu1 %vm2855_vm0, %v3044_v3 }
 0x45d   : > { %v3319_v36 = vpop.xlane.xlu1 %3318 }
 0x461   : > { %v3313_v20 = vpop.xlane.xlu1 %3312 }
 0x462   : > { %12133 = vrcp.f32 %v3313_v20 }
 0x464   : > { %v3322_v16 = vpop.xlane.xlu0 %3321 }
 0x465   : > { %v3331_v55 = vpop.xlane.xlu1 %3330 }
 0x468   : > { %v3316_v5 = vpop.xlane.xlu0 %3315 }
 0x469   : > { %12135 = vrcp.f32 %v3316_v5  ;;  %v3325_v34 = vpop.xlane.xlu1 %3324  ;;  %v11904_v5 = vld [vmem:[#allocation7 + $0xac] ss:$12 sps:$4 sm:$0xff]  }
 0x46a   : > { %12137 = vrcp.f32 %v3322_v16  ;;  %3550 = vmatprep.subr.bf16.mxu0 %v11904_v5 }
 0x46b   : > { %12139 = vrcp.f32 %v3319_v36 }
 0x46c   : > { %v3334_v17 = vpop.xlane.xlu0 %3333  ;;  %12141 = vrcp.f32 %v3325_v34  ;;  %v12134_v6 = vpop.eup %12133  ;;  %v11907_v34 = vld [vmem:[#allocation7 + $0x4] ss:$12 sps:$4 sm:$0xff]  }
 0x46d   : > { %v3364_v57 = vpop.permute.xlu1 %3363  ;;  %v3343_v62 = vmul.f32 %v12134_v6, %v13484_v54 }
 0x470   : > { %v3328_v13 = vpop.xlane.xlu0 %3327 }
 0x471   : > { %12143 = vrcp.f32 %v3328_v13 }
 0x472   : > { %12145 = vrcp.f32 %v3334_v17  ;;  %v11902_v17 = vld [vmem:[#allocation7 + $0xa8] ss:$12 sps:$4 sm:$0xff]  }
 0x473   : > { %v12136_v8 = vpop.eup %12135  ;;  %12147 = vrcp.f32 %v3331_v55  ;;  %3551 = vmatpush1.bf16.msra.mxu0 %v11902_v17 }
 0x474   : > { %v3362_v4 = vpop.permute.xlu0 %3361  ;;  %v3344_v46 = vmul.f32 %v12136_v8, %v13494_v30  ;;  %v12138_v27 = vpop.eup %12137  ;;  %3758 = vmatprep.subr.bf16.mxu0 %v11907_v34  ;;  %v11920_v34 = vld [vmem:[#allocation7 + $0xb0] ss:$12 sps:$4 sm:$0xff]  }
 0x475   : > { %10550 = vmatprep.subr.bf16.mxu1 %v3362_v4  ;;  %v12140_v54 = vpop.eup %12139  ;;  %v3366_v30 = vpop.permute.xlu1 %3365  ;;  %v3346_v21 = vmul.f32 %v12138_v27, %v13488_v39 }
 0x476   : > { %10551 = vmatpush3.bf16.msra.mxu1 %v3362_v4  ;;  %v3351_v49 = vpack.c.bf16 %v3344_v46, %v3343_v62  ;;  %v12142_v38 = vpop.eup %12141  ;;  %v3345_v63 = vmul.f32 %v12140_v54, %v13476_v41 }
 0x477   : > { %10552 = vmatprep.subr.bf16.mxu1 %v3364_v57  ;;  %v3347_v3 = vmul.f32 %v12142_v38, %v13498_v2  ;;  %v15060_v2 = vmov 0  }
 0x478   : > { %10556 = vmatprep.mubr.msk.bf16.mxu1 %vm2855_vm0, %v3351_v49  ;;  %v3352_v36 = vpack.c.bf16 %v3346_v21, %v3345_v63  ;;  %v11910_v21 = vld [vmem:[#allocation7 + $0x1c] ss:$12 sps:$4 sm:$0xff]   ;;  %v11914_v63 = vld [vmem:[#allocation7 + $0x34] ss:$12 sps:$4 sm:$0xff]  }
 0x47a   : > { %10553 = vmatpush3.bf16.msra.mxu1 %v3364_v57 }
 0x47b   : > { %v12144_v24 = vpop.eup %12143  ;;  %10554 = vmatprep.subr.bf16.mxu1 %v3366_v30 }
 0x47c   : > { %v3348_v11 = vmul.f32 %v12144_v24, %v13508_v61  ;;  %v12146_v20 = vpop.eup %12145 }
 0x47d   : > { %v12148_v55 = vpop.eup %12147  ;;  %v3350_v39 = vmul.f32 %v12146_v20, %v13504_v12  ;;  %v11911_v12 = vld [vmem:[#allocation7 + $0x68] ss:$12 sps:$4 sm:$0xff]  }
 0x47e   : > { %10555 = vmatpush3.bf16.msra.mxu1 %v3366_v30  ;;  %v3353_v16 = vpack.c.bf16 %v3348_v11, %v3347_v3  ;;  %v3349_v61 = vmul.f32 %v12148_v55, %v13490_v1  ;;  %v11905_v30 = vld [vmem:[#allocation7] ss:$12 sps:$4 sm:$0xff]   ;;  %v11912_v55 = vld [vmem:[#allocation7 + $0x30] ss:$12 sps:$4 sm:$0xff]  }
 0x47f   : > { %11076 = vmatprep.subr.bf16.mxu1 %v11895_v23 }
 0x480   : > { %v3354_v41 = vpack.c.bf16 %v3350_v39, %v3349_v61  ;;  %v11915_v61 = vld [vmem:[#allocation7 + $0x80] ss:$12 sps:$4 sm:$0xff]  }
 0x481   : > { %10557 = vmatmul.mubr.msk.bf16.vlgmr.msra.gmra.mrb[96].mxu1 %vm2855_vm0, %v3352_v36 }
 0x482   : > { %10560 = vmatprep.mubr.msk.bf16.mxu1 %vm2855_vm0, %v3353_v16  ;;  %11080 = vmatpush1.bf16.msra.mxu1 %v11893_v44 }
 0x483   : > { %11077 = vmatprep.subr.bf16.mxu1 %v11898_v50 }
 0x486   : > { %11081 = vmatpush1.bf16.msra.mxu1 %v11896_v28 }
 0x487   : > { %11078 = vmatprep.subr.bf16.mxu1 %v11901_v52 }
 0x489   : > { %10561 = vmatmul.mubr.msk.bf16.gmra.mrb[100].mxu1 %vm2855_vm0, %v3354_v41  ;;  %v11918_v41 = vld [vmem:[#allocation7 + $0x4c] ss:$12 sps:$4 sm:$0xff]  }
 0x48a   : > { %11082 = vmatpush1.bf16.msra.mxu1 %v11899_v26  ;;  %3596 = vmatprep.mubr.bf16.mxu1 %v15060_v2  ;;  %v11908_v26 = vld [vmem:[#allocation7 + $0x18] ss:$12 sps:$4 sm:$0xff]  }
 0x48b   : > { %11079 = vmatprep.subr.bf16.mxu1 %v11904_v5  ;;  %v11916_v5 = vld [vmem:[#allocation7 + $0x48] ss:$12 sps:$4 sm:$0xff]  }
 0x48e   : > { %11083 = vmatpush1.bf16.msra.mxu1 %v11902_v17  ;;  %v11919_v17 = vld [vmem:[#allocation7 + $0x98] ss:$12 sps:$4 sm:$0xff]  }
 0x48f   : > { %10564 = vmatprep.subr.bf16.mxu1 %v11911_v12 }
 0x4e8   : > { %v10526_v13 = vpop.f32.mrb[88].mxu1 }
 0x4e9   : > { %v3091_v1 = vpop.f32.mrb[89].mxu1 }
 0x4ea   : > { %v10527_v6 = vpop.f32.mrb[90].mxu1 }
 0x4eb   : > { %v13544_v8 = vpack.c.bf16 %v10527_v6, %v10526_v13  ;;  %v3094_v57 = vpop.f32.mrb[91].mxu1  ;;  %v11922_v13 = vld [vmem:[#allocation7 + $0x20] ss:$12 sps:$4 sm:$0xff]   ;;  %v11924_v6 = vld [vmem:[#allocation7 + $0x50] ss:$12 sps:$4 sm:$0xff]  }
 0x4ec   : > { %v13546_v4 = vpack.c.bf16 %v3094_v57, %v3091_v1  ;;  %v11923_v1 = vld [vmem:[#allocation7 + $0x38] ss:$12 sps:$4 sm:$0xff]   ;;  %v3909_v57 = vsel %vm2855_vm0, %v13195_v56, 0 }
 0x4f0   : > { %v10530_v62 = vpop.f32.mrb[92].mxu1 }
 0x4f1   : > { %v3107_v46 = vpop.f32.mrb[93].mxu1 }
 0x4f2   : > { %v10531_v44 = vpop.f32.mrb[94].mxu1 }
 0x4f3   : > { %v13548_v23 = vpack.c.bf16 %v10531_v44, %v10530_v62  ;;  %v3110_v50 = vpop.f32.mrb[95].mxu1  ;;  %v3918_v62 = vsel %vm2855_vm0, %v13227_v7, 0 }
 0x4f4   : > { %v13550_v49 = vpack.c.bf16 %v3110_v50, %v3107_v46 }
 0x554   : > { %v10558_v28 = vpop.f32.mrb[96].mxu1 }
 0x555   : > { %v3417_v27 = vpop.f32.mrb[97].mxu1 }
 0x556   : > { %v10559_v52 = vpop.f32.mrb[98].mxu1 }
 0x557   : > { %v3449_v54 = vpack.c.bf16 %v10559_v52, %v10558_v28  ;;  %v3420_v38 = vpop.f32.mrb[99].mxu1 }
 0x558   : > { %v3448_v24 = vpack.c.bf16 %v3420_v38, %v3417_v27 }
 0x55a   : > { %9763 = vmatmul.mubr.msk.bf16.vlgmr.msra.gmra.mrb[104].mxu0 %vm2855_vm0, %v3448_v24 }
 0x55b   : > { %3759 = vmatpush1.bf16.msra.mxu0 %v11905_v30  ;;  %3586 = vmatprep.mubr.bf16.mxu0 %v15060_v2 }
 0x55c   : > { %v10562_v11 = vpop.f32.mrb[100].mxu1  ;;  %3760 = vmatprep.subr.bf16.mxu0 %v11910_v21 }
 0x55d   : > { %v3433_v3 = vpop.f32.mrb[101].mxu1 }
 0x55e   : > { %v10563_v36 = vpop.f32.mrb[102].mxu1 }
 0x55f   : > { %v3451_v20 = vpack.c.bf16 %v10563_v36, %v10562_v11  ;;  %3761 = vmatpush1.bf16.msra.mxu0 %v11908_v26  ;;  %v3436_v16 = vpop.f32.mrb[103].mxu1 }
 0x560   : > { %v3450_v39 = vpack.c.bf16 %v3436_v16, %v3433_v3  ;;  %3762 = vmatprep.subr.bf16.mxu0 %v11914_v63 }
 0x562   : > { %9764 = vmatmul.mubr.msk.bf16.gmra.mrb[108].mxu0 %vm2855_vm0, %v3449_v54  ;;  %9765 = vmatmul.mubr.msk.bf16.vlgmr.msra.gmra.mrb[104].mxu1 %vm2855_vm0, %v3450_v39 }
 0x563   : > { %10565 = vmatpush3.bf16.msra.mxu1 %v11911_v12  ;;  %3763 = vmatpush1.bf16.msra.mxu0 %v11912_v55  ;;  %v11921_v12 = vld [vmem:[#allocation7 + $0x8] ss:$12 sps:$4 sm:$0xff]  }
 0x564   : > { %10566 = vmatprep.subr.bf16.mxu1 %v11915_v61  ;;  %3764 = vmatprep.subr.bf16.mxu0 %v11918_v41 }
 0x565   : > { %3606 = vmatprep.mubr.bf16.mxu1 %v15060_v2  ;;  %3790 = vmatprep.mubr.bf16.mxu0 %v15060_v2 }
 0x567   : > { %10567 = vmatpush3.bf16.msra.mxu1 %v11915_v61  ;;  %3765 = vmatpush1.bf16.msra.mxu0 %v11916_v5 }
 0x568   : > { %10612 = vmatprep.subr.bf16.mxu0 %v13180_v42  ;;  %10568 = vmatprep.subr.bf16.mxu1 %v11919_v17 }
 0x56a   : > { %9766 = vmatmul.mubr.msk.bf16.gmra.mrb[108].mxu1 %vm2855_vm0, %v3451_v20  ;;  %9783 = vmatmul.mubr.msk.bf16.vlgmr.msra.gmra.mrb[104].mxu0 %vm2855_vm0, %v13546_v4 }
 0x56b   : > { %10569 = vmatpush3.bf16.msra.mxu1 %v11919_v17  ;;  %10613 = vmatpush3.bf16.msra.mxu0 %v13180_v42 }
 0x56c   : > { %10572 = vmatprep.mubr.msk.bf16.mxu1 %vm2855_vm0, %v3448_v24  ;;  %10614 = vmatprep.subr.bf16.mxu0 %v13189_v10 }
 0x56d   : > { %10570 = vmatprep.subr.bf16.mxu1 %v11920_v34  ;;  %3800 = vmatprep.mubr.bf16.mxu0 %v15060_v2 }
 0x56f   : > { %10571 = vmatpush3.bf16.msra.mxu1 %v11920_v34  ;;  %10615 = vmatpush3.bf16.msra.mxu0 %v13189_v10 }
 0x570   : > { %10616 = vmatprep.subr.bf16.mxu0 %v13201_v37  ;;  %10580 = vmatprep.subr.bf16.mxu1 %v11921_v12 }
 0x572   : > { %10573 = vmatmul.mubr.msk.bf16.vlgmr.msra.gmra.mrb[112].mxu1 %vm2855_vm0, %v3449_v54  ;;  %9784 = vmatmul.mubr.msk.bf16.gmra.mrb[108].mxu0 %vm2855_vm0, %v13544_v8 }
 0x573   : > { %10581 = vmatpush3.bf16.msra.mxu1 %v11921_v12  ;;  %10617 = vmatpush3.bf16.msra.mxu0 %v13201_v37 }
 0x574   : > { %10576 = vmatprep.mubr.msk.bf16.mxu1 %vm2855_vm0, %v3450_v39  ;;  %10618 = vmatprep.subr.bf16.mxu0 %v13213_v40 }
 0x575   : > { %10582 = vmatprep.subr.bf16.mxu1 %v11922_v13  ;;  %3810 = vmatprep.mubr.bf16.mxu0 %v15060_v2 }
 0x577   : > { %10583 = vmatpush3.bf16.msra.mxu1 %v11922_v13  ;;  %10619 = vmatpush3.bf16.msra.mxu0 %v13213_v40 }
 0x578   : > { %10584 = vmatprep.subr.bf16.mxu1 %v11923_v1 }
 0x57a   : > { %10577 = vmatmul.mubr.msk.bf16.gmra.mrb[116].mxu1 %vm2855_vm0, %v3451_v20  ;;  %9785 = vmatmul.mubr.msk.bf16.gmra.mrb[112].mxu0 %vm2855_vm0, %v13550_v49 }
 0x57b   : > { %10585 = vmatpush3.bf16.msra.mxu1 %v11923_v1  ;;  %10588 = vmatprep.mubr.msk.bf16.mxu1 %vm2855_vm0, %v13546_v4  ;;  %v3912_v4 = vsel %vm2855_vm0, %v13206_v25, 0 }
 0x57c   : > { %10586 = vmatprep.subr.bf16.mxu1 %v11924_v6  ;;  %3820 = vmatprep.mubr.bf16.mxu0 %v15060_v2 }
 0x57f   : > { %10587 = vmatpush3.bf16.msra.mxu1 %v11924_v6 }
 0x580   : > { %11460 = vmatprep.subr.msk.bf16.mxu1 %vm2855_vm0, %v13195_v56 }
 0x582   : > { %9786 = vmatmul.mubr.msk.bf16.gmra.mrb[116].mxu0 %vm2855_vm0, %v13548_v23  ;;  %10589 = vmatmul.mubr.msk.bf16.vlgmr.msra.gmra.mrb[112].mxu1 %vm2855_vm0, %v13544_v8  ;;  %v3915_v8 = vsel %vm2855_vm0, %v13218_v47, 0 }
 0x583   : > { %10592 = vmatprep.mubr.msk.bf16.mxu1 %vm2855_vm0, %v13550_v49 }
 0x588   : > { %10597 = vmatpush3.bf16.xpose.msra.mxu1 %v3909_v57 }
 0x589   : > { %11461 = vmatprep.subr.msk.bf16.mxu1 %vm2855_vm0, %v13206_v25 }
 0x58a   : > { %10593 = vmatmul.mubr.msk.bf16.gmra.mrb[116].mxu1 %vm2855_vm0, %v13548_v23 }
 0x58b   : > { %10604 = vmatprep.mubr.msk.bf16.mxu1 %vm2855_vm0, %v13091_v9 }
 0x590   : > { %10599 = vmatpush3.bf16.xpose.msra.mxu1 %v3912_v4 }
 0x591   : > { %11462 = vmatprep.subr.msk.bf16.mxu1 %vm2855_vm0, %v13218_v47 }
 0x598   : > { %10601 = vmatpush3.bf16.xpose.msra.mxu1 %v3915_v8 }
 0x599   : > { %11463 = vmatprep.subr.msk.bf16.mxu1 %vm2855_vm0, %v13227_v7 }
 0x5a0   : > { %10603 = vmatpush3.bf16.xpose.msra.mxu1 %v3918_v62 }
 0x5a7   : > { %10605 = vmatmul.mubr.msk.bf16.vlgmr.msra.gmra.mrb[120].mxu1 %vm2855_vm0, %v13104_v59 }
 0x5a8   : > { %10608 = vmatprep.mubr.msk.bf16.mxu1 %vm2855_vm0, %v13114_v14 }
 0x5af   : > { %10609 = vmatmul.mubr.msk.bf16.gmra.mrb[124].mxu1 %vm2855_vm0, %v13124_v33 }
 0x635   : > { %v13614_v46 = vpop.f32.mrb[104].mxu1 }
 0x636   : > { %v13616_v44 = vpop.f32.mrb[105].mxu1 }
 0x637   : > { %v13618_v23 = vpop.f32.mrb[106].mxu1 }
 0x638   : > { %v13620_v50 = vpop.f32.mrb[107].mxu1 }
 0x63d   : > { %v13622_v49 = vpop.f32.mrb[108].mxu1 }
 0x63e   : > { %v13624_v28 = vpop.f32.mrb[109].mxu1 }
 0x63f   : > { %v13626_v27 = vpop.f32.mrb[110].mxu1 }
 0x640   : > { %v13628_v52 = vpop.f32.mrb[111].mxu1 }
 0x67a   : > { %v10606_v54 = vpop.f32.mrb[120].mxu1 }
 0x67b   : > { %v3954_v38 = vpop.f32.mrb[121].mxu1  ;;  %v3987_v11 = vsel %vm13285_vm1, %v10606_v54, -inf }
 0x67c   : > { %v3985_v30 = vsel %vm13290_vm2, %v3954_v38, -inf  ;;  %v10607_v24 = vpop.f32.mrb[122].mxu1  ;;  %v3999_v36 = vsel %vm2855_vm0, %v3987_v11, -inf }
 0x67d   : > { %v3957_v21 = vpop.f32.mrb[123].mxu1  ;;  %v3993_v26 = vsel %vm2855_vm0, %v3985_v30, -inf  ;;  %v3988_v20 = vsel %vm13312_vm4, %v10607_v24, -inf }
 0x67e   : > { %v3986_v63 = vsel %vm13299_vm3, %v3957_v21, -inf  ;;  %3994 = vmax.xlane.f32.xlu0 %v3993_v26  ;;  %v4002_v5 = vsel %vm2855_vm0, %v3988_v20, -inf }
 0x67f   : > { %v3996_v3 = vsel %vm2855_vm0, %v3986_v63, -inf }
 0x680   : > { %3997 = vmax.xlane.f32.xlu1 %v3996_v3 }
 0x682   : > { %4000 = vmax.xlane.f32.xlu0 %v3999_v36  ;;  %v10610_v16 = vpop.f32.mrb[124].mxu1 }
 0x683   : > { %v3970_v55 = vpop.f32.mrb[125].mxu1  ;;  %v3991_v34 = vsel %vm13328_vm5, %v10610_v16, -inf }
 0x684   : > { %v3989_v39 = vsel %vm13336_vm6, %v3970_v55, -inf  ;;  %v10611_v61 = vpop.f32.mrb[126].mxu1  ;;  %v4011_v13 = vsel %vm2855_vm0, %v3991_v34, -inf }
 0x685   : > { %v3973_v41 = vpop.f32.mrb[127].mxu1  ;;  %v4005_v17 = vsel %vm2855_vm0, %v3989_v39, -inf  ;;  %v3992_v6 = vsel %vm13359_vm8, %v10611_v61, -inf }
 0x686   : > { %v3990_v12 = vsel %vm13345_vm7, %v3973_v41, -inf  ;;  %4003 = vmax.xlane.f32.xlu0 %v4002_v5  ;;  %4006 = vmax.xlane.f32.xlu1 %v4005_v17  ;;  %v4014_v57 = vsel %vm2855_vm0, %v3992_v6, -inf }
 0x687   : > { %v4008_v1 = vsel %vm2855_vm0, %v3990_v12, -inf }
 0x68a   : > { %4012 = vmax.xlane.f32.xlu1 %v4011_v13  ;;  %4009 = vmax.xlane.f32.xlu0 %v4008_v1 }
 0x68e   : > { %4015 = vmax.xlane.f32.xlu0 %v4014_v57 }
 0x70b   : > { %v3995_v4 = vpop.xlane.xlu0 %3994 }
 0x70c   : > { %v4017_v8 = vsub.f32 %v3985_v30, %v3995_v4 }
 0x70d   : > { %v3998_v62 = vpop.xlane.xlu1 %3997 }
 0x70e   : > { %v4025_v54 = vmul.f32 1.442695, %v4017_v8  ;;  %v4018_v38 = vsub.f32 %v3986_v63, %v3998_v62 }
 0x70f   : > { %v4001_v24 = vpop.xlane.xlu0 %4000 }
 0x710   : > { %12149 = vpow2.f32 %v4025_v54  ;;  %v4027_v21 = vmul.f32 1.442695, %v4018_v38  ;;  %v4019_v26 = vsub.f32 %v3987_v11, %v4001_v24 }
 0x712   : > { %12151 = vpow2.f32 %v4027_v21  ;;  %v4029_v3 = vmul.f32 1.442695, %v4019_v26 }
 0x713   : > { %v4004_v36 = vpop.xlane.xlu0 %4003  ;;  %v4007_v16 = vpop.xlane.xlu1 %4006 }
 0x714   : > { %12153 = vpow2.f32 %v4029_v3  ;;  %v4020_v55 = vsub.f32 %v3988_v20, %v4004_v36  ;;  %v4021_v61 = vsub.f32 %v3989_v39, %v4007_v16 }
 0x716   : > { %v4031_v41 = vmul.f32 1.442695, %v4020_v55  ;;  %v4033_v5 = vmul.f32 1.442695, %v4021_v61 }
 0x717   : > { %v4013_v17 = vpop.xlane.xlu1 %4012  ;;  %v4010_v13 = vpop.xlane.xlu0 %4009 }
 0x718   : > { %12155 = vpow2.f32 %v4031_v41  ;;  %v4023_v30 = vsub.f32 %v3991_v34, %v4013_v17  ;;  %v4022_v1 = vsub.f32 %v3990_v12, %v4010_v13  ;;  %v11925_v41 = vld [vmem:[#allocation7 + $0xc8] ss:$12 sps:$4 sm:$0xff]   ;;  %v11927_v17 = vld [vmem:[#allocation7 + $0xf8] ss:$12 sps:$4 sm:$0xff]   ;;  %v11928_v13 = vld [vmem:[#allocation7 + $0x110] ss:$12 sps:$4 sm:$0xff]  }
 0x719   : > { %12157 = vpow2.f32 %v4033_v5  ;;  %10628 = vmatprep.subr.bf16.mxu1 %v11925_v41  ;;  %v11926_v5 = vld [vmem:[#allocation7 + $0xe0] ss:$12 sps:$4 sm:$0xff]  }
 0x71a   : > { %v13654_v63 = vpop.eup %12149  ;;  %v4037_v57 = vmul.f32 1.442695, %v4023_v30  ;;  %v4035_v4 = vmul.f32 1.442695, %v4022_v1  ;;  %10629 = vmatpush3.bf16.msra.mxu1 %v11925_v41 }
 0x71b   : > { %v4016_v11 = vpop.xlane.xlu0 %4015  ;;  %v4041_v8 = vsel %vm2855_vm0, %v13654_v63, 0.0  ;;  %10630 = vmatprep.subr.bf16.mxu1 %v11926_v5 }
 0x71c   : > { %v13658_v62 = vpop.eup %12151  ;;  %12159 = vpow2.f32 %v4037_v57  ;;  %v4024_v20 = vsub.f32 %v3992_v6, %v4016_v11  ;;  %4042 = vadd.xlane.f32.xlu1 %v4041_v8 }
 0x71d   : > { %12161 = vpow2.f32 %v4035_v4  ;;  %v4044_v39 = vsel %vm2855_vm0, %v13658_v62, 0.0 }
 0x71e   : > { %v13662_v34 = vpop.eup %12153  ;;  %v4039_v12 = vmul.f32 1.442695, %v4024_v20  ;;  %4045 = vadd.xlane.f32.xlu0 %v4044_v39  ;;  %10631 = vmatpush3.bf16.msra.mxu1 %v11926_v5 }
 0x71f   : > { %v4047_v54 = vsel %vm2855_vm0, %v13662_v34, 0.0  ;;  %10632 = vmatprep.subr.bf16.mxu1 %v11927_v17 }
 0x720   : > { %12163 = vpow2.f32 %v4039_v12  ;;  %4048 = vadd.xlane.f32.xlu1 %v4047_v54 }
 0x722   : > { %v13666_v38 = vpop.eup %12155  ;;  %10633 = vmatpush3.bf16.msra.mxu1 %v11927_v17 }
 0x723   : > { %v13668_v24 = vpop.eup %12157  ;;  %v4050_v6 = vsel %vm2855_vm0, %v13666_v38, 0.0  ;;  %10634 = vmatprep.subr.bf16.mxu1 %v11928_v13 }
 0x724   : > { %v4053_v21 = vsel %vm2855_vm0, %v13668_v24, 0.0  ;;  %4051 = vadd.xlane.f32.xlu0 %v4050_v6 }
 0x725   : > { %4054 = vadd.xlane.f32.xlu1 %v4053_v21  ;;  %v11929_v21 = vld [vmem:[#allocation7 + $0xc0] ss:$12 sps:$4 sm:$0xff]  }
 0x726   : > { %v13674_v26 = vpop.eup %12159  ;;  %10635 = vmatpush3.bf16.msra.mxu1 %v11928_v13  ;;  %v11937_v13 = vld [vmem:[#allocation7 + $0xf4] ss:$12 sps:$4 sm:$0xff]  }
 0x727   : > { %v13676_v3 = vpop.eup %12161  ;;  %v4059_v36 = vsel %vm2855_vm0, %v13674_v26, 0.0 }
 0x728   : > { %v4056_v16 = vsel %vm2855_vm0, %v13676_v3, 0.0 }
 0x729   : > { %4060 = vadd.xlane.f32.xlu1 %v4059_v36  ;;  %4057 = vadd.xlane.f32.xlu0 %v4056_v16  ;;  %v11934_v36 = vld [vmem:[#allocation7 + $0xdc] ss:$12 sps:$4 sm:$0xff]  }
 0x72a   : > { %v13682_v55 = vpop.eup %12163 }
 0x72b   : > { %v4062_v61 = vsel %vm2855_vm0, %v13682_v55, 0.0 }
 0x72d   : > { %4063 = vadd.xlane.f32.xlu0 %v4062_v61  ;;  %v11932_v61 = vld [vmem:[#allocation7 + $0xd8] ss:$12 sps:$4 sm:$0xff]  }
 0x73a   : > { %4436 = vrot.lane.b32.xlu1 %v13195_v56, %s12637_s21  ;;  %v11931_v56 = vld [vmem:[#allocation7 + $0xc4] ss:$12 sps:$4 sm:$0xff]  }
 0x73b   : > { %4258 = vmatprep.subr.bf16.mxu0 %v11931_v56 }
 0x73e   : > { %4440 = vrot.lane.b32.xlu1 %v13218_v47, %s12637_s21 }
 0x742   : > { %4442 = vrot.lane.b32.xlu1 %v13227_v7, %s12637_s21 }
 0x743   : > { %4438 = vrot.lane.b32.xlu0 %v13206_v25, %s12637_s21 }
 0x746   : > { %4426 = vrot.lane.b32.xlu1 %v13104_v59, %s12637_s21 }
 0x747   : > { %4424 = vrot.lane.b32.xlu0 %v13091_v9, %s12637_s21 }
 0x74a   : > { %4430 = vrot.lane.b32.xlu1 %v13124_v33, %s12637_s21 }
 0x74b   : > { %4428 = vrot.lane.b32.xlu0 %v13114_v14, %s12637_s21 }
 0x7a9   : > { %v4043_v47 = vpop.xlane.xlu1 %4042 }
 0x7aa   : > { %12165 = vrcp.f32 %v4043_v47 }
 0x7ab   : > { %v4046_v7 = vpop.xlane.xlu0 %4045 }
 0x7ac   : > { %12167 = vrcp.f32 %v4046_v7  ;;  %v11935_v7 = vld [vmem:[#allocation7 + $0xf0] ss:$12 sps:$4 sm:$0xff]  }
 0x7ad   : > { %v4049_v30 = vpop.xlane.xlu1 %4048 }
 0x7ae   : > { %12169 = vrcp.f32 %v4049_v30 }
 0x7b1   : > { %v4052_v25 = vpop.xlane.xlu0 %4051 }
 0x7b2   : > { %v4055_v1 = vpop.xlane.xlu1 %4054  ;;  %12171 = vrcp.f32 %v4052_v25 }
 0x7b3   : > { %12173 = vrcp.f32 %v4055_v1 }
 0x7b4   : > { %v12166_v59 = vpop.eup %12165 }
 0x7b5   : > { %v4073_v33 = vmul.f32 %v12166_v59, %v13654_v63 }
 0x7b6   : > { %v12168_v57 = vpop.eup %12167  ;;  %v4061_v9 = vpop.xlane.xlu1 %4060 }
 0x7b7   : > { %v4058_v4 = vpop.xlane.xlu0 %4057  ;;  %v4074_v11 = vmul.f32 %v12168_v57, %v13658_v62 }
 0x7b8   : > { %12175 = vrcp.f32 %v4058_v4  ;;  %v12170_v8 = vpop.eup %12169 }
 0x7b9   : > { %12177 = vrcp.f32 %v4061_v9  ;;  %v4081_v14 = vpack.c.bf16 %v4074_v11, %v4073_v33  ;;  %v4075_v54 = vmul.f32 %v12170_v8, %v13662_v34 }
 0x7ba   : > { %v4437_v20 = vpop.permute.xlu1 %4436 }
 0x7bb   : > { %v4064_v39 = vpop.xlane.xlu0 %4063  ;;  %11464 = vmatprep.subr.msk.bf16.mxu1 %vm2855_vm0, %v4437_v20  ;;  %10620 = vmatprep.mubr.msk.bf16.mxu0 %vm2855_vm0, %v4081_v14  ;;  %v4457_v9 = vsel %vm2855_vm0, %v4437_v20, 0 }
 0x7bc   : > { %12179 = vrcp.f32 %v4064_v39  ;;  %v12172_v12 = vpop.eup %12171 }
 0x7bd   : > { %v4076_v6 = vmul.f32 %v12172_v12, %v13666_v38  ;;  %v12174_v62 = vpop.eup %12173 }
 0x7be   : > { %v4077_v5 = vmul.f32 %v12174_v62, %v13668_v24  ;;  %v11940_v24 = vld [vmem:[#allocation7 + $0x10c] ss:$12 sps:$4 sm:$0xff]  }
 0x7bf   : > { %v4082_v63 = vpack.c.bf16 %v4076_v6, %v4075_v54  ;;  %v4439_v4 = vpop.permute.xlu0 %4438  ;;  %v4441_v6 = vpop.permute.xlu1 %4440 }
 0x7c0   : > { %v4460_v20 = vsel %vm2855_vm0, %v4439_v4, 0 }
 0x7c1   : > { %10621 = vmatmul.mubr.msk.bf16.vlgmr.msra.gmra.mrb[120].mxu0 %vm2855_vm0, %v4082_v63 }
 0x7c2   : > { %v12176_v16 = vpop.eup %12175  ;;  %4259 = vmatpush1.bf16.msra.mxu0 %v11929_v21  ;;  %v4463_v21 = vsel %vm2855_vm0, %v4441_v6, 0 }
 0x7c3   : > { %v12178_v41 = vpop.eup %12177  ;;  %v4078_v17 = vmul.f32 %v12176_v16, %v13676_v3  ;;  %4260 = vmatprep.subr.bf16.mxu0 %v11934_v36  ;;  %v11938_v3 = vld [vmem:[#allocation7 + $0x108] ss:$12 sps:$4 sm:$0xff]   ;;  %v4425_v54 = vpop.permute.xlu0 %4424  ;;  %v11942_v16 = vld [vmem:[#allocation7 + $0x140] ss:$12 sps:$4 sm:$0xff]  }
 0x7c4   : > { %v4079_v38 = vmul.f32 %v12178_v41, %v13674_v26  ;;  %v4443_v63 = vpop.permute.xlu1 %4442  ;;  %v11941_v36 = vld [vmem:[#allocation7 + $0x128] ss:$12 sps:$4 sm:$0xff]  }
 0x7c5   : > { %v4083_v34 = vpack.c.bf16 %v4078_v17, %v4077_v5  ;;  %v4466_v62 = vsel %vm2855_vm0, %v4443_v63, 0  ;;  %v11943_v5 = vld [vmem:[#allocation7 + $0x158] ss:$12 sps:$4 sm:$0xff]   ;;  %v11944_v17 = vld [vmem:[#allocation7 + $0x170] ss:$12 sps:$4 sm:$0xff]  }
 0x7c6   : > { %v12180_v56 = vpop.eup %12179  ;;  %4261 = vmatpush1.bf16.msra.mxu0 %v11932_v61 }
 0x7c7   : > { %v4080_v47 = vmul.f32 %v12180_v56, %v13682_v55  ;;  %10624 = vmatprep.mubr.msk.bf16.mxu0 %vm2855_vm0, %v4083_v34  ;;  %4262 = vmatprep.subr.bf16.mxu0 %v11937_v13  ;;  %v4429_v41 = vpop.permute.xlu0 %4428 }
 0x7c8   : > { %v4427_v61 = vpop.permute.xlu1 %4426 }
 0x7c9   : > { %v4084_v30 = vpack.c.bf16 %v4080_v47, %v4079_v38 }
 0x7ca   : > { %4263 = vmatpush1.bf16.msra.mxu0 %v11935_v7 }
 0x7cb   : > { %10625 = vmatmul.mubr.msk.bf16.gmra.mrb[124].mxu0 %vm2855_vm0, %v4084_v30  ;;  %4264 = vmatprep.subr.bf16.mxu0 %v11940_v24 }
 0x7cc   : > { %4290 = vmatprep.mubr.bf16.mxu0 %v15060_v2  ;;  %v4431_v13 = vpop.permute.xlu1 %4430 }
 0x7ce   : > { %4265 = vmatpush1.bf16.msra.mxu0 %v11938_v3 }
 0x894   : > { %v10622_v25 = vpop.f32.mrb[120].mxu0 }
 0x895   : > { %v4131_v1 = vpop.f32.mrb[121].mxu0 }
 0x896   : > { %v10623_v26 = vpop.f32.mrb[122].mxu0 }
 0x897   : > { %v4163_v59 = vpack.c.bf16 %v10623_v26, %v10622_v25  ;;  %v4134_v55 = vpop.f32.mrb[123].mxu0 }
 0x898   : > { %v4162_v57 = vpack.c.bf16 %v4134_v55, %v4131_v1 }
 0x89a   : > { %9811 = vmatmul.mubr.msk.bf16.vlgmr.msra.gmra.mrb[104].mxu0 %vm2855_vm0, %v4162_v57  ;;  %10636 = vmatprep.mubr.msk.bf16.mxu1 %vm2855_vm0, %v4162_v57 }
 0x89b   : > { %10637 = vmatmul.mubr.msk.bf16.vlgmr.msra.gmra.mrb[112].mxu1 %vm2855_vm0, %v4163_v59  ;;  %4300 = vmatprep.mubr.bf16.mxu0 %v15060_v2 }
 0x89c   : > { %10645 = vmatpush3.bf16.xpose.msra.mxu1 %v4457_v9 }
 0x89d   : > { %11465 = vmatprep.subr.msk.bf16.mxu1 %vm2855_vm0, %v4439_v4 }
 0x89e   : > { %v10626_v33 = vpop.f32.mrb[124].mxu0 }
 0x89f   : > { %v4147_v11 = vpop.f32.mrb[125].mxu0 }
 0x8a0   : > { %v10627_v14 = vpop.f32.mrb[126].mxu0 }
 0x8a1   : > { %v4165_v8 = vpack.c.bf16 %v10627_v14, %v10626_v33  ;;  %v4150_v39 = vpop.f32.mrb[127].mxu0 }
 0x8a2   : > { %v4164_v12 = vpack.c.bf16 %v4150_v39, %v4147_v11  ;;  %9812 = vmatmul.mubr.msk.bf16.gmra.mrb[108].mxu0 %vm2855_vm0, %v4163_v59 }
 0x8a3   : > { %4310 = vmatprep.mubr.bf16.mxu0 %v15060_v2 }
 0x8a4   : > { %10640 = vmatprep.mubr.msk.bf16.mxu1 %vm2855_vm0, %v4164_v12  ;;  %10647 = vmatpush3.bf16.xpose.msra.mxu1 %v4460_v20 }
 0x8a5   : > { %10641 = vmatmul.mubr.msk.bf16.gmra.mrb[116].mxu1 %vm2855_vm0, %v4165_v8  ;;  %11466 = vmatprep.subr.msk.bf16.mxu1 %vm2855_vm0, %v4441_v6 }
 0x8a6   : > { %10652 = vmatprep.mubr.msk.bf16.mxu1 %vm2855_vm0, %v4425_v54 }
 0x8aa   : > { %9813 = vmatmul.mubr.msk.bf16.gmra.mrb[112].mxu0 %vm2855_vm0, %v4164_v12 }
 0x8ab   : > { %4320 = vmatprep.mubr.bf16.mxu0 %v15060_v2 }
 0x8ac   : > { %10649 = vmatpush3.bf16.xpose.msra.mxu1 %v4463_v21 }
 0x8ad   : > { %11467 = vmatprep.subr.msk.bf16.mxu1 %vm2855_vm0, %v4443_v63 }
 0x8b2   : > { %9814 = vmatmul.mubr.msk.bf16.gmra.mrb[116].mxu0 %vm2855_vm0, %v4165_v8 }
 0x8b4   : > { %10651 = vmatpush3.bf16.xpose.msra.mxu1 %v4466_v62 }
 0x8b5   : > { %10676 = vmatprep.subr.bf16.mxu1 %v11941_v36 }
 0x8bb   : > { %10653 = vmatmul.mubr.msk.bf16.vlgmr.msra.gmra.mrb[128].mxu1 %vm2855_vm0, %v4427_v61 }
 0x8bc   : > { %10656 = vmatprep.mubr.msk.bf16.mxu1 %vm2855_vm0, %v4429_v41  ;;  %10677 = vmatpush3.bf16.msra.mxu1 %v11941_v36 }
 0x8bd   : > { %10678 = vmatprep.subr.bf16.mxu1 %v11942_v16 }
 0x8c0   : > { %10679 = vmatpush3.bf16.msra.mxu1 %v11942_v16 }
 0x8c1   : > { %10680 = vmatprep.subr.bf16.mxu1 %v11943_v5 }
 0x8c3   : > { %10657 = vmatmul.mubr.msk.bf16.gmra.mrb[132].mxu1 %vm2855_vm0, %v4431_v13 }
 0x8c4   : > { %10681 = vmatpush3.bf16.msra.mxu1 %v11943_v5 }
 0x8c5   : > { %10682 = vmatprep.subr.bf16.mxu1 %v11944_v17 }
 0x8c8   : > { %10683 = vmatpush3.bf16.msra.mxu1 %v11944_v17 }
 0x8c9   : > { %11468 = vmatprep.subr.msk.bf16.mxu1 %vm2855_vm0, %v13197_v60 }
 0x98e   : > { %v10654_v56 = vpop.f32.mrb[128].mxu1 }
 0x98f   : > { %v4535_v34 = vsel %vm13285_vm1, %v10654_v56, -inf  ;;  %v4502_v38 = vpop.f32.mrb[129].mxu1 }
 0x990   : > { %v10655_v47 = vpop.f32.mrb[130].mxu1  ;;  %v4547_v7 = vsel %vm2855_vm0, %v4535_v34, -inf  ;;  %v4533_v30 = vsel %vm13290_vm2, %v4502_v38, -inf }
 0x991   : > { %4548 = vmax.xlane.f32.xlu0 %v4547_v7  ;;  %v4505_v24 = vpop.f32.mrb[131].mxu1  ;;  %v4541_v1 = vsel %vm2855_vm0, %v4533_v30, -inf  ;;  %v4536_v26 = vsel %vm13312_vm4, %v10655_v47, -inf }
 0x992   : > { %v4534_v3 = vsel %vm13299_vm3, %v4505_v24, -inf  ;;  %v4550_v4 = vsel %vm2855_vm0, %v4536_v26, -inf }
 0x993   : > { %v4544_v25 = vsel %vm2855_vm0, %v4534_v3, -inf }
 0x994   : > { %4545 = vmax.xlane.f32.xlu1 %v4544_v25 }
 0x995   : > { %4542 = vmax.xlane.f32.xlu0 %v4541_v1 }
 0x996   : > { %v10658_v59 = vpop.f32.mrb[132].mxu1 }
 0x997   : > { %v4539_v55 = vsel %vm13328_vm5, %v10658_v59, -inf  ;;  %v4518_v57 = vpop.f32.mrb[133].mxu1 }
 0x998   : > { %v10659_v9 = vpop.f32.mrb[134].mxu1  ;;  %v4559_v33 = vsel %vm2855_vm0, %v4539_v55, -inf  ;;  %v13757_v11 = vsel %vm13336_vm6, %v4518_v57, -inf }
 0x999   : > { %v13761_v14 = vsel %vm13359_vm8, %v10659_v9, -inf  ;;  %4551 = vmax.xlane.f32.xlu0 %v4550_v4  ;;  %4560 = vmax.xlane.f32.xlu1 %v4559_v33  ;;  %v4521_v8 = vpop.f32.mrb[135].mxu1  ;;  %v4553_v39 = vsel %vm2855_vm0, %v13757_v11, -inf }
 0x99a   : > { %v4562_v12 = vsel %vm2855_vm0, %v13761_v14, -inf  ;;  %v4538_v54 = vsel %vm13345_vm7, %v4521_v8, -inf }
 0x99b   : > { %v4556_v20 = vsel %vm2855_vm0, %v4538_v54, -inf }
 0x99d   : > { %4554 = vmax.xlane.f32.xlu1 %v4553_v39  ;;  %4563 = vmax.xlane.f32.xlu0 %v4562_v12 }
 0x9a1   : > { %4557 = vmax.xlane.f32.xlu0 %v4556_v20 }
 0x9ae   : > { %4637 = vrot.lane.b32.xlu1 %v13180_v42, %s12637_s21 }
 0x9b7   : > { %4639 = vrot.lane.b32.xlu0 %v13189_v10, %s12637_s21 }
 0xa1e   : > { %v4549_v6 = vpop.xlane.xlu0 %4548 }
 0xa1f   : > { %v4567_v21 = vsub.f32 %v4535_v34, %v4549_v6 }
 0xa21   : > { %v4577_v63 = vmul.f32 1.442695, %v4567_v21  ;;  %v4546_v36 = vpop.xlane.xlu1 %4545 }
 0xa22   : > { %v4543_v62 = vpop.xlane.xlu0 %4542  ;;  %v4566_v41 = vsub.f32 %v4534_v3, %v4546_v36 }
 0xa23   : > { %12181 = vpow2.f32 %v4577_v63  ;;  %v4565_v16 = vsub.f32 %v4533_v30, %v4543_v62 }
 0xa24   : > { %v4575_v38 = vmul.f32 1.442695, %v4566_v41 }
 0xa25   : > { %v4573_v61 = vmul.f32 1.442695, %v4565_v16 }
 0xa26   : > { %v4561_v5 = vpop.xlane.xlu1 %4560  ;;  %v4552_v17 = vpop.xlane.xlu0 %4551 }
 0xa27   : > { %12183 = vpow2.f32 %v4573_v61  ;;  %v4568_v13 = vsub.f32 %v4536_v26, %v4552_v17  ;;  %v4571_v47 = vsub.f32 %v4539_v55, %v4561_v5 }
 0xa29   : > { %v4579_v56 = vmul.f32 1.442695, %v4568_v13  ;;  %v4585_v34 = vmul.f32 1.442695, %v4571_v47 }
 0xa2a   : > { %v4555_v42 = vpop.xlane.xlu1 %4554  ;;  %v4564_v7 = vpop.xlane.xlu0 %4563 }
 0xa2b   : > { %12185 = vpow2.f32 %v4579_v56  ;;  %v4569_v20 = vsub.f32 %v13757_v11, %v4555_v42  ;;  %v4572_v21 = vsub.f32 %v13761_v14, %v4564_v7  ;;  %v11947_v7 = vld [vmem:[#allocation7 + $0x124] ss:$12 sps:$4 sm:$0xff]  }
 0xa2c   : > { %12187 = vpow2.f32 %v4575_v38 }
 0xa2d   : > { %v13774_v10 = vpop.eup %12181  ;;  %12189 = vpow2.f32 %v4585_v34  ;;  %v4581_v6 = vmul.f32 1.442695, %v4569_v20  ;;  %v4587_v63 = vmul.f32 1.442695, %v4572_v21 }
 0xa2e   : > { %v4638_v24 = vpop.permute.xlu1 %4637  ;;  %v4558_v25 = vpop.xlane.xlu0 %4557  ;;  %v4595_v30 = vsel %vm2855_vm0, %v13774_v10, 0.0 }
 0xa2f   : > { %v4570_v3 = vsub.f32 %v4538_v54, %v4558_v25  ;;  %10660 = vmatprep.subr.bf16.mxu0 %v4638_v24  ;;  %4596 = vadd.xlane.f32.xlu1 %v4595_v30 }
 0xa30   : > { %10661 = vmatpush3.bf16.msra.mxu0 %v4638_v24 }
 0xa31   : > { %v12184_v1 = vpop.eup %12183  ;;  %v4583_v26 = vmul.f32 1.442695, %v4570_v3 }
 0xa32   : > { %v4640_v59 = vpop.permute.xlu0 %4639  ;;  %v4589_v55 = vsel %vm2855_vm0, %v12184_v1, 0.0 }
 0xa33   : > { %4590 = vadd.xlane.f32.xlu1 %v4589_v55  ;;  %10662 = vmatprep.subr.bf16.mxu0 %v4640_v59  ;;  %12191 = vpow2.f32 %v4583_v26  ;;  %v11945_v26 = vld [vmem:[#allocation7 + $0x120] ss:$12 sps:$4 sm:$0xff]   ;;  %v11950_v55 = vld [vmem:[#allocation7 + $0x13c] ss:$12 sps:$4 sm:$0xff]  }
 0xa34   : > { %10663 = vmatpush3.bf16.msra.mxu0 %v4640_v59  ;;  %12193 = vpow2.f32 %v4581_v6 }
 0xa35   : > { %v12186_v57 = vpop.eup %12185  ;;  %12195 = vpow2.f32 %v4587_v63 }
 0xa36   : > { %v4598_v9 = vsel %vm2855_vm0, %v12186_v57, 0.0  ;;  %v12188_v4 = vpop.eup %12187 }
 0xa37   : > { %4599 = vadd.xlane.f32.xlu0 %v4598_v9  ;;  %v4592_v33 = vsel %vm2855_vm0, %v12188_v4, 0.0  ;;  %v13781_v8 = vpop.eup %12189  ;;  %v11948_v9 = vld [vmem:[#allocation7 + $0x138] ss:$12 sps:$4 sm:$0xff]  }
 0xa38   : > { %v4607_v39 = vsel %vm2855_vm0, %v13781_v8, 0.0 }
 0xa3b   : > { %4593 = vadd.xlane.f32.xlu0 %v4592_v33 }
 0xa3d   : > { %v13785_v12 = vpop.eup %12191 }
 0xa3e   : > { %v4604_v54 = vsel %vm2855_vm0, %v13785_v12, 0.0  ;;  %v12194_v36 = vpop.eup %12193 }
 0xa3f   : > { %4608 = vadd.xlane.f32.xlu0 %v4607_v39  ;;  %v4601_v62 = vsel %vm2855_vm0, %v12194_v36, 0.0  ;;  %v13796_v16 = vpop.eup %12195 }
 0xa43   : > { %4605 = vadd.xlane.f32.xlu0 %v4604_v54 }
 0xa44   : > { %4641 = vrot.lane.b32.xlu1 %v13201_v37, %s12637_s21  ;;  %v4610_v37 = vsel %vm2855_vm0, %v13796_v16, 0.0 }
 0xa59   : > { %4643 = vrot.lane.b32.xlu0 %v13213_v40, %s12637_s21 }
 0xa68   : > { %4602 = vadd.xlane.f32.xlu1 %v4601_v62 }
 0xa6c   : > { %4611 = vadd.xlane.f32.xlu1 %v4610_v37 }
 0xabc   : > { %v4597_v11 = vpop.xlane.xlu1 %4596 }
 0xac0   : > { %v4591_v61 = vpop.xlane.xlu1 %4590 }
 0xac4   : > { %v4642_v41 = vpop.permute.xlu1 %4641  ;;  %v4600_v14 = vpop.xlane.xlu0 %4599 }
 0xac5   : > { %10664 = vmatprep.subr.bf16.mxu0 %v4642_v41  ;;  %12197 = vrcp.f32 %v4600_v14 }
 0xac6   : > { %10665 = vmatpush3.bf16.msra.mxu0 %v4642_v41  ;;  %12199 = vrcp.f32 %v4591_v61 }
 0xac7   : > { %12201 = vrcp.f32 %v4597_v11 }
 0xac8   : > { %v4594_v40 = vpop.xlane.xlu0 %4593 }
 0xac9   : > { %12203 = vrcp.f32 %v4594_v40 }
 0xacc   : > { %v4609_v5 = vpop.xlane.xlu0 %4608 }
 0xacf   : > { %v12198_v17 = vpop.eup %12197 }
 0xad0   : > { %v4606_v13 = vpop.xlane.xlu0 %4605  ;;  %v12200_v56 = vpop.eup %12199  ;;  %v4624_v42 = vmul.f32 %v12198_v17, %v12186_v57  ;;  %v11953_v57 = vld [vmem:[#allocation7 + $0x154] ss:$12 sps:$4 sm:$0xff]  }
 0xad1   : > { %v12202_v38 = vpop.eup %12201  ;;  %v4621_v24 = vmul.f32 %v12200_v56, %v12184_v1  ;;  %v11951_v1 = vld [vmem:[#allocation7 + $0x150] ss:$12 sps:$4 sm:$0xff]   ;;  %12205 = vrcp.f32 %v4606_v13  ;;  %v5003_v13 = vsel %vm2855_vm0, %v13220_v31, 0  ;;  %v5006_v56 = vsel %vm2855_vm0, %v13229_v15, 0 }
 0xad2   : > { %v4623_v30 = vmul.f32 %v12202_v38, %v13774_v10  ;;  %v11954_v10 = vld [vmem:[#allocation7 + $0x168] ss:$12 sps:$4 sm:$0xff]  }
 0xad3   : > { %v12204_v47 = vpop.eup %12203 }
 0xad4   : > { %v4644_v34 = vpop.permute.xlu0 %4643  ;;  %v4622_v25 = vmul.f32 %v12204_v47, %v12188_v4  ;;  %v4630_v59 = vpack.c.bf16 %v4624_v42, %v4623_v30  ;;  %v11956_v4 = vld [vmem:[#allocation7 + $0x16c] ss:$12 sps:$4 sm:$0xff]  }
 0xad5   : > { %10666 = vmatprep.subr.bf16.mxu0 %v4644_v34  ;;  %v15062_v30 = vld [vmem:[#allocation13_spill] sm:$0xff] }
 0xad6   : > { %10667 = vmatpush3.bf16.msra.mxu0 %v4644_v34  ;;  %v4629_v3 = vpack.c.bf16 %v4622_v25, %v4621_v24  ;;  %v15061_v25 = vld [vmem:[#allocation12_spill] sm:$0xff] }
 0xad7   : > { %4822 = vmatprep.subr.bf16.mxu0 %v11947_v7 }
 0xad8   : > { %10668 = vmatprep.mubr.msk.bf16.mxu0 %vm2855_vm0, %v4629_v3  ;;  %v15063_v3 = vld [vmem:[#allocation14_spill] sm:$0xff] }
 0xad9   : > { %10669 = vmatmul.mubr.msk.bf16.vlgmr.msra.gmra.mrb[128].mxu0 %vm2855_vm0, %v4630_v59 }
 0xada   : > { %4823 = vmatpush1.bf16.msra.mxu0 %v11945_v26  ;;  %v15064_v26 = vld [vmem:[#allocation15_spill] sm:$0xff] }
 0xadb   : > { %4824 = vmatprep.subr.bf16.mxu0 %v11950_v55  ;;  %v12206_v54 = vpop.eup %12205 }
 0xadc   : > { %v4626_v21 = vmul.f32 %v12206_v54, %v13785_v12 }
 0xade   : > { %4825 = vmatpush1.bf16.msra.mxu0 %v11948_v9 }
 0xadf   : > { %4826 = vmatprep.subr.bf16.mxu0 %v11953_v57 }
 0xae2   : > { %4827 = vmatpush1.bf16.msra.mxu0 %v11951_v1 }
 0xae3   : > { %4828 = vmatprep.subr.bf16.mxu0 %v11956_v4 }
 0xae6   : > { %4829 = vmatpush1.bf16.msra.mxu0 %v11954_v10 }
 0xae7   : > { %10708 = vmatprep.subr.bf16.mxu0 %v13263_v53 }
 0xaf5   : > { %v4603_v33 = vpop.xlane.xlu1 %4602 }
 0xaf6   : > { %12207 = vrcp.f32 %v4603_v33 }
 0xaf7   : > { %12209 = vrcp.f32 %v4609_v5 }
 0xaf9   : > { %v4612_v39 = vpop.xlane.xlu1 %4611 }
 0xafa   : > { %12211 = vrcp.f32 %v4612_v39 }
 0xb00   : > { %v12208_v20 = vpop.eup %12207 }
 0xb01   : > { %v4625_v6 = vmul.f32 %v12208_v20, %v12194_v36  ;;  %v12210_v63 = vpop.eup %12209 }
 0xb02   : > { %v4627_v11 = vmul.f32 %v12210_v63, %v13781_v8  ;;  %v4997_v8 = vsel %vm2855_vm0, %v13197_v60, 0 }
 0xb03   : > { %v4631_v62 = vpack.c.bf16 %v4626_v21, %v4625_v6 }
 0xb04   : > { %v12212_v37 = vpop.eup %12211 }
 0xb05   : > { %10672 = vmatprep.mubr.msk.bf16.mxu0 %vm2855_vm0, %v4631_v62  ;;  %v4628_v61 = vmul.f32 %v12212_v37, %v13796_v16  ;;  %v5000_v16 = vsel %vm2855_vm0, %v13209_v29, 0 }
 0xb07   : > { %v4632_v41 = vpack.c.bf16 %v4628_v61, %v4627_v11 }
 0xb09   : > { %10673 = vmatmul.mubr.msk.bf16.gmra.mrb[132].mxu0 %vm2855_vm0, %v4632_v41 }
 0xb0a   : > { %4854 = vmatprep.mubr.bf16.mxu0 %v15060_v2 }
 0xbac   : > { %v10670_v14 = vpop.f32.mrb[128].mxu0 }
 0xbad   : > { %v4695_v40 = vpop.f32.mrb[129].mxu0 }
 0xbae   : > { %v10671_v5 = vpop.f32.mrb[130].mxu0 }
 0xbaf   : > { %v4727_v36 = vpack.c.bf16 %v10671_v5, %v10670_v14  ;;  %v4698_v17 = vpop.f32.mrb[131].mxu0 }
 0xbb0   : > { %v4726_v12 = vpack.c.bf16 %v4698_v17, %v4695_v40 }
 0xbb2   : > { %9839 = vmatmul.mubr.msk.bf16.vlgmr.msra.gmra.mrb[104].mxu0 %vm2855_vm0, %v4726_v12  ;;  %10684 = vmatprep.mubr.msk.bf16.mxu1 %vm2855_vm0, %v4726_v12  ;;  %v11957_v12 = vld [vmem:[#allocation7 + $0x188] ss:$12 sps:$4 sm:$0xff]  }
 0xbb3   : > { %10709 = vmatpush3.bf16.msra.mxu0 %v13263_v53  ;;  %10685 = vmatmul.mubr.msk.bf16.vlgmr.msra.gmra.mrb[112].mxu1 %vm2855_vm0, %v4727_v36 }
 0xbb4   : > { %10693 = vmatpush3.bf16.xpose.msra.mxu1 %v4997_v8  ;;  %10710 = vmatprep.subr.bf16.mxu0 %v13273_v0 }
 0xbb5   : > { %11469 = vmatprep.subr.msk.bf16.mxu1 %vm2855_vm0, %v13209_v29  ;;  %4864 = vmatprep.mubr.bf16.mxu0 %v15060_v2 }
 0xbb7   : > { %10711 = vmatpush3.bf16.msra.mxu0 %v13273_v0 }
 0xbb8   : > { %10712 = vmatprep.subr.bf16.mxu0 %v13275_v51 }
 0xbba   : > { %9840 = vmatmul.mubr.msk.bf16.gmra.mrb[108].mxu0 %vm2855_vm0, %v4727_v36 }
 0xbbb   : > { %10713 = vmatpush3.bf16.msra.mxu0 %v13275_v51  ;;  %4874 = vmatprep.mubr.bf16.mxu0 %v15060_v2 }
 0xbbc   : > { %10695 = vmatpush3.bf16.xpose.msra.mxu1 %v5000_v16  ;;  %10714 = vmatprep.subr.bf16.mxu0 %v13277_v19 }
 0xbbd   : > { %11470 = vmatprep.subr.msk.bf16.mxu1 %vm2855_vm0, %v13220_v31 }
 0xbbf   : > { %10715 = vmatpush3.bf16.msra.mxu0 %v13277_v19 }
 0xbc4   : > { %10697 = vmatpush3.bf16.xpose.msra.mxu1 %v5003_v13 }
 0xbc5   : > { %11471 = vmatprep.subr.msk.bf16.mxu1 %vm2855_vm0, %v13229_v15 }
 0xbcc   : > { %10699 = vmatpush3.bf16.xpose.msra.mxu1 %v5006_v56 }
 0xbcd   : > { %10724 = vmatprep.subr.bf16.mxu1 %v11957_v12 }
 0xbdc   : > { %v10674_v38 = vpop.f32.mrb[132].mxu0 }
 0xbdd   : > { %v4711_v47 = vpop.f32.mrb[133].mxu0 }
 0xbde   : > { %v10675_v42 = vpop.f32.mrb[134].mxu0 }
 0xbdf   : > { %v4729_v7 = vpack.c.bf16 %v10675_v42, %v10674_v38  ;;  %v4714_v34 = vpop.f32.mrb[135].mxu0 }
 0xbe0   : > { %v4728_v24 = vpack.c.bf16 %v4714_v34, %v4711_v47 }
 0xbe2   : > { %9841 = vmatmul.mubr.msk.bf16.gmra.mrb[112].mxu0 %vm2855_vm0, %v4728_v24  ;;  %10688 = vmatprep.mubr.msk.bf16.mxu1 %vm2855_vm0, %v4728_v24 }
 0xbe3   : > { %10689 = vmatmul.mubr.msk.bf16.gmra.mrb[116].mxu1 %vm2855_vm0, %v4729_v7  ;;  %4884 = vmatprep.mubr.bf16.mxu0 %v15060_v2 }
 0xbe4   : > { %10700 = vmatprep.mubr.msk.bf16.mxu1 %vm2855_vm0, %v15061_v25 }
 0xbea   : > { %9842 = vmatmul.mubr.msk.bf16.gmra.mrb[116].mxu0 %vm2855_vm0, %v4729_v7 }
 0xbeb   : > { %10701 = vmatmul.mubr.msk.bf16.vlgmr.msra.gmra.mrb[136].mxu1 %vm2855_vm0, %v15062_v30 }
 0xbec   : > { %10704 = vmatprep.mubr.msk.bf16.mxu1 %vm2855_vm0, %v15063_v3  ;;  %10725 = vmatpush3.bf16.msra.mxu1 %v11957_v12 }
 0xbf3   : > { %10705 = vmatmul.mubr.msk.bf16.gmra.mrb[140].mxu1 %vm2855_vm0, %v15064_v26 }
 0xcbe   : > { %v10702_v59 = vpop.f32.mrb[136].mxu1 }
 0xcbf   : > { %v5075_v55 = vsel %vm13285_vm1, %v10702_v59, -inf  ;;  %v5042_v9 = vpop.f32.mrb[137].mxu1 }
 0xcc0   : > { %v10703_v57 = vpop.f32.mrb[138].mxu1  ;;  %v5087_v1 = vsel %vm2855_vm0, %v5075_v55, -inf  ;;  %v5073_v4 = vsel %vm13290_vm2, %v5042_v9, -inf }
 0xcc1   : > { %5088 = vmax.xlane.f32.xlu1 %v5087_v1  ;;  %v5045_v10 = vpop.f32.mrb[139].mxu1  ;;  %v5081_v33 = vsel %vm2855_vm0, %v5073_v4, -inf  ;;  %v5076_v37 = vsel %vm13312_vm4, %v10703_v57, -inf }
 0xcc2   : > { %v5074_v39 = vsel %vm13299_vm3, %v5045_v10, -inf  ;;  %v5090_v61 = vsel %vm2855_vm0, %v5076_v37, -inf }
 0xcc3   : > { %v5084_v63 = vsel %vm2855_vm0, %v5074_v39, -inf }
 0xcc5   : > { %5082 = vmax.xlane.f32.xlu1 %v5081_v33 }
 0xcc6   : > { %v10706_v54 = vpop.f32.mrb[140].mxu1 }
 0xcc7   : > { %v5079_v20 = vsel %vm13328_vm5, %v10706_v54, -inf  ;;  %v5058_v6 = vpop.f32.mrb[141].mxu1 }
 0xcc8   : > { %v10707_v21 = vpop.f32.mrb[142].mxu1  ;;  %v5099_v62 = vsel %vm2855_vm0, %v5079_v20, -inf  ;;  %v5077_v41 = vsel %vm13336_vm6, %v5058_v6, -inf }
 0xcc9   : > { %5085 = vmax.xlane.f32.xlu1 %v5084_v63  ;;  %5100 = vmax.xlane.f32.xlu0 %v5099_v62  ;;  %v5061_v11 = vpop.f32.mrb[143].mxu1  ;;  %v5093_v14 = vsel %vm2855_vm0, %v5077_v41, -inf  ;;  %v5080_v36 = vsel %vm13359_vm8, %v10707_v21, -inf }
 0xcca   : > { %v5078_v40 = vsel %vm13345_vm7, %v5061_v11, -inf  ;;  %v5102_v17 = vsel %vm2855_vm0, %v5080_v36, -inf }
 0xccb   : > { %v5096_v5 = vsel %vm2855_vm0, %v5078_v40, -inf }
 0xccd   : > { %5091 = vmax.xlane.f32.xlu1 %v5090_v61 }
 0xcd1   : > { %5094 = vmax.xlane.f32.xlu1 %v5093_v14 }
 0xcd5   : > { %5097 = vmax.xlane.f32.xlu1 %v5096_v5 }
 0xcd9   : > { %5103 = vmax.xlane.f32.xlu1 %v5102_v17 }
 0xd4e   : > { %v5089_v8 = vpop.xlane.xlu1 %5088 }
 0xd4f   : > { %v5107_v16 = vsub.f32 %v5075_v55, %v5089_v8 }
 0xd51   : > { %v5117_v13 = vmul.f32 1.442695, %v5107_v16 }
 0xd52   : > { %v5083_v56 = vpop.xlane.xlu1 %5082 }
 0xd53   : > { %12213 = vpow2.f32 %v5117_v13  ;;  %v5105_v38 = vsub.f32 %v5073_v4, %v5083_v56  ;;  %v11958_v13 = vld [vmem:[#allocation7 + $0x1a0] ss:$12 sps:$4 sm:$0xff]  }
 0xd54   : > { %10726 = vmatprep.subr.bf16.mxu1 %v11958_v13 }
 0xd55   : > { %v5113_v47 = vmul.f32 1.442695, %v5105_v38  ;;  %10727 = vmatpush3.bf16.msra.mxu1 %v11958_v13  ;;  %v11959_v38 = vld [vmem:[#allocation7 + $0x1b8] ss:$12 sps:$4 sm:$0xff]  }
 0xd56   : > { %v5086_v42 = vpop.xlane.xlu1 %5085  ;;  %v5101_v7 = vpop.xlane.xlu0 %5100  ;;  %10728 = vmatprep.subr.bf16.mxu1 %v11959_v38 }
 0xd57   : > { %12215 = vpow2.f32 %v5113_v47  ;;  %v5106_v34 = vsub.f32 %v5074_v39, %v5086_v42  ;;  %v5111_v24 = vsub.f32 %v5079_v20, %v5101_v7  ;;  %v11960_v7 = vld [vmem:[#allocation7 + $0x1d0] ss:$12 sps:$4 sm:$0xff]  }
 0xd59   : > { %v5115_v59 = vmul.f32 1.442695, %v5106_v34  ;;  %v5125_v9 = vmul.f32 1.442695, %v5111_v24  ;;  %10729 = vmatpush3.bf16.msra.mxu1 %v11959_v38 }
 0xd5a   : > { %v5092_v57 = vpop.xlane.xlu1 %5091  ;;  %10730 = vmatprep.subr.bf16.mxu1 %v11960_v7 }
 0xd5b   : > { %12217 = vpow2.f32 %v5115_v59  ;;  %v5108_v1 = vsub.f32 %v5076_v37, %v5092_v57 }
 0xd5c   : > { %12219 = vpow2.f32 %v5125_v9 }
 0xd5d   : > { %v13874_v10 = vpop.eup %12213  ;;  %v5119_v33 = vmul.f32 1.442695, %v5108_v1  ;;  %10731 = vmatpush3.bf16.msra.mxu1 %v11960_v7 }
 0xd5e   : > { %v5095_v55 = vpop.xlane.xlu1 %5094  ;;  %v5135_v54 = vsel %vm2855_vm0, %v13874_v10, 0.0 }
 0xd5f   : > { %12221 = vpow2.f32 %v5119_v33  ;;  %v5109_v4 = vsub.f32 %v5077_v41, %v5095_v55  ;;  %5136 = vadd.xlane.f32.xlu1 %v5135_v54 }
 0xd61   : > { %v13878_v6 = vpop.eup %12215  ;;  %v5121_v39 = vmul.f32 1.442695, %v5109_v4 }
 0xd62   : > { %v5098_v20 = vpop.xlane.xlu1 %5097  ;;  %v5129_v21 = vsel %vm2855_vm0, %v13878_v6, 0.0 }
 0xd63   : > { %12223 = vpow2.f32 %v5121_v39  ;;  %v5110_v63 = vsub.f32 %v5078_v40, %v5098_v20  ;;  %5130 = vadd.xlane.f32.xlu1 %v5129_v21  ;;  %v11961_v20 = vld [vmem:[#allocation7 + $0x180] ss:$12 sps:$4 sm:$0xff]  }
 0xd65   : > { %v12218_v62 = vpop.eup %12217  ;;  %v5123_v37 = vmul.f32 1.442695, %v5110_v63  ;;  %v11966_v63 = vld [vmem:[#allocation7 + $0x19c] ss:$12 sps:$4 sm:$0xff]  }
 0xd66   : > { %v13882_v11 = vpop.eup %12219  ;;  %v5104_v61 = vpop.xlane.xlu1 %5103  ;;  %v5132_v14 = vsel %vm2855_vm0, %v12218_v62, 0.0 }
 0xd67   : > { %12225 = vpow2.f32 %v5123_v37  ;;  %v5112_v41 = vsub.f32 %v5080_v36, %v5104_v61  ;;  %v5147_v5 = vsel %vm2855_vm0, %v13882_v11, 0.0  ;;  %5133 = vadd.xlane.f32.xlu1 %v5132_v14 }
 0xd68   : > { %5148 = vadd.xlane.f32.xlu0 %v5147_v5  ;;  %v11967_v5 = vld [vmem:[#allocation7 + $0x1b0] ss:$12 sps:$4 sm:$0xff]  }
 0xd69   : > { %v12222_v17 = vpop.eup %12221  ;;  %v5127_v12 = vmul.f32 1.442695, %v5112_v41 }
 0xd6a   : > { %v5138_v8 = vsel %vm2855_vm0, %v12222_v17, 0.0 }
 0xd6b   : > { %12227 = vpow2.f32 %v5127_v12  ;;  %5139 = vadd.xlane.f32.xlu1 %v5138_v8 }
 0xd6d   : > { %v13888_v40 = vpop.eup %12223 }
 0xd6e   : > { %v5141_v16 = vsel %vm2855_vm0, %v13888_v40, 0.0 }
 0xd6f   : > { %5142 = vadd.xlane.f32.xlu1 %v5141_v16 }
 0xd71   : > { %v13892_v56 = vpop.eup %12225 }
 0xd72   : > { %v5144_v36 = vsel %vm2855_vm0, %v13892_v56, 0.0 }
 0xd73   : > { %5145 = vadd.xlane.f32.xlu1 %v5144_v36 }
 0xd75   : > { %v13896_v47 = vpop.eup %12227 }
 0xd76   : > { %v5150_v42 = vsel %vm2855_vm0, %v13896_v47, 0.0 }
 0xd77   : > { %5151 = vadd.xlane.f32.xlu1 %v5150_v42 }
 0xd7e   : > { %5524 = vrot.lane.b32.xlu0 %v13197_v60, %s12637_s21  ;;  %v11963_v60 = vld [vmem:[#allocation7 + $0x184] ss:$12 sps:$4 sm:$0xff]  }
 0xd7f   : > { %5346 = vmatprep.subr.bf16.mxu0 %v11963_v60 }
 0xd82   : > { %5512 = vrot.lane.b32.xlu0 %v15061_v25, %s12637_s21 }
 0xd86   : > { %5516 = vrot.lane.b32.xlu0 %v15063_v3, %s12637_s21 }
 0xd88   : > { %5526 = vrot.lane.b32.xlu1 %v13209_v29, %s12637_s21 }
 0xd8c   : > { %5528 = vrot.lane.b32.xlu1 %v13220_v31, %s12637_s21 }
 0xd90   : > { %5530 = vrot.lane.b32.xlu1 %v13229_v15, %s12637_s21 }
 0xd94   : > { %5514 = vrot.lane.b32.xlu1 %v15062_v30, %s12637_s21 }
 0xd98   : > { %5518 = vrot.lane.b32.xlu1 %v15064_v26, %s12637_s21 }
 0xdec   : > { %v5137_v25 = vpop.xlane.xlu1 %5136 }
 0xdf0   : > { %v5131_v34 = vpop.xlane.xlu1 %5130 }
 0xdf1   : > { %12229 = vrcp.f32 %v5131_v34 }
 0xdf4   : > { %v5134_v3 = vpop.xlane.xlu1 %5133 }
 0xdf5   : > { %v5149_v24 = vpop.xlane.xlu0 %5148  ;;  %12231 = vrcp.f32 %v5134_v3 }
 0xdf6   : > { %12233 = vrcp.f32 %v5137_v25 }
 0xdf8   : > { %v5140_v29 = vpop.xlane.xlu1 %5139 }
 0xdf9   : > { %v5525_v31 = vpop.permute.xlu0 %5524  ;;  %12235 = vrcp.f32 %v5140_v29 }
 0xdfa   : > { %11472 = vmatprep.subr.msk.bf16.mxu1 %vm2855_vm0, %v5525_v31 }
 0xdfb   : > { %v12230_v59 = vpop.eup %12229 }
 0xdfc   : > { %v5143_v15 = vpop.xlane.xlu1 %5142  ;;  %v5161_v26 = vmul.f32 %v12230_v59, %v13878_v6  ;;  %v11964_v6 = vld [vmem:[#allocation7 + $0x198] ss:$12 sps:$4 sm:$0xff]  }
 0xdfd   : > { %12237 = vrcp.f32 %v5143_v15 }
 0xdff   : > { %v12232_v30 = vpop.eup %12231 }
 0xe00   : > { %v5146_v9 = vpop.xlane.xlu1 %5145  ;;  %v5162_v57 = vmul.f32 %v12232_v30, %v12218_v62  ;;  %v12234_v1 = vpop.eup %12233  ;;  %v11969_v62 = vld [vmem:[#allocation7 + $0x1b4] ss:$12 sps:$4 sm:$0xff]  }
 0xe01   : > { %12239 = vrcp.f32 %v5146_v9  ;;  %v5163_v54 = vmul.f32 %v12234_v1, %v13874_v10  ;;  %v11973_v1 = vld [vmem:[#allocation7 + $0x1e8] ss:$12 sps:$4 sm:$0xff]  }
 0xe02   : > { %v5169_v33 = vpack.c.bf16 %v5162_v57, %v5161_v26  ;;  %12241 = vrcp.f32 %v5149_v24 }
 0xe03   : > { %v12236_v55 = vpop.eup %12235 }
 0xe04   : > { %v5164_v4 = vmul.f32 %v12236_v55, %v12222_v17  ;;  %v5152_v39 = vpop.xlane.xlu1 %5151  ;;  %10716 = vmatprep.mubr.msk.bf16.mxu0 %vm2855_vm0, %v5169_v33  ;;  %v11974_v55 = vld [vmem:[#allocation7 + $0x200] ss:$12 sps:$4 sm:$0xff]  }
 0xe05   : > { %12243 = vrcp.f32 %v5152_v39  ;;  %v11975_v39 = vld [vmem:[#allocation7 + $0x218] ss:$12 sps:$4 sm:$0xff]  }
 0xe06   : > { %v5170_v21 = vpack.c.bf16 %v5164_v4, %v5163_v54 }
 0xe07   : > { %v12238_v37 = vpop.eup %12237 }
 0xe08   : > { %10717 = vmatmul.mubr.msk.bf16.vlgmr.msra.gmra.mrb[136].mxu0 %vm2855_vm0, %v5170_v21  ;;  %v5165_v14 = vmul.f32 %v12238_v37, %v13888_v40  ;;  %v11972_v40 = vld [vmem:[#allocation7 + $0x1cc] ss:$12 sps:$4 sm:$0xff]  }
 0xe09   : > { %5347 = vmatpush1.bf16.msra.mxu0 %v11961_v20  ;;  %v11976_v20 = vld [vmem:[#allocation7 + $0x230] ss:$12 sps:$4 sm:$0xff]  }
 0xe0a   : > { %5348 = vmatprep.subr.bf16.mxu0 %v11966_v63  ;;  %v15065_v63 = vld [vmem:[#allocation19_spill] sm:$0xff] }
 0xe0b   : > { %v12240_v61 = vpop.eup %12239 }
 0xe0c   : > { %v5166_v10 = vmul.f32 %v12240_v61, %v13892_v56  ;;  %v12242_v41 = vpop.eup %12241  ;;  %v11970_v56 = vld [vmem:[#allocation7 + $0x1c8] ss:$12 sps:$4 sm:$0xff]  }
 0xe0d   : > { %5349 = vmatpush1.bf16.msra.mxu0 %v11964_v6  ;;  %v5167_v8 = vmul.f32 %v12242_v41, %v13882_v11  ;;  %v5545_v11 = vsel %vm2855_vm0, %v5525_v31, 0  ;;  %v5513_v31 = vpop.permute.xlu0 %5512 }
 0xe0e   : > { %v5171_v17 = vpack.c.bf16 %v5166_v10, %v5165_v14  ;;  %5350 = vmatprep.subr.bf16.mxu0 %v11969_v62 }
 0xe0f   : > { %v12244_v12 = vpop.eup %12243 }
 0xe10   : > { %10720 = vmatprep.mubr.msk.bf16.mxu0 %vm2855_vm0, %v5171_v17  ;;  %v5168_v16 = vmul.f32 %v12244_v12, %v13896_v47  ;;  %v5527_v47 = vpop.permute.xlu1 %5526 }
 0xe11   : > { %5351 = vmatpush1.bf16.msra.mxu0 %v11967_v5  ;;  %v5548_v59 = vsel %vm2855_vm0, %v5527_v47, 0  ;;  %v5517_v4 = vpop.permute.xlu0 %5516 }
 0xe12   : > { %v5172_v13 = vpack.c.bf16 %v5168_v16, %v5167_v8  ;;  %5352 = vmatprep.subr.bf16.mxu0 %v11972_v40 }
 0xe14   : > { %10721 = vmatmul.mubr.msk.bf16.gmra.mrb[140].mxu0 %vm2855_vm0, %v5172_v13  ;;  %v5529_v30 = vpop.permute.xlu1 %5528 }
 0xe15   : > { %5378 = vmatprep.mubr.bf16.mxu0 %v15060_v2  ;;  %5353 = vmatpush1.bf16.msra.mxu0 %v11970_v56  ;;  %v5551_v26 = vsel %vm2855_vm0, %v5529_v30, 0 }
 0xe18   : > { %v5531_v57 = vpop.permute.xlu1 %5530 }
 0xe19   : > { %v5554_v33 = vsel %vm2855_vm0, %v5531_v57, 0 }
 0xe1c   : > { %v5515_v54 = vpop.permute.xlu1 %5514 }
 0xe20   : > { %v5519_v21 = vpop.permute.xlu1 %5518 }
 0xedb   : > { %v10718_v36 = vpop.f32.mrb[136].mxu0 }
 0xedc   : > { %v5219_v38 = vpop.f32.mrb[137].mxu0 }
 0xedd   : > { %v10719_v42 = vpop.f32.mrb[138].mxu0 }
 0xede   : > { %v5251_v7 = vpack.c.bf16 %v10719_v42, %v10718_v36  ;;  %v5222_v60 = vpop.f32.mrb[139].mxu0 }
 0xedf   : > { %v5250_v25 = vpack.c.bf16 %v5222_v60, %v5219_v38 }
 0xee1   : > { %9867 = vmatmul.mubr.msk.bf16.vlgmr.msra.gmra.mrb[104].mxu0 %vm2855_vm0, %v5250_v25  ;;  %10732 = vmatprep.mubr.msk.bf16.mxu1 %vm2855_vm0, %v5250_v25 }
 0xee2   : > { %10733 = vmatmul.mubr.msk.bf16.vlgmr.msra.gmra.mrb[112].mxu1 %vm2855_vm0, %v5251_v7  ;;  %5388 = vmatprep.mubr.bf16.mxu0 %v15060_v2 }
 0xee3   : > { %10741 = vmatpush3.bf16.xpose.msra.mxu1 %v5545_v11 }
 0xee4   : > { %11473 = vmatprep.subr.msk.bf16.mxu1 %vm2855_vm0, %v5527_v47 }
 0xee7   : > { %v10722_v34 = vpop.f32.mrb[140].mxu0 }
 0xee8   : > { %v5235_v3 = vpop.f32.mrb[141].mxu0 }
 0xee9   : > { %v10723_v24 = vpop.f32.mrb[142].mxu0  ;;  %9868 = vmatmul.mubr.msk.bf16.gmra.mrb[108].mxu0 %vm2855_vm0, %v5251_v7 }
 0xeea   : > { %v5253_v29 = vpack.c.bf16 %v10723_v24, %v10722_v34  ;;  %v5238_v15 = vpop.f32.mrb[143].mxu0  ;;  %5398 = vmatprep.mubr.bf16.mxu0 %v15060_v2 }
 0xeeb   : > { %v5252_v9 = vpack.c.bf16 %v5238_v15, %v5235_v3  ;;  %10743 = vmatpush3.bf16.xpose.msra.mxu1 %v5548_v59 }
 0xeec   : > { %11474 = vmatprep.subr.msk.bf16.mxu1 %vm2855_vm0, %v5529_v30 }
 0xeed   : > { %10736 = vmatprep.mubr.msk.bf16.mxu1 %vm2855_vm0, %v5252_v9 }
 0xeee   : > { %10737 = vmatmul.mubr.msk.bf16.gmra.mrb[116].mxu1 %vm2855_vm0, %v5253_v29 }
 0xeef   : > { %10748 = vmatprep.mubr.msk.bf16.mxu1 %vm2855_vm0, %v5513_v31 }
 0xef1   : > { %9869 = vmatmul.mubr.msk.bf16.gmra.mrb[112].mxu0 %vm2855_vm0, %v5252_v9 }
 0xef2   : > { %5408 = vmatprep.mubr.bf16.mxu0 %v15060_v2 }
 0xef3   : > { %10745 = vmatpush3.bf16.xpose.msra.mxu1 %v5551_v26 }
 0xef4   : > { %11475 = vmatprep.subr.msk.bf16.mxu1 %vm2855_vm0, %v5531_v57 }
 0xef9   : > { %9870 = vmatmul.mubr.msk.bf16.gmra.mrb[116].mxu0 %vm2855_vm0, %v5253_v29 }
 0xefb   : > { %10747 = vmatpush3.bf16.xpose.msra.mxu1 %v5554_v33 }
 0xefc   : > { %10772 = vmatprep.subr.bf16.mxu1 %v11973_v1 }
 0xf02   : > { %10749 = vmatmul.mubr.msk.bf16.vlgmr.msra.gmra.mrb[144].mxu1 %vm2855_vm0, %v5515_v54 }
 0xf03   : > { %10752 = vmatprep.mubr.msk.bf16.mxu1 %vm2855_vm0, %v5517_v4  ;;  %10773 = vmatpush3.bf16.msra.mxu1 %v11973_v1 }
 0xf04   : > { %10774 = vmatprep.subr.bf16.mxu1 %v11974_v55 }
 0xf07   : > { %10775 = vmatpush3.bf16.msra.mxu1 %v11974_v55 }
 0xf08   : > { %10776 = vmatprep.subr.bf16.mxu1 %v11975_v39 }
 0xf0a   : > { %10753 = vmatmul.mubr.msk.bf16.gmra.mrb[148].mxu1 %vm2855_vm0, %v5519_v21 }
 0xf0b   : > { %10777 = vmatpush3.bf16.msra.mxu1 %v11975_v39 }
 0xf0c   : > { %10778 = vmatprep.subr.bf16.mxu1 %v11976_v20 }
 0xf0f   : > { %10779 = vmatpush3.bf16.msra.mxu1 %v11976_v20 }
 0xf10   : > { %11476 = vmatprep.subr.msk.bf16.mxu1 %vm2855_vm0, %v15065_v63 }
 0xfd5   : > { %v10750_v37 = vpop.f32.mrb[144].mxu1 }
 0xfd6   : > { %v5590_v6 = vpop.f32.mrb[145].mxu1  ;;  %v5623_v41 = vsel %vm13285_vm1, %v10750_v37, -inf }
 0xfd7   : > { %v5621_v62 = vsel %vm13290_vm2, %v5590_v6, -inf  ;;  %v10751_v61 = vpop.f32.mrb[146].mxu1  ;;  %v5635_v12 = vsel %vm2855_vm0, %v5623_v41, -inf }
 0xfd8   : > { %v5629_v14 = vsel %vm2855_vm0, %v5621_v62, -inf  ;;  %v5593_v10 = vpop.f32.mrb[147].mxu1  ;;  %v5624_v8 = vsel %vm13312_vm4, %v10751_v61, -inf }
 0xfd9   : > { %v5622_v5 = vsel %vm13299_vm3, %v5593_v10, -inf  ;;  %5630 = vmax.xlane.f32.xlu0 %v5629_v14  ;;  %v5638_v56 = vsel %vm2855_vm0, %v5624_v8, -inf }
 0xfda   : > { %v5632_v17 = vsel %vm2855_vm0, %v5622_v5, -inf }
 0xfdb   : > { %5633 = vmax.xlane.f32.xlu1 %v5632_v17 }
 0xfdd   : > { %5636 = vmax.xlane.f32.xlu0 %v5635_v12  ;;  %v10754_v16 = vpop.f32.mrb[148].mxu1 }
 0xfde   : > { %v5606_v13 = vpop.f32.mrb[149].mxu1  ;;  %v5627_v11 = vsel %vm13328_vm5, %v10754_v16, -inf }
 0xfdf   : > { %v10755_v40 = vpop.f32.mrb[150].mxu1  ;;  %v5625_v42 = vsel %vm13336_vm6, %v5606_v13, -inf  ;;  %v5647_v34 = vsel %vm2855_vm0, %v5627_v11, -inf }
 0xfe0   : > { %v13966_v36 = vsel %vm13359_vm8, %v10755_v40, -inf  ;;  %v5609_v38 = vpop.f32.mrb[151].mxu1  ;;  %v5641_v25 = vsel %vm2855_vm0, %v5625_v42, -inf  ;;  %v15068_v40 = vld [vmem:[#allocation31_spill] sm:$0xff] }
 0xfe1   : > { %v5650_v7 = vsel %vm2855_vm0, %v13966_v36, -inf  ;;  %5639 = vmax.xlane.f32.xlu0 %v5638_v56  ;;  %v5626_v60 = vsel %vm13345_vm7, %v5609_v38, -inf }
 0xfe2   : > { %5651 = vmax.xlane.f32.xlu1 %v5650_v7  ;;  %v5644_v47 = vsel %vm2855_vm0, %v5626_v60, -inf }
 0xfe5   : > { %5642 = vmax.xlane.f32.xlu0 %v5641_v25 }
 0xfe6   : > { %5645 = vmax.xlane.f32.xlu1 %v5644_v47 }
 0xfe9   : > { %5648 = vmax.xlane.f32.xlu0 %v5647_v34  ;;  %v15071_v34 = vld [vmem:[#allocation17_spill] sm:$0xff] }
 0xff7   : > { %5727 = vrot.lane.b32.xlu1 %v13273_v0, %s12637_s21 }
 0xffb   : > { %5729 = vrot.lane.b32.xlu1 %v13275_v51, %s12637_s21 }
0x1066   : > { %v5631_v3 = vpop.xlane.xlu0 %5630 }
0x1067   : > { %v5653_v24 = vsub.f32 %v5621_v62, %v5631_v3  ;;  %v15072_v3 = vld [vmem:[#allocation24_spill] sm:$0xff] }
0x1068   : > { %v5634_v29 = vpop.xlane.xlu1 %5633 }
0x1069   : > { %v5661_v30 = vmul.f32 1.442695, %v5653_v24  ;;  %v5654_v9 = vsub.f32 %v5622_v5, %v5634_v29  ;;  %v15066_v5 = vld [vmem:[#allocation23_spill] sm:$0xff] }
0x106a   : > { %v5637_v15 = vpop.xlane.xlu0 %5636 }
0x106b   : > { %v5655_v59 = vsub.f32 %v5623_v41, %v5637_v15  ;;  %v5663_v1 = vmul.f32 1.442695, %v5654_v9 }
0x106d   : > { %v5665_v31 = vmul.f32 1.442695, %v5655_v59 }
0x106e   : > { %v5640_v26 = vpop.xlane.xlu0 %5639 }
0x106f   : > { %12245 = vpow2.f32 %v5665_v31  ;;  %v5656_v57 = vsub.f32 %v5624_v8, %v5640_v26  ;;  %v5652_v10 = vpop.xlane.xlu1 %5651  ;;  %v15067_v8 = vld [vmem:[#allocation27_spill] sm:$0xff] }
0x1070   : > { %12247 = vpow2.f32 %v5661_v30 }
0x1071   : > { %v5667_v33 = vmul.f32 1.442695, %v5656_v57 }
0x1072   : > { %v5643_v55 = vpop.xlane.xlu0 %5642 }
0x1073   : > { %12249 = vpow2.f32 %v5667_v33  ;;  %v5657_v0 = vsub.f32 %v5625_v42, %v5643_v55  ;;  %v5646_v12 = vpop.xlane.xlu1 %5645  ;;  %v15070_v42 = vld [vmem:[#allocation28_spill] sm:$0xff] }
0x1074   : > { %12251 = vpow2.f32 %v5663_v1  ;;  %v5658_v16 = vsub.f32 %v5626_v60, %v5646_v12  ;;  %v11985_v12 = vld [vmem:[#allocation7 + $0x214] ss:$12 sps:$4 sm:$0xff]  }
0x1075   : > { %v5669_v54 = vmul.f32 1.442695, %v5657_v0 }
0x1076   : > { %v5649_v41 = vpop.xlane.xlu0 %5648  ;;  %v5671_v56 = vmul.f32 1.442695, %v5658_v16  ;;  %v15073_v16 = vld [vmem:[#allocation32_spill] sm:$0xff] }
0x1077   : > { %12253 = vpow2.f32 %v5669_v54  ;;  %v5659_v17 = vsub.f32 %v5627_v11, %v5649_v41  ;;  %v5728_v24 = vpop.permute.xlu1 %5727 }
0x1079   : > { %v13983_v51 = vpop.eup %12245  ;;  %v5673_v13 = vmul.f32 1.442695, %v5659_v17  ;;  %v11982_v17 = vld [vmem:[#allocation7 + $0x1fc] ss:$12 sps:$4 sm:$0xff]  }
0x107a   : > { %v5683_v4 = vsel %vm2855_vm0, %v13983_v51, 0.0  ;;  %v13987_v39 = vpop.eup %12247 }
0x107b   : > { %5684 = vadd.xlane.f32.xlu0 %v5683_v4  ;;  %v5677_v21 = vsel %vm2855_vm0, %v13987_v39, 0.0  ;;  %12255 = vpow2.f32 %v5673_v13  ;;  %v5730_v29 = vpop.permute.xlu1 %5729  ;;  %v11979_v4 = vld [vmem:[#allocation7 + $0x1e4] ss:$12 sps:$4 sm:$0xff]  }
0x107c   : > { %12257 = vpow2.f32 %v5671_v56 }
0x107d   : > { %v13989_v20 = vpop.eup %12249 }
0x107e   : > { %v5686_v37 = vsel %vm2855_vm0, %v13989_v20, 0.0  ;;  %v13995_v6 = vpop.eup %12251 }
0x107f   : > { %5678 = vadd.xlane.f32.xlu0 %v5677_v21  ;;  %5687 = vadd.xlane.f32.xlu1 %v5686_v37  ;;  %v5680_v62 = vsel %vm2855_vm0, %v13995_v6, 0.0 }
0x1081   : > { %v13999_v61 = vpop.eup %12253 }
0x1082   : > { %v5689_v14 = vsel %vm2855_vm0, %v13999_v61, 0.0 }
0x1083   : > { %5681 = vadd.xlane.f32.xlu1 %v5680_v62 }
0x1085   : > { %v14018_v7 = vpop.eup %12255 }
0x1086   : > { %v5695_v60 = vsel %vm2855_vm0, %v14018_v7, 0.0  ;;  %v14022_v25 = vpop.eup %12257 }
0x1087   : > { %5690 = vadd.xlane.f32.xlu1 %v5689_v14 }
0x1095   : > { %5725 = vrot.lane.b32.xlu0 %v13263_v53, %s12637_s21  ;;  %v5660_v53 = vsub.f32 %v13966_v36, %v5652_v10  ;;  %v5692_v36 = vsel %vm2855_vm0, %v14022_v25, 0.0  ;;  %v11977_v10 = vld [vmem:[#allocation7 + $0x1e0] ss:$12 sps:$4 sm:$0xff]  }
0x1097   : > { %v5675_v38 = vmul.f32 1.442695, %v5660_v53 }
0x1098   : > { %5731 = vrot.lane.b32.xlu1 %v13277_v19, %s12637_s21  ;;  %v15069_v19 = vld [vmem:[#allocation20_spill] sm:$0xff] }
0x1099   : > { %12259 = vpow2.f32 %v5675_v38 }
0x109c   : > { %6440 = vrot.lane.b32.xlu1 %v15066_v5, %s12637_s21 }
0x10a0   : > { %6442 = vrot.lane.b32.xlu1 %v15067_v8, %s12637_s21 }
0x10a3   : > { %v14026_v11 = vpop.eup %12259 }
0x10a4   : > { %6444 = vrot.lane.b32.xlu1 %v15068_v40, %s12637_s21  ;;  %v5698_v47 = vsel %vm2855_vm0, %v14026_v11, 0.0 }
0x10a8   : > { %6428 = vrot.lane.b32.xlu1 %v15069_v19, %s12637_s21 }
0x10ac   : > { %6432 = vrot.lane.b32.xlu1 %v15070_v42, %s12637_s21 }
0x10b4   : > { %5696 = vadd.xlane.f32.xlu0 %v5695_v60 }
0x10b8   : > { %5693 = vadd.xlane.f32.xlu0 %v5692_v36 }
0x10bc   : > { %5699 = vadd.xlane.f32.xlu0 %v5698_v47 }
0x10d2   : > { %6438 = vrot.lane.b32.xlu0 %v15065_v63, %s12637_s21 }
0x10d6   : > { %6426 = vrot.lane.b32.xlu0 %v15071_v34, %s12637_s21 }
0x10da   : > { %6430 = vrot.lane.b32.xlu0 %v15072_v3, %s12637_s21 }
0x1108   : > { %v5685_v15 = vpop.xlane.xlu0 %5684 }
0x110c   : > { %v5679_v59 = vpop.xlane.xlu0 %5678  ;;  %v5688_v30 = vpop.xlane.xlu1 %5687 }
0x110d   : > { %12261 = vrcp.f32 %v5688_v30 }
0x110e   : > { %12263 = vrcp.f32 %v5679_v59 }
0x110f   : > { %12265 = vrcp.f32 %v5685_v15 }
0x1110   : > { %v5726_v9 = vpop.permute.xlu0 %5725  ;;  %v5682_v31 = vpop.xlane.xlu1 %5681 }
0x1111   : > { %12267 = vrcp.f32 %v5682_v31  ;;  %10756 = vmatprep.subr.bf16.mxu0 %v5726_v9 }
0x1112   : > { %10757 = vmatpush3.bf16.msra.mxu0 %v5726_v9 }
0x1113   : > { %10758 = vmatprep.subr.bf16.mxu0 %v5728_v24 }
0x1114   : > { %v5691_v26 = vpop.xlane.xlu1 %5690 }
0x1115   : > { %12269 = vrcp.f32 %v5691_v26 }
0x1116   : > { %10759 = vmatpush3.bf16.msra.mxu0 %v5728_v24 }
0x1117   : > { %10760 = vmatprep.subr.bf16.mxu0 %v5730_v29  ;;  %v12262_v57 = vpop.eup %12261 }
0x1118   : > { %v12264_v1 = vpop.eup %12263  ;;  %v5732_v55 = vpop.permute.xlu1 %5731  ;;  %v5712_v54 = vmul.f32 %v12262_v57, %v13989_v20  ;;  %v11980_v20 = vld [vmem:[#allocation7 + $0x1f8] ss:$12 sps:$4 sm:$0xff]  }
0x1119   : > { %v12266_v33 = vpop.eup %12265  ;;  %v5709_v21 = vmul.f32 %v12264_v1, %v13987_v39  ;;  %v11983_v39 = vld [vmem:[#allocation7 + $0x210] ss:$12 sps:$4 sm:$0xff]  }
0x111a   : > { %10761 = vmatpush3.bf16.msra.mxu0 %v5730_v29  ;;  %v5711_v62 = vmul.f32 %v12266_v33, %v13983_v51  ;;  %v11986_v51 = vld [vmem:[#allocation7 + $0x228] ss:$12 sps:$4 sm:$0xff]  }
0x111b   : > { %v12268_v0 = vpop.eup %12267  ;;  %10762 = vmatprep.subr.bf16.mxu0 %v5732_v55  ;;  %v15075_v33 = vld [vmem:[#allocation38_spill] sm:$0xff] }
0x111c   : > { %v5710_v37 = vmul.f32 %v12268_v0, %v13995_v6  ;;  %v5718_v41 = vpack.c.bf16 %v5712_v54, %v5711_v62  ;;  %v11988_v6 = vld [vmem:[#allocation7 + $0x22c] ss:$12 sps:$4 sm:$0xff]   ;;  %v6155_v0 = vsel %vm2855_vm0, %v15067_v8, 0 }
0x111e   : > { %10763 = vmatpush3.bf16.msra.mxu0 %v5732_v55  ;;  %v5717_v14 = vpack.c.bf16 %v5710_v37, %v5709_v21  ;;  %v6152_v55 = vsel %vm2855_vm0, %v15066_v5, 0 }
0x111f   : > { %5910 = vmatprep.subr.bf16.mxu0 %v11979_v4  ;;  %v12270_v38 = vpop.eup %12269 }
0x1120   : > { %10764 = vmatprep.mubr.msk.bf16.mxu0 %vm2855_vm0, %v5717_v14  ;;  %v5713_v36 = vmul.f32 %v12270_v38, %v13999_v61 }
0x1121   : > { %10765 = vmatmul.mubr.msk.bf16.vlgmr.msra.gmra.mrb[144].mxu0 %vm2855_vm0, %v5718_v41 }
0x1122   : > { %5911 = vmatpush1.bf16.msra.mxu0 %v11977_v10 }
0x1123   : > { %5912 = vmatprep.subr.bf16.mxu0 %v11982_v17 }
0x1126   : > { %5913 = vmatpush1.bf16.msra.mxu0 %v11980_v20 }
0x1127   : > { %5914 = vmatprep.subr.bf16.mxu0 %v11985_v12 }
0x112a   : > { %5915 = vmatpush1.bf16.msra.mxu0 %v11983_v39 }
0x112b   : > { %5916 = vmatprep.subr.bf16.mxu0 %v11988_v6  ;;  %v15077_v6 = vld [vmem:[#allocation48_spill] sm:$0xff] }
0x112e   : > { %5917 = vmatpush1.bf16.msra.mxu0 %v11986_v51  ;;  %v6075_v51 = vsub.s32 0, %v15077_v6 }
0x112f   : > { %10804 = vmatprep.subr.bf16.mxu0 %v15073_v16 }
0x1141   : > { %v5697_v13 = vpop.xlane.xlu0 %5696 }
0x1145   : > { %v5694_v53 = vpop.xlane.xlu0 %5693 }
0x1146   : > { %12271 = vrcp.f32 %v5694_v53  ;;  %v6079_v53 = vsub.s32 1, %v15077_v6 }
0x1147   : > { %12273 = vrcp.f32 %v5697_v13  ;;  %v2854_v13 = vld [vmem:[%s14944_s3] sm:$0x7] }
0x1148   : > { %v14108_v38 = vrot.slane %v2854_v13, %v6075_v51 }
0x1149   : > { %v5700_v56 = vpop.xlane.xlu0 %5699 }
0x114a   : > { %12275 = vrcp.f32 %v5700_v56  ;;  %v6083_v56 = vsub.s32 2, %v15077_v6 }
0x114d   : > { %v6439_v54 = vpop.permute.xlu0 %6438 }
0x1150   : > { %v12272_v60 = vpop.eup %12271 }
0x1151   : > { %v5714_v47 = vmul.f32 %v12272_v60, %v14022_v25  ;;  %v12274_v24 = vpop.eup %12273  ;;  %v6427_v41 = vpop.permute.xlu0 %6426  ;;  %v14110_v60 = vrot.slane %v2854_v13, %v6079_v53 }
0x1152   : > { %v5715_v59 = vmul.f32 %v12274_v24, %v14018_v7  ;;  %v6149_v7 = vsel %vm2855_vm0, %v15065_v63, 0  ;;  %v15076_v63 = vld [vmem:[#allocation42_spill] sm:$0xff] }
0x1153   : > { %v5719_v29 = vpack.c.bf16 %v5714_v47, %v5713_v36  ;;  %v14112_v36 = vrot.slane %v2854_v13, %v6083_v56 }
0x1154   : > { %v12276_v15 = vpop.eup %12275 }
0x1155   : > { %10768 = vmatprep.mubr.msk.bf16.mxu0 %vm2855_vm0, %v5719_v29  ;;  %v5716_v30 = vmul.f32 %v12276_v15, %v14026_v11  ;;  %v15074_v11 = vld [vmem:[#allocation34_spill] sm:$0xff]  ;;  %v6431_v39 = vpop.permute.xlu0 %6430 }
0x1157   : > { %v5720_v9 = vpack.c.bf16 %v5716_v30, %v5715_v59 }
0x1159   : > { %10769 = vmatmul.mubr.msk.bf16.gmra.mrb[148].mxu0 %vm2855_vm0, %v5720_v9 }
0x115a   : > { %5942 = vmatprep.mubr.bf16.mxu0 %v15060_v2 }
0x11f4   : > { %v10766_v31 = vpop.f32.mrb[144].mxu0 }
0x11f5   : > { %v5783_v26 = vpop.f32.mrb[145].mxu0 }
0x11f6   : > { %v10767_v57 = vpop.f32.mrb[146].mxu0 }
0x11f7   : > { %v5815_v61 = vpack.c.bf16 %v10767_v57, %v10766_v31  ;;  %v5786_v1 = vpop.f32.mrb[147].mxu0 }
0x11f8   : > { %v5814_v25 = vpack.c.bf16 %v5786_v1, %v5783_v26 }
0x11fa   : > { %9895 = vmatmul.mubr.msk.bf16.vlgmr.msra.gmra.mrb[104].mxu0 %vm2855_vm0, %v5814_v25  ;;  %10780 = vmatprep.mubr.msk.bf16.mxu1 %vm2855_vm0, %v5814_v25 }
0x11fb   : > { %10805 = vmatpush3.bf16.msra.mxu0 %v15073_v16  ;;  %10781 = vmatmul.mubr.msk.bf16.vlgmr.msra.gmra.mrb[112].mxu1 %vm2855_vm0, %v5815_v61 }
0x11fc   : > { %10789 = vmatpush3.bf16.xpose.msra.mxu1 %v6149_v7  ;;  %10806 = vmatprep.subr.bf16.mxu0 %v15074_v11 }
0x11fd   : > { %11477 = vmatprep.subr.msk.bf16.mxu1 %vm2855_vm0, %v15066_v5  ;;  %5952 = vmatprep.mubr.bf16.mxu0 %v15060_v2  ;;  %v6158_v5 = vsel %vm2855_vm0, %v15068_v40, 0 }
0x11ff   : > { %10807 = vmatpush3.bf16.msra.mxu0 %v15074_v11 }
0x1200   : > { %10808 = vmatprep.subr.bf16.mxu0 %v15075_v33 }
0x1202   : > { %9896 = vmatmul.mubr.msk.bf16.gmra.mrb[108].mxu0 %vm2855_vm0, %v5815_v61 }
0x1203   : > { %10809 = vmatpush3.bf16.msra.mxu0 %v15075_v33  ;;  %5962 = vmatprep.mubr.bf16.mxu0 %v15060_v2 }
0x1204   : > { %10791 = vmatpush3.bf16.xpose.msra.mxu1 %v6152_v55  ;;  %10810 = vmatprep.subr.bf16.mxu0 %v15076_v63 }
0x1205   : > { %11478 = vmatprep.subr.msk.bf16.mxu1 %vm2855_vm0, %v15067_v8  ;;  %v6459_v8 = vsel %vm2855_vm0, %v6439_v54, 0 }
0x1207   : > { %10811 = vmatpush3.bf16.msra.mxu0 %v15076_v63 }
0x120c   : > { %10793 = vmatpush3.bf16.xpose.msra.mxu1 %v6155_v0 }
0x120d   : > { %11479 = vmatprep.subr.msk.bf16.mxu1 %vm2855_vm0, %v15068_v40  ;;  %v6441_v40 = vpop.permute.xlu1 %6440 }
0x1211   : > { %v6443_v17 = vpop.permute.xlu1 %6442 }
0x1214   : > { %10795 = vmatpush3.bf16.xpose.msra.mxu1 %v6158_v5 }
0x1215   : > { %11480 = vmatprep.subr.msk.bf16.mxu1 %vm2855_vm0, %v6439_v54  ;;  %v6445_v20 = vpop.permute.xlu1 %6444 }
0x1219   : > { %v6429_v12 = vpop.permute.xlu1 %6428 }
0x122c   : > { %v10770_v4 = vpop.f32.mrb[148].mxu0 }
0x122d   : > { %v5799_v21 = vpop.f32.mrb[149].mxu0 }
0x122e   : > { %v10771_v37 = vpop.f32.mrb[150].mxu0 }
0x122f   : > { %v5817_v62 = vpack.c.bf16 %v10771_v37, %v10770_v4  ;;  %v5802_v14 = vpop.f32.mrb[151].mxu0 }
0x1230   : > { %v5816_v10 = vpack.c.bf16 %v5802_v14, %v5799_v21 }
0x1232   : > { %9897 = vmatmul.mubr.msk.bf16.gmra.mrb[112].mxu0 %vm2855_vm0, %v5816_v10  ;;  %10784 = vmatprep.mubr.msk.bf16.mxu1 %vm2855_vm0, %v5816_v10 }
0x1233   : > { %10785 = vmatmul.mubr.msk.bf16.gmra.mrb[116].mxu1 %vm2855_vm0, %v5817_v62  ;;  %5972 = vmatprep.mubr.bf16.mxu0 %v15060_v2 }
0x1234   : > { %10796 = vmatprep.mubr.msk.bf16.mxu1 %vm2855_vm0, %v15071_v34  ;;  %v6462_v34 = vsel %vm2855_vm0, %v6441_v40, 0 }
0x123a   : > { %9898 = vmatmul.mubr.msk.bf16.gmra.mrb[116].mxu0 %vm2855_vm0, %v5817_v62 }
0x123b   : > { %10797 = vmatmul.mubr.msk.bf16.vlgmr.msra.gmra.mrb[152].mxu1 %vm2855_vm0, %v15069_v19  ;;  %v6465_v19 = vsel %vm2855_vm0, %v6443_v17, 0 }
0x123c   : > { %10821 = vmatpush3.bf16.xpose.msra.mxu1 %v6459_v8  ;;  %10800 = vmatprep.mubr.msk.bf16.mxu1 %vm2855_vm0, %v15072_v3  ;;  %v6468_v3 = vsel %vm2855_vm0, %v6445_v20, 0 }
0x123d   : > { %11481 = vmatprep.subr.msk.bf16.mxu1 %vm2855_vm0, %v6441_v40 }
0x1243   : > { %10801 = vmatmul.mubr.msk.bf16.gmra.mrb[156].mxu1 %vm2855_vm0, %v15070_v42  ;;  %v6433_v42 = vpop.permute.xlu1 %6432 }
0x1244   : > { %10823 = vmatpush3.bf16.xpose.msra.mxu1 %v6462_v34  ;;  %10828 = vmatprep.mubr.msk.bf16.mxu1 %vm2855_vm0, %v6427_v41 }
0x1245   : > { %11482 = vmatprep.subr.msk.bf16.mxu1 %vm2855_vm0, %v6443_v17 }
0x124c   : > { %10825 = vmatpush3.bf16.xpose.msra.mxu1 %v6465_v19 }
0x124d   : > { %11483 = vmatprep.subr.msk.bf16.mxu1 %vm2855_vm0, %v6445_v20 }
0x1254   : > { %10827 = vmatpush3.bf16.xpose.msra.mxu1 %v6468_v3 }
0x125b   : > { %10829 = vmatmul.mubr.msk.bf16.vlgmr.msra.gmra.mrb[160].mxu1 %vm2855_vm0, %v6429_v12 }
0x125c   : > { %10832 = vmatprep.mubr.msk.bf16.mxu1 %vm2855_vm0, %v6431_v39 }
0x1263   : > { %10833 = vmatmul.mubr.msk.bf16.gmra.mrb[164].mxu1 %vm2855_vm0, %v6433_v42 }
0x12cd   : > { %v5944_v47 = vpop.f32.mrb[104].mxu0 }
0x12ce   : > { %v6088_v24 = vadd.f32 %v14108_v38, %v5944_v47  ;;  %v5946_v29 = vpop.f32.mrb[105].mxu0  ;;  %v10782_v15 = vpop.f32.mrb[112].mxu1 }
0x12cf   : > { %v6089_v59 = vadd.f32 %v14110_v60, %v5946_v29  ;;  %v6096_v30 = vadd.f32 %v10782_v15, %v14112_v36  ;;  %v5948_v9 = vpop.f32.mrb[106].mxu0  ;;  %v6017_v31 = vpop.f32.mrb[113].mxu1 }
0x12d0   : > { %6112 = vst [vmem:[%s14119_s5] sm:$0xff] %v6088_v24  ;;  %v6091_v26 = vadd.f32 %v14108_v38, %v5948_v9  ;;  %v6090_v57 = vadd.f32 %v14112_v36, %v6017_v31  ;;  %v5950_v61 = vpop.f32.mrb[107].mxu0  ;;  %v10783_v1 = vpop.f32.mrb[114].mxu1 }
0x12d1   : > { %6113 = vst [vmem:[%s14119_s5 + $0x8] sm:$0xff] %v6089_v59  ;;  %6120 = vst [vmem:[%s14119_s5 + $0x40] sm:$0xff] %v6096_v30  ;;  %v6092_v25 = vadd.f32 %v14110_v60, %v5950_v61  ;;  %v6099_v7 = vadd.f32 %v10783_v1, %v14112_v36  ;;  %v6020_v55 = vpop.f32.mrb[115].mxu1 }
0x12d2   : > { %6115 = vst [vmem:[%s14119_s5 + $0x18] sm:$0xff] %v6091_v26  ;;  %6114 = vst [vmem:[%s14119_s5 + $0x10] sm:$0xff] %v6090_v57  ;;  %v6093_v0 = vadd.f32 %v14112_v36, %v6020_v55 }
0x12d3   : > { %6116 = vst [vmem:[%s14119_s5 + $0x20] sm:$0xff] %v6092_v25  ;;  %6123 = vst [vmem:[%s14119_s5 + $0x58] sm:$0xff] %v6099_v7 }
0x12d4   : > { %6117 = vst [vmem:[%s14119_s5 + $0x28] sm:$0xff] %v6093_v0 }
0x12d5   : > { %v5954_v5 = vpop.f32.mrb[108].mxu0 }
0x12d6   : > { %v6094_v54 = vadd.f32 %v14108_v38, %v5954_v5  ;;  %v5956_v4 = vpop.f32.mrb[109].mxu0 }
0x12d7   : > { %v6095_v21 = vadd.f32 %v14110_v60, %v5956_v4  ;;  %v5958_v37 = vpop.f32.mrb[110].mxu0 }
0x12d8   : > { %6118 = vst [vmem:[%s14119_s5 + $0x30] sm:$0xff] %v6094_v54  ;;  %v6097_v62 = vadd.f32 %v14108_v38, %v5958_v37  ;;  %v5960_v14 = vpop.f32.mrb[111].mxu0 }
0x12d9   : > { %6119 = vst [vmem:[%s14119_s5 + $0x38] sm:$0xff] %v6095_v21  ;;  %v6098_v10 = vadd.f32 %v14110_v60, %v5960_v14 }
0x12da   : > { %6121 = vst [vmem:[%s14119_s5 + $0x48] sm:$0xff] %v6097_v62 }
0x12db   : > { %6122 = vst [vmem:[%s14119_s5 + $0x50] sm:$0xff] %v6098_v10 }
0x1305   : > { %v5964_v8 = vpop.f32.mrb[112].mxu0 }
0x1306   : > { %v11084_v40 = vadd.f32 %v5964_v8, %v13614_v46  ;;  %v5966_v41 = vpop.f32.mrb[113].mxu0  ;;  %v10786_v34 = vpop.f32.mrb[116].mxu1 }
0x1307   : > { %v11085_v17 = vadd.f32 %v5966_v41, %v13616_v44  ;;  %v6108_v19 = vadd.f32 %v10786_v34, %v14112_v36  ;;  %v5968_v20 = vpop.f32.mrb[114].mxu0  ;;  %v6033_v3 = vpop.f32.mrb[117].mxu1 }
0x1308   : > { %v6100_v12 = vadd.f32 %v11084_v40, %v14108_v38  ;;  %v11086_v39 = vadd.f32 %v5968_v20, %v13618_v23  ;;  %v6102_v42 = vadd.f32 %v14112_v36, %v6033_v3  ;;  %v5970_v46 = vpop.f32.mrb[115].mxu0  ;;  %v10787_v6 = vpop.f32.mrb[118].mxu1 }
0x1309   : > { %v6101_v44 = vadd.f32 %v11085_v17, %v14110_v60  ;;  %6132 = vst [vmem:[%s14119_s5 + $0xa0] sm:$0xff] %v6108_v19  ;;  %v11087_v51 = vadd.f32 %v5970_v46, %v13620_v50  ;;  %v6111_v13 = vadd.f32 %v10787_v6, %v14112_v36  ;;  %v6036_v53 = vpop.f32.mrb[119].mxu1 }
0x130a   : > { %6124 = vst [vmem:[%s14119_s5 + $0x60] sm:$0xff] %v6100_v12  ;;  %v6103_v56 = vadd.f32 %v11086_v39, %v14108_v38  ;;  %6126 = vst [vmem:[%s14119_s5 + $0x70] sm:$0xff] %v6102_v42  ;;  %v6105_v23 = vadd.f32 %v14112_v36, %v6036_v53 }
0x130b   : > { %6125 = vst [vmem:[%s14119_s5 + $0x68] sm:$0xff] %v6101_v44  ;;  %v6104_v47 = vadd.f32 %v11087_v51, %v14110_v60  ;;  %6135 = vst [vmem:[%s14119_s5 + $0xb8] sm:$0xff] %v6111_v13 }
0x130c   : > { %6127 = vst [vmem:[%s14119_s5 + $0x78] sm:$0xff] %v6103_v56  ;;  %6129 = vst [vmem:[%s14119_s5 + $0x88] sm:$0xff] %v6105_v23 }
0x130d   : > { %6128 = vst [vmem:[%s14119_s5 + $0x80] sm:$0xff] %v6104_v47  ;;  %v5974_v24 = vpop.f32.mrb[116].mxu0 }
0x130e   : > { %v11088_v29 = vadd.f32 %v5974_v24, %v13622_v49  ;;  %v5976_v50 = vpop.f32.mrb[117].mxu0  ;;  %v10798_v15 = vpop.f32.mrb[152].mxu1 }
0x130f   : > { %v11089_v59 = vadd.f32 %v5976_v50, %v13624_v28  ;;  %v14166_v30 = vsel %vm13285_vm1, %v10798_v15, -inf  ;;  %v5978_v9 = vpop.f32.mrb[118].mxu0  ;;  %v6194_v31 = vpop.f32.mrb[153].mxu1 }
0x1310   : > { %v6106_v26 = vadd.f32 %v11088_v29, %v14108_v38  ;;  %v6239_v57 = vsel %vm2855_vm0, %v14166_v30, -inf  ;;  %v11090_v49 = vadd.f32 %v5978_v9, %v13626_v27  ;;  %v5980_v61 = vpop.f32.mrb[119].mxu0  ;;  %v10799_v1 = vpop.f32.mrb[154].mxu1  ;;  %v14175_v25 = vsel %vm13290_vm2, %v6194_v31, -inf }
0x1311   : > { %v6107_v28 = vadd.f32 %v11089_v59, %v14110_v60  ;;  %v11091_v7 = vadd.f32 %v5980_v61, %v13628_v52  ;;  %6240 = vmax.xlane.f32.xlu0 %v6239_v57  ;;  %v6197_v55 = vpop.f32.mrb[155].mxu1  ;;  %v6233_v4 = vsel %vm2855_vm0, %v14175_v25, -inf  ;;  %v14194_v52 = vsel %vm13312_vm4, %v10799_v1, -inf }
0x1312   : > { %6130 = vst [vmem:[%s14119_s5 + $0x90] sm:$0xff] %v6106_v26  ;;  %v6109_v0 = vadd.f32 %v11090_v49, %v14108_v38  ;;  %v14182_v5 = vsel %vm13299_vm3, %v6197_v55, -inf  ;;  %v6242_v62 = vsel %vm2855_vm0, %v14194_v52, -inf }
0x1313   : > { %6131 = vst [vmem:[%s14119_s5 + $0x98] sm:$0xff] %v6107_v28  ;;  %v6110_v27 = vadd.f32 %v11091_v7, %v14110_v60  ;;  %v6236_v54 = vsel %vm2855_vm0, %v14182_v5, -inf }
0x1314   : > { %6133 = vst [vmem:[%s14119_s5 + $0xa8] sm:$0xff] %v6109_v0  ;;  %6237 = vmax.xlane.f32.xlu1 %v6236_v54 }
0x1315   : > { %6134 = vst [vmem:[%s14119_s5 + $0xb0] sm:$0xff] %v6110_v27  ;;  %6234 = vmax.xlane.f32.xlu0 %v6233_v4 }
0x1316   : > { %v10802_v21 = vpop.f32.mrb[156].mxu1 }
0x1317   : > { %v6210_v37 = vpop.f32.mrb[157].mxu1  ;;  %v14216_v19 = vsel %vm13328_vm5, %v10802_v21, -inf }
0x1318   : > { %v10803_v14 = vpop.f32.mrb[158].mxu1  ;;  %v14200_v10 = vsel %vm13336_vm6, %v6210_v37, -inf  ;;  %v6251_v3 = vsel %vm2855_vm0, %v14216_v19, -inf }
0x1319   : > { %v14204_v8 = vsel %vm13359_vm8, %v10803_v14, -inf  ;;  %6243 = vmax.xlane.f32.xlu0 %v6242_v62  ;;  %v6213_v40 = vpop.f32.mrb[159].mxu1  ;;  %v6245_v17 = vsel %vm2855_vm0, %v14200_v10, -inf }
0x131a   : > { %v6254_v41 = vsel %vm2855_vm0, %v14204_v8, -inf  ;;  %v14210_v34 = vsel %vm13345_vm7, %v6213_v40, -inf }
0x131b   : > { %6255 = vmax.xlane.f32.xlu1 %v6254_v41  ;;  %v6248_v20 = vsel %vm2855_vm0, %v14210_v34, -inf }
0x131d   : > { %6246 = vmax.xlane.f32.xlu0 %v6245_v17 }
0x131f   : > { %6249 = vmax.xlane.f32.xlu1 %v6248_v20 }
0x1321   : > { %6252 = vmax.xlane.f32.xlu0 %v6251_v3 }
0x132e   : > { %v10830_v12 = vpop.f32.mrb[160].mxu1 }
0x132f   : > { %v6504_v39 = vpop.f32.mrb[161].mxu1  ;;  %v14234_v13 = vsel %vm13285_vm1, %v10830_v12, -inf }
0x1330   : > { %v14224_v42 = vsel %vm13290_vm2, %v6504_v39, -inf  ;;  %v10831_v46 = vpop.f32.mrb[162].mxu1  ;;  %v6549_v23 = vsel %vm2855_vm0, %v14234_v13, -inf }
0x1331   : > { %v6543_v6 = vsel %vm2855_vm0, %v14224_v42, -inf  ;;  %v14230_v44 = vsel %vm13312_vm4, %v10831_v46, -inf  ;;  %v6507_v51 = vpop.f32.mrb[163].mxu1 }
0x1332   : > { %v6552_v53 = vsel %vm2855_vm0, %v14230_v44, -inf  ;;  %6544 = vmax.xlane.f32.xlu0 %v6543_v6  ;;  %v14240_v56 = vsel %vm13299_vm3, %v6507_v51, -inf }
0x1333   : > { %6553 = vmax.xlane.f32.xlu1 %v6552_v53  ;;  %v6546_v47 = vsel %vm2855_vm0, %v14240_v56, -inf }
0x1336   : > { %6550 = vmax.xlane.f32.xlu0 %v6549_v23  ;;  %v10834_v24 = vpop.f32.mrb[164].mxu1 }
0x1337   : > { %v6520_v29 = vpop.f32.mrb[165].mxu1  ;;  %6547 = vmax.xlane.f32.xlu1 %v6546_v47  ;;  %v14258_v26 = vsel %vm13328_vm5, %v10834_v24, -inf }
0x1338   : > { %v14248_v50 = vsel %vm13336_vm6, %v6520_v29, -inf  ;;  %v10835_v15 = vpop.f32.mrb[166].mxu1  ;;  %v6561_v61 = vsel %vm2855_vm0, %v14258_v26, -inf }
0x1339   : > { %v6555_v59 = vsel %vm2855_vm0, %v14248_v50, -inf  ;;  %v14254_v9 = vsel %vm13359_vm8, %v10835_v15, -inf  ;;  %v6523_v31 = vpop.f32.mrb[167].mxu1 }
0x133a   : > { %v6564_v57 = vsel %vm2855_vm0, %v14254_v9, -inf  ;;  %6556 = vmax.xlane.f32.xlu0 %v6555_v59  ;;  %v14264_v49 = vsel %vm13345_vm7, %v6523_v31, -inf }
0x133b   : > { %6565 = vmax.xlane.f32.xlu1 %v6564_v57  ;;  %v6558_v1 = vsel %vm2855_vm0, %v14264_v49, -inf }
0x133e   : > { %6562 = vmax.xlane.f32.xlu0 %v6561_v61 }
0x133f   : > { %6559 = vmax.xlane.f32.xlu1 %v6558_v1 }
0x139e   : > { %v6241_v28 = vpop.xlane.xlu0 %6240 }
0x139f   : > { %v6259_v7 = vsub.f32 %v14166_v30, %v6241_v28 }
0x13a1   : > { %v6269_v55 = vmul.f32 1.442695, %v6259_v7  ;;  %v6238_v0 = vpop.xlane.xlu1 %6237 }
0x13a2   : > { %v6235_v27 = vpop.xlane.xlu0 %6234  ;;  %v6258_v4 = vsub.f32 %v14182_v5, %v6238_v0 }
0x13a3   : > { %12277 = vpow2.f32 %v6269_v55  ;;  %v6257_v54 = vsub.f32 %v14175_v25, %v6235_v27 }
0x13a4   : > { %v6267_v40 = vmul.f32 1.442695, %v6258_v4 }
0x13a5   : > { %v6265_v21 = vmul.f32 1.442695, %v6257_v54 }
0x13a6   : > { %v6244_v37 = vpop.xlane.xlu0 %6243 }
0x13a7   : > { %12279 = vpow2.f32 %v6265_v21  ;;  %v6260_v62 = vsub.f32 %v14194_v52, %v6244_v37 }
0x13a8   : > { %v6256_v14 = vpop.xlane.xlu1 %6255 }
0x13a9   : > { %v6271_v41 = vmul.f32 1.442695, %v6260_v62  ;;  %v6264_v17 = vsub.f32 %v14204_v8, %v6256_v14 }
0x13aa   : > { %v6247_v20 = vpop.xlane.xlu0 %6246 }
0x13ab   : > { %12281 = vpow2.f32 %v6271_v41  ;;  %v6261_v30 = vsub.f32 %v14200_v10, %v6247_v20  ;;  %v6279_v25 = vmul.f32 1.442695, %v6264_v17 }
0x13ac   : > { %v6250_v3 = vpop.xlane.xlu1 %6249  ;;  %12283 = vpow2.f32 %v6267_v40 }
0x13ad   : > { %v14276_v12 = vpop.eup %12277  ;;  %v6262_v5 = vsub.f32 %v14210_v34, %v6250_v3  ;;  %v6273_v6 = vmul.f32 1.442695, %v6261_v30  ;;  %12285 = vpow2.f32 %v6279_v25 }
0x13ae   : > { %v6253_v39 = vpop.xlane.xlu0 %6252  ;;  %v6287_v52 = vsel %vm2855_vm0, %v14276_v12, 0.0 }
0x13af   : > { %v6263_v46 = vsub.f32 %v14216_v19, %v6253_v39  ;;  %6288 = vadd.xlane.f32.xlu0 %v6287_v52  ;;  %v6275_v51 = vmul.f32 1.442695, %v6262_v5 }
0x13b1   : > { %v14282_v8 = vpop.eup %12279  ;;  %v6277_v10 = vmul.f32 1.442695, %v6263_v46 }
0x13b2   : > { %v6281_v53 = vsel %vm2855_vm0, %v14282_v8, 0.0 }
0x13b3   : > { %12287 = vpow2.f32 %v6277_v10  ;;  %6282 = vadd.xlane.f32.xlu0 %v6281_v53 }
0x13b4   : > { %12289 = vpow2.f32 %v6273_v6 }
0x13b5   : > { %v14286_v34 = vpop.eup %12281  ;;  %12291 = vpow2.f32 %v6275_v51 }
0x13b6   : > { %v6290_v23 = vsel %vm2855_vm0, %v14286_v34, 0.0  ;;  %v14290_v19 = vpop.eup %12283 }
0x13b7   : > { %6291 = vadd.xlane.f32.xlu1 %v6290_v23  ;;  %v6284_v47 = vsel %vm2855_vm0, %v14290_v19, 0.0  ;;  %v14294_v24 = vpop.eup %12285 }
0x13b8   : > { %v6302_v31 = vsel %vm2855_vm0, %v14294_v24, 0.0 }
0x13bb   : > { %6285 = vadd.xlane.f32.xlu1 %v6284_v47 }
0x13bd   : > { %v14296_v29 = vpop.eup %12287 }
0x13be   : > { %v14298_v15 = vpop.eup %12289  ;;  %v6299_v59 = vsel %vm2855_vm0, %v14296_v29, 0.0 }
0x13bf   : > { %v14304_v57 = vpop.eup %12291  ;;  %v6545_v61 = vpop.xlane.xlu0 %6544  ;;  %6300 = vadd.xlane.f32.xlu0 %v6299_v59  ;;  %6303 = vadd.xlane.f32.xlu1 %v6302_v31  ;;  %v6293_v55 = vsel %vm2855_vm0, %v14298_v15, 0.0 }
0x13c0   : > { %v6554_v1 = vpop.xlane.xlu1 %6553  ;;  %v6567_v7 = vsub.f32 %v14224_v42, %v6545_v61  ;;  %v6296_v0 = vsel %vm2855_vm0, %v14304_v57, 0.0 }
0x13c1   : > { %v6570_v28 = vsub.f32 %v14230_v44, %v6554_v1 }
0x13c2   : > { %v6575_v62 = vmul.f32 1.442695, %v6567_v7 }
0x13c3   : > { %v6581_v27 = vmul.f32 1.442695, %v6570_v28  ;;  %v6551_v54 = vpop.xlane.xlu0 %6550  ;;  %6294 = vadd.xlane.f32.xlu0 %v6293_v55  ;;  %6297 = vadd.xlane.f32.xlu1 %v6296_v0 }
0x13c4   : > { %v6569_v4 = vsub.f32 %v14234_v13, %v6551_v54  ;;  %v6548_v21 = vpop.xlane.xlu1 %6547 }
0x13c5   : > { %12293 = vpow2.f32 %v6581_v27  ;;  %v6568_v37 = vsub.f32 %v14240_v56, %v6548_v21 }
0x13c6   : > { %v6579_v44 = vmul.f32 1.442695, %v6569_v4 }
0x13c7   : > { %v6577_v14 = vmul.f32 1.442695, %v6568_v37  ;;  %v6557_v42 = vpop.xlane.xlu0 %6556 }
0x13c8   : > { %12295 = vpow2.f32 %v6579_v44  ;;  %v6571_v40 = vsub.f32 %v14248_v50, %v6557_v42  ;;  %v6566_v10 = vpop.xlane.xlu1 %6565 }
0x13c9   : > { %12297 = vpow2.f32 %v6577_v14  ;;  %v6574_v53 = vsub.f32 %v14254_v9, %v6566_v10 }
0x13ca   : > { %12299 = vpow2.f32 %v6575_v62  ;;  %v6583_v20 = vmul.f32 1.442695, %v6571_v40 }
0x13cb   : > { %v6563_v41 = vpop.xlane.xlu0 %6562  ;;  %v6589_v47 = vmul.f32 1.442695, %v6574_v53 }
0x13cc   : > { %v6573_v17 = vsub.f32 %v14258_v26, %v6563_v41  ;;  %v6560_v23 = vpop.xlane.xlu1 %6559 }
0x13cd   : > { %v6572_v59 = vsub.f32 %v14264_v49, %v6560_v23 }
0x13ce   : > { %v6587_v30 = vmul.f32 1.442695, %v6573_v17 }
0x13cf   : > { %v14316_v3 = vpop.eup %12293  ;;  %v6585_v31 = vmul.f32 1.442695, %v6572_v59 }
0x13d0   : > { %12301 = vpow2.f32 %v6587_v30  ;;  %v6600_v13 = vsel %vm2855_vm0, %v14316_v3, 0.0 }
0x13d1   : > { %6601 = vadd.xlane.f32.xlu1 %v6600_v13  ;;  %12303 = vpow2.f32 %v6583_v20 }
0x13d2   : > { %v14320_v56 = vpop.eup %12295  ;;  %12305 = vpow2.f32 %v6589_v47 }
0x13d3   : > { %v14322_v25 = vpop.eup %12297  ;;  %v6597_v50 = vsel %vm2855_vm0, %v14320_v56, 0.0  ;;  %12307 = vpow2.f32 %v6585_v31 }
0x13d4   : > { %v14326_v5 = vpop.eup %12299  ;;  %6598 = vadd.xlane.f32.xlu0 %v6597_v50  ;;  %v6594_v26 = vsel %vm2855_vm0, %v14322_v25, 0.0 }
0x13d5   : > { %6595 = vadd.xlane.f32.xlu1 %v6594_v26  ;;  %v6591_v39 = vsel %vm2855_vm0, %v14326_v5, 0.0 }
0x13d8   : > { %6592 = vadd.xlane.f32.xlu0 %v6591_v39 }
0x13da   : > { %v14332_v52 = vpop.eup %12301 }
0x13db   : > { %v6609_v46 = vsel %vm2855_vm0, %v14332_v52, 0.0  ;;  %v14336_v6 = vpop.eup %12303 }
0x13dc   : > { %6610 = vadd.xlane.f32.xlu0 %v6609_v46  ;;  %v6603_v51 = vsel %vm2855_vm0, %v14336_v6, 0.0  ;;  %v14348_v61 = vpop.eup %12305 }
0x13dd   : > { %v14352_v1 = vpop.eup %12307 }
0x13e0   : > { %6604 = vadd.xlane.f32.xlu0 %v6603_v51 }
0x13e6   : > { %6641 = vrot.lane.b32.xlu1 %v15074_v11, %s12637_s21  ;;  %v6612_v11 = vsel %vm2855_vm0, %v14348_v61, 0.0 }
0x13ea   : > { %6643 = vrot.lane.b32.xlu1 %v15075_v33, %s12637_s21 }
0x13f6   : > { %6639 = vrot.lane.b32.xlu0 %v15073_v16, %s12637_s21  ;;  %v6606_v16 = vsel %vm2855_vm0, %v14352_v1, 0.0 }
0x140e   : > { %6613 = vadd.xlane.f32.xlu1 %v6612_v11 }
0x1412   : > { %6607 = vadd.xlane.f32.xlu1 %v6606_v16 }
0x1423   : > { %6645 = vrot.lane.b32.xlu1 %v15076_v63, %s12637_s21 }
0x143c   : > { %v6289_v33 = vpop.xlane.xlu0 %6288 }
0x1440   : > { %v6283_v9 = vpop.xlane.xlu0 %6282 }
0x1444   : > { %v6292_v49 = vpop.xlane.xlu1 %6291 }
0x1445   : > { %12309 = vrcp.f32 %v6292_v49 }
0x1446   : > { %12311 = vrcp.f32 %v6283_v9 }
0x1447   : > { %12313 = vrcp.f32 %v6289_v33 }
0x1448   : > { %v6286_v28 = vpop.xlane.xlu1 %6285 }
0x1449   : > { %12315 = vrcp.f32 %v6286_v28 }
0x144c   : > { %v6301_v7 = vpop.xlane.xlu0 %6300  ;;  %v6304_v55 = vpop.xlane.xlu1 %6303 }
0x144d   : > { %12317 = vrcp.f32 %v6301_v7 }
0x144e   : > { %12319 = vrcp.f32 %v6304_v55 }
0x144f   : > { %v12310_v0 = vpop.eup %12309 }
0x1450   : > { %v6295_v27 = vpop.xlane.xlu0 %6294  ;;  %v6298_v54 = vpop.xlane.xlu1 %6297  ;;  %v6316_v37 = vmul.f32 %v12310_v0, %v14286_v34 }
0x1451   : > { %v12312_v4 = vpop.eup %12311  ;;  %12321 = vrcp.f32 %v6295_v27 }
0x1452   : > { %v12314_v21 = vpop.eup %12313  ;;  %12323 = vrcp.f32 %v6298_v54  ;;  %v6313_v62 = vmul.f32 %v12312_v4, %v14282_v8 }
0x1453   : > { %v12316_v63 = vpop.eup %12315  ;;  %v6315_v14 = vmul.f32 %v12314_v21, %v14276_v12 }
0x1454   : > { %v6314_v44 = vmul.f32 %v12316_v63, %v14290_v19 }
0x1455   : > { %v6322_v40 = vpack.c.bf16 %v6316_v37, %v6315_v14  ;;  %v11995_v14 = vld [vmem:[#allocation7 + $0x7c] ss:$12 sps:$4 sm:$0xff]  }
0x1456   : > { %v6321_v42 = vpack.c.bf16 %v6314_v44, %v6313_v62  ;;  %v11991_v62 = vld [vmem:[#allocation7 + $0x64] ss:$12 sps:$4 sm:$0xff]   ;;  %v11992_v44 = vld [vmem:[#allocation7 + $0x68] ss:$12 sps:$4 sm:$0xff]  }
0x1457   : > { %v12318_v41 = vpop.eup %12317  ;;  %10852 = vmatprep.subr.bf16.mxu1 %v11992_v44 }
0x1458   : > { %10812 = vmatprep.mubr.msk.bf16.mxu0 %vm2855_vm0, %v6321_v42  ;;  %v12320_v17 = vpop.eup %12319  ;;  %v6319_v34 = vmul.f32 %v12318_v41, %v14296_v29  ;;  %v11996_v42 = vld [vmem:[#allocation7 + $0x80] ss:$12 sps:$4 sm:$0xff]   ;;  %10853 = vmatpush3.bf16.msra.mxu1 %v11992_v44  ;;  %v12001_v41 = vld [vmem:[#allocation7 + $0xa8] ss:$12 sps:$4 sm:$0xff]  }
0x1459   : > { %10813 = vmatmul.mubr.msk.bf16.vlgmr.msra.gmra.mrb[152].mxu0 %vm2855_vm0, %v6322_v40  ;;  %v6320_v8 = vmul.f32 %v12320_v17, %v14294_v24  ;;  %10854 = vmatprep.subr.bf16.mxu1 %v11996_v42  ;;  %v12003_v40 = vld [vmem:[#allocation7 + $0xac] ss:$12 sps:$4 sm:$0xff]   ;;  %v12004_v17 = vld [vmem:[#allocation7 + $0xb0] ss:$12 sps:$4 sm:$0xff]   ;;  %v15082_v44 = vld [vmem:[#allocation44_spill] sm:$0xff] }
0x145b   : > { %v12322_v20 = vpop.eup %12321  ;;  %v6324_v26 = vpack.c.bf16 %v6320_v8, %v6319_v34 }
0x145c   : > { %v12324_v30 = vpop.eup %12323  ;;  %v6317_v13 = vmul.f32 %v12322_v20, %v14298_v15  ;;  %10855 = vmatpush3.bf16.msra.mxu1 %v11996_v42  ;;  %v12007_v20 = vld [vmem:[#allocation7 + $0x4] ss:$12 sps:$4 sm:$0xff]   ;;  %v15084_v42 = vld [vmem:[#allocation39_spill] sm:$0xff] }
0x145d   : > { %v6318_v19 = vmul.f32 %v12324_v30, %v14304_v57  ;;  %v12008_v30 = vld [vmem:[#allocation7 + $0x8] ss:$12 sps:$4 sm:$0xff]  }
0x145e   : > { %v6602_v50 = vpop.xlane.xlu1 %6601 }
0x145f   : > { %v6323_v12 = vpack.c.bf16 %v6318_v19, %v6317_v13 }
0x1461   : > { %v6599_v39 = vpop.xlane.xlu0 %6598  ;;  %10816 = vmatprep.mubr.msk.bf16.mxu0 %vm2855_vm0, %v6323_v12 }
0x1462   : > { %v6596_v46 = vpop.xlane.xlu1 %6595  ;;  %10817 = vmatmul.mubr.msk.bf16.gmra.mrb[156].mxu0 %vm2855_vm0, %v6324_v26 }
0x1463   : > { %12325 = vrcp.f32 %v6596_v46 }
0x1465   : > { %v6593_v51 = vpop.xlane.xlu0 %6592 }
0x1466   : > { %12327 = vrcp.f32 %v6593_v51  ;;  %v6642_v23 = vpop.permute.xlu1 %6641 }
0x1467   : > { %12329 = vrcp.f32 %v6599_v39 }
0x1468   : > { %12331 = vrcp.f32 %v6602_v50 }
0x1469   : > { %v6611_v10 = vpop.xlane.xlu0 %6610 }
0x146a   : > { %v6644_v31 = vpop.permute.xlu1 %6643 }
0x146d   : > { %v6605_v15 = vpop.xlane.xlu0 %6604  ;;  %v12326_v53 = vpop.eup %12325 }
0x146e   : > { %v6624_v47 = vmul.f32 %v12326_v53, %v14322_v25 }
0x1470   : > { %v12328_v29 = vpop.eup %12327 }
0x1471   : > { %v6640_v24 = vpop.permute.xlu0 %6639  ;;  %v6623_v57 = vmul.f32 %v12328_v29, %v14326_v5  ;;  %v12330_v16 = vpop.eup %12329 }
0x1472   : > { %10836 = vmatprep.subr.bf16.mxu0 %v6640_v24  ;;  %v12332_v25 = vpop.eup %12331  ;;  %v6625_v33 = vmul.f32 %v12330_v16, %v14320_v56  ;;  %v12009_v16 = vld [vmem:[#allocation7 + $0x18] ss:$12 sps:$4 sm:$0xff]  }
0x1473   : > { %10837 = vmatpush3.bf16.msra.mxu0 %v6640_v24  ;;  %v6631_v59 = vpack.c.bf16 %v6624_v47, %v6623_v57  ;;  %v6626_v49 = vmul.f32 %v12332_v25, %v14316_v3  ;;  %v11989_v3 = vld [vmem:[#allocation7 + $0x60] ss:$12 sps:$4 sm:$0xff]  }
0x1474   : > { %10838 = vmatprep.subr.bf16.mxu0 %v6642_v23  ;;  %v12005_v47 = vld [vmem:[#allocation7] ss:$12 sps:$4 sm:$0xff]  }
0x1475   : > { %10844 = vmatprep.mubr.msk.bf16.mxu0 %vm2855_vm0, %v6631_v59  ;;  %v6632_v28 = vpack.c.bf16 %v6626_v49, %v6625_v33  ;;  %v12015_v25 = vld [vmem:[#allocation7 + $0x34] ss:$12 sps:$4 sm:$0xff]  }
0x1477   : > { %10839 = vmatpush3.bf16.msra.mxu0 %v6642_v23 }
0x1478   : > { %10840 = vmatprep.subr.bf16.mxu0 %v6644_v31 }
0x147b   : > { %10841 = vmatpush3.bf16.msra.mxu0 %v6644_v31  ;;  %v12011_v31 = vld [vmem:[#allocation7 + $0x1c] ss:$12 sps:$4 sm:$0xff]  }
0x149b   : > { %v6614_v11 = vpop.xlane.xlu1 %6613 }
0x149c   : > { %12333 = vrcp.f32 %v6614_v11  ;;  %v12012_v11 = vld [vmem:[#allocation7 + $0x20] ss:$12 sps:$4 sm:$0xff]  }
0x149d   : > { %12335 = vrcp.f32 %v6605_v15 }
0x149e   : > { %12337 = vrcp.f32 %v6611_v10 }
0x149f   : > { %v6608_v5 = vpop.xlane.xlu1 %6607 }
0x14a0   : > { %12339 = vrcp.f32 %v6608_v5 }
0x14a3   : > { %v6646_v9 = vpop.permute.xlu1 %6645 }
0x14a4   : > { %10842 = vmatprep.subr.bf16.mxu0 %v6646_v9 }
0x14a5   : > { %10843 = vmatpush3.bf16.msra.mxu0 %v6646_v9  ;;  %v12016_v9 = vld [vmem:[#allocation7 + $0x38] ss:$12 sps:$4 sm:$0xff]  }
0x14a6   : > { %v12334_v7 = vpop.eup %12333  ;;  %6824 = vmatprep.subr.bf16.mxu0 %v11991_v62 }
0x14a7   : > { %v12336_v55 = vpop.eup %12335  ;;  %v6630_v54 = vmul.f32 %v12334_v7, %v14348_v61  ;;  %v12000_v61 = vld [vmem:[#allocation7 + $0x98] ss:$12 sps:$4 sm:$0xff]  }
0x14a8   : > { %10845 = vmatmul.mubr.msk.bf16.vlgmr.msra.gmra.mrb[160].mxu0 %vm2855_vm0, %v6632_v28  ;;  %v12338_v0 = vpop.eup %12337  ;;  %v6627_v4 = vmul.f32 %v12336_v55, %v14336_v6  ;;  %v11993_v6 = vld [vmem:[#allocation7 + $0x78] ss:$12 sps:$4 sm:$0xff]   ;;  %10856 = vmatprep.subr.bf16.mxu1 %v12000_v61  ;;  %v12013_v55 = vld [vmem:[#allocation7 + $0x30] ss:$12 sps:$4 sm:$0xff]  }
0x14a9   : > { %v6629_v56 = vmul.f32 %v12338_v0, %v14332_v52  ;;  %6825 = vmatpush1.bf16.msra.mxu0 %v11989_v3  ;;  %v11999_v52 = vld [vmem:[#allocation7 + $0x94] ss:$12 sps:$4 sm:$0xff]   ;;  %10857 = vmatpush3.bf16.msra.mxu1 %v12000_v61  ;;  %v15086_v61 = vld [vmem:[#allocation43_spill] sm:$0xff] }
0x14aa   : > { %v12340_v27 = vpop.eup %12339  ;;  %6826 = vmatprep.subr.bf16.mxu0 %v11995_v14  ;;  %10858 = vmatprep.subr.bf16.mxu1 %v12004_v17  ;;  %v15081_v3 = vld [vmem:[#allocation18_spill] sm:$0xff]  ;;  %v15083_v14 = vld [vmem:[#allocation35_spill] sm:$0xff] }
0x14ab   : > { %v6628_v21 = vmul.f32 %v12340_v27, %v14352_v1  ;;  %v6634_v37 = vpack.c.bf16 %v6630_v54, %v6629_v56  ;;  %v11997_v1 = vld [vmem:[#allocation7 + $0x90] ss:$12 sps:$4 sm:$0xff]   ;;  %v12019_v27 = vld [vmem:[#allocation7 + $0x4c] ss:$12 sps:$4 sm:$0xff]   ;;  %v15079_v56 = vld [vmem:[#allocation36_spill] sm:$0xff] }
0x14ac   : > { %v12020_v54 = vld [vmem:[#allocation7 + $0x50] ss:$12 sps:$4 sm:$0xff]  }
0x14ad   : > { %v6633_v63 = vpack.c.bf16 %v6628_v21, %v6627_v4  ;;  %6827 = vmatpush1.bf16.msra.mxu0 %v11993_v6  ;;  %10859 = vmatpush3.bf16.msra.mxu1 %v12004_v17  ;;  %v12017_v4 = vld [vmem:[#allocation7 + $0x48] ss:$12 sps:$4 sm:$0xff]   ;;  %v7195_v6 = vsel %vm2855_vm0, %v15082_v44, 0 }
0x14ae   : > { %6828 = vmatprep.subr.bf16.mxu0 %v11999_v52  ;;  %10868 = vmatprep.subr.bf16.mxu1 %v12008_v30  ;;  %v15078_v21 = vld [vmem:[#allocation33_spill] sm:$0xff]  ;;  %v15085_v52 = vld [vmem:[#allocation46_spill] sm:$0xff] }
0x14af   : > { %10848 = vmatprep.mubr.msk.bf16.mxu0 %vm2855_vm0, %v6633_v63  ;;  %v7189_v63 = vsel %vm2855_vm0, %v15079_v56, 0  ;;  %v15089_v17 = vld [vmem:[#allocation30_spill] sm:$0xff] }
0x14b0   : > { %10849 = vmatmul.mubr.msk.bf16.gmra.mrb[164].mxu0 %vm2855_vm0, %v6634_v37  ;;  %v15080_v37 = vld [vmem:[#allocation40_spill] sm:$0xff] }
0x14b1   : > { %6856 = vmatprep.mubr.bf16.mxu0 %v15060_v2  ;;  %6829 = vmatpush1.bf16.msra.mxu0 %v11997_v1  ;;  %v7192_v62 = vsel %vm2855_vm0, %v15080_v37, 0  ;;  %v7198_v1 = vsel %vm2855_vm0, %v15085_v52, 0 }
0x14b2   : > { %6830 = vmatprep.subr.bf16.mxu0 %v12003_v40  ;;  %v15087_v40 = vld [vmem:[#allocation22_spill] sm:$0xff] }
0x14b5   : > { %6831 = vmatpush1.bf16.msra.mxu0 %v12001_v41  ;;  %v15088_v41 = vld [vmem:[#allocation26_spill] sm:$0xff] }
0x14b6   : > { %7038 = vmatprep.subr.bf16.mxu0 %v12007_v20 }
0x152c   : > { %v10814_v13 = vpop.f32.mrb[152].mxu0 }
0x152d   : > { %v6371_v34 = vpop.f32.mrb[153].mxu0 }
0x152e   : > { %v10815_v8 = vpop.f32.mrb[154].mxu0 }
0x152f   : > { %v14383_v19 = vpack.c.bf16 %v10815_v8, %v10814_v13  ;;  %v6374_v50 = vpop.f32.mrb[155].mxu0 }
0x1530   : > { %v14385_v12 = vpack.c.bf16 %v6374_v50, %v6371_v34 }
0x1535   : > { %v10818_v26 = vpop.f32.mrb[156].mxu0 }
0x1536   : > { %v6387_v39 = vpop.f32.mrb[157].mxu0 }
0x1537   : > { %v10819_v46 = vpop.f32.mrb[158].mxu0 }
0x1538   : > { %v14387_v51 = vpack.c.bf16 %v10819_v46, %v10818_v26  ;;  %v6390_v10 = vpop.f32.mrb[159].mxu0 }
0x1539   : > { %v14389_v15 = vpack.c.bf16 %v6390_v10, %v6387_v39 }
0x157b   : > { %v10846_v53 = vpop.f32.mrb[160].mxu0 }
0x157c   : > { %v6697_v29 = vpop.f32.mrb[161].mxu0 }
0x157d   : > { %v10847_v23 = vpop.f32.mrb[162].mxu0 }
0x157e   : > { %v6729_v24 = vpack.c.bf16 %v10847_v23, %v10846_v53  ;;  %v6700_v57 = vpop.f32.mrb[163].mxu0 }
0x157f   : > { %v6728_v59 = vpack.c.bf16 %v6700_v57, %v6697_v29 }
0x1581   : > { %9931 = vmatmul.mubr.msk.bf16.vlgmr.msra.gmra.mrb[168].mxu0 %vm2855_vm0, %v6728_v59  ;;  %10860 = vmatprep.mubr.msk.bf16.mxu1 %vm2855_vm0, %v6728_v59 }
0x1582   : > { %7039 = vmatpush1.bf16.msra.mxu0 %v12005_v47  ;;  %10861 = vmatmul.mubr.msk.bf16.vlgmr.msra.gmra.mrb[168].mxu1 %vm2855_vm0, %v6729_v24 }
0x1583   : > { %10869 = vmatpush3.bf16.msra.mxu1 %v12008_v30  ;;  %v10850_v5 = vpop.f32.mrb[164].mxu0  ;;  %7040 = vmatprep.subr.bf16.mxu0 %v12011_v31 }
0x1584   : > { %v6713_v33 = vpop.f32.mrb[165].mxu0  ;;  %10870 = vmatprep.subr.bf16.mxu1 %v12012_v11  ;;  %6866 = vmatprep.mubr.bf16.mxu0 %v15060_v2 }
0x1585   : > { %v10851_v49 = vpop.f32.mrb[166].mxu0 }
0x1586   : > { %v6731_v28 = vpack.c.bf16 %v10851_v49, %v10850_v5  ;;  %7041 = vmatpush1.bf16.msra.mxu0 %v12009_v16  ;;  %v6716_v7 = vpop.f32.mrb[167].mxu0 }
0x1587   : > { %v6730_v0 = vpack.c.bf16 %v6716_v7, %v6713_v33  ;;  %10871 = vmatpush3.bf16.msra.mxu1 %v12012_v11  ;;  %7042 = vmatprep.subr.bf16.mxu0 %v12015_v25 }
0x1588   : > { %10872 = vmatprep.subr.bf16.mxu1 %v12016_v9 }
0x1589   : > { %9932 = vmatmul.mubr.msk.bf16.gmra.mrb[172].mxu0 %vm2855_vm0, %v6729_v24  ;;  %10864 = vmatprep.mubr.msk.bf16.mxu1 %vm2855_vm0, %v6730_v0 }
0x158a   : > { %7043 = vmatpush1.bf16.msra.mxu0 %v12013_v55  ;;  %10865 = vmatmul.mubr.msk.bf16.gmra.mrb[172].mxu1 %vm2855_vm0, %v6731_v28 }
0x158b   : > { %10873 = vmatpush3.bf16.msra.mxu1 %v12016_v9  ;;  %10876 = vmatprep.mubr.msk.bf16.mxu1 %vm2855_vm0, %v14385_v12 }
0x158c   : > { %7044 = vmatprep.subr.bf16.mxu0 %v12019_v27  ;;  %10874 = vmatprep.subr.bf16.mxu1 %v12020_v54 }
0x158d   : > { %6876 = vmatprep.mubr.bf16.mxu0 %v15060_v2 }
0x158e   : > { %7045 = vmatpush1.bf16.msra.mxu0 %v12017_v4 }
0x158f   : > { %10875 = vmatpush3.bf16.msra.mxu1 %v12020_v54  ;;  %10900 = vmatprep.subr.bf16.mxu0 %v15078_v21 }
0x1590   : > { %11484 = vmatprep.subr.msk.bf16.mxu1 %vm2855_vm0, %v15079_v56 }
0x1591   : > { %9933 = vmatmul.mubr.msk.bf16.gmra.mrb[176].mxu0 %vm2855_vm0, %v6730_v0 }
0x1592   : > { %10877 = vmatmul.mubr.msk.bf16.vlgmr.msra.gmra.mrb[168].mxu1 %vm2855_vm0, %v14383_v19  ;;  %6886 = vmatprep.mubr.bf16.mxu0 %v15060_v2 }
0x1593   : > { %10880 = vmatprep.mubr.msk.bf16.mxu1 %vm2855_vm0, %v14389_v15 }
0x1598   : > { %10885 = vmatpush3.bf16.xpose.msra.mxu1 %v7189_v63 }
0x1599   : > { %11485 = vmatprep.subr.msk.bf16.mxu1 %vm2855_vm0, %v15080_v37  ;;  %9934 = vmatmul.mubr.msk.bf16.gmra.mrb[180].mxu0 %vm2855_vm0, %v6731_v28 }
0x159a   : > { %10881 = vmatmul.mubr.msk.bf16.gmra.mrb[172].mxu1 %vm2855_vm0, %v14387_v51  ;;  %7070 = vmatprep.mubr.bf16.mxu0 %v15060_v2 }
0x159b   : > { %10892 = vmatprep.mubr.msk.bf16.mxu1 %vm2855_vm0, %v15081_v3 }
0x15a0   : > { %10887 = vmatpush3.bf16.xpose.msra.mxu1 %v7192_v62 }
0x15a1   : > { %11486 = vmatprep.subr.msk.bf16.mxu1 %vm2855_vm0, %v15082_v44  ;;  %9951 = vmatmul.mubr.msk.bf16.vlgmr.msra.gmra.mrb[168].mxu0 %vm2855_vm0, %v14385_v12 }
0x15a2   : > { %10901 = vmatpush3.bf16.msra.mxu0 %v15078_v21  ;;  %7080 = vmatprep.mubr.bf16.mxu0 %v15060_v2 }
0x15a3   : > { %10902 = vmatprep.subr.bf16.mxu0 %v15083_v14 }
0x15a6   : > { %10903 = vmatpush3.bf16.msra.mxu0 %v15083_v14 }
0x15a7   : > { %10904 = vmatprep.subr.bf16.mxu0 %v15084_v42 }
0x15a8   : > { %10889 = vmatpush3.bf16.xpose.msra.mxu1 %v7195_v6 }
0x15a9   : > { %11487 = vmatprep.subr.msk.bf16.mxu1 %vm2855_vm0, %v15085_v52  ;;  %9952 = vmatmul.mubr.msk.bf16.gmra.mrb[172].mxu0 %vm2855_vm0, %v14383_v19 }
0x15aa   : > { %10905 = vmatpush3.bf16.msra.mxu0 %v15084_v42  ;;  %7090 = vmatprep.mubr.bf16.mxu0 %v15060_v2 }
0x15ab   : > { %10906 = vmatprep.subr.bf16.mxu0 %v15086_v61 }
0x15ae   : > { %10907 = vmatpush3.bf16.msra.mxu0 %v15086_v61 }
0x15b0   : > { %10891 = vmatpush3.bf16.xpose.msra.mxu1 %v7198_v1 }
0x15b1   : > { %9953 = vmatmul.mubr.msk.bf16.gmra.mrb[176].mxu0 %vm2855_vm0, %v14389_v15 }
0x15b2   : > { %7100 = vmatprep.mubr.bf16.mxu0 %v15060_v2 }
0x15b7   : > { %10893 = vmatmul.mubr.msk.bf16.vlgmr.msra.gmra.mrb[176].mxu1 %vm2855_vm0, %v15087_v40 }
0x15b8   : > { %10896 = vmatprep.mubr.msk.bf16.mxu1 %vm2855_vm0, %v15088_v41 }
0x15b9   : > { %9954 = vmatmul.mubr.msk.bf16.gmra.mrb[180].mxu0 %vm2855_vm0, %v14387_v51 }
0x15bf   : > { %10897 = vmatmul.mubr.msk.bf16.gmra.mrb[180].mxu1 %vm2855_vm0, %v15089_v17 }
0x168a   : > { %v10894_v20 = vpop.f32.mrb[176].mxu1 }
0x168b   : > { %v7234_v30 = vpop.f32.mrb[177].mxu1  ;;  %v7267_v50 = vsel %vm13285_vm1, %v10894_v20, -inf }
0x168c   : > { %v7265_v13 = vsel %vm13290_vm2, %v7234_v30, -inf  ;;  %v10895_v34 = vpop.f32.mrb[178].mxu1  ;;  %v7279_v39 = vsel %vm2855_vm0, %v7267_v50, -inf }
0x168d   : > { %v7273_v8 = vsel %vm2855_vm0, %v7265_v13, -inf  ;;  %v7237_v19 = vpop.f32.mrb[179].mxu1  ;;  %v7268_v46 = vsel %vm13312_vm4, %v10895_v34, -inf }
0x168e   : > { %v7266_v12 = vsel %vm13299_vm3, %v7237_v19, -inf  ;;  %7274 = vmax.xlane.f32.xlu0 %v7273_v8  ;;  %v7282_v53 = vsel %vm2855_vm0, %v7268_v46, -inf }
0x168f   : > { %v7276_v26 = vsel %vm2855_vm0, %v7266_v12, -inf }
0x1690   : > { %7277 = vmax.xlane.f32.xlu1 %v7276_v26 }
0x1692   : > { %7280 = vmax.xlane.f32.xlu0 %v7279_v39  ;;  %v10898_v51 = vpop.f32.mrb[180].mxu1 }
0x1693   : > { %v7250_v10 = vpop.f32.mrb[181].mxu1  ;;  %v7271_v31 = vsel %vm13328_vm5, %v10898_v51, -inf }
0x1694   : > { %v10899_v15 = vpop.f32.mrb[182].mxu1  ;;  %v7269_v23 = vsel %vm13336_vm6, %v7250_v10, -inf  ;;  %v7291_v16 = vsel %vm2855_vm0, %v7271_v31, -inf }
0x1695   : > { %v7253_v29 = vpop.f32.mrb[183].mxu1  ;;  %v7272_v47 = vsel %vm13359_vm8, %v10899_v15, -inf  ;;  %v7285_v59 = vsel %vm2855_vm0, %v7269_v23, -inf }
0x1696   : > { %v7270_v24 = vsel %vm13345_vm7, %v7253_v29, -inf  ;;  %7283 = vmax.xlane.f32.xlu0 %v7282_v53  ;;  %v7294_v11 = vsel %vm2855_vm0, %v7272_v47, -inf }
0x1697   : > { %v7288_v57 = vsel %vm2855_vm0, %v7270_v24, -inf }
0x1698   : > { %7289 = vmax.xlane.f32.xlu1 %v7288_v57 }
0x169a   : > { %7286 = vmax.xlane.f32.xlu0 %v7285_v59 }
0x169c   : > { %7295 = vmax.xlane.f32.xlu1 %v7294_v11 }
0x169e   : > { %7292 = vmax.xlane.f32.xlu0 %v7291_v16 }
0x171b   : > { %v7275_v5 = vpop.xlane.xlu0 %7274 }
0x171c   : > { %v7297_v25 = vsub.f32 %v7265_v13, %v7275_v5  ;;  %v12021_v5 = vld [vmem:[#allocation7 + $0xc8] ss:$12 sps:$4 sm:$0xff]  }
0x171d   : > { %v7278_v33 = vpop.xlane.xlu1 %7277  ;;  %10916 = vmatprep.subr.bf16.mxu1 %v12021_v5 }
0x171e   : > { %v7305_v9 = vmul.f32 1.442695, %v7297_v25  ;;  %v7298_v49 = vsub.f32 %v7266_v12, %v7278_v33  ;;  %10917 = vmatpush3.bf16.msra.mxu1 %v12021_v5  ;;  %v12022_v25 = vld [vmem:[#allocation7 + $0xe0] ss:$12 sps:$4 sm:$0xff]   ;;  %v12023_v33 = vld [vmem:[#allocation7 + $0xf8] ss:$12 sps:$4 sm:$0xff]  }
0x171f   : > { %v7281_v28 = vpop.xlane.xlu0 %7280  ;;  %10918 = vmatprep.subr.bf16.mxu1 %v12022_v25 }
0x1720   : > { %12341 = vpow2.f32 %v7305_v9  ;;  %v7307_v7 = vmul.f32 1.442695, %v7298_v49  ;;  %v7299_v55 = vsub.f32 %v7267_v50, %v7281_v28  ;;  %v12024_v9 = vld [vmem:[#allocation7 + $0x110] ss:$12 sps:$4 sm:$0xff]  }
0x1722   : > { %12343 = vpow2.f32 %v7307_v7  ;;  %v7309_v0 = vmul.f32 1.442695, %v7299_v55  ;;  %10919 = vmatpush3.bf16.msra.mxu1 %v12022_v25 }
0x1723   : > { %v7284_v27 = vpop.xlane.xlu0 %7283  ;;  %10920 = vmatprep.subr.bf16.mxu1 %v12023_v33 }
0x1724   : > { %12345 = vpow2.f32 %v7309_v0  ;;  %v7300_v54 = vsub.f32 %v7268_v46, %v7284_v27 }
0x1725   : > { %v7290_v4 = vpop.xlane.xlu1 %7289 }
0x1726   : > { %v7311_v63 = vmul.f32 1.442695, %v7300_v54  ;;  %v7302_v62 = vsub.f32 %v7270_v24, %v7290_v4  ;;  %10921 = vmatpush3.bf16.msra.mxu1 %v12023_v33 }
0x1727   : > { %v7287_v6 = vpop.xlane.xlu0 %7286  ;;  %10922 = vmatprep.subr.bf16.mxu1 %v12024_v9 }
0x1728   : > { %12347 = vpow2.f32 %v7311_v63  ;;  %v7315_v1 = vmul.f32 1.442695, %v7302_v62  ;;  %v7301_v20 = vsub.f32 %v7269_v23, %v7287_v6 }
0x1729   : > { %v7296_v30 = vpop.xlane.xlu1 %7295 }
0x172a   : > { %v14478_v13 = vpop.eup %12341  ;;  %12349 = vpow2.f32 %v7315_v1  ;;  %v7313_v34 = vmul.f32 1.442695, %v7301_v20  ;;  %v7304_v8 = vsub.f32 %v7272_v47, %v7296_v30  ;;  %10923 = vmatpush3.bf16.msra.mxu1 %v12024_v9  ;;  %v12025_v1 = vld [vmem:[#allocation7 + $0xc0] ss:$12 sps:$4 sm:$0xff]   ;;  %v12030_v30 = vld [vmem:[#allocation7 + $0xdc] ss:$12 sps:$4 sm:$0xff]  }
0x172b   : > { %v7293_v19 = vpop.xlane.xlu0 %7292  ;;  %v7321_v50 = vsel %vm2855_vm0, %v14478_v13, 0.0 }
0x172c   : > { %v14482_v12 = vpop.eup %12343  ;;  %12351 = vpow2.f32 %v7313_v34  ;;  %v7319_v26 = vmul.f32 1.442695, %v7304_v8  ;;  %v7303_v39 = vsub.f32 %v7271_v31, %v7293_v19  ;;  %7322 = vadd.xlane.f32.xlu0 %v7321_v50  ;;  %v12028_v50 = vld [vmem:[#allocation7 + $0xd8] ss:$12 sps:$4 sm:$0xff]  }
0x172d   : > { %v7324_v46 = vsel %vm2855_vm0, %v14482_v12, 0.0 }
0x172e   : > { %v14486_v51 = vpop.eup %12345  ;;  %12353 = vpow2.f32 %v7319_v26  ;;  %v7317_v10 = vmul.f32 1.442695, %v7303_v39  ;;  %7325 = vadd.xlane.f32.xlu1 %v7324_v46 }
0x172f   : > { %v7327_v15 = vsel %vm2855_vm0, %v14486_v51, 0.0 }
0x1730   : > { %12355 = vpow2.f32 %v7317_v10  ;;  %7328 = vadd.xlane.f32.xlu0 %v7327_v15  ;;  %v12031_v15 = vld [vmem:[#allocation7 + $0xf0] ss:$12 sps:$4 sm:$0xff]  }
0x1732   : > { %v12348_v53 = vpop.eup %12347 }
0x1733   : > { %v7330_v29 = vsel %vm2855_vm0, %v12348_v53, 0.0 }
0x1734   : > { %v14491_v23 = vpop.eup %12349  ;;  %7331 = vadd.xlane.f32.xlu1 %v7330_v29  ;;  %v12036_v29 = vld [vmem:[#allocation7 + $0x10c] ss:$12 sps:$4 sm:$0xff]  }
0x1735   : > { %v7336_v47 = vsel %vm2855_vm0, %v14491_v23, 0.0 }
0x1736   : > { %v14493_v24 = vpop.eup %12351 }
0x1737   : > { %v7333_v57 = vsel %vm2855_vm0, %v14493_v24, 0.0 }
0x1738   : > { %v14499_v59 = vpop.eup %12353  ;;  %7334 = vadd.xlane.f32.xlu0 %v7333_v57  ;;  %7337 = vadd.xlane.f32.xlu1 %v7336_v47 }
0x1739   : > { %v7342_v16 = vsel %vm2855_vm0, %v14499_v59, 0.0 }
0x173a   : > { %v14501_v31 = vpop.eup %12355 }
0x173b   : > { %v7339_v11 = vsel %vm2855_vm0, %v14501_v31, 0.0 }
0x173c   : > { %7340 = vadd.xlane.f32.xlu0 %v7339_v11  ;;  %7343 = vadd.xlane.f32.xlu1 %v7342_v16 }
0x174d   : > { %7718 = vrot.lane.b32.xlu1 %v15080_v37, %s12637_s21  ;;  %v12027_v37 = vld [vmem:[#allocation7 + $0xc4] ss:$12 sps:$4 sm:$0xff]  }
0x174e   : > { %7538 = vmatprep.subr.bf16.mxu0 %v12027_v37 }
0x1751   : > { %7720 = vrot.lane.b32.xlu1 %v15082_v44, %s12637_s21 }
0x1752   : > { %7716 = vrot.lane.b32.xlu0 %v15079_v56, %s12637_s21 }
0x1755   : > { %7722 = vrot.lane.b32.xlu1 %v15085_v52, %s12637_s21 }
0x1756   : > { %7704 = vrot.lane.b32.xlu0 %v15081_v3, %s12637_s21 }
0x1759   : > { %7706 = vrot.lane.b32.xlu1 %v15087_v40, %s12637_s21 }
0x175a   : > { %7708 = vrot.lane.b32.xlu0 %v15088_v41, %s12637_s21 }
0x175d   : > { %7710 = vrot.lane.b32.xlu1 %v15089_v17, %s12637_s21 }
0x17b9   : > { %v7323_v44 = vpop.xlane.xlu0 %7322 }
0x17ba   : > { %12357 = vrcp.f32 %v7323_v44 }
0x17bb   : > { %v7326_v56 = vpop.xlane.xlu1 %7325 }
0x17bc   : > { %12359 = vrcp.f32 %v7326_v56 }
0x17bd   : > { %v7329_v49 = vpop.xlane.xlu0 %7328 }
0x17be   : > { %12361 = vrcp.f32 %v7329_v49 }
0x17c1   : > { %v7332_v52 = vpop.xlane.xlu1 %7331 }
0x17c2   : > { %12363 = vrcp.f32 %v7332_v52 }
0x17c4   : > { %v12358_v3 = vpop.eup %12357 }
0x17c5   : > { %v7335_v28 = vpop.xlane.xlu0 %7334  ;;  %v7338_v7 = vpop.xlane.xlu1 %7337  ;;  %v7353_v41 = vmul.f32 %v12358_v3, %v14478_v13 }
0x17c6   : > { %v12360_v40 = vpop.eup %12359  ;;  %12365 = vrcp.f32 %v7335_v28 }
0x17c7   : > { %12367 = vrcp.f32 %v7338_v7  ;;  %v7354_v17 = vmul.f32 %v12360_v40, %v14482_v12  ;;  %v12033_v12 = vld [vmem:[#allocation7 + $0xf4] ss:$12 sps:$4 sm:$0xff]  }
0x17c8   : > { %v12362_v54 = vpop.eup %12361  ;;  %v12037_v40 = vld [vmem:[#allocation7 + $0x128] ss:$12 sps:$4 sm:$0xff]  }
0x17c9   : > { %v7341_v55 = vpop.xlane.xlu0 %7340  ;;  %v7344_v0 = vpop.xlane.xlu1 %7343  ;;  %v7361_v27 = vpack.c.bf16 %v7354_v17, %v7353_v41  ;;  %v7355_v63 = vmul.f32 %v12362_v54, %v14486_v51  ;;  %v12038_v17 = vld [vmem:[#allocation7 + $0x140] ss:$12 sps:$4 sm:$0xff]   ;;  %v12040_v54 = vld [vmem:[#allocation7 + $0x170] ss:$12 sps:$4 sm:$0xff]  }
0x17ca   : > { %12369 = vrcp.f32 %v7341_v55 }
0x17cb   : > { %12371 = vrcp.f32 %v7344_v0  ;;  %10908 = vmatprep.mubr.msk.bf16.mxu0 %vm2855_vm0, %v7361_v27  ;;  %v12039_v27 = vld [vmem:[#allocation7 + $0x158] ss:$12 sps:$4 sm:$0xff]  }
0x17cc   : > { %v12364_v4 = vpop.eup %12363 }
0x17cd   : > { %v7356_v62 = vmul.f32 %v12364_v4, %v12348_v53  ;;  %v7717_v6 = vpop.permute.xlu0 %7716  ;;  %v7719_v5 = vpop.permute.xlu1 %7718 }
0x17ce   : > { %11488 = vmatprep.subr.msk.bf16.mxu1 %vm2855_vm0, %v7717_v6  ;;  %v7740_v49 = vsel %vm2855_vm0, %v7719_v5, 0 }
0x17cf   : > { %v7362_v20 = vpack.c.bf16 %v7356_v62, %v7355_v63  ;;  %v15090_v63 = vld [vmem:[#allocation37_spill] sm:$0xff] }
0x17d0   : > { %v12366_v13 = vpop.eup %12365 }
0x17d1   : > { %v12368_v34 = vpop.eup %12367  ;;  %10909 = vmatmul.mubr.msk.bf16.vlgmr.msra.gmra.mrb[184].mxu0 %vm2855_vm0, %v7362_v20  ;;  %v7357_v8 = vmul.f32 %v12366_v13, %v14493_v24  ;;  %v7705_v52 = vpop.permute.xlu0 %7704 }
0x17d2   : > { %v7358_v19 = vmul.f32 %v12368_v34, %v14491_v23  ;;  %7539 = vmatpush1.bf16.msra.mxu0 %v12025_v1  ;;  %v12034_v23 = vld [vmem:[#allocation7 + $0x108] ss:$12 sps:$4 sm:$0xff]   ;;  %v7721_v3 = vpop.permute.xlu1 %7720 }
0x17d3   : > { %7540 = vmatprep.subr.bf16.mxu0 %v12030_v30  ;;  %v7743_v28 = vsel %vm2855_vm0, %v7721_v3, 0 }
0x17d4   : > { %v12370_v26 = vpop.eup %12369  ;;  %v7363_v39 = vpack.c.bf16 %v7358_v19, %v7357_v8 }
0x17d5   : > { %v12372_v46 = vpop.eup %12371  ;;  %v7359_v51 = vmul.f32 %v12370_v26, %v14501_v31  ;;  %v7709_v0 = vpop.permute.xlu0 %7708 }
0x17d6   : > { %10912 = vmatprep.mubr.msk.bf16.mxu0 %vm2855_vm0, %v7363_v39  ;;  %v7360_v10 = vmul.f32 %v12372_v46, %v14499_v59  ;;  %7541 = vmatpush1.bf16.msra.mxu0 %v12028_v50  ;;  %v7737_v59 = vsel %vm2855_vm0, %v7717_v6, 0  ;;  %v7723_v7 = vpop.permute.xlu1 %7722 }
0x17d7   : > { %7542 = vmatprep.subr.bf16.mxu0 %v12033_v12  ;;  %v7746_v41 = vsel %vm2855_vm0, %v7723_v7, 0 }
0x17d8   : > { %v7364_v53 = vpack.c.bf16 %v7360_v10, %v7359_v51 }
0x17da   : > { %10913 = vmatmul.mubr.msk.bf16.gmra.mrb[188].mxu0 %vm2855_vm0, %v7364_v53  ;;  %v7707_v55 = vpop.permute.xlu1 %7706 }
0x17db   : > { %7543 = vmatpush1.bf16.msra.mxu0 %v12031_v15  ;;  %7570 = vmatprep.mubr.bf16.mxu0 %v15060_v2 }
0x17dc   : > { %7544 = vmatprep.subr.bf16.mxu0 %v12036_v29 }
0x17de   : > { %v7711_v4 = vpop.permute.xlu1 %7710 }
0x17df   : > { %7545 = vmatpush1.bf16.msra.mxu0 %v12034_v23 }
0x18a4   : > { %v10910_v24 = vpop.f32.mrb[184].mxu0 }
0x18a5   : > { %v7411_v57 = vpop.f32.mrb[185].mxu0 }
0x18a6   : > { %v10911_v47 = vpop.f32.mrb[186].mxu0 }
0x18a7   : > { %v7443_v31 = vpack.c.bf16 %v10911_v47, %v10910_v24  ;;  %v7414_v11 = vpop.f32.mrb[187].mxu0 }
0x18a8   : > { %v7442_v16 = vpack.c.bf16 %v7414_v11, %v7411_v57 }
0x18aa   : > { %9979 = vmatmul.mubr.msk.bf16.vlgmr.msra.gmra.mrb[168].mxu0 %vm2855_vm0, %v7442_v16  ;;  %10924 = vmatprep.mubr.msk.bf16.mxu1 %vm2855_vm0, %v7442_v16 }
0x18ab   : > { %10925 = vmatmul.mubr.msk.bf16.vlgmr.msra.gmra.mrb[168].mxu1 %vm2855_vm0, %v7443_v31  ;;  %7580 = vmatprep.mubr.bf16.mxu0 %v15060_v2 }
0x18ac   : > { %10933 = vmatpush3.bf16.xpose.msra.mxu1 %v7737_v59 }
0x18ad   : > { %v10914_v25 = vpop.f32.mrb[188].mxu0  ;;  %11489 = vmatprep.subr.msk.bf16.mxu1 %vm2855_vm0, %v7719_v5 }
0x18ae   : > { %v7427_v33 = vpop.f32.mrb[189].mxu0 }
0x18af   : > { %v10915_v9 = vpop.f32.mrb[190].mxu0 }
0x18b0   : > { %v7445_v37 = vpack.c.bf16 %v10915_v9, %v10914_v25  ;;  %v7430_v44 = vpop.f32.mrb[191].mxu0 }
0x18b1   : > { %v7444_v56 = vpack.c.bf16 %v7430_v44, %v7427_v33 }
0x18b2   : > { %9980 = vmatmul.mubr.msk.bf16.gmra.mrb[172].mxu0 %vm2855_vm0, %v7443_v31 }
0x18b3   : > { %10928 = vmatprep.mubr.msk.bf16.mxu1 %vm2855_vm0, %v7444_v56  ;;  %7590 = vmatprep.mubr.bf16.mxu0 %v15060_v2 }
0x18b4   : > { %10929 = vmatmul.mubr.msk.bf16.gmra.mrb[172].mxu1 %vm2855_vm0, %v7445_v37 }
0x18b5   : > { %10935 = vmatpush3.bf16.xpose.msra.mxu1 %v7740_v49  ;;  %10940 = vmatprep.mubr.msk.bf16.mxu1 %vm2855_vm0, %v7705_v52 }
0x18b6   : > { %11490 = vmatprep.subr.msk.bf16.mxu1 %vm2855_vm0, %v7721_v3 }
0x18ba   : > { %9981 = vmatmul.mubr.msk.bf16.gmra.mrb[176].mxu0 %vm2855_vm0, %v7444_v56 }
0x18bb   : > { %7600 = vmatprep.mubr.bf16.mxu0 %v15060_v2 }
0x18bd   : > { %10937 = vmatpush3.bf16.xpose.msra.mxu1 %v7743_v28 }
0x18be   : > { %11491 = vmatprep.subr.msk.bf16.mxu1 %vm2855_vm0, %v7723_v7 }
0x18c2   : > { %9982 = vmatmul.mubr.msk.bf16.gmra.mrb[180].mxu0 %vm2855_vm0, %v7445_v37 }
0x18c5   : > { %10939 = vmatpush3.bf16.xpose.msra.mxu1 %v7746_v41 }
0x18c6   : > { %10964 = vmatprep.subr.bf16.mxu1 %v12037_v40 }
0x18cc   : > { %10941 = vmatmul.mubr.msk.bf16.vlgmr.msra.gmra.mrb[184].mxu1 %vm2855_vm0, %v7707_v55 }
0x18cd   : > { %10944 = vmatprep.mubr.msk.bf16.mxu1 %vm2855_vm0, %v7709_v0  ;;  %10965 = vmatpush3.bf16.msra.mxu1 %v12037_v40 }
0x18ce   : > { %10966 = vmatprep.subr.bf16.mxu1 %v12038_v17 }
0x18d1   : > { %10967 = vmatpush3.bf16.msra.mxu1 %v12038_v17 }
0x18d2   : > { %10968 = vmatprep.subr.bf16.mxu1 %v12039_v27 }
0x18d4   : > { %10945 = vmatmul.mubr.msk.bf16.gmra.mrb[188].mxu1 %vm2855_vm0, %v7711_v4 }
0x18d5   : > { %10969 = vmatpush3.bf16.msra.mxu1 %v12039_v27 }
0x18d6   : > { %10970 = vmatprep.subr.bf16.mxu1 %v12040_v54 }
0x18d9   : > { %10971 = vmatpush3.bf16.msra.mxu1 %v12040_v54 }
0x18da   : > { %11492 = vmatprep.subr.msk.bf16.mxu1 %vm2855_vm0, %v15090_v63 }
0x199f   : > { %v10942_v62 = vpop.f32.mrb[184].mxu1 }
0x19a0   : > { %v7782_v6 = vpop.f32.mrb[185].mxu1  ;;  %v7815_v34 = vsel %vm13285_vm1, %v10942_v62, -inf }
0x19a1   : > { %v7813_v1 = vsel %vm13290_vm2, %v7782_v6, -inf  ;;  %v10943_v20 = vpop.f32.mrb[186].mxu1  ;;  %v7827_v50 = vsel %vm2855_vm0, %v7815_v34, -inf }
0x19a2   : > { %v7821_v30 = vsel %vm2855_vm0, %v7813_v1, -inf  ;;  %v7785_v13 = vpop.f32.mrb[187].mxu1  ;;  %v7816_v12 = vsel %vm13312_vm4, %v10943_v20, -inf }
0x19a3   : > { %v7814_v8 = vsel %vm13299_vm3, %v7785_v13, -inf  ;;  %7822 = vmax.xlane.f32.xlu0 %v7821_v30  ;;  %v7830_v51 = vsel %vm2855_vm0, %v7816_v12, -inf }
0x19a4   : > { %v7824_v19 = vsel %vm2855_vm0, %v7814_v8, -inf }
0x19a5   : > { %7825 = vmax.xlane.f32.xlu1 %v7824_v19 }
0x19a7   : > { %7828 = vmax.xlane.f32.xlu0 %v7827_v50  ;;  %v10946_v26 = vpop.f32.mrb[188].mxu1 }
0x19a8   : > { %v7798_v39 = vpop.f32.mrb[189].mxu1  ;;  %v7819_v57 = vsel %vm13328_vm5, %v10946_v26, -inf }
0x19a9   : > { %v10947_v46 = vpop.f32.mrb[190].mxu1  ;;  %v7817_v53 = vsel %vm13336_vm6, %v7798_v39, -inf  ;;  %v7839_v31 = vsel %vm2855_vm0, %v7819_v57, -inf }
0x19aa   : > { %v7820_v10 = vsel %vm13359_vm8, %v10947_v46, -inf  ;;  %v7801_v15 = vpop.f32.mrb[191].mxu1  ;;  %v7833_v24 = vsel %vm2855_vm0, %v7817_v53, -inf }
0x19ab   : > { %v7842_v29 = vsel %vm2855_vm0, %v7820_v10, -inf  ;;  %7831 = vmax.xlane.f32.xlu0 %v7830_v51  ;;  %v7818_v23 = vsel %vm13345_vm7, %v7801_v15, -inf }
0x19ac   : > { %7843 = vmax.xlane.f32.xlu1 %v7842_v29  ;;  %v7836_v47 = vsel %vm2855_vm0, %v7818_v23, -inf }
0x19af   : > { %7834 = vmax.xlane.f32.xlu0 %v7833_v24 }
0x19b0   : > { %7837 = vmax.xlane.f32.xlu1 %v7836_v47 }
0x19b3   : > { %7840 = vmax.xlane.f32.xlu0 %v7839_v31 }
0x19c1   : > { %7919 = vrot.lane.b32.xlu1 %v15083_v14, %s12637_s21 }
0x19c5   : > { %7921 = vrot.lane.b32.xlu1 %v15084_v42, %s12637_s21 }
0x1a30   : > { %v7823_v11 = vpop.xlane.xlu0 %7822 }
0x1a31   : > { %v7845_v16 = vsub.f32 %v7813_v1, %v7823_v11 }
0x1a32   : > { %v7826_v59 = vpop.xlane.xlu1 %7825 }
0x1a33   : > { %v7853_v33 = vmul.f32 1.442695, %v7845_v16  ;;  %v7846_v9 = vsub.f32 %v7814_v8, %v7826_v59 }
0x1a34   : > { %v7829_v5 = vpop.xlane.xlu0 %7828 }
0x1a35   : > { %v7847_v25 = vsub.f32 %v7815_v34, %v7829_v5  ;;  %v7855_v49 = vmul.f32 1.442695, %v7846_v9  ;;  %v12043_v5 = vld [vmem:[#allocation7 + $0x124] ss:$12 sps:$4 sm:$0xff]  }
0x1a37   : > { %v7857_v37 = vmul.f32 1.442695, %v7847_v25 }
0x1a38   : > { %v7832_v44 = vpop.xlane.xlu0 %7831 }
0x1a39   : > { %12373 = vpow2.f32 %v7857_v37  ;;  %v7848_v56 = vsub.f32 %v7816_v12, %v7832_v44  ;;  %v7844_v62 = vpop.xlane.xlu1 %7843  ;;  %v12041_v44 = vld [vmem:[#allocation7 + $0x120] ss:$12 sps:$4 sm:$0xff]  }
0x1a3a   : > { %12375 = vpow2.f32 %v7853_v33  ;;  %v7852_v34 = vsub.f32 %v7820_v10, %v7844_v62 }
0x1a3b   : > { %v7859_v52 = vmul.f32 1.442695, %v7848_v56 }
0x1a3c   : > { %v7835_v3 = vpop.xlane.xlu0 %7834  ;;  %v7867_v19 = vmul.f32 1.442695, %v7852_v34 }
0x1a3d   : > { %12377 = vpow2.f32 %v7859_v52  ;;  %v7849_v14 = vsub.f32 %v7817_v53, %v7835_v3  ;;  %v7838_v20 = vpop.xlane.xlu1 %7837  ;;  %v12044_v52 = vld [vmem:[#allocation7 + $0x138] ss:$12 sps:$4 sm:$0xff]   ;;  %v12049_v3 = vld [vmem:[#allocation7 + $0x154] ss:$12 sps:$4 sm:$0xff]  }
0x1a3e   : > { %12379 = vpow2.f32 %v7855_v49  ;;  %v7850_v30 = vsub.f32 %v7818_v23, %v7838_v20  ;;  %v12046_v49 = vld [vmem:[#allocation7 + $0x13c] ss:$12 sps:$4 sm:$0xff]  }
0x1a3f   : > { %v7861_v28 = vmul.f32 1.442695, %v7849_v14  ;;  %v12047_v14 = vld [vmem:[#allocation7 + $0x150] ss:$12 sps:$4 sm:$0xff]  }
0x1a40   : > { %v7841_v6 = vpop.xlane.xlu0 %7840  ;;  %v7863_v8 = vmul.f32 1.442695, %v7850_v30 }
0x1a41   : > { %12381 = vpow2.f32 %v7861_v28  ;;  %v7851_v1 = vsub.f32 %v7819_v57, %v7841_v6  ;;  %v7920_v46 = vpop.permute.xlu1 %7919  ;;  %v12052_v28 = vld [vmem:[#allocation7 + $0x16c] ss:$12 sps:$4 sm:$0xff]  }
0x1a43   : > { %v14588_v42 = vpop.eup %12373  ;;  %v7865_v13 = vmul.f32 1.442695, %v7851_v1 }
0x1a44   : > { %v7875_v7 = vsel %vm2855_vm0, %v14588_v42, 0.0  ;;  %v12376_v40 = vpop.eup %12375 }
0x1a45   : > { %7876 = vadd.xlane.f32.xlu0 %v7875_v7  ;;  %v7869_v17 = vsel %vm2855_vm0, %v12376_v40, 0.0  ;;  %12383 = vpow2.f32 %v7865_v13  ;;  %v7922_v51 = vpop.permute.xlu1 %7921  ;;  %v15091_v7 = vld [vmem:[#allocation49_spill] sm:$0xff] }
0x1a46   : > { %12385 = vpow2.f32 %v7863_v8 }
0x1a47   : > { %v12378_v41 = vpop.eup %12377  ;;  %12387 = vpow2.f32 %v7867_v19 }
0x1a48   : > { %v7878_v55 = vsel %vm2855_vm0, %v12378_v41, 0.0  ;;  %v12380_v0 = vpop.eup %12379 }
0x1a49   : > { %7870 = vadd.xlane.f32.xlu0 %v7869_v17  ;;  %7879 = vadd.xlane.f32.xlu1 %v7878_v55  ;;  %v7872_v27 = vsel %vm2855_vm0, %v12380_v0, 0.0 }
0x1a4b   : > { %v14595_v54 = vpop.eup %12381 }
0x1a4c   : > { %v7881_v4 = vsel %vm2855_vm0, %v14595_v54, 0.0 }
0x1a4d   : > { %7873 = vadd.xlane.f32.xlu1 %v7872_v27 }
0x1a4f   : > { %v14603_v50 = vpop.eup %12383 }
0x1a50   : > { %v14607_v12 = vpop.eup %12385 }
0x1a51   : > { %7882 = vadd.xlane.f32.xlu1 %v7881_v4  ;;  %v14611_v26 = vpop.eup %12387 }
0x1a52   : > { %v7890_v39 = vsel %vm2855_vm0, %v14611_v26, 0.0 }
0x1a5f   : > { %7917 = vrot.lane.b32.xlu0 %v15078_v21, %s12637_s21  ;;  %v7887_v21 = vsel %vm2855_vm0, %v14603_v50, 0.0 }
0x1a62   : > { %7923 = vrot.lane.b32.xlu1 %v15086_v61, %s12637_s21  ;;  %v7884_v61 = vsel %vm2855_vm0, %v14607_v12, 0.0 }
0x1a7e   : > { %7888 = vadd.xlane.f32.xlu0 %v7887_v21 }
0x1a82   : > { %7885 = vadd.xlane.f32.xlu0 %v7884_v61  ;;  %v15092_v61 = vld [vmem:[#allocation50_spill] sm:$0xff] }
0x1a86   : > { %7891 = vadd.xlane.f32.xlu0 %v7890_v39  ;;  %v15094_v39 = vld [vmem:[#allocation51_spill] sm:$0xff] }
0x1ad2   : > { %v7877_v10 = vpop.xlane.xlu0 %7876 }
0x1ad6   : > { %v7871_v15 = vpop.xlane.xlu0 %7870  ;;  %v7880_v53 = vpop.xlane.xlu1 %7879 }
0x1ad7   : > { %12389 = vrcp.f32 %v7880_v53  ;;  %v15097_v53 = vld [vmem:[#allocation47_spill] sm:$0xff] }
0x1ad8   : > { %12391 = vrcp.f32 %v7871_v15 }
0x1ad9   : > { %12393 = vrcp.f32 %v7877_v10  ;;  %v15096_v10 = vld [vmem:[#allocation45_spill] sm:$0xff] }
0x1ada   : > { %v7918_v29 = vpop.permute.xlu0 %7917  ;;  %v7874_v23 = vpop.xlane.xlu1 %7873  ;;  %v8283_v15 = vsel %vm2855_vm0, %v15096_v10, 0 }
0x1adb   : > { %12395 = vrcp.f32 %v7874_v23  ;;  %10948 = vmatprep.subr.bf16.mxu0 %v7918_v29 }
0x1adc   : > { %10949 = vmatpush3.bf16.msra.mxu0 %v7918_v29  ;;  %v8286_v29 = vsel %vm2855_vm0, %v15097_v53, 0 }
0x1add   : > { %10950 = vmatprep.subr.bf16.mxu0 %v7920_v46 }
0x1ade   : > { %v7883_v24 = vpop.xlane.xlu1 %7882 }
0x1adf   : > { %12397 = vrcp.f32 %v7883_v24 }
0x1ae0   : > { %10951 = vmatpush3.bf16.msra.mxu0 %v7920_v46 }
0x1ae1   : > { %10952 = vmatprep.subr.bf16.mxu0 %v7922_v51  ;;  %v12390_v57 = vpop.eup %12389 }
0x1ae2   : > { %v12392_v47 = vpop.eup %12391  ;;  %v7924_v11 = vpop.permute.xlu1 %7923  ;;  %v7904_v59 = vmul.f32 %v12390_v57, %v12378_v41 }
0x1ae3   : > { %v12394_v31 = vpop.eup %12393  ;;  %v7901_v25 = vmul.f32 %v12392_v47, %v12376_v40 }
0x1ae4   : > { %10953 = vmatpush3.bf16.msra.mxu0 %v7922_v51  ;;  %v7903_v9 = vmul.f32 %v12394_v31, %v14588_v42  ;;  %v12050_v42 = vld [vmem:[#allocation7 + $0x168] ss:$12 sps:$4 sm:$0xff]   ;;  %v15095_v51 = vld [vmem:[#allocation52_spill] sm:$0xff] }
0x1ae5   : > { %v12396_v16 = vpop.eup %12395  ;;  %10954 = vmatprep.subr.bf16.mxu0 %v7924_v11 }
0x1ae6   : > { %v7902_v33 = vmul.f32 %v12396_v16, %v12380_v0  ;;  %v7910_v56 = vpack.c.bf16 %v7904_v59, %v7903_v9  ;;  %v15098_v16 = vld [vmem:[#allocation16_spill] sm:$0xff]  ;;  %v15099_v59 = vld [vmem:[#allocation21_spill] sm:$0xff] }
0x1ae8   : > { %10955 = vmatpush3.bf16.msra.mxu0 %v7924_v11  ;;  %v7909_v37 = vpack.c.bf16 %v7902_v33, %v7901_v25  ;;  %v15101_v25 = vld [vmem:[#allocation29_spill] sm:$0xff] }
0x1ae9   : > { %8102 = vmatprep.subr.bf16.mxu0 %v12043_v5  ;;  %v12398_v55 = vpop.eup %12397  ;;  %v15100_v5 = vld [vmem:[#allocation25_spill] sm:$0xff] }
0x1aea   : > { %10956 = vmatprep.mubr.msk.bf16.mxu0 %vm2855_vm0, %v7909_v37  ;;  %v7905_v27 = vmul.f32 %v12398_v55, %v14595_v54 }
0x1aeb   : > { %10957 = vmatmul.mubr.msk.bf16.vlgmr.msra.gmra.mrb[192].mxu0 %vm2855_vm0, %v7910_v56 }
0x1aec   : > { %8103 = vmatpush1.bf16.msra.mxu0 %v12041_v44 }
0x1aed   : > { %8104 = vmatprep.subr.bf16.mxu0 %v12046_v49 }
0x1af0   : > { %8105 = vmatpush1.bf16.msra.mxu0 %v12044_v52 }
0x1af1   : > { %8106 = vmatprep.subr.bf16.mxu0 %v12049_v3 }
0x1af4   : > { %8107 = vmatpush1.bf16.msra.mxu0 %v12047_v14 }
0x1af5   : > { %8108 = vmatprep.subr.bf16.mxu0 %v12052_v28 }
0x1af8   : > { %8109 = vmatpush1.bf16.msra.mxu0 %v12050_v42 }
0x1af9   : > { %10996 = vmatprep.subr.bf16.mxu0 %v15091_v7 }
0x1b0b   : > { %v7889_v40 = vpop.xlane.xlu0 %7888 }
0x1b0f   : > { %v7886_v41 = vpop.xlane.xlu0 %7885 }
0x1b10   : > { %12399 = vrcp.f32 %v7886_v41 }
0x1b11   : > { %12401 = vrcp.f32 %v7889_v40 }
0x1b13   : > { %v7892_v17 = vpop.xlane.xlu0 %7891 }
0x1b14   : > { %12403 = vrcp.f32 %v7892_v17 }
0x1b1a   : > { %v12400_v0 = vpop.eup %12399 }
0x1b1b   : > { %v7906_v4 = vmul.f32 %v12400_v0, %v14607_v12  ;;  %v12402_v62 = vpop.eup %12401 }
0x1b1c   : > { %v7907_v20 = vmul.f32 %v12402_v62, %v14603_v50  ;;  %v8277_v50 = vsel %vm2855_vm0, %v15090_v63, 0 }
0x1b1d   : > { %v7911_v6 = vpack.c.bf16 %v7906_v4, %v7905_v27 }
0x1b1e   : > { %v12404_v1 = vpop.eup %12403 }
0x1b1f   : > { %10960 = vmatprep.mubr.msk.bf16.mxu0 %vm2855_vm0, %v7911_v6  ;;  %v7908_v30 = vmul.f32 %v12404_v1, %v14611_v26  ;;  %v15093_v26 = vld [vmem:[#allocation41_spill] sm:$0xff] }
0x1b20   : > { %v8280_v46 = vsel %vm2855_vm0, %v15093_v26, 0 }
0x1b21   : > { %v7912_v13 = vpack.c.bf16 %v7908_v30, %v7907_v20 }
0x1b23   : > { %10961 = vmatmul.mubr.msk.bf16.gmra.mrb[196].mxu0 %vm2855_vm0, %v7912_v13 }
0x1b24   : > { %8134 = vmatprep.mubr.bf16.mxu0 %v15060_v2 }
0x1bbe   : > { %v10958_v34 = vpop.f32.mrb[192].mxu0 }
0x1bbf   : > { %v7975_v8 = vpop.f32.mrb[193].mxu0 }
0x1bc0   : > { %v10959_v19 = vpop.f32.mrb[194].mxu0 }
0x1bc1   : > { %v8007_v54 = vpack.c.bf16 %v10959_v19, %v10958_v34  ;;  %v7978_v21 = vpop.f32.mrb[195].mxu0 }
0x1bc2   : > { %v8006_v12 = vpack.c.bf16 %v7978_v21, %v7975_v8 }
0x1bc4   : > { %10007 = vmatmul.mubr.msk.bf16.vlgmr.msra.gmra.mrb[168].mxu0 %vm2855_vm0, %v8006_v12  ;;  %10972 = vmatprep.mubr.msk.bf16.mxu1 %vm2855_vm0, %v8006_v12 }
0x1bc5   : > { %10997 = vmatpush3.bf16.msra.mxu0 %v15091_v7  ;;  %10973 = vmatmul.mubr.msk.bf16.vlgmr.msra.gmra.mrb[168].mxu1 %vm2855_vm0, %v8007_v54 }
0x1bc6   : > { %10981 = vmatpush3.bf16.xpose.msra.mxu1 %v8277_v50  ;;  %10998 = vmatprep.subr.bf16.mxu0 %v15092_v61 }
0x1bc7   : > { %11493 = vmatprep.subr.msk.bf16.mxu1 %vm2855_vm0, %v15093_v26  ;;  %8144 = vmatprep.mubr.bf16.mxu0 %v15060_v2 }
0x1bc9   : > { %10999 = vmatpush3.bf16.msra.mxu0 %v15092_v61 }
0x1bca   : > { %11000 = vmatprep.subr.bf16.mxu0 %v15094_v39 }
0x1bcc   : > { %10008 = vmatmul.mubr.msk.bf16.gmra.mrb[172].mxu0 %vm2855_vm0, %v8007_v54 }
0x1bcd   : > { %11001 = vmatpush3.bf16.msra.mxu0 %v15094_v39  ;;  %8154 = vmatprep.mubr.bf16.mxu0 %v15060_v2 }
0x1bce   : > { %10983 = vmatpush3.bf16.xpose.msra.mxu1 %v8280_v46  ;;  %11002 = vmatprep.subr.bf16.mxu0 %v15095_v51 }
0x1bcf   : > { %11494 = vmatprep.subr.msk.bf16.mxu1 %vm2855_vm0, %v15096_v10 }
0x1bd1   : > { %11003 = vmatpush3.bf16.msra.mxu0 %v15095_v51 }
0x1bd6   : > { %10985 = vmatpush3.bf16.xpose.msra.mxu1 %v8283_v15 }
0x1bd7   : > { %11495 = vmatprep.subr.msk.bf16.mxu1 %vm2855_vm0, %v15097_v53 }
0x1bde   : > { %10987 = vmatpush3.bf16.xpose.msra.mxu1 %v8286_v29 }
0x1bf6   : > { %v10962_v23 = vpop.f32.mrb[196].mxu0 }
0x1bf7   : > { %v7991_v24 = vpop.f32.mrb[197].mxu0 }
0x1bf8   : > { %v10963_v57 = vpop.f32.mrb[198].mxu0 }
0x1bf9   : > { %v8009_v47 = vpack.c.bf16 %v10963_v57, %v10962_v23  ;;  %v7994_v31 = vpop.f32.mrb[199].mxu0 }
0x1bfa   : > { %v8008_v11 = vpack.c.bf16 %v7994_v31, %v7991_v24 }
0x1bfc   : > { %10009 = vmatmul.mubr.msk.bf16.gmra.mrb[176].mxu0 %vm2855_vm0, %v8008_v11  ;;  %10976 = vmatprep.mubr.msk.bf16.mxu1 %vm2855_vm0, %v8008_v11 }
0x1bfd   : > { %10977 = vmatmul.mubr.msk.bf16.gmra.mrb[172].mxu1 %vm2855_vm0, %v8009_v47  ;;  %8164 = vmatprep.mubr.bf16.mxu0 %v15060_v2 }
0x1bfe   : > { %10988 = vmatprep.mubr.msk.bf16.mxu1 %vm2855_vm0, %v15098_v16 }
0x1c04   : > { %10010 = vmatmul.mubr.msk.bf16.gmra.mrb[180].mxu0 %vm2855_vm0, %v8009_v47 }
0x1c05   : > { %10989 = vmatmul.mubr.msk.bf16.vlgmr.msra.gmra.mrb[192].mxu1 %vm2855_vm0, %v15099_v59 }
0x1c06   : > { %10992 = vmatprep.mubr.msk.bf16.mxu1 %vm2855_vm0, %v15100_v5 }
0x1c0d   : > { %10993 = vmatmul.mubr.msk.bf16.gmra.mrb[196].mxu1 %vm2855_vm0, %v15101_v25 }
0x1cd8   : > { %v10990_v33 = vpop.f32.mrb[192].mxu1 }
0x1cd9   : > { %v8355_v9 = vsel %vm13285_vm1, %v10990_v33, -inf  ;;  %v8322_v37 = vpop.f32.mrb[193].mxu1 }
0x1cda   : > { %v8367_v44 = vsel %vm2855_vm0, %v8355_v9, -inf  ;;  %v10991_v56 = vpop.f32.mrb[194].mxu1  ;;  %v8353_v49 = vsel %vm13290_vm2, %v8322_v37, -inf }
0x1cdb   : > { %8368 = vmax.xlane.f32.xlu0 %v8367_v44  ;;  %v8325_v52 = vpop.f32.mrb[195].mxu1  ;;  %v8361_v3 = vsel %vm2855_vm0, %v8353_v49, -inf  ;;  %v8356_v55 = vsel %vm13312_vm4, %v10991_v56, -inf }
0x1cdc   : > { %v8354_v14 = vsel %vm13299_vm3, %v8325_v52, -inf  ;;  %v8370_v4 = vsel %vm2855_vm0, %v8356_v55, -inf }
0x1cdd   : > { %v8364_v40 = vsel %vm2855_vm0, %v8354_v14, -inf }
0x1cdf   : > { %8362 = vmax.xlane.f32.xlu0 %v8361_v3 }
0x1ce0   : > { %v10994_v28 = vpop.f32.mrb[196].mxu1 }
0x1ce1   : > { %v8338_v42 = vpop.f32.mrb[197].mxu1  ;;  %v8359_v62 = vsel %vm13328_vm5, %v10994_v28, -inf }
0x1ce2   : > { %v8357_v41 = vsel %vm13336_vm6, %v8338_v42, -inf  ;;  %v10995_v17 = vpop.f32.mrb[198].mxu1  ;;  %v8379_v6 = vsel %vm2855_vm0, %v8359_v62, -inf }
0x1ce3   : > { %v8373_v0 = vsel %vm2855_vm0, %v8357_v41, -inf  ;;  %8365 = vmax.xlane.f32.xlu0 %v8364_v40  ;;  %v8341_v27 = vpop.f32.mrb[199].mxu1  ;;  %v8360_v30 = vsel %vm13359_vm8, %v10995_v17, -inf }
0x1ce4   : > { %8374 = vmax.xlane.f32.xlu1 %v8373_v0  ;;  %v8358_v1 = vsel %vm13345_vm7, %v8341_v27, -inf  ;;  %v8382_v13 = vsel %vm2855_vm0, %v8360_v30, -inf }
0x1ce5   : > { %v8376_v20 = vsel %vm2855_vm0, %v8358_v1, -inf }
0x1ce7   : > { %8371 = vmax.xlane.f32.xlu0 %v8370_v4 }
0x1ceb   : > { %8380 = vmax.xlane.f32.xlu0 %v8379_v6 }
0x1cef   : > { %8377 = vmax.xlane.f32.xlu0 %v8376_v20 }
0x1cf3   : > { %8383 = vmax.xlane.f32.xlu0 %v8382_v13 }
0x1d68   : > { %v8369_v34 = vpop.xlane.xlu0 %8368 }
0x1d69   : > { %v8387_v8 = vsub.f32 %v8355_v9, %v8369_v34 }
0x1d6b   : > { %v8397_v19 = vmul.f32 1.442695, %v8387_v8  ;;  %v12054_v8 = vld [vmem:[#allocation7 + $0x1a0] ss:$12 sps:$4 sm:$0xff]  }
0x1d6c   : > { %v8363_v54 = vpop.xlane.xlu0 %8362 }
0x1d6d   : > { %12405 = vpow2.f32 %v8397_v19  ;;  %v8385_v21 = vsub.f32 %v8353_v49, %v8363_v54  ;;  %v12055_v19 = vld [vmem:[#allocation7 + $0x1b8] ss:$12 sps:$4 sm:$0xff]   ;;  %v12056_v54 = vld [vmem:[#allocation7 + $0x1d0] ss:$12 sps:$4 sm:$0xff]  }
0x1d6f   : > { %v8393_v12 = vmul.f32 1.442695, %v8385_v21 }
0x1d70   : > { %v8366_v50 = vpop.xlane.xlu0 %8365 }
0x1d71   : > { %12407 = vpow2.f32 %v8393_v12  ;;  %v8386_v46 = vsub.f32 %v8354_v14, %v8366_v50  ;;  %v8375_v15 = vpop.xlane.xlu1 %8374 }
0x1d72   : > { %v8389_v23 = vsub.f32 %v8357_v41, %v8375_v15 }
0x1d73   : > { %v8395_v29 = vmul.f32 1.442695, %v8386_v46 }
0x1d74   : > { %v8372_v24 = vpop.xlane.xlu0 %8371  ;;  %v8401_v31 = vmul.f32 1.442695, %v8389_v23 }
0x1d75   : > { %12409 = vpow2.f32 %v8395_v29  ;;  %v8388_v57 = vsub.f32 %v8356_v55, %v8372_v24 }
0x1d77   : > { %v14690_v47 = vpop.eup %12405  ;;  %v8399_v11 = vmul.f32 1.442695, %v8388_v57 }
0x1d78   : > { %v8381_v33 = vpop.xlane.xlu0 %8380  ;;  %v8415_v9 = vsel %vm2855_vm0, %v14690_v47, 0.0 }
0x1d79   : > { %12411 = vpow2.f32 %v8399_v11  ;;  %v8391_v37 = vsub.f32 %v8359_v62, %v8381_v33  ;;  %8416 = vadd.xlane.f32.xlu0 %v8415_v9  ;;  %v12057_v33 = vld [vmem:[#allocation7 + $0x180] ss:$12 sps:$4 sm:$0xff]  }
0x1d7a   : > { %12413 = vpow2.f32 %v8401_v31 }
0x1d7b   : > { %v14694_v44 = vpop.eup %12407  ;;  %v8405_v56 = vmul.f32 1.442695, %v8391_v37  ;;  %v12062_v37 = vld [vmem:[#allocation7 + $0x19c] ss:$12 sps:$4 sm:$0xff]  }
0x1d7c   : > { %v8378_v49 = vpop.xlane.xlu0 %8377  ;;  %v8409_v52 = vsel %vm2855_vm0, %v14694_v44, 0.0 }
0x1d7d   : > { %12415 = vpow2.f32 %v8405_v56  ;;  %v8390_v3 = vsub.f32 %v8358_v1, %v8378_v49  ;;  %8410 = vadd.xlane.f32.xlu0 %v8409_v52  ;;  %v12060_v56 = vld [vmem:[#allocation7 + $0x198] ss:$12 sps:$4 sm:$0xff]   ;;  %v12065_v49 = vld [vmem:[#allocation7 + $0x1b4] ss:$12 sps:$4 sm:$0xff]  }
0x1d7f   : > { %v12410_v14 = vpop.eup %12409  ;;  %v8403_v28 = vmul.f32 1.442695, %v8390_v3 }
0x1d80   : > { %v8384_v42 = vpop.xlane.xlu0 %8383  ;;  %v8412_v40 = vsel %vm2855_vm0, %v12410_v14, 0.0 }
0x1d81   : > { %12417 = vpow2.f32 %v8403_v28  ;;  %v8392_v41 = vsub.f32 %v8360_v30, %v8384_v42  ;;  %8413 = vadd.xlane.f32.xlu0 %v8412_v40  ;;  %v12053_v30 = vld [vmem:[#allocation7 + $0x188] ss:$12 sps:$4 sm:$0xff]   ;;  %v12063_v28 = vld [vmem:[#allocation7 + $0x1b0] ss:$12 sps:$4 sm:$0xff]  }
0x1d82   : > { %11012 = vmatprep.subr.bf16.mxu1 %v12053_v30 }
0x1d83   : > { %v14699_v17 = vpop.eup %12411  ;;  %v8407_v55 = vmul.f32 1.442695, %v8392_v41  ;;  %11013 = vmatpush3.bf16.msra.mxu1 %v12053_v30 }
0x1d84   : > { %v8418_v0 = vsel %vm2855_vm0, %v14699_v17, 0.0  ;;  %v14703_v27 = vpop.eup %12413  ;;  %11014 = vmatprep.subr.bf16.mxu1 %v12054_v8 }
0x1d85   : > { %12419 = vpow2.f32 %v8407_v55  ;;  %8419 = vadd.xlane.f32.xlu0 %v8418_v0  ;;  %v8421_v6 = vsel %vm2855_vm0, %v14703_v27, 0.0  ;;  %v12068_v0 = vld [vmem:[#allocation7 + $0x1cc] ss:$12 sps:$4 sm:$0xff]  }
0x1d87   : > { %v14705_v4 = vpop.eup %12415  ;;  %11015 = vmatpush3.bf16.msra.mxu1 %v12054_v8 }
0x1d88   : > { %v8427_v62 = vsel %vm2855_vm0, %v14705_v4, 0.0  ;;  %11016 = vmatprep.subr.bf16.mxu1 %v12055_v19 }
0x1d89   : > { %8428 = vadd.xlane.f32.xlu1 %v8427_v62  ;;  %8422 = vadd.xlane.f32.xlu0 %v8421_v6 }
0x1d8b   : > { %v14711_v1 = vpop.eup %12417  ;;  %11017 = vmatpush3.bf16.msra.mxu1 %v12055_v19 }
0x1d8c   : > { %v8424_v20 = vsel %vm2855_vm0, %v14711_v1, 0.0  ;;  %11018 = vmatprep.subr.bf16.mxu1 %v12056_v54 }
0x1d8d   : > { %8425 = vadd.xlane.f32.xlu0 %v8424_v20 }
0x1d8f   : > { %v14715_v13 = vpop.eup %12419  ;;  %11019 = vmatpush3.bf16.msra.mxu1 %v12056_v54 }
0x1d90   : > { %v8430_v34 = vsel %vm2855_vm0, %v14715_v13, 0.0 }
0x1d91   : > { %8431 = vadd.xlane.f32.xlu0 %v8430_v34 }
0x1d9a   : > { %8804 = vrot.lane.b32.xlu1 %v15090_v63, %s12637_s21  ;;  %v12059_v63 = vld [vmem:[#allocation7 + $0x184] ss:$12 sps:$4 sm:$0xff]  }
0x1d9b   : > { %8626 = vmatprep.subr.bf16.mxu0 %v12059_v63 }
0x1d9e   : > { %8808 = vrot.lane.b32.xlu1 %v15096_v10, %s12637_s21 }
0x1da2   : > { %8810 = vrot.lane.b32.xlu1 %v15097_v53, %s12637_s21 }
0x1da6   : > { %8794 = vrot.lane.b32.xlu1 %v15099_v59, %s12637_s21 }
0x1da7   : > { %8806 = vrot.lane.b32.xlu0 %v15093_v26, %s12637_s21 }
0x1daa   : > { %8798 = vrot.lane.b32.xlu1 %v15101_v25, %s12637_s21 }
0x1dab   : > { %8792 = vrot.lane.b32.xlu0 %v15098_v16, %s12637_s21 }
0x1daf   : > { %8796 = vrot.lane.b32.xlu0 %v15100_v5, %s12637_s21 }
0x1e06   : > { %v8417_v10 = vpop.xlane.xlu0 %8416 }
0x1e0a   : > { %v8411_v21 = vpop.xlane.xlu0 %8410 }
0x1e0b   : > { %12421 = vrcp.f32 %v8411_v21 }
0x1e0e   : > { %v8414_v53 = vpop.xlane.xlu0 %8413 }
0x1e0f   : > { %12423 = vrcp.f32 %v8414_v53 }
0x1e10   : > { %12425 = vrcp.f32 %v8417_v10 }
0x1e12   : > { %v8420_v59 = vpop.xlane.xlu0 %8419 }
0x1e13   : > { %12427 = vrcp.f32 %v8420_v59 }
0x1e15   : > { %v12422_v50 = vpop.eup %12421 }
0x1e16   : > { %v8429_v26 = vpop.xlane.xlu1 %8428  ;;  %v8423_v12 = vpop.xlane.xlu0 %8422  ;;  %v8441_v15 = vmul.f32 %v12422_v50, %v14694_v44 }
0x1e17   : > { %12429 = vrcp.f32 %v8423_v12 }
0x1e19   : > { %v12424_v25 = vpop.eup %12423 }
0x1e1a   : > { %v8805_v46 = vpop.permute.xlu1 %8804  ;;  %v8426_v16 = vpop.xlane.xlu0 %8425  ;;  %v8442_v29 = vmul.f32 %v12424_v25, %v12410_v14 }
0x1e1b   : > { %v12426_v5 = vpop.eup %12425  ;;  %12431 = vrcp.f32 %v8426_v16  ;;  %11496 = vmatprep.subr.msk.bf16.mxu1 %vm2855_vm0, %v8805_v46 }
0x1e1c   : > { %v8449_v23 = vpack.c.bf16 %v8442_v29, %v8441_v15  ;;  %12433 = vrcp.f32 %v8429_v26  ;;  %v8443_v57 = vmul.f32 %v12426_v5, %v14690_v47 }
0x1e1d   : > { %v12428_v24 = vpop.eup %12427 }
0x1e1e   : > { %v8444_v31 = vmul.f32 %v12428_v24, %v14699_v17  ;;  %v8432_v11 = vpop.xlane.xlu0 %8431  ;;  %11004 = vmatprep.mubr.msk.bf16.mxu0 %vm2855_vm0, %v8449_v23  ;;  %v8809_v53 = vpop.permute.xlu1 %8808 }
0x1e1f   : > { %12435 = vrcp.f32 %v8432_v11  ;;  %v8831_v12 = vsel %vm2855_vm0, %v8809_v53, 0 }
0x1e20   : > { %v8450_v9 = vpack.c.bf16 %v8444_v31, %v8443_v57 }
0x1e21   : > { %v12430_v44 = vpop.eup %12429 }
0x1e22   : > { %11005 = vmatmul.mubr.msk.bf16.vlgmr.msra.gmra.mrb[200].mxu0 %vm2855_vm0, %v8450_v9  ;;  %v8445_v3 = vmul.f32 %v12430_v44, %v14703_v27  ;;  %v12066_v27 = vld [vmem:[#allocation7 + $0x1c8] ss:$12 sps:$4 sm:$0xff]   ;;  %v8811_v50 = vpop.permute.xlu1 %8810 }
0x1e23   : > { %8627 = vmatpush1.bf16.msra.mxu0 %v12057_v33  ;;  %v8834_v25 = vsel %vm2855_vm0, %v8811_v50, 0 }
0x1e24   : > { %8628 = vmatprep.subr.bf16.mxu0 %v12062_v37 }
0x1e25   : > { %v12432_v52 = vpop.eup %12431 }
0x1e26   : > { %v8446_v47 = vmul.f32 %v12432_v52, %v14711_v1  ;;  %v12434_v14 = vpop.eup %12433 }
0x1e27   : > { %8629 = vmatpush1.bf16.msra.mxu0 %v12060_v56  ;;  %v8447_v41 = vmul.f32 %v12434_v14, %v14705_v4  ;;  %v8825_v4 = vsel %vm2855_vm0, %v8805_v46, 0  ;;  %v8795_v46 = vpop.permute.xlu1 %8794 }
0x1e28   : > { %v8451_v42 = vpack.c.bf16 %v8446_v47, %v8445_v3  ;;  %8630 = vmatprep.subr.bf16.mxu0 %v12065_v49 }
0x1e29   : > { %v12436_v40 = vpop.eup %12435 }
0x1e2a   : > { %11008 = vmatprep.mubr.msk.bf16.mxu0 %vm2855_vm0, %v8451_v42  ;;  %v8448_v17 = vmul.f32 %v12436_v40, %v14715_v13  ;;  %v8807_v13 = vpop.permute.xlu0 %8806 }
0x1e2b   : > { %8631 = vmatpush1.bf16.msra.mxu0 %v12063_v28  ;;  %v8828_v63 = vsel %vm2855_vm0, %v8807_v13, 0  ;;  %v8799_v15 = vpop.permute.xlu1 %8798 }
0x1e2c   : > { %v8452_v55 = vpack.c.bf16 %v8448_v17, %v8447_v41  ;;  %8632 = vmatprep.subr.bf16.mxu0 %v12068_v0 }
0x1e2e   : > { %11009 = vmatmul.mubr.msk.bf16.gmra.mrb[204].mxu0 %vm2855_vm0, %v8452_v55  ;;  %v8793_v26 = vpop.permute.xlu0 %8792 }
0x1e2f   : > { %8658 = vmatprep.mubr.bf16.mxu0 %v15060_v2  ;;  %8633 = vmatpush1.bf16.msra.mxu0 %v12066_v27 }
0x1e32   : > { %v8797_v16 = vpop.permute.xlu0 %8796 }
0x1ef5   : > { %v11006_v62 = vpop.f32.mrb[200].mxu0 }
0x1ef6   : > { %v8499_v6 = vpop.f32.mrb[201].mxu0 }
0x1ef7   : > { %v11007_v1 = vpop.f32.mrb[202].mxu0 }
0x1ef8   : > { %v8531_v20 = vpack.c.bf16 %v11007_v1, %v11006_v62  ;;  %v8502_v30 = vpop.f32.mrb[203].mxu0 }
0x1ef9   : > { %v8530_v34 = vpack.c.bf16 %v8502_v30, %v8499_v6 }
0x1efb   : > { %10035 = vmatmul.mubr.msk.bf16.vlgmr.msra.gmra.mrb[168].mxu0 %vm2855_vm0, %v8530_v34  ;;  %11020 = vmatprep.mubr.msk.bf16.mxu1 %vm2855_vm0, %v8530_v34 }
0x1efc   : > { %11021 = vmatmul.mubr.msk.bf16.vlgmr.msra.gmra.mrb[168].mxu1 %vm2855_vm0, %v8531_v20  ;;  %8668 = vmatprep.mubr.bf16.mxu0 %v15060_v2 }
0x1efd   : > { %11029 = vmatpush3.bf16.xpose.msra.mxu1 %v8825_v4 }
0x1efe   : > { %11497 = vmatprep.subr.msk.bf16.mxu1 %vm2855_vm0, %v8807_v13 }
0x1f01   : > { %v11010_v8 = vpop.f32.mrb[204].mxu0 }
0x1f02   : > { %v8515_v19 = vpop.f32.mrb[205].mxu0 }
0x1f03   : > { %v11011_v54 = vpop.f32.mrb[206].mxu0  ;;  %10036 = vmatmul.mubr.msk.bf16.gmra.mrb[172].mxu0 %vm2855_vm0, %v8531_v20 }
0x1f04   : > { %v8533_v10 = vpack.c.bf16 %v11011_v54, %v11010_v8  ;;  %v8518_v21 = vpop.f32.mrb[207].mxu0  ;;  %8678 = vmatprep.mubr.bf16.mxu0 %v15060_v2 }
0x1f05   : > { %v8532_v59 = vpack.c.bf16 %v8518_v21, %v8515_v19  ;;  %11031 = vmatpush3.bf16.xpose.msra.mxu1 %v8828_v63 }
0x1f06   : > { %11498 = vmatprep.subr.msk.bf16.mxu1 %vm2855_vm0, %v8809_v53 }
0x1f07   : > { %11024 = vmatprep.mubr.msk.bf16.mxu1 %vm2855_vm0, %v8532_v59 }
0x1f08   : > { %11025 = vmatmul.mubr.msk.bf16.gmra.mrb[172].mxu1 %vm2855_vm0, %v8533_v10 }
0x1f09   : > { %11036 = vmatprep.mubr.msk.bf16.mxu1 %vm2855_vm0, %v8793_v26 }
0x1f0b   : > { %10037 = vmatmul.mubr.msk.bf16.gmra.mrb[176].mxu0 %vm2855_vm0, %v8532_v59 }
0x1f0c   : > { %8688 = vmatprep.mubr.bf16.mxu0 %v15060_v2 }
0x1f0d   : > { %11033 = vmatpush3.bf16.xpose.msra.mxu1 %v8831_v12 }
0x1f0e   : > { %11499 = vmatprep.subr.msk.bf16.mxu1 %vm2855_vm0, %v8811_v50 }
0x1f13   : > { %10038 = vmatmul.mubr.msk.bf16.gmra.mrb[180].mxu0 %vm2855_vm0, %v8533_v10 }
0x1f15   : > { %11035 = vmatpush3.bf16.xpose.msra.mxu1 %v8834_v25 }
0x1f1c   : > { %11037 = vmatmul.mubr.msk.bf16.vlgmr.msra.gmra.mrb[200].mxu1 %vm2855_vm0, %v8795_v46 }
0x1f1d   : > { %11040 = vmatprep.mubr.msk.bf16.mxu1 %vm2855_vm0, %v8797_v16 }
0x1f24   : > { %11041 = vmatmul.mubr.msk.bf16.gmra.mrb[204].mxu1 %vm2855_vm0, %v8799_v15 }
0x1fef   : > { %v11038_v29 = vpop.f32.mrb[200].mxu1 }
0x1ff0   : > { %v8870_v5 = vpop.f32.mrb[201].mxu1  ;;  %v8903_v11 = vsel %vm13285_vm1, %v11038_v29, -inf }
0x1ff1   : > { %v8901_v23 = vsel %vm13290_vm2, %v8870_v5, -inf  ;;  %v11039_v24 = vpop.f32.mrb[202].mxu1  ;;  %v8915_v37 = vsel %vm2855_vm0, %v8903_v11, -inf }
0x1ff2   : > { %v8909_v57 = vsel %vm2855_vm0, %v8901_v23, -inf  ;;  %v8873_v31 = vpop.f32.mrb[203].mxu1  ;;  %v8904_v48 = vsel %vm13312_vm4, %v11039_v24, -inf }
0x1ff3   : > { %v8902_v33 = vsel %vm13299_vm3, %v8873_v31, -inf  ;;  %8910 = vmax.xlane.f32.xlu0 %v8909_v57  ;;  %v8918_v52 = vsel %vm2855_vm0, %v8904_v48, -inf }
0x1ff4   : > { %v8912_v9 = vsel %vm2855_vm0, %v8902_v33, -inf }
0x1ff5   : > { %8913 = vmax.xlane.f32.xlu1 %v8912_v9  ;;  %v12072_v9 = vld [vmem:[#allocation7 + $0x1e8] ss:$12 sps:$4 sm:$0xff]  }
0x1ff6   : > { %11060 = vmatprep.subr.bf16.mxu1 %v12072_v9 }
0x1ff7   : > { %8916 = vmax.xlane.f32.xlu0 %v8915_v37  ;;  %v11042_v44 = vpop.f32.mrb[204].mxu1  ;;  %v12076_v37 = vld [vmem:[#allocation7 + $0x200] ss:$12 sps:$4 sm:$0xff]   ;;  %11061 = vmatpush3.bf16.msra.mxu1 %v12072_v9 }
0x1ff8   : > { %v8886_v56 = vpop.f32.mrb[205].mxu1  ;;  %v8907_v47 = vsel %vm13328_vm5, %v11042_v44, -inf  ;;  %11062 = vmatprep.subr.bf16.mxu1 %v12076_v37 }
0x1ff9   : > { %v8905_v49 = vsel %vm13336_vm6, %v8886_v56, -inf  ;;  %v11043_v35 = vpop.f32.mrb[206].mxu1  ;;  %v8927_v43 = vsel %vm2855_vm0, %v8907_v47, -inf }
0x1ffa   : > { %v8921_v58 = vsel %vm2855_vm0, %v8905_v49, -inf  ;;  %v8889_v3 = vpop.f32.mrb[207].mxu1  ;;  %v8908_v32 = vsel %vm13359_vm8, %v11043_v35, -inf }
0x1ffb   : > { %v8906_v14 = vsel %vm13345_vm7, %v8889_v3, -inf  ;;  %8919 = vmax.xlane.f32.xlu0 %v8918_v52  ;;  %8922 = vmax.xlane.f32.xlu1 %v8921_v58  ;;  %v8930_v42 = vsel %vm2855_vm0, %v8908_v32, -inf }
0x1ffc   : > { %v8924_v28 = vsel %vm2855_vm0, %v8906_v14, -inf  ;;  %11063 = vmatpush3.bf16.msra.mxu1 %v12076_v37 }
0x1fff   : > { %8928 = vmax.xlane.f32.xlu1 %v8927_v43  ;;  %8925 = vmax.xlane.f32.xlu0 %v8924_v28 }
0x2003   : > { %8931 = vmax.xlane.f32.xlu0 %v8930_v42 }
0x2010   : > { %9005 = vrot.lane.b32.xlu1 %v15091_v7, %s12637_s21 }
0x2014   : > { %9007 = vrot.lane.b32.xlu1 %v15092_v61, %s12637_s21 }
0x2080   : > { %v8911_v22 = vpop.xlane.xlu0 %8910 }
0x2081   : > { %v8933_v45 = vsub.f32 %v8901_v23, %v8911_v22 }
0x2082   : > { %v8914_v40 = vpop.xlane.xlu1 %8913 }
0x2083   : > { %v8941_v55 = vmul.f32 1.442695, %v8933_v45  ;;  %v8934_v0 = vsub.f32 %v8902_v33, %v8914_v40 }
0x2084   : > { %v8917_v41 = vpop.xlane.xlu0 %8916 }
0x2085   : > { %v8935_v17 = vsub.f32 %v8903_v11, %v8917_v41  ;;  %v8943_v1 = vmul.f32 1.442695, %v8934_v0  ;;  %v12071_v41 = vld [vmem:[#allocation7 + $0x1e4] ss:$12 sps:$4 sm:$0xff]   ;;  %v12069_v0 = vld [vmem:[#allocation7 + $0x1e0] ss:$12 sps:$4 sm:$0xff]  }
0x2087   : > { %v8945_v18 = vmul.f32 1.442695, %v8935_v17 }
0x2088   : > { %v8920_v27 = vpop.xlane.xlu0 %8919  ;;  %v8923_v62 = vpop.xlane.xlu1 %8922 }
0x2089   : > { %12437 = vpow2.f32 %v8945_v18  ;;  %v8936_v6 = vsub.f32 %v8904_v48, %v8920_v27  ;;  %v8937_v61 = vsub.f32 %v8905_v49, %v8923_v62  ;;  %v12080_v48 = vld [vmem:[#allocation7 + $0x218] ss:$12 sps:$4 sm:$0xff]   ;;  %v12075_v62 = vld [vmem:[#allocation7 + $0x1fc] ss:$12 sps:$4 sm:$0xff]  }
0x208a   : > { %12439 = vpow2.f32 %v8941_v55  ;;  %11064 = vmatprep.subr.bf16.mxu1 %v12080_v48 }
0x208b   : > { %v8947_v20 = vmul.f32 1.442695, %v8936_v6  ;;  %v8949_v54 = vmul.f32 1.442695, %v8937_v61  ;;  %11065 = vmatpush3.bf16.msra.mxu1 %v12080_v48 }
0x208c   : > { %v8929_v30 = vpop.xlane.xlu1 %8928  ;;  %v8926_v7 = vpop.xlane.xlu0 %8925 }
0x208d   : > { %12441 = vpow2.f32 %v8947_v20  ;;  %v8939_v34 = vsub.f32 %v8907_v47, %v8929_v30  ;;  %v8938_v26 = vsub.f32 %v8906_v14, %v8926_v7 }
0x208e   : > { %12443 = vpow2.f32 %v8943_v1 }
0x208f   : > { %v8953_v4 = vmul.f32 1.442695, %v8939_v34  ;;  %v8951_v16 = vmul.f32 1.442695, %v8938_v26  ;;  %v12073_v34 = vld [vmem:[#allocation7 + $0x1f8] ss:$12 sps:$4 sm:$0xff]  }
0x2090   : > { %v9006_v13 = vpop.permute.xlu1 %9005  ;;  %v8932_v8 = vpop.xlane.xlu0 %8931 }
0x2091   : > { %11044 = vmatprep.subr.bf16.mxu0 %v9006_v13  ;;  %12445 = vpow2.f32 %v8953_v4  ;;  %v8940_v63 = vsub.f32 %v8908_v32, %v8932_v8  ;;  %v12079_v4 = vld [vmem:[#allocation7 + $0x214] ss:$12 sps:$4 sm:$0xff]   ;;  %v12077_v8 = vld [vmem:[#allocation7 + $0x210] ss:$12 sps:$4 sm:$0xff]  }
0x2092   : > { %11045 = vmatpush3.bf16.msra.mxu0 %v9006_v13  ;;  %12447 = vpow2.f32 %v8949_v54  ;;  %v12083_v54 = vld [vmem:[#allocation7 + $0x22c] ss:$12 sps:$4 sm:$0xff]  }
0x2093   : > { %v14798_v19 = vpop.eup %12437  ;;  %v8955_v12 = vmul.f32 1.442695, %v8940_v63  ;;  %v12081_v63 = vld [vmem:[#allocation7 + $0x228] ss:$12 sps:$4 sm:$0xff]  }
0x2094   : > { %v9008_v10 = vpop.permute.xlu1 %9007  ;;  %v8963_v21 = vsel %vm2855_vm0, %v14798_v19, 0.0  ;;  %v12440_v53 = vpop.eup %12439 }
0x2095   : > { %8964 = vadd.xlane.f32.xlu1 %v8963_v21  ;;  %11046 = vmatprep.subr.bf16.mxu0 %v9008_v10  ;;  %v8957_v50 = vsel %vm2855_vm0, %v12440_v53, 0.0  ;;  %12449 = vpow2.f32 %v8955_v12 }
0x2096   : > { %11047 = vmatpush3.bf16.msra.mxu0 %v9008_v10  ;;  %12451 = vpow2.f32 %v8951_v16  ;;  %v12084_v10 = vld [vmem:[#allocation7 + $0x230] ss:$12 sps:$4 sm:$0xff]  }
0x2097   : > { %v14802_v59 = vpop.eup %12441  ;;  %11066 = vmatprep.subr.bf16.mxu1 %v12084_v10 }
0x2098   : > { %v8966_v25 = vsel %vm2855_vm0, %v14802_v59, 0.0  ;;  %v12444_v46 = vpop.eup %12443  ;;  %11067 = vmatpush3.bf16.msra.mxu1 %v12084_v10 }
0x2099   : > { %8958 = vadd.xlane.f32.xlu1 %v8957_v50  ;;  %8967 = vadd.xlane.f32.xlu0 %v8966_v25  ;;  %v8960_v15 = vsel %vm2855_vm0, %v12444_v46, 0.0 }
0x209b   : > { %v14808_v29 = vpop.eup %12445 }
0x209c   : > { %v8975_v5 = vsel %vm2855_vm0, %v14808_v29, 0.0  ;;  %v12448_v23 = vpop.eup %12447 }
0x209d   : > { %8961 = vadd.xlane.f32.xlu0 %v8960_v15  ;;  %v8969_v24 = vsel %vm2855_vm0, %v12448_v23, 0.0 }
0x209f   : > { %v14813_v57 = vpop.eup %12449 }
0x20a0   : > { %v8978_v31 = vsel %vm2855_vm0, %v14813_v57, 0.0  ;;  %v12452_v11 = vpop.eup %12451 }
0x20a1   : > { %8976 = vadd.xlane.f32.xlu0 %v8975_v5  ;;  %v8972_v33 = vsel %vm2855_vm0, %v12452_v11, 0.0 }
0x20a5   : > { %8970 = vadd.xlane.f32.xlu0 %v8969_v24 }
0x20a9   : > { %8979 = vadd.xlane.f32.xlu0 %v8978_v31 }
0x20aa   : > { %9011 = vrot.lane.b32.xlu1 %v15095_v51, %s12637_s21 }
0x20ad   : > { %8973 = vadd.xlane.f32.xlu0 %v8972_v33 }
0x20c3   : > { %9009 = vrot.lane.b32.xlu0 %v15094_v39, %s12637_s21 }
0x2122   : > { %v8965_v44 = vpop.xlane.xlu1 %8964 }
0x2126   : > { %v8959_v56 = vpop.xlane.xlu1 %8958  ;;  %v8968_v49 = vpop.xlane.xlu0 %8967 }
0x2127   : > { %12453 = vrcp.f32 %v8959_v56 }
0x212a   : > { %v8962_v51 = vpop.xlane.xlu0 %8961  ;;  %v9012_v45 = vpop.permute.xlu1 %9011 }
0x212b   : > { %12455 = vrcp.f32 %v8962_v51 }
0x212c   : > { %12457 = vrcp.f32 %v8968_v49 }
0x212d   : > { %12459 = vrcp.f32 %v8965_v44 }
0x212e   : > { %v8977_v35 = vpop.xlane.xlu0 %8976 }
0x2131   : > { %v12454_v58 = vpop.eup %12453 }
0x2132   : > { %v8971_v52 = vpop.xlane.xlu0 %8970  ;;  %v8989_v47 = vmul.f32 %v12454_v58, %v12440_v53 }
0x2133   : > { %12461 = vrcp.f32 %v8971_v52 }
0x2135   : > { %v12456_v39 = vpop.eup %12455 }
0x2136   : > { %v8980_v3 = vpop.xlane.xlu0 %8979  ;;  %v8990_v14 = vmul.f32 %v12456_v39, %v12444_v46  ;;  %v12458_v32 = vpop.eup %12457 }
0x2137   : > { %v12460_v22 = vpop.eup %12459  ;;  %v8992_v40 = vmul.f32 %v12458_v32, %v14802_v59 }
0x2138   : > { %v8997_v43 = vpack.c.bf16 %v8990_v14, %v8989_v47  ;;  %v8991_v55 = vmul.f32 %v12460_v22, %v14798_v19 }
0x213a   : > { %v8974_v28 = vpop.xlane.xlu0 %8973  ;;  %11052 = vmatprep.mubr.msk.bf16.mxu0 %vm2855_vm0, %v8997_v43  ;;  %v8998_v27 = vpack.c.bf16 %v8992_v40, %v8991_v55 }
0x213b   : > { %12463 = vrcp.f32 %v8974_v28 }
0x213c   : > { %12465 = vrcp.f32 %v8980_v3 }
0x213d   : > { %12467 = vrcp.f32 %v8977_v35  ;;  %v12462_v17 = vpop.eup %12461 }
0x213e   : > { %v9010_v42 = vpop.permute.xlu0 %9009  ;;  %v8993_v1 = vmul.f32 %v12462_v17, %v12448_v23 }
0x213f   : > { %11048 = vmatprep.subr.bf16.mxu0 %v9010_v42 }
0x2140   : > { %11049 = vmatpush3.bf16.msra.mxu0 %v9010_v42 }
0x2141   : > { %11050 = vmatprep.subr.bf16.mxu0 %v9012_v45 }
0x2144   : > { %11051 = vmatpush3.bf16.msra.mxu0 %v9012_v45 }
0x2145   : > { %v12464_v18 = vpop.eup %12463  ;;  %9190 = vmatprep.subr.bf16.mxu0 %v12071_v41 }
0x2146   : > { %v12466_v6 = vpop.eup %12465  ;;  %v8994_v20 = vmul.f32 %v12464_v18, %v12452_v11 }
0x2147   : > { %11053 = vmatmul.mubr.msk.bf16.vlgmr.msra.gmra.mrb[208].mxu0 %vm2855_vm0, %v8998_v27  ;;  %v12468_v30 = vpop.eup %12467  ;;  %v8996_v61 = vmul.f32 %v12466_v6, %v14813_v57 }
0x2148   : > { %v8999_v7 = vpack.c.bf16 %v8994_v20, %v8993_v1  ;;  %9191 = vmatpush1.bf16.msra.mxu0 %v12069_v0  ;;  %v8995_v13 = vmul.f32 %v12468_v30, %v14808_v29 }
0x2149   : > { %9192 = vmatprep.subr.bf16.mxu0 %v12075_v62 }
0x214a   : > { %11056 = vmatprep.mubr.msk.bf16.mxu0 %vm2855_vm0, %v8999_v7  ;;  %v9000_v19 = vpack.c.bf16 %v8996_v61, %v8995_v13 }
0x214c   : > { %9193 = vmatpush1.bf16.msra.mxu0 %v12073_v34 }
0x214d   : > { %9194 = vmatprep.subr.bf16.mxu0 %v12079_v4 }
0x214f   : > { %11057 = vmatmul.mubr.msk.bf16.gmra.mrb[212].mxu0 %vm2855_vm0, %v9000_v19 }
0x2150   : > { %9195 = vmatpush1.bf16.msra.mxu0 %v12077_v8  ;;  %9222 = vmatprep.mubr.bf16.mxu0 %v15060_v2 }
0x2151   : > { %9196 = vmatprep.subr.bf16.mxu0 %v12083_v54 }
0x2154   : > { %9197 = vmatpush1.bf16.msra.mxu0 %v12081_v63 }
0x221a   : > { %v11054_v21 = vpop.f32.mrb[208].mxu0 }
0x221b   : > { %v9063_v53 = vpop.f32.mrb[209].mxu0 }
0x221c   : > { %v11055_v59 = vpop.f32.mrb[210].mxu0 }
0x221d   : > { %v9095_v26 = vpack.c.bf16 %v11055_v59, %v11054_v21  ;;  %v9066_v12 = vpop.f32.mrb[211].mxu0 }
0x221e   : > { %v9094_v50 = vpack.c.bf16 %v9066_v12, %v9063_v53 }
0x2220   : > { %10063 = vmatmul.mubr.msk.bf16.vlgmr.msra.gmra.mrb[168].mxu0 %vm2855_vm0, %v9094_v50  ;;  %11068 = vmatprep.mubr.msk.bf16.mxu1 %vm2855_vm0, %v9094_v50 }
0x2221   : > { %11069 = vmatmul.mubr.msk.bf16.vlgmr.msra.gmra.mrb[168].mxu1 %vm2855_vm0, %v9095_v26  ;;  %9232 = vmatprep.mubr.bf16.mxu0 %v15060_v2 }
0x2222   : > { %v11058_v25 = vpop.f32.mrb[212].mxu0 }
0x2223   : > { %v9079_v46 = vpop.f32.mrb[213].mxu0 }
0x2224   : > { %v11059_v16 = vpop.f32.mrb[214].mxu0 }
0x2225   : > { %v9097_v15 = vpack.c.bf16 %v11059_v16, %v11058_v25  ;;  %v9082_v29 = vpop.f32.mrb[215].mxu0 }
0x2226   : > { %v9096_v5 = vpack.c.bf16 %v9082_v29, %v9079_v46 }
0x2228   : > { %10064 = vmatmul.mubr.msk.bf16.gmra.mrb[172].mxu0 %vm2855_vm0, %v9095_v26  ;;  %11072 = vmatprep.mubr.msk.bf16.mxu1 %vm2855_vm0, %v9096_v5 }
0x2229   : > { %11073 = vmatmul.mubr.msk.bf16.gmra.mrb[172].mxu1 %vm2855_vm0, %v9097_v15  ;;  %9242 = vmatprep.mubr.bf16.mxu0 %v15060_v2 }
0x2230   : > { %10065 = vmatmul.mubr.msk.bf16.gmra.mrb[176].mxu0 %vm2855_vm0, %v9096_v5 }
0x2231   : > { %9252 = vmatprep.mubr.bf16.mxu0 %v15060_v2 }
0x2238   : > { %10066 = vmatmul.mubr.msk.bf16.gmra.mrb[180].mxu0 %vm2855_vm0, %v9097_v15 }
0x22f3   : > { %v9224_v23 = vpop.f32.mrb[168].mxu0 }
0x22f4   : > { %v9352_v24 = vadd.f32 %v9224_v23, %v14108_v38  ;;  %v9226_v57 = vpop.f32.mrb[169].mxu0  ;;  %v11070_v31 = vpop.f32.mrb[168].mxu1 }
0x22f5   : > { %v9353_v11 = vadd.f32 %v9226_v57, %v14110_v60  ;;  %v9360_v33 = vadd.f32 %v11070_v31, %v14112_v36  ;;  %v9228_v9 = vpop.f32.mrb[170].mxu0  ;;  %v9297_v37 = vpop.f32.mrb[169].mxu1 }
0x22f6   : > { %10071 = vst [vmem:[%s14119_s5 + $0xc0] sm:$0xff] %v9352_v24  ;;  %v9355_v2 = vadd.f32 %v9228_v9, %v14108_v38  ;;  %v9354_v48 = vadd.f32 %v9297_v37, %v14112_v36  ;;  %v9230_v44 = vpop.f32.mrb[171].mxu0  ;;  %v11071_v56 = vpop.f32.mrb[170].mxu1 }
0x22f7   : > { %10072 = vst [vmem:[%s14119_s5 + $0xc8] sm:$0xff] %v9353_v11  ;;  %10079 = vst [vmem:[%s14119_s5 + $0x100] sm:$0xff] %v9360_v33  ;;  %v9356_v49 = vadd.f32 %v9230_v44, %v14110_v60  ;;  %v9363_v51 = vadd.f32 %v11071_v56, %v14112_v36  ;;  %v9300_v35 = vpop.f32.mrb[171].mxu1 }
0x22f8   : > { %10074 = vst [vmem:[%s14119_s5 + $0xd8] sm:$0xff] %v9355_v2  ;;  %10073 = vst [vmem:[%s14119_s5 + $0xd0] sm:$0xff] %v9354_v48  ;;  %v9357_v52 = vadd.f32 %v9300_v35, %v14112_v36 }
0x22f9   : > { %10075 = vst [vmem:[%s14119_s5 + $0xe0] sm:$0xff] %v9356_v49  ;;  %10082 = vst [vmem:[%s14119_s5 + $0x118] sm:$0xff] %v9363_v51 }
0x22fa   : > { %10076 = vst [vmem:[%s14119_s5 + $0xe8] sm:$0xff] %v9357_v52 }
0x22fb   : > { %v9234_v58 = vpop.f32.mrb[172].mxu0 }
0x22fc   : > { %v9358_v39 = vadd.f32 %v9234_v58, %v14108_v38  ;;  %v9236_v3 = vpop.f32.mrb[173].mxu0  ;;  %v11074_v47 = vpop.f32.mrb[172].mxu1 }
0x22fd   : > { %v9359_v14 = vadd.f32 %v9236_v3, %v14110_v60  ;;  %v9372_v43 = vadd.f32 %v11074_v47, %v14112_v36  ;;  %v9238_v28 = vpop.f32.mrb[174].mxu0  ;;  %v9313_v32 = vpop.f32.mrb[173].mxu1 }
0x22fe   : > { %10077 = vst [vmem:[%s14119_s5 + $0xf0] sm:$0xff] %v9358_v39  ;;  %v9361_v42 = vadd.f32 %v9238_v28, %v14108_v38  ;;  %v9366_v22 = vadd.f32 %v9313_v32, %v14112_v36  ;;  %v9240_v45 = vpop.f32.mrb[175].mxu0  ;;  %v11075_v40 = vpop.f32.mrb[174].mxu1 }
0x22ff   : > { %10078 = vst [vmem:[%s14119_s5 + $0xf8] sm:$0xff] %v9359_v14  ;;  %10091 = vst [vmem:[%s14119_s5 + $0x160] sm:$0xff] %v9372_v43  ;;  %v9362_v41 = vadd.f32 %v9240_v45, %v14110_v60  ;;  %v9375_v17 = vadd.f32 %v11075_v40, %v14112_v36  ;;  %v9316_v55 = vpop.f32.mrb[175].mxu1 }
0x2300   : > { %10080 = vst [vmem:[%s14119_s5 + $0x108] sm:$0xff] %v9361_v42  ;;  %10085 = vst [vmem:[%s14119_s5 + $0x130] sm:$0xff] %v9366_v22  ;;  %v9369_v0 = vadd.f32 %v9316_v55, %v14112_v36 }
0x2301   : > { %10081 = vst [vmem:[%s14119_s5 + $0x110] sm:$0xff] %v9362_v41  ;;  %10094 = vst [vmem:[%s14119_s5 + $0x178] sm:$0xff] %v9375_v17 }
0x2302   : > { %10088 = vst [vmem:[%s14119_s5 + $0x148] sm:$0xff] %v9369_v0 }
0x2303   : > { %v9244_v18 = vpop.f32.mrb[176].mxu0 }
0x2304   : > { %v9364_v27 = vadd.f32 %v9244_v18, %v14108_v38  ;;  %v9246_v62 = vpop.f32.mrb[177].mxu0 }
0x2305   : > { %v9365_v6 = vadd.f32 %v9246_v62, %v14110_v60  ;;  %v9248_v1 = vpop.f32.mrb[178].mxu0 }
0x2306   : > { %10083 = vst [vmem:[%s14119_s5 + $0x120] sm:$0xff] %v9364_v27  ;;  %v9367_v20 = vadd.f32 %v9248_v1, %v14108_v38  ;;  %v9250_v30 = vpop.f32.mrb[179].mxu0 }
0x2307   : > { %10084 = vst [vmem:[%s14119_s5 + $0x128] sm:$0xff] %v9365_v6  ;;  %v9368_v36 = vadd.f32 %v9250_v30, %v14110_v60 }
0x2308   : > { %10086 = vst [vmem:[%s14119_s5 + $0x138] sm:$0xff] %v9367_v20 }
0x2309   : > { %10087 = vst [vmem:[%s14119_s5 + $0x140] sm:$0xff] %v9368_v36 }
0x230b   : > { %v9254_v7 = vpop.f32.mrb[180].mxu0 }
0x230c   : > { %v9370_v34 = vadd.f32 %v9254_v7, %v14108_v38  ;;  %v9256_v61 = vpop.f32.mrb[181].mxu0 }
0x230d   : > { %v9371_v4 = vadd.f32 %v9256_v61, %v14110_v60  ;;  %v9258_v13 = vpop.f32.mrb[182].mxu0 }
0x230e   : > { %10089 = vst [vmem:[%s14119_s5 + $0x150] sm:$0xff] %v9370_v34  ;;  %v9373_v8 = vadd.f32 %v9258_v13, %v14108_v38  ;;  %v9260_v19 = vpop.f32.mrb[183].mxu0 }
0x230f   : > { %10090 = vst [vmem:[%s14119_s5 + $0x158] sm:$0xff] %v9371_v4  ;;  %v9374_v54 = vadd.f32 %v9260_v19, %v14110_v60 }
0x2310   : > { %10092 = vst [vmem:[%s14119_s5 + $0x168] sm:$0xff] %v9373_v8 }
0x2311   : > { %10093 = vst [vmem:[%s14119_s5 + $0x170] sm:$0xff] %v9374_v54 }
0x2312   : > { %12568 = shalt.err (!%p12565_p2)
}
0x2313   : > { %s12569_s10 = scalar_lea.hbm %s14891_s24, 6144  ;;  %s12573_s21 = scalar_lea.hbm %s14945_s4, 12288 }
0x2314   : > { %p12570_p13 = scmp.ne.s32.totalorder %s14891_s24, %s12569_s10  ;;  %p12574_p4 = scmp.lt.u32.totalorder %s14891_s24, %s14945_s4 }
0x2315   : > { %p12575_p7 = scmp.lt.u32.totalorder %s12573_s21, %s12569_s10  ;;  %p12577_p11 = scmp.lt.u32.totalorder %s12569_s10, %s14891_s24 }
0x2316   : > { %p12571_p6 = pnand %p12570_p13, %p15102_p0 }
0x2317   : > { %p12576_p8 = por %p12575_p7, %p12574_p4 }
0x2318   : > { %p12572_p10 = pneg %p12571_p6 }
0x2319   : > { %p12578_p1 = por %p12577_p11, %p12576_p8 }
0x231b   : > { %p12579_p3 = pnand %p12578_p1, %p12572_p10 }
0x231d   : > { %12582 = shalt.err (!%p12579_p3)
}
0x231e   : > { %s12639_s5 = smov 384   ;;  %s12640_s25 = smov 24  }
0x231f   : > { %11514 = dma.vmem_to_hbm [thread:$0]  (%p15102_p0), %s14893_s7, 6144, %s14891_s24, %s9402_s19, %s12639_s5, %s12639_s5, %s12640_s25  }
0x2320 PF: > { %s9431_s28 = sand.u32 1, %s12613_s15   ;;  %p15103_p5 = scmp.ne.s32.totalorder %s14994_s22, 0 }
0x2321   : > { %p15104_p9 = scmp.ge.s32.totalorder %s12625_s18, 2  ;;  %s9432_s26 = scalar_lea.sflag [#allocation4], %s9431_s28 }
0x2323   : > { %p11528_p12 = pnand %p15104_p9, %p15103_p5 }
0x2325   : > { %12608 = dma.done.wait (!%p11528_p12), %s9432_s26, 6144  }
0x2326   : > { %12610 = vsyncadd (!%p11528_p12), %s9432_s26, 4294961152  ;;  %p18_p2 = scmp.ge.s32.totalorder %s12776_s11, 4   ;;  %s15105_s15 = smov %s12617_s16 }
0x2327   : > { %s15106_s16 = smov %s12621_s17  ;;  %s15107_s17 = smov %s12785_s14 }
0x2328   : > { %s15108_s18 = smov %s12776_s11  ;;  %20 = sbr.rel (!%p18_p2) target bundleno = 6 (0x6), region = 90 }
0x232f   :  { %9437 = vsyncpa [#allocation3], 1 }
0x2330   :  { %9439 = vsyncpa [#allocation3 + $0x1], 1 }
0x2331   :  { %9440 = vsyncpa [#allocation6], 1 }
0x2332   :  { %9441 = vsyncpa [#allocation4], 1 }
0x2333   :  { %9443 = vsyncpa [#allocation4 + $0x1], 1 }

</bundles_post_ra>
